<compile_context>
chip_gen: v7x
topology: tpu7x:2x2x1
jax: 0.10.0
libtpu: 0.0.40
codegen_flags: <defaults>
</compile_context>

<pallas_src>
import functools

import jax
import jax.numpy as jnp
from jax import lax
from jax.experimental import pallas as pl
from jax.experimental.pallas import tpu as pltpu


# ----------------------------------------------------------------------------
# Kernel bodies
# ----------------------------------------------------------------------------
def _matmul_bias_lrelu_kernel(x_ref, w_ref, b_ref, o_ref):
    """o = LeakyReLU(x @ w + b).  x:(1,M,K) f32, w:(K,N) bf16, b:(1,N) f32."""
    lhs = x_ref[0].astype(jnp.bfloat16)                   # bf16 feeds the MXU
    y = jnp.dot(lhs, w_ref[...], preferred_element_type=jnp.float32)
    y = y + b_ref[...]                                    # f32 bias
    y = jnp.where(y > 0.0, y, 0.2 * y)                    # f32 LeakyReLU(0.2)
    o_ref[0] = y.astype(o_ref.dtype)


def _conv_taps(ph_ref, w_ref, *, cin, hout, wout):
    """Fused-im2col accumulation of the 16 taps of a 4x4 / stride-2 conv.

    ph_ref: (1, 4, hout+1, wout+1, cin) f32 phase-split padded input, where
            phase p = (kh % 2) * 2 + (kw % 2) holds padded_x[kh%2::2, kw%2::2].
    w_ref:  (16*cin, cout) bf16 weights, rows ordered (kh, kw, cin).
    Returns (hout*wout, cout) f32.
    """
    acc = None
    for kh in range(4):
        for kw in range(4):
            p = (kh % 2) * 2 + (kw % 2)
            dh, dw = kh // 2, kw // 2
            # Contiguous *static* slices only -- no strided loads in-kernel.
            view = ph_ref[0, p, dh:dh + hout, dw:dw + wout, :]
            lhs = view.reshape(hout * wout, cin).astype(jnp.bfloat16)
            rhs = w_ref[(kh * 4 + kw) * cin:(kh * 4 + kw + 1) * cin, :]
            t = jnp.dot(lhs, rhs, preferred_element_type=jnp.float32)
            acc = t if acc is None else acc + t
    return acc


def _conv4x4s2_lrelu_kernel(ph_ref, w_ref, b_ref, o_ref, *, cin, hout, wout):
    y = _conv_taps(ph_ref, w_ref, cin=cin, hout=hout, wout=wout)
    y = y + b_ref[...]
    y = jnp.where(y > 0.0, y, 0.2 * y)
    o_ref[0] = y.astype(o_ref.dtype)


def _conv4x4s2_fc_sigmoid_kernel(ph_ref, w_ref, b_ref, fw_ref, fb_ref, o_ref,
                                 *, cin, hout, wout):
    """conv3 + LeakyReLU + flatten + Linear(16384, 1) + sigmoid, fully fused."""
    y = _conv_taps(ph_ref, w_ref, cin=cin, hout=hout, wout=wout)  # (64,256) f32
    y = y + b_ref[...]
    y = jnp.where(y > 0.0, y, 0.2 * y)
    # FC as a lane-dense multiply + reduce: fw is (hout*wout, cout) in the same
    # layout as `y`, so no (16384, 1) lane-padded operand is ever built.
    s = jnp.sum(y * fw_ref[...], axis=-1, keepdims=True)          # (64, 1)
    s = jnp.sum(s, axis=0, keepdims=True) + fb_ref[...]           # (1, 1)
    out = jax.nn.sigmoid(s)                                       # f32 (1, 1)
    # Pad the per-image scalar to a tile-aligned (1, 8, 128) block; the
    # wrapper slices element [b, 0, 0].
    o_ref[...] = jnp.broadcast_to(out, (8, 128))[None].astype(o_ref.dtype)


# ----------------------------------------------------------------------------
# Glue (cheap, ~1x relayouts only -- no k^2/s^2 patch amplification)
# ----------------------------------------------------------------------------
def _phase_split(x_nhwc):
    """(B, H, W, C) -> (B, 4, H//2+1, W//2+1, C): pad 1, split by (h%2, w%2)."""
    xp = jnp.pad(x_nhwc, ((0, 0), (1, 1), (1, 1), (0, 0)))
    return jnp.stack(
        [xp[:, ph::2, pw::2, :] for ph in range(2) for pw in range(2)], axis=1)


def _im2col_s2_k4(x_nhwc):
    """im2col for conv1 only (Cin=3): keeps the MXU contraction at K=48; the
    patch tensor is <0.4 MB so HBM amplification is irrelevant here."""
    B, H, W, C = x_nhwc.shape
    Hout, Wout = H // 2, W // 2
    xp = jnp.pad(x_nhwc, ((0, 0), (1, 1), (1, 1), (0, 0)))
    cols = [xp[:, kh:kh + 2 * Hout:2, kw:kw + 2 * Wout:2, :]
            for kh in range(4) for kw in range(4)]
    return jnp.concatenate(cols, axis=-1).reshape(B, Hout * Wout, 16 * C)


# ----------------------------------------------------------------------------
# Layer wrappers (one pallas_call each, grid over batch)
# ----------------------------------------------------------------------------
def _conv1_lrelu(x, w, b):
    B, H, W, Cin = x.shape
    Cout = w.shape[1]
    Hout, Wout = H // 2, W // 2
    M, K = Hout * Wout, 16 * Cin
    patches = _im2col_s2_k4(x)                                  # (B, M, K) f32
    y = pl.pallas_call(
        _matmul_bias_lrelu_kernel,
        out_shape=jax.ShapeDtypeStruct((B, M, Cout), jnp.float32),
        grid=(B,),
        in_specs=[
            pl.BlockSpec((1, M, K), lambda i: (i, 0, 0)),
            pl.BlockSpec((K, Cout), lambda i: (0, 0)),
            pl.BlockSpec((1, Cout), lambda i: (0, 0)),
        ],
        out_specs=pl.BlockSpec((1, M, Cout), lambda i: (i, 0, 0)),
        compiler_params=pltpu.CompilerParams(
            dimension_semantics=("parallel",)),
    )(patches, w, b)
    return y.reshape(B, Hout, Wout, Cout)


def _conv_lrelu(x, w, b):
    B, H, W, Cin = x.shape
    Cout = w.shape[1]
    Hout, Wout = H // 2, W // 2
    M = Hout * Wout
    phases = _phase_split(x)                     # (B, 4, Hout+1, Wout+1, Cin)
    y = pl.pallas_call(
        functools.partial(_conv4x4s2_lrelu_kernel,
                          cin=Cin, hout=Hout, wout=Wout),
        out_shape=jax.ShapeDtypeStruct((B, M, Cout), jnp.float32),
        grid=(B,),
        in_specs=[
            pl.BlockSpec((1, 4, Hout + 1, Wout + 1, Cin),
                         lambda i: (i, 0, 0, 0, 0)),
            pl.BlockSpec((16 * Cin, Cout), lambda i: (0, 0)),
            pl.BlockSpec((1, Cout), lambda i: (0, 0)),
        ],
        out_specs=pl.BlockSpec((1, M, Cout), lambda i: (i, 0, 0)),
        compiler_params=pltpu.CompilerParams(
            dimension_semantics=("parallel",)),
    )(phases, w, b)
    return y.reshape(B, Hout, Wout, Cout)


def _conv_fc_sigmoid(x, w, b, fw, fb):
    B, H, W, Cin = x.shape                                   # (B, 16, 16, 128)
    Cout = w.shape[1]                                        # 256
    Hout, Wout = H // 2, W // 2                              # 8, 8
    phases = _phase_split(x)                                 # (B, 4, 9, 9, 128)
    out = pl.pallas_call(
        functools.partial(_conv4x4s2_fc_sigmoid_kernel,
                          cin=Cin, hout=Hout, wout=Wout),
        out_shape=jax.ShapeDtypeStruct((B, 8, 128), jnp.float32),
        grid=(B,),
        in_specs=[
            pl.BlockSpec((1, 4, Hout + 1, Wout + 1, Cin),
                         lambda i: (i, 0, 0, 0, 0)),
            pl.BlockSpec((16 * Cin, Cout), lambda i: (0, 0)),
            pl.BlockSpec((1, Cout), lambda i: (0, 0)),
            pl.BlockSpec((Hout * Wout, Cout), lambda i: (0, 0)),
            pl.BlockSpec((1, 1), lambda i: (0, 0)),
        ],
        out_specs=pl.BlockSpec((1, 8, 128), lambda i: (i, 0, 0)),
        compiler_params=pltpu.CompilerParams(
            dimension_semantics=("parallel",)),
    )(phases, w, b, fw, fb)
    return out[:, 0, :1]                                     # (B, 1)


# ----------------------------------------------------------------------------
# Full Discriminator forward (Pallas)
# ----------------------------------------------------------------------------
def discriminator_forward(x_nchw, p):
    x = jnp.transpose(x_nchw, (0, 2, 3, 1)).astype(jnp.float32)  # NCHW -> NHWC
    x = _conv1_lrelu(x, p["w1"], p["b1"])        # (B, 32, 32,  64)
    x = _conv_lrelu(x, p["w2"], p["b2"])         # (B, 16, 16, 128)
    return _conv_fc_sigmoid(x, p["w3"], p["b3"], p["wf"], p["bf"])   # (B, 1)


def prepare_params(params):
    """One-time weight re-layout, done OUTSIDE the jitted forward:
      * conv weights OIHW -> (k*k*Cin, Cout), rows in (kh, kw, cin) order, bf16;
      * fc weight columns permuted from NCHW-flatten (c, h, w) order into the
        (h*W + w, c) layout of the conv3 accumulator (replaces the runtime
        NHWC->NCHW transpose + (16384, 1) weight).
    """
    def conv_w(w):
        cout, cin, k, _ = w.shape
        return jnp.transpose(w, (2, 3, 1, 0)).reshape(
            k * k * cin, cout).astype(jnp.bfloat16)

    return {
        "w1": conv_w(params["w1"]),
        "b1": params["b1"].reshape(1, -1).astype(jnp.float32),
        "w2": conv_w(params["w2"]),
        "b2": params["b2"].reshape(1, -1).astype(jnp.float32),
        "w3": conv_w(params["w3"]),
        "b3": params["b3"].reshape(1, -1).astype(jnp.float32),
        "wf": params["wf"].reshape(256, 8, 8).transpose(1, 2, 0)
                          .reshape(8 * 8, 256).astype(jnp.float32),
        "bf": params["bf"].reshape(1, 1).astype(jnp.float32),
    }


# ----------------------------------------------------------------------------
# Pure-JAX reference (lax.conv) for the correctness check
# ----------------------------------------------------------------------------
def discriminator_reference(x_nchw, params):
    y = x_nchw.astype(jnp.float32)
    for w, b in [(params["w1"], params["b1"]),
                 (params["w2"], params["b2"]),
                 (params["w3"], params["b3"])]:
        y = lax.conv_general_dilated(
            y, w, window_strides=(2, 2), padding=((1, 1), (1, 1)),
            dimension_numbers=("NCHW", "OIHW", "NCHW"))
        y = y + b[None, :, None, None]
        y = jnp.where(y > 0, y, 0.2 * y)
    y = y.reshape(y.shape[0], -1)
    y = jax.nn.sigmoid(y @ params["wf"].T + params["bf"][None, :])
    return y


def init_params(key):
    ks = jax.random.split(key, 8)
    s = 0.05  # deterministic synthetic init (not a checkpoint load)
    return {
        "w1": jax.random.normal(ks[0], (64, 3, 4, 4), jnp.float32) * s,
        "b1": jax.random.normal(ks[1], (64,), jnp.float32) * s,
        "w2": jax.random.normal(ks[2], (128, 64, 4, 4), jnp.float32) * s,
        "b2": jax.random.normal(ks[3], (128,), jnp.float32) * s,
        "w3": jax.random.normal(ks[4], (256, 128, 4, 4), jnp.float32) * s,
        "b3": jax.random.normal(ks[5], (256,), jnp.float32) * s,
        "wf": jax.random.normal(ks[6], (1, 256 * 8 * 8), jnp.float32) * s * 0.1,
        "bf": jax.random.normal(ks[7], (1,), jnp.float32) * s,
    }


if __name__ == "__main__":
    key = jax.random.PRNGKey(0)
    k_in, k_p = jax.random.split(key)
    # The FC layer (256*8*8) implies 64x64 spatial input (64 -> 32 -> 16 -> 8).
    x = jax.random.normal(k_in, (2, 3, 64, 64), jnp.float32)
    params = init_params(k_p)
    prepped = prepare_params(params)   # one-time weight re-layout, outside jit

    out = jax.block_until_ready(jax.jit(discriminator_forward)(x, prepped))
    ref = jax.block_until_ready(jax.jit(discriminator_reference)(x, params))

    assert out.shape == (2, 1), out.shape
    assert bool(jnp.all(jnp.isfinite(out)))
    assert bool(jnp.allclose(out, ref, atol=5e-2, rtol=5e-2)), (out, ref)
    print("KERNEL_OK")
</pallas_src>

<mosaic_0001>
module attributes {stable_mosaic.version = 11 : i64} {
  func.func @_matmul_bias_lrelu_kernel(%arg0: i32, %arg1: memref<1x1024x48xf32, #tpu.memory_space<vmem>>, %arg2: memref<48x64xbf16, #tpu.memory_space<vmem>>, %arg3: memref<1x64xf32, #tpu.memory_space<vmem>>, %arg4: memref<1x1024x64xf32, #tpu.memory_space<vmem>>) attributes {dimension_semantics = [#tpu.dimension_semantics<parallel>], iteration_bounds = array<i64: 2>, scalar_prefetch = 0 : i64, scratch_operands = 0 : i64, tpu.core_type = #tpu.core_type<tc>, window_params = [{transform_indices = @transform_0, window_bounds = array<i64: 1, 1024, 48>}, {pipeline_mode = #tpu.pipeline_mode<synchronous>, transform_indices = @transform_1, window_bounds = array<i64: 48, 64>}, {pipeline_mode = #tpu.pipeline_mode<synchronous>, transform_indices = @transform_2, window_bounds = array<i64: 1, 64>}, {transform_indices = @transform_3, window_bounds = array<i64: 1, 1024, 64>}]} {
    %c0 = arith.constant 0 : index
    %c0_0 = arith.constant 0 : index
    %c0_1 = arith.constant 0 : index
    %0 = vector.load %arg1[%c0, %c0_0, %c0_1] : memref<1x1024x48xf32, #tpu.memory_space<vmem>>, vector<1x1024x48xf32>
    %1 = vector.shape_cast %0 : vector<1x1024x48xf32> to vector<1024x48xf32>
    %2 = arith.truncf %1 : vector<1024x48xf32> to vector<1024x48xbf16>
    %c0_2 = arith.constant 0 : index
    %c0_3 = arith.constant 0 : index
    %3 = vector.load %arg2[%c0_2, %c0_3] : memref<48x64xbf16, #tpu.memory_space<vmem>>, vector<48x64xbf16>
    %cst = arith.constant dense<0.000000e+00> : vector<1024x64xf32>
    %4 = tpu.matmul %2, %3, %cst {dimension_numbers = #tpu.dot_dimension_numbers<[1], [0], [0], [1], [0, 0, 1, 1], [], []>} : vector<1024x48xbf16>, vector<48x64xbf16>, vector<1024x64xf32> -> vector<1024x64xf32>
    %c0_4 = arith.constant 0 : index
    %c0_5 = arith.constant 0 : index
    %5 = vector.load %arg3[%c0_4, %c0_5] : memref<1x64xf32, #tpu.memory_space<vmem>>, vector<1x64xf32>
    %6 = vector.broadcast %5 : vector<1x64xf32> to vector<1024x64xf32>
    %7 = arith.addf %4, %6 : vector<1024x64xf32>
    %cst_6 = arith.constant 0.000000e+00 : f32
    %8 = vector.broadcast %cst_6 : f32 to vector<1024x64xf32>
    %9 = arith.cmpf ogt, %7, %8 : vector<1024x64xf32>
    %cst_7 = arith.constant 2.000000e-01 : f32
    %10 = vector.broadcast %cst_7 : f32 to vector<1024x64xf32>
    %11 = arith.mulf %10, %7 : vector<1024x64xf32>
    %12 = arith.select %9, %7, %11 : vector<1024x64xi1>, vector<1024x64xf32>
    %c0_8 = arith.constant 0 : index
    %c0_9 = arith.constant 0 : index
    %c0_10 = arith.constant 0 : index
    %13 = vector.load %arg4[%c0_8, %c0_9, %c0_10] : memref<1x1024x64xf32, #tpu.memory_space<vmem>>, vector<1x1024x64xf32>
    %14 = vector.shape_cast %13 : vector<1x1024x64xf32> to vector<1024x64xf32>
    %15 = vector.shape_cast %12 : vector<1024x64xf32> to vector<1x1024x64xf32>
    tpu.vector_store %arg4[%c0_8, %c0_9, %c0_10], %15 {strides = array<i32>} : memref<1x1024x64xf32, #tpu.memory_space<vmem>>, vector<1x1024x64xf32>,
    return
  }
  func.func @transform_0(%arg0: i32) -> (i32, i32, i32) {
    %c0_i32 = arith.constant 0 : i32
    %c0_i32_0 = arith.constant 0 : i32
    %c0_i32_1 = arith.constant 0 : i32
    return %arg0, %c0_i32, %c0_i32_0 : i32, i32, i32
  }
  func.func @transform_1(%arg0: i32) -> (i32, i32) {
    %c0_i32 = arith.constant 0 : i32
    %c0_i32_0 = arith.constant 0 : i32
    %c0_i32_1 = arith.constant 0 : i32
    return %c0_i32, %c0_i32_0 : i32, i32
  }
  func.func @transform_2(%arg0: i32) -> (i32, i32) {
    %c0_i32 = arith.constant 0 : i32
    %c0_i32_0 = arith.constant 0 : i32
    %c0_i32_1 = arith.constant 0 : i32
    return %c0_i32, %c0_i32_0 : i32, i32
  }
  func.func @transform_3(%arg0: i32) -> (i32, i32, i32) {
    %c0_i32 = arith.constant 0 : i32
    %c0_i32_0 = arith.constant 0 : i32
    %c0_i32_1 = arith.constant 0 : i32
    return %arg0, %c0_i32, %c0_i32_0 : i32, i32, i32
  }
}

module attributes {stable_mosaic.version = 11 : i64} {
  func.func @_conv4x4s2_lrelu_kernel(%arg0: i32, %arg1: memref<1x4x17x17x64xf32, #tpu.memory_space<vmem>>, %arg2: memref<1024x128xbf16, #tpu.memory_space<vmem>>, %arg3: memref<1x128xf32, #tpu.memory_space<vmem>>, %arg4: memref<1x256x128xf32, #tpu.memory_space<vmem>>) attributes {dimension_semantics = [#tpu.dimension_semantics<parallel>], iteration_bounds = array<i64: 2>, scalar_prefetch = 0 : i64, scratch_operands = 0 : i64, tpu.core_type = #tpu.core_type<tc>, window_params = [{transform_indices = @transform_0, window_bounds = array<i64: 1, 4, 17, 17, 64>}, {pipeline_mode = #tpu.pipeline_mode<synchronous>, transform_indices = @transform_1, window_bounds = array<i64: 1024, 128>}, {pipeline_mode = #tpu.pipeline_mode<synchronous>, transform_indices = @transform_2, window_bounds = array<i64: 1, 128>}, {transform_indices = @transform_3, window_bounds = array<i64: 1, 256, 128>}]} {
    %c0 = arith.constant 0 : index
    %c0_0 = arith.constant 0 : index
    %c0_1 = arith.constant 0 : index
    %c0_2 = arith.constant 0 : index
    %c0_3 = arith.constant 0 : index
    %0 = vector.load %arg1[%c0, %c0_0, %c0_1, %c0_2, %c0_3] : memref<1x4x17x17x64xf32, #tpu.memory_space<vmem>>, vector<1x1x16x16x64xf32>
    %1 = vector.shape_cast %0 : vector<1x1x16x16x64xf32> to vector<16x16x64xf32>
    %2 = vector.shape_cast %1 : vector<16x16x64xf32> to vector<256x64xf32>
    %3 = arith.truncf %2 : vector<256x64xf32> to vector<256x64xbf16>
    %c0_4 = arith.constant 0 : index
    %c0_5 = arith.constant 0 : index
    %4 = vector.load %arg2[%c0_4, %c0_5] : memref<1024x128xbf16, #tpu.memory_space<vmem>>, vector<64x128xbf16>
    %cst = arith.constant dense<0.000000e+00> : vector<256x128xf32>
    %5 = tpu.matmul %3, %4, %cst {dimension_numbers = #tpu.dot_dimension_numbers<[1], [0], [0], [1], [0, 0, 1, 1], [], []>} : vector<256x64xbf16>, vector<64x128xbf16>, vector<256x128xf32> -> vector<256x128xf32>
    %c0_6 = arith.constant 0 : index
    %c1 = arith.constant 1 : index
    %c0_7 = arith.constant 0 : index
    %c0_8 = arith.constant 0 : index
    %c0_9 = arith.constant 0 : index
    %6 = vector.load %arg1[%c0_6, %c1, %c0_7, %c0_8, %c0_9] : memref<1x4x17x17x64xf32, #tpu.memory_space<vmem>>, vector<1x1x16x16x64xf32>
    %7 = vector.shape_cast %6 : vector<1x1x16x16x64xf32> to vector<16x16x64xf32>
    %8 = vector.shape_cast %7 : vector<16x16x64xf32> to vector<256x64xf32>
    %9 = arith.truncf %8 : vector<256x64xf32> to vector<256x64xbf16>
    %c64 = arith.constant 64 : index
    %c0_10 = arith.constant 0 : index
    %10 = vector.load %arg2[%c64, %c0_10] : memref<1024x128xbf16, #tpu.memory_space<vmem>>, vector<64x128xbf16>
    %cst_11 = arith.constant dense<0.000000e+00> : vector<256x128xf32>
    %11 = tpu.matmul %9, %10, %cst_11 {dimension_numbers = #tpu.dot_dimension_numbers<[1], [0], [0], [1], [0, 0, 1, 1], [], []>} : vector<256x64xbf16>, vector<64x128xbf16>, vector<256x128xf32> -> vector<256x128xf32>
    %12 = arith.addf %5, %11 : vector<256x128xf32>
    %c0_12 = arith.constant 0 : index
    %c0_13 = arith.constant 0 : index
    %c0_14 = arith.constant 0 : index
    %c1_15 = arith.constant 1 : index
    %c0_16 = arith.constant 0 : index
    %13 = vector.load %arg1[%c0_12, %c0_13, %c0_14, %c1_15, %c0_16] : memref<1x4x17x17x64xf32, #tpu.memory_space<vmem>>, vector<1x1x16x16x64xf32>
    %14 = vector.shape_cast %13 : vector<1x1x16x16x64xf32> to vector<16x16x64xf32>
    %15 = vector.shape_cast %14 : vector<16x16x64xf32> to vector<256x64xf32>
    %16 = arith.truncf %15 : vector<256x64xf32> to vector<256x64xbf16>
    %c128 = arith.constant 128 : index
    %c0_17 = arith.constant 0 : index
    %17 = vector.load %arg2[%c128, %c0_17] : memref<1024x128xbf16, #tpu.memory_space<vmem>>, vector<64x128xbf16>
    %cst_18 = arith.constant dense<0.000000e+00> : vector<256x128xf32>
    %18 = tpu.matmul %16, %17, %cst_18 {dimension_numbers = #tpu.dot_dimension_numbers<[1], [0], [0], [1], [0, 0, 1, 1], [], []>} : vector<256x64xbf16>, vector<64x128xbf16>, vector<256x128xf32> -> vector<256x128xf32>
    %19 = arith.addf %12, %18 : vector<256x128xf32>
    %c0_19 = arith.constant 0 : index
    %c1_20 = arith.constant 1 : index
    %c0_21 = arith.constant 0 : index
    %c1_22 = arith.constant 1 : index
    %c0_23 = arith.constant 0 : index
    %20 = vector.load %arg1[%c0_19, %c1_20, %c0_21, %c1_22, %c0_23] : memref<1x4x17x17x64xf32, #tpu.memory_space<vmem>>, vector<1x1x16x16x64xf32>
    %21 = vector.shape_cast %20 : vector<1x1x16x16x64xf32> to vector<16x16x64xf32>
    %22 = vector.shape_cast %21 : vector<16x16x64xf32> to vector<256x64xf32>
    %23 = arith.truncf %22 : vector<256x64xf32> to vector<256x64xbf16>
    %c192 = arith.constant 192 : index
    %c0_24 = arith.constant 0 : index
    %24 = vector.load %arg2[%c192, %c0_24] : memref<1024x128xbf16, #tpu.memory_space<vmem>>, vector<64x128xbf16>
    %cst_25 = arith.constant dense<0.000000e+00> : vector<256x128xf32>
    %25 = tpu.matmul %23, %24, %cst_25 {dimension_numbers = #tpu.dot_dimension_numbers<[1], [0], [0], [1], [0, 0, 1, 1], [], []>} : vector<256x64xbf16>, vector<64x128xbf16>, vector<256x128xf32> -> vector<256x128xf32>
    %26 = arith.addf %19, %25 : vector<256x128xf32>
    %c0_26 = arith.constant 0 : index
    %c2 = arith.constant 2 : index
    %c0_27 = arith.constant 0 : index
    %c0_28 = arith.constant 0 : index
    %c0_29 = arith.constant 0 : index
    %27 = vector.load %arg1[%c0_26, %c2, %c0_27, %c0_28, %c0_29] : memref<1x4x17x17x64xf32, #tpu.memory_space<vmem>>, vector<1x1x16x16x64xf32>
    %28 = vector.shape_cast %27 : vector<1x1x16x16x64xf32> to vector<16x16x64xf32>
    %29 = vector.shape_cast %28 : vector<16x16x64xf32> to vector<256x64xf32>
    %30 = arith.truncf %29 : vector<256x64xf32> to vector<256x64xbf16>
    %c256 = arith.constant 256 : index
    %c0_30 = arith.constant 0 : index
    %31 = vector.load %arg2[%c256, %c0_30] : memref<1024x128xbf16, #tpu.memory_space<vmem>>, vector<64x128xbf16>
    %cst_31 = arith.constant dense<0.000000e+00> : vector<256x128xf32>
    %32 = tpu.matmul %30, %31, %cst_31 {dimension_numbers = #tpu.dot_dimension_numbers<[1], [0], [0], [1], [0, 0, 1, 1], [], []>} : vector<256x64xbf16>, vector<64x128xbf16>, vector<256x128xf32> -> vector<256x128xf32>
    %33 = arith.addf %26, %32 : vector<256x128xf32>
    %c0_32 = arith.constant 0 : index
    %c3 = arith.constant 3 : index
    %c0_33 = arith.constant 0 : index
    %c0_34 = arith.constant 0 : index
    %c0_35 = arith.constant 0 : index
    %34 = vector.load %arg1[%c0_32, %c3, %c0_33, %c0_34, %c0_35] : memref<1x4x17x17x64xf32, #tpu.memory_space<vmem>>, vector<1x1x16x16x64xf32>
    %35 = vector.shape_cast %34 : vector<1x1x16x16x64xf32> to vector<16x16x64xf32>
    %36 = vector.shape_cast %35 : vector<16x16x64xf32> to vector<256x64xf32>
    %37 = arith.truncf %36 : vector<256x64xf32> to vector<256x64xbf16>
    %c320 = arith.constant 320 : index
    %c0_36 = arith.constant 0 : index
    %38 = vector.load %arg2[%c320, %c0_36] : memref<1024x128xbf16, #tpu.memory_space<vmem>>, vector<64x128xbf16>
    %cst_37 = arith.constant dense<0.000000e+00> : vector<256x128xf32>
    %39 = tpu.matmul %37, %38, %cst_37 {dimension_numbers = #tpu.dot_dimension_numbers<[1], [0], [0], [1], [0, 0, 1, 1], [], []>} : vector<256x64xbf16>, vector<64x128xbf16>, vector<256x128xf32> -> vector<256x128xf32>
    %40 = arith.addf %33, %39 : vector<256x128xf32>
    %c0_38 = arith.constant 0 : index
    %c2_39 = arith.constant 2 : index
    %c0_40 = arith.constant 0 : index
    %c1_41 = arith.constant 1 : index
    %c0_42 = arith.constant 0 : index
    %41 = vector.load %arg1[%c0_38, %c2_39, %c0_40, %c1_41, %c0_42] : memref<1x4x17x17x64xf32, #tpu.memory_space<vmem>>, vector<1x1x16x16x64xf32>
    %42 = vector.shape_cast %41 : vector<1x1x16x16x64xf32> to vector<16x16x64xf32>
    %43 = vector.shape_cast %42 : vector<16x16x64xf32> to vector<256x64xf32>
    %44 = arith.truncf %43 : vector<256x64xf32> to vector<256x64xbf16>
    %c384 = arith.constant 384 : index
    %c0_43 = arith.constant 0 : index
    %45 = vector.load %arg2[%c384, %c0_43] : memref<1024x128xbf16, #tpu.memory_space<vmem>>, vector<64x128xbf16>
    %cst_44 = arith.constant dense<0.000000e+00> : vector<256x128xf32>
    %46 = tpu.matmul %44, %45, %cst_44 {dimension_numbers = #tpu.dot_dimension_numbers<[1], [0], [0], [1], [0, 0, 1, 1], [], []>} : vector<256x64xbf16>, vector<64x128xbf16>, vector<256x128xf32> -> vector<256x128xf32>
    %47 = arith.addf %40, %46 : vector<256x128xf32>
    %c0_45 = arith.constant 0 : index
    %c3_46 = arith.constant 3 : index
    %c0_47 = arith.constant 0 : index
    %c1_48 = arith.constant 1 : index
    %c0_49 = arith.constant 0 : index
    %48 = vector.load %arg1[%c0_45, %c3_46, %c0_47, %c1_48, %c0_49] : memref<1x4x17x17x64xf32, #tpu.memory_space<vmem>>, vector<1x1x16x16x64xf32>
    %49 = vector.shape_cast %48 : vector<1x1x16x16x64xf32> to vector<16x16x64xf32>
    %50 = vector.shape_cast %49 : vector<16x16x64xf32> to vector<256x64xf32>
    %51 = arith.truncf %50 : vector<256x64xf32> to vector<256x64xbf16>
    %c448 = arith.constant 448 : index
    %c0_50 = arith.constant 0 : index
    %52 = vector.load %arg2[%c448, %c0_50] : memref<1024x128xbf16, #tpu.memory_space<vmem>>, vector<64x128xbf16>
    %cst_51 = arith.constant dense<0.000000e+00> : vector<256x128xf32>
    %53 = tpu.matmul %51, %52, %cst_51 {dimension_numbers = #tpu.dot_dimension_numbers<[1], [0], [0], [1], [0, 0, 1, 1], [], []>} : vector<256x64xbf16>, vector<64x128xbf16>, vector<256x128xf32> -> vector<256x128xf32>
    %54 = arith.addf %47, %53 : vector<256x128xf32>
    %c0_52 = arith.constant 0 : index
    %c0_53 = arith.constant 0 : index
    %c1_54 = arith.constant 1 : index
    %c0_55 = arith.constant 0 : index
    %c0_56 = arith.constant 0 : index
    %55 = vector.load %arg1[%c0_52, %c0_53, %c1_54, %c0_55, %c0_56] : memref<1x4x17x17x64xf32, #tpu.memory_space<vmem>>, vector<1x1x16x16x64xf32>
    %56 = vector.shape_cast %55 : vector<1x1x16x16x64xf32> to vector<16x16x64xf32>
    %57 = vector.shape_cast %56 : vector<16x16x64xf32> to vector<256x64xf32>
    %58 = arith.truncf %57 : vector<256x64xf32> to vector<256x64xbf16>
    %c512 = arith.constant 512 : index
    %c0_57 = arith.constant 0 : index
    %59 = vector.load %arg2[%c512, %c0_57] : memref<1024x128xbf16, #tpu.memory_space<vmem>>, vector<64x128xbf16>
    %cst_58 = arith.constant dense<0.000000e+00> : vector<256x128xf32>
    %60 = tpu.matmul %58, %59, %cst_58 {dimension_numbers = #tpu.dot_dimension_numbers<[1], [0], [0], [1], [0, 0, 1, 1], [], []>} : vector<256x64xbf16>, vector<64x128xbf16>, vector<256x128xf32> -> vector<256x128xf32>
    %61 = arith.addf %54, %60 : vector<256x128xf32>
    %c0_59 = arith.constant 0 : index
    %c1_60 = arith.constant 1 : index
    %c1_61 = arith.constant 1 : index
    %c0_62 = arith.constant 0 : index
    %c0_63 = arith.constant 0 : index
    %62 = vector.load %arg1[%c0_59, %c1_60, %c1_61, %c0_62, %c0_63] : memref<1x4x17x17x64xf32, #tpu.memory_space<vmem>>, vector<1x1x16x16x64xf32>
    %63 = vector.shape_cast %62 : vector<1x1x16x16x64xf32> to vector<16x16x64xf32>
    %64 = vector.shape_cast %63 : vector<16x16x64xf32> to vector<256x64xf32>
    %65 = arith.truncf %64 : vector<256x64xf32> to vector<256x64xbf16>
    %c576 = arith.constant 576 : index
    %c0_64 = arith.constant 0 : index
    %66 = vector.load %arg2[%c576, %c0_64] : memref<1024x128xbf16, #tpu.memory_space<vmem>>, vector<64x128xbf16>
    %cst_65 = arith.constant dense<0.000000e+00> : vector<256x128xf32>
    %67 = tpu.matmul %65, %66, %cst_65 {dimension_numbers = #tpu.dot_dimension_numbers<[1], [0], [0], [1], [0, 0, 1, 1], [], []>} : vector<256x64xbf16>, vector<64x128xbf16>, vector<256x128xf32> -> vector<256x128xf32>
    %68 = arith.addf %61, %67 : vector<256x128xf32>
    %c0_66 = arith.constant 0 : index
    %c0_67 = arith.constant 0 : index
    %c1_68 = arith.constant 1 : index
    %c1_69 = arith.constant 1 : index
    %c0_70 = arith.constant 0 : index
    %69 = vector.load %arg1[%c0_66, %c0_67, %c1_68, %c1_69, %c0_70] : memref<1x4x17x17x64xf32, #tpu.memory_space<vmem>>, vector<1x1x16x16x64xf32>
    %70 = vector.shape_cast %69 : vector<1x1x16x16x64xf32> to vector<16x16x64xf32>
    %71 = vector.shape_cast %70 : vector<16x16x64xf32> to vector<256x64xf32>
    %72 = arith.truncf %71 : vector<256x64xf32> to vector<256x64xbf16>
    %c640 = arith.constant 640 : index
    %c0_71 = arith.constant 0 : index
    %73 = vector.load %arg2[%c640, %c0_71] : memref<1024x128xbf16, #tpu.memory_space<vmem>>, vector<64x128xbf16>
    %cst_72 = arith.constant dense<0.000000e+00> : vector<256x128xf32>
    %74 = tpu.matmul %72, %73, %cst_72 {dimension_numbers = #tpu.dot_dimension_numbers<[1], [0], [0], [1], [0, 0, 1, 1], [], []>} : vector<256x64xbf16>, vector<64x128xbf16>, vector<256x128xf32> -> vector<256x128xf32>
    %75 = arith.addf %68, %74 : vector<256x128xf32>
    %c0_73 = arith.constant 0 : index
    %c1_74 = arith.constant 1 : index
    %c1_75 = arith.constant 1 : index
    %c1_76 = arith.constant 1 : index
    %c0_77 = arith.constant 0 : index
    %76 = vector.load %arg1[%c0_73, %c1_74, %c1_75, %c1_76, %c0_77] : memref<1x4x17x17x64xf32, #tpu.memory_space<vmem>>, vector<1x1x16x16x64xf32>
    %77 = vector.shape_cast %76 : vector<1x1x16x16x64xf32> to vector<16x16x64xf32>
    %78 = vector.shape_cast %77 : vector<16x16x64xf32> to vector<256x64xf32>
    %79 = arith.truncf %78 : vector<256x64xf32> to vector<256x64xbf16>
    %c704 = arith.constant 704 : index
    %c0_78 = arith.constant 0 : index
    %80 = vector.load %arg2[%c704, %c0_78] : memref<1024x128xbf16, #tpu.memory_space<vmem>>, vector<64x128xbf16>
    %cst_79 = arith.constant dense<0.000000e+00> : vector<256x128xf32>
    %81 = tpu.matmul %79, %80, %cst_79 {dimension_numbers = #tpu.dot_dimension_numbers<[1], [0], [0], [1], [0, 0, 1, 1], [], []>} : vector<256x64xbf16>, vector<64x128xbf16>, vector<256x128xf32> -> vector<256x128xf32>
    %82 = arith.addf %75, %81 : vector<256x128xf32>
    %c0_80 = arith.constant 0 : index
    %c2_81 = arith.constant 2 : index
    %c1_82 = arith.constant 1 : index
    %c0_83 = arith.constant 0 : index
    %c0_84 = arith.constant 0 : index
    %83 = vector.load %arg1[%c0_80, %c2_81, %c1_82, %c0_83, %c0_84] : memref<1x4x17x17x64xf32, #tpu.memory_space<vmem>>, vector<1x1x16x16x64xf32>
    %84 = vector.shape_cast %83 : vector<1x1x16x16x64xf32> to vector<16x16x64xf32>
    %85 = vector.shape_cast %84 : vector<16x16x64xf32> to vector<256x64xf32>
    %86 = arith.truncf %85 : vector<256x64xf32> to vector<256x64xbf16>
    %c768 = arith.constant 768 : index
    %c0_85 = arith.constant 0 : index
    %87 = vector.load %arg2[%c768, %c0_85] : memref<1024x128xbf16, #tpu.memory_space<vmem>>, vector<64x128xbf16>
    %cst_86 = arith.constant dense<0.000000e+00> : vector<256x128xf32>
    %88 = tpu.matmul %86, %87, %cst_86 {dimension_numbers = #tpu.dot_dimension_numbers<[1], [0], [0], [1], [0, 0, 1, 1], [], []>} : vector<256x64xbf16>, vector<64x128xbf16>, vector<256x128xf32> -> vector<256x128xf32>
    %89 = arith.addf %82, %88 : vector<256x128xf32>
    %c0_87 = arith.constant 0 : index
    %c3_88 = arith.constant 3 : index
    %c1_89 = arith.constant 1 : index
    %c0_90 = arith.constant 0 : index
    %c0_91 = arith.constant 0 : index
    %90 = vector.load %arg1[%c0_87, %c3_88, %c1_89, %c0_90, %c0_91] : memref<1x4x17x17x64xf32, #tpu.memory_space<vmem>>, vector<1x1x16x16x64xf32>
    %91 = vector.shape_cast %90 : vector<1x1x16x16x64xf32> to vector<16x16x64xf32>
    %92 = vector.shape_cast %91 : vector<16x16x64xf32> to vector<256x64xf32>
    %93 = arith.truncf %92 : vector<256x64xf32> to vector<256x64xbf16>
    %c832 = arith.constant 832 : index
    %c0_92 = arith.constant 0 : index
    %94 = vector.load %arg2[%c832, %c0_92] : memref<1024x128xbf16, #tpu.memory_space<vmem>>, vector<64x128xbf16>
    %cst_93 = arith.constant dense<0.000000e+00> : vector<256x128xf32>
    %95 = tpu.matmul %93, %94, %cst_93 {dimension_numbers = #tpu.dot_dimension_numbers<[1], [0], [0], [1], [0, 0, 1, 1], [], []>} : vector<256x64xbf16>, vector<64x128xbf16>, vector<256x128xf32> -> vector<256x128xf32>
    %96 = arith.addf %89, %95 : vector<256x128xf32>
    %c0_94 = arith.constant 0 : index
    %c2_95 = arith.constant 2 : index
    %c1_96 = arith.constant 1 : index
    %c1_97 = arith.constant 1 : index
    %c0_98 = arith.constant 0 : index
    %97 = vector.load %arg1[%c0_94, %c2_95, %c1_96, %c1_97, %c0_98] : memref<1x4x17x17x64xf32, #tpu.memory_space<vmem>>, vector<1x1x16x16x64xf32>
    %98 = vector.shape_cast %97 : vector<1x1x16x16x64xf32> to vector<16x16x64xf32>
    %99 = vector.shape_cast %98 : vector<16x16x64xf32> to vector<256x64xf32>
    %100 = arith.truncf %99 : vector<256x64xf32> to vector<256x64xbf16>
    %c896 = arith.constant 896 : index
    %c0_99 = arith.constant 0 : index
    %101 = vector.load %arg2[%c896, %c0_99] : memref<1024x128xbf16, #tpu.memory_space<vmem>>, vector<64x128xbf16>
    %cst_100 = arith.constant dense<0.000000e+00> : vector<256x128xf32>
    %102 = tpu.matmul %100, %101, %cst_100 {dimension_numbers = #tpu.dot_dimension_numbers<[1], [0], [0], [1], [0, 0, 1, 1], [], []>} : vector<256x64xbf16>, vector<64x128xbf16>, vector<256x128xf32> -> vector<256x128xf32>
    %103 = arith.addf %96, %102 : vector<256x128xf32>
    %c0_101 = arith.constant 0 : index
    %c3_102 = arith.constant 3 : index
    %c1_103 = arith.constant 1 : index
    %c1_104 = arith.constant 1 : index
    %c0_105 = arith.constant 0 : index
    %104 = vector.load %arg1[%c0_101, %c3_102, %c1_103, %c1_104, %c0_105] : memref<1x4x17x17x64xf32, #tpu.memory_space<vmem>>, vector<1x1x16x16x64xf32>
    %105 = vector.shape_cast %104 : vector<1x1x16x16x64xf32> to vector<16x16x64xf32>
    %106 = vector.shape_cast %105 : vector<16x16x64xf32> to vector<256x64xf32>
    %107 = arith.truncf %106 : vector<256x64xf32> to vector<256x64xbf16>
    %c960 = arith.constant 960 : index
    %c0_106 = arith.constant 0 : index
    %108 = vector.load %arg2[%c960, %c0_106] : memref<1024x128xbf16, #tpu.memory_space<vmem>>, vector<64x128xbf16>
    %cst_107 = arith.constant dense<0.000000e+00> : vector<256x128xf32>
    %109 = tpu.matmul %107, %108, %cst_107 {dimension_numbers = #tpu.dot_dimension_numbers<[1], [0], [0], [1], [0, 0, 1, 1], [], []>} : vector<256x64xbf16>, vector<64x128xbf16>, vector<256x128xf32> -> vector<256x128xf32>
    %110 = arith.addf %103, %109 : vector<256x128xf32>
    %c0_108 = arith.constant 0 : index
    %c0_109 = arith.constant 0 : index
    %111 = vector.load %arg3[%c0_108, %c0_109] : memref<1x128xf32, #tpu.memory_space<vmem>>, vector<1x128xf32>
    %112 = vector.broadcast %111 : vector<1x128xf32> to vector<256x128xf32>
    %113 = arith.addf %110, %112 : vector<256x128xf32>
    %cst_110 = arith.constant 0.000000e+00 : f32
    %114 = vector.broadcast %cst_110 : f32 to vector<256x128xf32>
    %115 = arith.cmpf ogt, %113, %114 : vector<256x128xf32>
    %cst_111 = arith.constant 2.000000e-01 : f32
    %116 = vector.broadcast %cst_111 : f32 to vector<256x128xf32>
    %117 = arith.mulf %116, %113 : vector<256x128xf32>
    %118 = arith.select %115, %113, %117 : vector<256x128xi1>, vector<256x128xf32>
    %c0_112 = arith.constant 0 : index
    %c0_113 = arith.constant 0 : index
    %c0_114 = arith.constant 0 : index
    %119 = vector.load %arg4[%c0_112, %c0_113, %c0_114] : memref<1x256x128xf32, #tpu.memory_space<vmem>>, vector<1x256x128xf32>
    %120 = vector.shape_cast %119 : vector<1x256x128xf32> to vector<256x128xf32>
    %121 = vector.shape_cast %118 : vector<256x128xf32> to vector<1x256x128xf32>
    tpu.vector_store %arg4[%c0_112, %c0_113, %c0_114], %121 {strides = array<i32>} : memref<1x256x128xf32, #tpu.memory_space<vmem>>, vector<1x256x128xf32>,
    return
  }
  func.func @transform_0(%arg0: i32) -> (i32, i32, i32, i32, i32) {
    %c0_i32 = arith.constant 0 : i32
    %c0_i32_0 = arith.constant 0 : i32
    %c0_i32_1 = arith.constant 0 : i32
    %c0_i32_2 = arith.constant 0 : i32
    %c0_i32_3 = arith.constant 0 : i32
    return %arg0, %c0_i32, %c0_i32_0, %c0_i32_1, %c0_i32_2 : i32, i32, i32, i32, i32
  }
  func.func @transform_1(%arg0: i32) -> (i32, i32) {
    %c0_i32 = arith.constant 0 : i32
    %c0_i32_0 = arith.constant 0 : i32
    %c0_i32_1 = arith.constant 0 : i32
    return %c0_i32, %c0_i32_0 : i32, i32
  }
  func.func @transform_2(%arg0: i32) -> (i32, i32) {
    %c0_i32 = arith.constant 0 : i32
    %c0_i32_0 = arith.constant 0 : i32
    %c0_i32_1 = arith.constant 0 : i32
    return %c0_i32, %c0_i32_0 : i32, i32
  }
  func.func @transform_3(%arg0: i32) -> (i32, i32, i32) {
    %c0_i32 = arith.constant 0 : i32
    %c0_i32_0 = arith.constant 0 : i32
    %c0_i32_1 = arith.constant 0 : i32
    return %arg0, %c0_i32, %c0_i32_0 : i32, i32, i32
  }
}

module attributes {stable_mosaic.version = 11 : i64} {
  func.func @_conv4x4s2_fc_sigmoid_kernel(%arg0: i32, %arg1: memref<1x4x9x9x128xf32, #tpu.memory_space<vmem>>, %arg2: memref<2048x256xbf16, #tpu.memory_space<vmem>>, %arg3: memref<1x256xf32, #tpu.memory_space<vmem>>, %arg4: memref<64x256xf32, #tpu.memory_space<vmem>>, %arg5: memref<1x1xf32, #tpu.memory_space<vmem>>, %arg6: memref<1x8x128xf32, #tpu.memory_space<vmem>>) attributes {dimension_semantics = [#tpu.dimension_semantics<parallel>], iteration_bounds = array<i64: 2>, scalar_prefetch = 0 : i64, scratch_operands = 0 : i64, tpu.core_type = #tpu.core_type<tc>, window_params = [{transform_indices = @transform_0, window_bounds = array<i64: 1, 4, 9, 9, 128>}, {pipeline_mode = #tpu.pipeline_mode<synchronous>, transform_indices = @transform_1, window_bounds = array<i64: 2048, 256>}, {pipeline_mode = #tpu.pipeline_mode<synchronous>, transform_indices = @transform_2, window_bounds = array<i64: 1, 256>}, {pipeline_mode = #tpu.pipeline_mode<synchronous>, transform_indices = @transform_3, window_bounds = array<i64: 64, 256>}, {pipeline_mode = #tpu.pipeline_mode<synchronous>, transform_indices = @transform_4, window_bounds = array<i64: 1, 1>}, {transform_indices = @transform_5, window_bounds = array<i64: 1, 8, 128>}]} {
    %c0 = arith.constant 0 : index
    %c0_0 = arith.constant 0 : index
    %c0_1 = arith.constant 0 : index
    %c0_2 = arith.constant 0 : index
    %c0_3 = arith.constant 0 : index
    %0 = vector.load %arg1[%c0, %c0_0, %c0_1, %c0_2, %c0_3] : memref<1x4x9x9x128xf32, #tpu.memory_space<vmem>>, vector<1x1x8x8x128xf32>
    %1 = vector.shape_cast %0 : vector<1x1x8x8x128xf32> to vector<8x8x128xf32>
    %2 = vector.shape_cast %1 : vector<8x8x128xf32> to vector<64x128xf32>
    %3 = arith.truncf %2 : vector<64x128xf32> to vector<64x128xbf16>
    %c0_4 = arith.constant 0 : index
    %c0_5 = arith.constant 0 : index
    %4 = vector.load %arg2[%c0_4, %c0_5] : memref<2048x256xbf16, #tpu.memory_space<vmem>>, vector<128x256xbf16>
    %cst = arith.constant dense<0.000000e+00> : vector<64x256xf32>
    %5 = tpu.matmul %3, %4, %cst {dimension_numbers = #tpu.dot_dimension_numbers<[1], [0], [0], [1], [0, 0, 1, 1], [], []>} : vector<64x128xbf16>, vector<128x256xbf16>, vector<64x256xf32> -> vector<64x256xf32>
    %c0_6 = arith.constant 0 : index
    %c1 = arith.constant 1 : index
    %c0_7 = arith.constant 0 : index
    %c0_8 = arith.constant 0 : index
    %c0_9 = arith.constant 0 : index
    %6 = vector.load %arg1[%c0_6, %c1, %c0_7, %c0_8, %c0_9] : memref<1x4x9x9x128xf32, #tpu.memory_space<vmem>>, vector<1x1x8x8x128xf32>
    %7 = vector.shape_cast %6 : vector<1x1x8x8x128xf32> to vector<8x8x128xf32>
    %8 = vector.shape_cast %7 : vector<8x8x128xf32> to vector<64x128xf32>
    %9 = arith.truncf %8 : vector<64x128xf32> to vector<64x128xbf16>
    %c128 = arith.constant 128 : index
    %c0_10 = arith.constant 0 : index
    %10 = vector.load %arg2[%c128, %c0_10] : memref<2048x256xbf16, #tpu.memory_space<vmem>>, vector<128x256xbf16>
    %cst_11 = arith.constant dense<0.000000e+00> : vector<64x256xf32>
    %11 = tpu.matmul %9, %10, %cst_11 {dimension_numbers = #tpu.dot_dimension_numbers<[1], [0], [0], [1], [0, 0, 1, 1], [], []>} : vector<64x128xbf16>, vector<128x256xbf16>, vector<64x256xf32> -> vector<64x256xf32>
    %12 = arith.addf %5, %11 : vector<64x256xf32>
    %c0_12 = arith.constant 0 : index
    %c0_13 = arith.constant 0 : index
    %c0_14 = arith.constant 0 : index
    %c1_15 = arith.constant 1 : index
    %c0_16 = arith.constant 0 : index
    %13 = vector.load %arg1[%c0_12, %c0_13, %c0_14, %c1_15, %c0_16] : memref<1x4x9x9x128xf32, #tpu.memory_space<vmem>>, vector<1x1x8x8x128xf32>
    %14 = vector.shape_cast %13 : vector<1x1x8x8x128xf32> to vector<8x8x128xf32>
    %15 = vector.shape_cast %14 : vector<8x8x128xf32> to vector<64x128xf32>
    %16 = arith.truncf %15 : vector<64x128xf32> to vector<64x128xbf16>
    %c256 = arith.constant 256 : index
    %c0_17 = arith.constant 0 : index
    %17 = vector.load %arg2[%c256, %c0_17] : memref<2048x256xbf16, #tpu.memory_space<vmem>>, vector<128x256xbf16>
    %cst_18 = arith.constant dense<0.000000e+00> : vector<64x256xf32>
    %18 = tpu.matmul %16, %17, %cst_18 {dimension_numbers = #tpu.dot_dimension_numbers<[1], [0], [0], [1], [0, 0, 1, 1], [], []>} : vector<64x128xbf16>, vector<128x256xbf16>, vector<64x256xf32> -> vector<64x256xf32>
    %19 = arith.addf %12, %18 : vector<64x256xf32>
    %c0_19 = arith.constant 0 : index
    %c1_20 = arith.constant 1 : index
    %c0_21 = arith.constant 0 : index
    %c1_22 = arith.constant 1 : index
    %c0_23 = arith.constant 0 : index
    %20 = vector.load %arg1[%c0_19, %c1_20, %c0_21, %c1_22, %c0_23] : memref<1x4x9x9x128xf32, #tpu.memory_space<vmem>>, vector<1x1x8x8x128xf32>
    %21 = vector.shape_cast %20 : vector<1x1x8x8x128xf32> to vector<8x8x128xf32>
    %22 = vector.shape_cast %21 : vector<8x8x128xf32> to vector<64x128xf32>
    %23 = arith.truncf %22 : vector<64x128xf32> to vector<64x128xbf16>
    %c384 = arith.constant 384 : index
    %c0_24 = arith.constant 0 : index
    %24 = vector.load %arg2[%c384, %c0_24] : memref<2048x256xbf16, #tpu.memory_space<vmem>>, vector<128x256xbf16>
    %cst_25 = arith.constant dense<0.000000e+00> : vector<64x256xf32>
    %25 = tpu.matmul %23, %24, %cst_25 {dimension_numbers = #tpu.dot_dimension_numbers<[1], [0], [0], [1], [0, 0, 1, 1], [], []>} : vector<64x128xbf16>, vector<128x256xbf16>, vector<64x256xf32> -> vector<64x256xf32>
    %26 = arith.addf %19, %25 : vector<64x256xf32>
    %c0_26 = arith.constant 0 : index
    %c2 = arith.constant 2 : index
    %c0_27 = arith.constant 0 : index
    %c0_28 = arith.constant 0 : index
    %c0_29 = arith.constant 0 : index
    %27 = vector.load %arg1[%c0_26, %c2, %c0_27, %c0_28, %c0_29] : memref<1x4x9x9x128xf32, #tpu.memory_space<vmem>>, vector<1x1x8x8x128xf32>
    %28 = vector.shape_cast %27 : vector<1x1x8x8x128xf32> to vector<8x8x128xf32>
    %29 = vector.shape_cast %28 : vector<8x8x128xf32> to vector<64x128xf32>
    %30 = arith.truncf %29 : vector<64x128xf32> to vector<64x128xbf16>
    %c512 = arith.constant 512 : index
    %c0_30 = arith.constant 0 : index
    %31 = vector.load %arg2[%c512, %c0_30] : memref<2048x256xbf16, #tpu.memory_space<vmem>>, vector<128x256xbf16>
    %cst_31 = arith.constant dense<0.000000e+00> : vector<64x256xf32>
    %32 = tpu.matmul %30, %31, %cst_31 {dimension_numbers = #tpu.dot_dimension_numbers<[1], [0], [0], [1], [0, 0, 1, 1], [], []>} : vector<64x128xbf16>, vector<128x256xbf16>, vector<64x256xf32> -> vector<64x256xf32>
    %33 = arith.addf %26, %32 : vector<64x256xf32>
    %c0_32 = arith.constant 0 : index
    %c3 = arith.constant 3 : index
    %c0_33 = arith.constant 0 : index
    %c0_34 = arith.constant 0 : index
    %c0_35 = arith.constant 0 : index
    %34 = vector.load %arg1[%c0_32, %c3, %c0_33, %c0_34, %c0_35] : memref<1x4x9x9x128xf32, #tpu.memory_space<vmem>>, vector<1x1x8x8x128xf32>
    %35 = vector.shape_cast %34 : vector<1x1x8x8x128xf32> to vector<8x8x128xf32>
    %36 = vector.shape_cast %35 : vector<8x8x128xf32> to vector<64x128xf32>
    %37 = arith.truncf %36 : vector<64x128xf32> to vector<64x128xbf16>
    %c640 = arith.constant 640 : index
    %c0_36 = arith.constant 0 : index
    %38 = vector.load %arg2[%c640, %c0_36] : memref<2048x256xbf16, #tpu.memory_space<vmem>>, vector<128x256xbf16>
    %cst_37 = arith.constant dense<0.000000e+00> : vector<64x256xf32>
    %39 = tpu.matmul %37, %38, %cst_37 {dimension_numbers = #tpu.dot_dimension_numbers<[1], [0], [0], [1], [0, 0, 1, 1], [], []>} : vector<64x128xbf16>, vector<128x256xbf16>, vector<64x256xf32> -> vector<64x256xf32>
    %40 = arith.addf %33, %39 : vector<64x256xf32>
    %c0_38 = arith.constant 0 : index
    %c2_39 = arith.constant 2 : index
    %c0_40 = arith.constant 0 : index
    %c1_41 = arith.constant 1 : index
    %c0_42 = arith.constant 0 : index
    %41 = vector.load %arg1[%c0_38, %c2_39, %c0_40, %c1_41, %c0_42] : memref<1x4x9x9x128xf32, #tpu.memory_space<vmem>>, vector<1x1x8x8x128xf32>
    %42 = vector.shape_cast %41 : vector<1x1x8x8x128xf32> to vector<8x8x128xf32>
    %43 = vector.shape_cast %42 : vector<8x8x128xf32> to vector<64x128xf32>
    %44 = arith.truncf %43 : vector<64x128xf32> to vector<64x128xbf16>
    %c768 = arith.constant 768 : index
    %c0_43 = arith.constant 0 : index
    %45 = vector.load %arg2[%c768, %c0_43] : memref<2048x256xbf16, #tpu.memory_space<vmem>>, vector<128x256xbf16>
    %cst_44 = arith.constant dense<0.000000e+00> : vector<64x256xf32>
    %46 = tpu.matmul %44, %45, %cst_44 {dimension_numbers = #tpu.dot_dimension_numbers<[1], [0], [0], [1], [0, 0, 1, 1], [], []>} : vector<64x128xbf16>, vector<128x256xbf16>, vector<64x256xf32> -> vector<64x256xf32>
    %47 = arith.addf %40, %46 : vector<64x256xf32>
    %c0_45 = arith.constant 0 : index
    %c3_46 = arith.constant 3 : index
    %c0_47 = arith.constant 0 : index
    %c1_48 = arith.constant 1 : index
    %c0_49 = arith.constant 0 : index
    %48 = vector.load %arg1[%c0_45, %c3_46, %c0_47, %c1_48, %c0_49] : memref<1x4x9x9x128xf32, #tpu.memory_space<vmem>>, vector<1x1x8x8x128xf32>
    %49 = vector.shape_cast %48 : vector<1x1x8x8x128xf32> to vector<8x8x128xf32>
    %50 = vector.shape_cast %49 : vector<8x8x128xf32> to vector<64x128xf32>
    %51 = arith.truncf %50 : vector<64x128xf32> to vector<64x128xbf16>
    %c896 = arith.constant 896 : index
    %c0_50 = arith.constant 0 : index
    %52 = vector.load %arg2[%c896, %c0_50] : memref<2048x256xbf16, #tpu.memory_space<vmem>>, vector<128x256xbf16>
    %cst_51 = arith.constant dense<0.000000e+00> : vector<64x256xf32>
    %53 = tpu.matmul %51, %52, %cst_51 {dimension_numbers = #tpu.dot_dimension_numbers<[1], [0], [0], [1], [0, 0, 1, 1], [], []>} : vector<64x128xbf16>, vector<128x256xbf16>, vector<64x256xf32> -> vector<64x256xf32>
    %54 = arith.addf %47, %53 : vector<64x256xf32>
    %c0_52 = arith.constant 0 : index
    %c0_53 = arith.constant 0 : index
    %c1_54 = arith.constant 1 : index
    %c0_55 = arith.constant 0 : index
    %c0_56 = arith.constant 0 : index
    %55 = vector.load %arg1[%c0_52, %c0_53, %c1_54, %c0_55, %c0_56] : memref<1x4x9x9x128xf32, #tpu.memory_space<vmem>>, vector<1x1x8x8x128xf32>
    %56 = vector.shape_cast %55 : vector<1x1x8x8x128xf32> to vector<8x8x128xf32>
    %57 = vector.shape_cast %56 : vector<8x8x128xf32> to vector<64x128xf32>
    %58 = arith.truncf %57 : vector<64x128xf32> to vector<64x128xbf16>
    %c1024 = arith.constant 1024 : index
    %c0_57 = arith.constant 0 : index
    %59 = vector.load %arg2[%c1024, %c0_57] : memref<2048x256xbf16, #tpu.memory_space<vmem>>, vector<128x256xbf16>
    %cst_58 = arith.constant dense<0.000000e+00> : vector<64x256xf32>
    %60 = tpu.matmul %58, %59, %cst_58 {dimension_numbers = #tpu.dot_dimension_numbers<[1], [0], [0], [1], [0, 0, 1, 1], [], []>} : vector<64x128xbf16>, vector<128x256xbf16>, vector<64x256xf32> -> vector<64x256xf32>
    %61 = arith.addf %54, %60 : vector<64x256xf32>
    %c0_59 = arith.constant 0 : index
    %c1_60 = arith.constant 1 : index
    %c1_61 = arith.constant 1 : index
    %c0_62 = arith.constant 0 : index
    %c0_63 = arith.constant 0 : index
    %62 = vector.load %arg1[%c0_59, %c1_60, %c1_61, %c0_62, %c0_63] : memref<1x4x9x9x128xf32, #tpu.memory_space<vmem>>, vector<1x1x8x8x128xf32>
    %63 = vector.shape_cast %62 : vector<1x1x8x8x128xf32> to vector<8x8x128xf32>
    %64 = vector.shape_cast %63 : vector<8x8x128xf32> to vector<64x128xf32>
    %65 = arith.truncf %64 : vector<64x128xf32> to vector<64x128xbf16>
    %c1152 = arith.constant 1152 : index
    %c0_64 = arith.constant 0 : index
    %66 = vector.load %arg2[%c1152, %c0_64] : memref<2048x256xbf16, #tpu.memory_space<vmem>>, vector<128x256xbf16>
    %cst_65 = arith.constant dense<0.000000e+00> : vector<64x256xf32>
    %67 = tpu.matmul %65, %66, %cst_65 {dimension_numbers = #tpu.dot_dimension_numbers<[1], [0], [0], [1], [0, 0, 1, 1], [], []>} : vector<64x128xbf16>, vector<128x256xbf16>, vector<64x256xf32> -> vector<64x256xf32>
    %68 = arith.addf %61, %67 : vector<64x256xf32>
    %c0_66 = arith.constant 0 : index
    %c0_67 = arith.constant 0 : index
    %c1_68 = arith.constant 1 : index
    %c1_69 = arith.constant 1 : index
    %c0_70 = arith.constant 0 : index
    %69 = vector.load %arg1[%c0_66, %c0_67, %c1_68, %c1_69, %c0_70] : memref<1x4x9x9x128xf32, #tpu.memory_space<vmem>>, vector<1x1x8x8x128xf32>
    %70 = vector.shape_cast %69 : vector<1x1x8x8x128xf32> to vector<8x8x128xf32>
    %71 = vector.shape_cast %70 : vector<8x8x128xf32> to vector<64x128xf32>
    %72 = arith.truncf %71 : vector<64x128xf32> to vector<64x128xbf16>
    %c1280 = arith.constant 1280 : index
    %c0_71 = arith.constant 0 : index
    %73 = vector.load %arg2[%c1280, %c0_71] : memref<2048x256xbf16, #tpu.memory_space<vmem>>, vector<128x256xbf16>
    %cst_72 = arith.constant dense<0.000000e+00> : vector<64x256xf32>
    %74 = tpu.matmul %72, %73, %cst_72 {dimension_numbers = #tpu.dot_dimension_numbers<[1], [0], [0], [1], [0, 0, 1, 1], [], []>} : vector<64x128xbf16>, vector<128x256xbf16>, vector<64x256xf32> -> vector<64x256xf32>
    %75 = arith.addf %68, %74 : vector<64x256xf32>
    %c0_73 = arith.constant 0 : index
    %c1_74 = arith.constant 1 : index
    %c1_75 = arith.constant 1 : index
    %c1_76 = arith.constant 1 : index
    %c0_77 = arith.constant 0 : index
    %76 = vector.load %arg1[%c0_73, %c1_74, %c1_75, %c1_76, %c0_77] : memref<1x4x9x9x128xf32, #tpu.memory_space<vmem>>, vector<1x1x8x8x128xf32>
    %77 = vector.shape_cast %76 : vector<1x1x8x8x128xf32> to vector<8x8x128xf32>
    %78 = vector.shape_cast %77 : vector<8x8x128xf32> to vector<64x128xf32>
    %79 = arith.truncf %78 : vector<64x128xf32> to vector<64x128xbf16>
    %c1408 = arith.constant 1408 : index
    %c0_78 = arith.constant 0 : index
    %80 = vector.load %arg2[%c1408, %c0_78] : memref<2048x256xbf16, #tpu.memory_space<vmem>>, vector<128x256xbf16>
    %cst_79 = arith.constant dense<0.000000e+00> : vector<64x256xf32>
    %81 = tpu.matmul %79, %80, %cst_79 {dimension_numbers = #tpu.dot_dimension_numbers<[1], [0], [0], [1], [0, 0, 1, 1], [], []>} : vector<64x128xbf16>, vector<128x256xbf16>, vector<64x256xf32> -> vector<64x256xf32>
    %82 = arith.addf %75, %81 : vector<64x256xf32>
    %c0_80 = arith.constant 0 : index
    %c2_81 = arith.constant 2 : index
    %c1_82 = arith.constant 1 : index
    %c0_83 = arith.constant 0 : index
    %c0_84 = arith.constant 0 : index
    %83 = vector.load %arg1[%c0_80, %c2_81, %c1_82, %c0_83, %c0_84] : memref<1x4x9x9x128xf32, #tpu.memory_space<vmem>>, vector<1x1x8x8x128xf32>
    %84 = vector.shape_cast %83 : vector<1x1x8x8x128xf32> to vector<8x8x128xf32>
    %85 = vector.shape_cast %84 : vector<8x8x128xf32> to vector<64x128xf32>
    %86 = arith.truncf %85 : vector<64x128xf32> to vector<64x128xbf16>
    %c1536 = arith.constant 1536 : index
    %c0_85 = arith.constant 0 : index
    %87 = vector.load %arg2[%c1536, %c0_85] : memref<2048x256xbf16, #tpu.memory_space<vmem>>, vector<128x256xbf16>
    %cst_86 = arith.constant dense<0.000000e+00> : vector<64x256xf32>
    %88 = tpu.matmul %86, %87, %cst_86 {dimension_numbers = #tpu.dot_dimension_numbers<[1], [0], [0], [1], [0, 0, 1, 1], [], []>} : vector<64x128xbf16>, vector<128x256xbf16>, vector<64x256xf32> -> vector<64x256xf32>
    %89 = arith.addf %82, %88 : vector<64x256xf32>
    %c0_87 = arith.constant 0 : index
    %c3_88 = arith.constant 3 : index
    %c1_89 = arith.constant 1 : index
    %c0_90 = arith.constant 0 : index
    %c0_91 = arith.constant 0 : index
    %90 = vector.load %arg1[%c0_87, %c3_88, %c1_89, %c0_90, %c0_91] : memref<1x4x9x9x128xf32, #tpu.memory_space<vmem>>, vector<1x1x8x8x128xf32>
    %91 = vector.shape_cast %90 : vector<1x1x8x8x128xf32> to vector<8x8x128xf32>
    %92 = vector.shape_cast %91 : vector<8x8x128xf32> to vector<64x128xf32>
    %93 = arith.truncf %92 : vector<64x128xf32> to vector<64x128xbf16>
    %c1664 = arith.constant 1664 : index
    %c0_92 = arith.constant 0 : index
    %94 = vector.load %arg2[%c1664, %c0_92] : memref<2048x256xbf16, #tpu.memory_space<vmem>>, vector<128x256xbf16>
    %cst_93 = arith.constant dense<0.000000e+00> : vector<64x256xf32>
    %95 = tpu.matmul %93, %94, %cst_93 {dimension_numbers = #tpu.dot_dimension_numbers<[1], [0], [0], [1], [0, 0, 1, 1], [], []>} : vector<64x128xbf16>, vector<128x256xbf16>, vector<64x256xf32> -> vector<64x256xf32>
    %96 = arith.addf %89, %95 : vector<64x256xf32>
    %c0_94 = arith.constant 0 : index
    %c2_95 = arith.constant 2 : index
    %c1_96 = arith.constant 1 : index
    %c1_97 = arith.constant 1 : index
    %c0_98 = arith.constant 0 : index
    %97 = vector.load %arg1[%c0_94, %c2_95, %c1_96, %c1_97, %c0_98] : memref<1x4x9x9x128xf32, #tpu.memory_space<vmem>>, vector<1x1x8x8x128xf32>
    %98 = vector.shape_cast %97 : vector<1x1x8x8x128xf32> to vector<8x8x128xf32>
    %99 = vector.shape_cast %98 : vector<8x8x128xf32> to vector<64x128xf32>
    %100 = arith.truncf %99 : vector<64x128xf32> to vector<64x128xbf16>
    %c1792 = arith.constant 1792 : index
    %c0_99 = arith.constant 0 : index
    %101 = vector.load %arg2[%c1792, %c0_99] : memref<2048x256xbf16, #tpu.memory_space<vmem>>, vector<128x256xbf16>
    %cst_100 = arith.constant dense<0.000000e+00> : vector<64x256xf32>
    %102 = tpu.matmul %100, %101, %cst_100 {dimension_numbers = #tpu.dot_dimension_numbers<[1], [0], [0], [1], [0, 0, 1, 1], [], []>} : vector<64x128xbf16>, vector<128x256xbf16>, vector<64x256xf32> -> vector<64x256xf32>
    %103 = arith.addf %96, %102 : vector<64x256xf32>
    %c0_101 = arith.constant 0 : index
    %c3_102 = arith.constant 3 : index
    %c1_103 = arith.constant 1 : index
    %c1_104 = arith.constant 1 : index
    %c0_105 = arith.constant 0 : index
    %104 = vector.load %arg1[%c0_101, %c3_102, %c1_103, %c1_104, %c0_105] : memref<1x4x9x9x128xf32, #tpu.memory_space<vmem>>, vector<1x1x8x8x128xf32>
    %105 = vector.shape_cast %104 : vector<1x1x8x8x128xf32> to vector<8x8x128xf32>
    %106 = vector.shape_cast %105 : vector<8x8x128xf32> to vector<64x128xf32>
    %107 = arith.truncf %106 : vector<64x128xf32> to vector<64x128xbf16>
    %c1920 = arith.constant 1920 : index
    %c0_106 = arith.constant 0 : index
    %108 = vector.load %arg2[%c1920, %c0_106] : memref<2048x256xbf16, #tpu.memory_space<vmem>>, vector<128x256xbf16>
    %cst_107 = arith.constant dense<0.000000e+00> : vector<64x256xf32>
    %109 = tpu.matmul %107, %108, %cst_107 {dimension_numbers = #tpu.dot_dimension_numbers<[1], [0], [0], [1], [0, 0, 1, 1], [], []>} : vector<64x128xbf16>, vector<128x256xbf16>, vector<64x256xf32> -> vector<64x256xf32>
    %110 = arith.addf %103, %109 : vector<64x256xf32>
    %c0_108 = arith.constant 0 : index
    %c0_109 = arith.constant 0 : index
    %111 = vector.load %arg3[%c0_108, %c0_109] : memref<1x256xf32, #tpu.memory_space<vmem>>, vector<1x256xf32>
    %112 = vector.broadcast %111 : vector<1x256xf32> to vector<64x256xf32>
    %113 = arith.addf %110, %112 : vector<64x256xf32>
    %cst_110 = arith.constant 0.000000e+00 : f32
    %114 = vector.broadcast %cst_110 : f32 to vector<64x256xf32>
    %115 = arith.cmpf ogt, %113, %114 : vector<64x256xf32>
    %cst_111 = arith.constant 2.000000e-01 : f32
    %116 = vector.broadcast %cst_111 : f32 to vector<64x256xf32>
    %117 = arith.mulf %116, %113 : vector<64x256xf32>
    %118 = arith.select %115, %113, %117 : vector<64x256xi1>, vector<64x256xf32>
    %c0_112 = arith.constant 0 : index
    %c0_113 = arith.constant 0 : index
    %119 = vector.load %arg4[%c0_112, %c0_113] : memref<64x256xf32, #tpu.memory_space<vmem>>, vector<64x256xf32>
    %120 = arith.mulf %118, %119 : vector<64x256xf32>
    %cst_114 = arith.constant dense<0.000000e+00> : vector<64xf32>
    %121 = vector.multi_reduction <add>, %120, %cst_114 [1] : vector<64x256xf32> to vector<64xf32>
    %122 = vector.shape_cast %121 : vector<64xf32> to vector<64x1xf32>
    %cst_115 = arith.constant dense<0.000000e+00> : vector<1xf32>
    %123 = vector.multi_reduction <add>, %122, %cst_115 [0] : vector<64x1xf32> to vector<1xf32>
    %124 = vector.shape_cast %123 : vector<1xf32> to vector<1x1xf32>
    %c0_116 = arith.constant 0 : index
    %c0_117 = arith.constant 0 : index
    %125 = vector.load %arg5[%c0_116, %c0_117] : memref<1x1xf32, #tpu.memory_space<vmem>>, vector<1x1xf32>
    %126 = arith.addf %124, %125 : vector<1x1xf32>
    %127 = arith.negf %126 : vector<1x1xf32>
    %128 = math.exp %127 : vector<1x1xf32>
    %cst_118 = arith.constant 1.000000e+00 : f32
    %129 = vector.broadcast %cst_118 : f32 to vector<1x1xf32>
    %130 = arith.addf %129, %128 : vector<1x1xf32>
    %131 = arith.divf %129, %130 : vector<1x1xf32>
    %132 = vector.shape_cast %131 : vector<1x1xf32> to vector<1x1xf32>
    %133 = vector.broadcast %132 : vector<1x1xf32> to vector<8x128xf32>
    %134 = vector.shape_cast %133 : vector<8x128xf32> to vector<1x8x128xf32>
    %c0_119 = arith.constant 0 : index
    %c0_120 = arith.constant 0 : index
    %c0_121 = arith.constant 0 : index
    %135 = vector.load %arg6[%c0_119, %c0_120, %c0_121] : memref<1x8x128xf32, #tpu.memory_space<vmem>>, vector<1x8x128xf32>
    tpu.vector_store %arg6[%c0_119, %c0_120, %c0_121], %134 {strides = array<i32>} : memref<1x8x128xf32, #tpu.memory_space<vmem>>, vector<1x8x128xf32>,
    return
  }
  func.func @transform_0(%arg0: i32) -> (i32, i32, i32, i32, i32) {
    %c0_i32 = arith.constant 0 : i32
    %c0_i32_0 = arith.constant 0 : i32
    %c0_i32_1 = arith.constant 0 : i32
    %c0_i32_2 = arith.constant 0 : i32
    %c0_i32_3 = arith.constant 0 : i32
    return %arg0, %c0_i32, %c0_i32_0, %c0_i32_1, %c0_i32_2 : i32, i32, i32, i32, i32
  }
  func.func @transform_1(%arg0: i32) -> (i32, i32) {
    %c0_i32 = arith.constant 0 : i32
    %c0_i32_0 = arith.constant 0 : i32
    %c0_i32_1 = arith.constant 0 : i32
    return %c0_i32, %c0_i32_0 : i32, i32
  }
  func.func @transform_2(%arg0: i32) -> (i32, i32) {
    %c0_i32 = arith.constant 0 : i32
    %c0_i32_0 = arith.constant 0 : i32
    %c0_i32_1 = arith.constant 0 : i32
    return %c0_i32, %c0_i32_0 : i32, i32
  }
  func.func @transform_3(%arg0: i32) -> (i32, i32) {
    %c0_i32 = arith.constant 0 : i32
    %c0_i32_0 = arith.constant 0 : i32
    %c0_i32_1 = arith.constant 0 : i32
    return %c0_i32, %c0_i32_0 : i32, i32
  }
  func.func @transform_4(%arg0: i32) -> (i32, i32) {
    %c0_i32 = arith.constant 0 : i32
    %c0_i32_0 = arith.constant 0 : i32
    %c0_i32_1 = arith.constant 0 : i32
    return %c0_i32, %c0_i32_0 : i32, i32
  }
  func.func @transform_5(%arg0: i32) -> (i32, i32, i32) {
    %c0_i32 = arith.constant 0 : i32
    %c0_i32_0 = arith.constant 0 : i32
    %c0_i32_1 = arith.constant 0 : i32
    return %arg0, %c0_i32, %c0_i32_0 : i32, i32, i32
  }
}

</mosaic_0001>

<bundles_post_ra>
// kernel: discriminator_forward.3
= control target key start
LH: loop header
LB: loop body
LE: loop exit
PB: predicated region body
PF: predicated region fallthrough
CT: control target
= control target key end

     0   :  { %s2029_s12 = smov 0   ;;  %s2652_s0 = inlined_call_operand.vmem [shape: f32[2,1024,48], index: 0, kind: input, shape index: {}]   ;;  %s2653_s1 = inlined_call_operand.vmem [shape: bf16[48,64], index: 1, kind: input, shape index: {}]   ;;  %s2654_s2 = inlined_call_operand.vmem [shape: f32[1,64], index: 2, kind: input, shape index: {}]   ;;  %s2655_s3 = inlined_call_operand.vmem [shape: f32[2,1024,64], index: 3, kind: output, shape index: {}]  }
   0x1 LB: > { %s1701_s13 = sadd.s32 4294967295, %s2007_s12   ;;  %p1705_p0 = scmp.ge.s32.totalorder %s2007_s12, 1  ;;  %s2007_s12 = sphi %s2029_s12, %s13_s12  }
   0x2   : > { %p137_p1 = scmp.lt.s32.totalorder %s2007_s12, 3 }
   0x4   : > { %p138_p2 = pnand %p1705_p0, %p137_p1 }
   0x5   : > { %v1997_v0 = vld [vmem:[%s2653_s1] sm:$0xff] (!%p138_p2)   ;;  %p161_p3 = scmp.lt.s32.totalorder (!%p138_p2), %s1701_s13, 1  ;;  %v1998_v1 = vld [vmem:[%s2653_s1 + $0x8] sm:$0xff] (!%p138_p2)   ;;  %v1999_v2 = vld [vmem:[%s2653_s1 + $0x10] sm:$0xff] (!%p138_p2)   ;;  %vm395_vm0 = vcmask (!%p138_p2), 392192   ;;  %vm1517_vm1 = vcmask (!%p138_p2), 523264  }
   0x6   : > { %141 = sbr.rel (%p138_p2) target bundleno = 366 (0x16e), region = 32  ;;  %1849 = vmatprep.subr.bf16.mxu0 (!%p138_p2), %v1997_v0  ;;  %1983 = vmatprep.subr.bf16.mxu1 (!%p138_p2), %v1997_v0 }
   0x7   : > { %1850 = vmatpush3.bf16.msra.mxu0 (!%p138_p2), %v1997_v0  ;;  %1986 = vmatpush3.bf16.msra.mxu1 (!%p138_p2), %v1997_v0 }
   0x8   : > { %1851 = vmatprep.subr.bf16.mxu0 (!%p138_p2), %v1998_v1  ;;  %1984 = vmatprep.subr.bf16.mxu1 (!%p138_p2), %v1998_v1 }
   0xb   : > { %1852 = vmatpush3.bf16.msra.mxu0 (!%p138_p2), %v1998_v1  ;;  %1987 = vmatpush3.bf16.msra.mxu1 (!%p138_p2), %v1998_v1 }
   0xc   : > { %1853 = vmatprep.subr.bf16.mxu0 (!%p138_p2), %v1999_v2  ;;  %1985 = vmatprep.subr.bf16.mxu1 (!%p138_p2), %v1999_v2 }
   0xd   : > { %s2657_s13 = smov (!%p161_p3, %s1701_s13), 1 }
   0xe   : > { %s1780_s20 = sshll.u32 %s2657_s13, 10 }
   0xf   : > { %s2054_s23 = scalar_lea.vmem %s2652_s0, %s1780_s20  ;;  %1854 = vmatpush3.bf16.msra.mxu0 %v1999_v2  ;;  %1988 = vmatpush3.bf16.msra.mxu1 %v1999_v2  ;;  %s2262_s28 = scalar_lea.vmem %s2655_s3, %s1780_s20 }
  0x10   : > { %v172_v3 = vld [vmem:[%s2054_s23] sm:$0xff]  ;;  %v173_v4 = vld [vmem:[%s2054_s23 + $0x8] sm:$0xff]  ;;  %v174_v8 = vld [vmem:[%s2054_s23 + $0x10] sm:$0xff] }
  0x11   : > { %v236_v5 = vld [vmem:[%s2054_s23 + $0x200] sm:$0xff]  ;;  %v300_v6 = vpack.c.bf16 %v173_v4, %v172_v3  ;;  %v237_v7 = vld [vmem:[%s2054_s23 + $0x208] sm:$0xff]  ;;  %v175_v9 = vld [vmem:[%s2054_s23 + $0x18] sm:$0xff] }
  0x12   : > { %v332_v10 = vpack.c.bf16 %v237_v7, %v236_v5  ;;  %v238_v11 = vld [vmem:[%s2054_s23 + $0x210] sm:$0xff]  ;;  %v239_v12 = vld [vmem:[%s2054_s23 + $0x218] sm:$0xff]  ;;  %v176_v13 = vld [vmem:[%s2054_s23 + $0x20] sm:$0xff]  ;;  %v301_v17 = vpack.c.bf16 %v175_v9, %v174_v8 }
  0x13   : > { %1855 = vmatprep.mubr.msk.bf16.mxu0 %vm395_vm0, %v300_v6  ;;  %v177_v14 = vld [vmem:[%s2054_s23 + $0x28] sm:$0xff]  ;;  %v240_v15 = vld [vmem:[%s2054_s23 + $0x220] sm:$0xff]  ;;  %v333_v18 = vpack.c.bf16 %v239_v12, %v238_v11  ;;  %v178_v21 = vld [vmem:[%s2054_s23 + $0x30] sm:$0xff] }
  0x14   : > { %v241_v16 = vld [vmem:[%s2054_s23 + $0x228] sm:$0xff]  ;;  %1919 = vmatprep.mubr.msk.bf16.mxu1 %vm395_vm0, %v332_v10  ;;  %v302_v19 = vpack.c.bf16 %v177_v14, %v176_v13  ;;  %1856 = vmatmul.mubr.msk.bf16.vlgmr.msra.gmra.mrb[0].mxu0 %vm395_vm0, %v301_v17  ;;  %v179_v22 = vld [vmem:[%s2054_s23 + $0x38] sm:$0xff]  ;;  %v242_v23 = vld [vmem:[%s2054_s23 + $0x230] sm:$0xff] }
  0x15   : > { %v334_v20 = vpack.c.bf16 %v241_v16, %v240_v15  ;;  %1920 = vmatmul.mubr.msk.bf16.vlgmr.msra.gmra.mrb[0].mxu1 %vm395_vm0, %v333_v18  ;;  %v243_v24 = vld [vmem:[%s2054_s23 + $0x238] sm:$0xff]  ;;  %v180_v25 = vld [vmem:[%s2054_s23 + $0x40] sm:$0xff]  ;;  %v181_v26 = vld [vmem:[%s2054_s23 + $0x48] sm:$0xff]  ;;  %v303_v29 = vpack.c.bf16 %v179_v22, %v178_v21 }
  0x16   : > { %1859 = vmatprep.mubr.msk.bf16.mxu0 %vm395_vm0, %v302_v19  ;;  %v244_v27 = vld [vmem:[%s2054_s23 + $0x240] sm:$0xff]  ;;  %v245_v28 = vld [vmem:[%s2054_s23 + $0x248] sm:$0xff]  ;;  %v335_v30 = vpack.c.bf16 %v243_v24, %v242_v23  ;;  %v304_v31 = vpack.c.bf16 %v181_v26, %v180_v25  ;;  %v182_v33 = vld [vmem:[%s2054_s23 + $0x50] sm:$0xff] }
  0x17   : > { %1923 = vmatprep.mubr.msk.bf16.mxu1 %vm395_vm0, %v334_v20  ;;  %v336_v32 = vpack.c.bf16 %v245_v28, %v244_v27  ;;  %v183_v34 = vld [vmem:[%s2054_s23 + $0x58] sm:$0xff]  ;;  %v246_v35 = vld [vmem:[%s2054_s23 + $0x250] sm:$0xff]  ;;  %v184_v37 = vld [vmem:[%s2054_s23 + $0x60] sm:$0xff] }
  0x18   : > { %v247_v36 = vld [vmem:[%s2054_s23 + $0x258] sm:$0xff]  ;;  %v185_v38 = vld [vmem:[%s2054_s23 + $0x68] sm:$0xff]  ;;  %v248_v39 = vld [vmem:[%s2054_s23 + $0x260] sm:$0xff]  ;;  %v305_v41 = vpack.c.bf16 %v183_v34, %v182_v33 }
  0x19   : > { %v249_v40 = vld [vmem:[%s2054_s23 + $0x268] sm:$0xff]  ;;  %v337_v42 = vpack.c.bf16 %v247_v36, %v246_v35  ;;  %v306_v43 = vpack.c.bf16 %v185_v38, %v184_v37  ;;  %v186_v45 = vld [vmem:[%s2054_s23 + $0x70] sm:$0xff]  ;;  %v187_v46 = vld [vmem:[%s2054_s23 + $0x78] sm:$0xff] }
  0x1a   : > { %v338_v44 = vpack.c.bf16 %v249_v40, %v248_v39  ;;  %v250_v47 = vld [vmem:[%s2054_s23 + $0x270] sm:$0xff]  ;;  %v251_v48 = vld [vmem:[%s2054_s23 + $0x278] sm:$0xff]  ;;  %v188_v49 = vld [vmem:[%s2054_s23 + $0x80] sm:$0xff]  ;;  %v307_v53 = vpack.c.bf16 %v187_v46, %v186_v45 }
  0x1b   : > { %v189_v50 = vld [vmem:[%s2054_s23 + $0x88] sm:$0xff]  ;;  %v252_v51 = vld [vmem:[%s2054_s23 + $0x280] sm:$0xff]  ;;  %v339_v54 = vpack.c.bf16 %v251_v48, %v250_v47  ;;  %v190_v57 = vld [vmem:[%s2054_s23 + $0x90] sm:$0xff] }
  0x1c   : > { %1860 = vmatmul.mubr.msk.bf16.gmra.mrb[4].mxu0 %vm395_vm0, %v303_v29  ;;  %v253_v52 = vld [vmem:[%s2054_s23 + $0x288] sm:$0xff]  ;;  %v308_v55 = vpack.c.bf16 %v189_v50, %v188_v49  ;;  %v191_v58 = vld [vmem:[%s2054_s23 + $0x98] sm:$0xff]  ;;  %v254_v59 = vld [vmem:[%s2054_s23 + $0x290] sm:$0xff] }
  0x1d   : > { %1924 = vmatmul.mubr.msk.bf16.gmra.mrb[4].mxu1 %vm395_vm0, %v335_v30  ;;  %1863 = vmatprep.mubr.msk.bf16.mxu0 %vm395_vm0, %v304_v31  ;;  %v340_v56 = vpack.c.bf16 %v253_v52, %v252_v51  ;;  %v255_v60 = vld [vmem:[%s2054_s23 + $0x298] sm:$0xff]  ;;  %v192_v61 = vld [vmem:[%s2054_s23 + $0xa0] sm:$0xff]  ;;  %v193_v62 = vld [vmem:[%s2054_s23 + $0xa8] sm:$0xff]  ;;  %v309_v1 = vpack.c.bf16 %v191_v58, %v190_v57 }
  0x1e   : > { %1927 = vmatprep.mubr.msk.bf16.mxu1 %vm395_vm0, %v336_v32  ;;  %v256_v63 = vld [vmem:[%s2054_s23 + $0x2a0] sm:$0xff]  ;;  %v257_v0 = vld [vmem:[%s2054_s23 + $0x2a8] sm:$0xff]  ;;  %v341_v2 = vpack.c.bf16 %v255_v60, %v254_v59  ;;  %v310_v3 = vpack.c.bf16 %v193_v62, %v192_v61  ;;  %v194_v5 = vld [vmem:[%s2054_s23 + $0xb0] sm:$0xff] }
  0x1f   : > { %v342_v4 = vpack.c.bf16 %v257_v0, %v256_v63  ;;  %v195_v6 = vld [vmem:[%s2054_s23 + $0xb8] sm:$0xff]  ;;  %v258_v7 = vld [vmem:[%s2054_s23 + $0x2b0] sm:$0xff]  ;;  %v196_v9 = vld [vmem:[%s2054_s23 + $0xc0] sm:$0xff] }
  0x20   : > { %v259_v8 = vld [vmem:[%s2054_s23 + $0x2b8] sm:$0xff]  ;;  %v197_v10 = vld [vmem:[%s2054_s23 + $0xc8] sm:$0xff]  ;;  %v260_v11 = vld [vmem:[%s2054_s23 + $0x2c0] sm:$0xff]  ;;  %v311_v13 = vpack.c.bf16 %v195_v6, %v194_v5 }
  0x21   : > { %v261_v12 = vld [vmem:[%s2054_s23 + $0x2c8] sm:$0xff]  ;;  %v343_v14 = vpack.c.bf16 %v259_v8, %v258_v7  ;;  %v312_v15 = vpack.c.bf16 %v197_v10, %v196_v9  ;;  %v198_v17 = vld [vmem:[%s2054_s23 + $0xd0] sm:$0xff]  ;;  %v199_v18 = vld [vmem:[%s2054_s23 + $0xd8] sm:$0xff] }
  0x22   : > { %v344_v16 = vpack.c.bf16 %v261_v12, %v260_v11  ;;  %v262_v19 = vld [vmem:[%s2054_s23 + $0x2d0] sm:$0xff]  ;;  %v263_v20 = vld [vmem:[%s2054_s23 + $0x2d8] sm:$0xff]  ;;  %v200_v21 = vld [vmem:[%s2054_s23 + $0xe0] sm:$0xff]  ;;  %v313_v25 = vpack.c.bf16 %v199_v18, %v198_v17 }
  0x23   : > { %v201_v22 = vld [vmem:[%s2054_s23 + $0xe8] sm:$0xff]  ;;  %v264_v23 = vld [vmem:[%s2054_s23 + $0x2e0] sm:$0xff]  ;;  %v345_v26 = vpack.c.bf16 %v263_v20, %v262_v19  ;;  %v202_v29 = vld [vmem:[%s2054_s23 + $0xf0] sm:$0xff] }
  0x24   : > { %1864 = vmatmul.mubr.msk.bf16.gmra.mrb[8].mxu0 %vm395_vm0, %v305_v41  ;;  %v265_v24 = vld [vmem:[%s2054_s23 + $0x2e8] sm:$0xff]  ;;  %v314_v27 = vpack.c.bf16 %v201_v22, %v200_v21  ;;  %v203_v30 = vld [vmem:[%s2054_s23 + $0xf8] sm:$0xff]  ;;  %v266_v31 = vld [vmem:[%s2054_s23 + $0x2f0] sm:$0xff] }
  0x25   : > { %1928 = vmatmul.mubr.msk.bf16.gmra.mrb[8].mxu1 %vm395_vm0, %v337_v42  ;;  %1867 = vmatprep.mubr.msk.bf16.mxu0 %vm395_vm0, %v306_v43  ;;  %v346_v28 = vpack.c.bf16 %v265_v24, %v264_v23  ;;  %v267_v32 = vld [vmem:[%s2054_s23 + $0x2f8] sm:$0xff]  ;;  %v204_v33 = vld [vmem:[%s2054_s23 + $0x100] sm:$0xff]  ;;  %v205_v34 = vld [vmem:[%s2054_s23 + $0x108] sm:$0xff]  ;;  %v315_v37 = vpack.c.bf16 %v203_v30, %v202_v29 }
  0x26   : > { %1931 = vmatprep.mubr.msk.bf16.mxu1 %vm395_vm0, %v338_v44  ;;  %v268_v35 = vld [vmem:[%s2054_s23 + $0x300] sm:$0xff]  ;;  %v269_v36 = vld [vmem:[%s2054_s23 + $0x308] sm:$0xff]  ;;  %v347_v38 = vpack.c.bf16 %v267_v32, %v266_v31  ;;  %v316_v39 = vpack.c.bf16 %v205_v34, %v204_v33  ;;  %v206_v41 = vld [vmem:[%s2054_s23 + $0x110] sm:$0xff] }
  0x27   : > { %v348_v40 = vpack.c.bf16 %v269_v36, %v268_v35  ;;  %v207_v42 = vld [vmem:[%s2054_s23 + $0x118] sm:$0xff]  ;;  %v270_v43 = vld [vmem:[%s2054_s23 + $0x310] sm:$0xff]  ;;  %v208_v45 = vld [vmem:[%s2054_s23 + $0x120] sm:$0xff] }
  0x28   : > { %v271_v44 = vld [vmem:[%s2054_s23 + $0x318] sm:$0xff]  ;;  %v209_v46 = vld [vmem:[%s2054_s23 + $0x128] sm:$0xff]  ;;  %v272_v47 = vld [vmem:[%s2054_s23 + $0x320] sm:$0xff]  ;;  %v317_v49 = vpack.c.bf16 %v207_v42, %v206_v41 }
  0x29   : > { %v273_v48 = vld [vmem:[%s2054_s23 + $0x328] sm:$0xff]  ;;  %v349_v50 = vpack.c.bf16 %v271_v44, %v270_v43  ;;  %v318_v51 = vpack.c.bf16 %v209_v46, %v208_v45  ;;  %v212_v57 = vld [vmem:[%s2054_s23 + $0x140] sm:$0xff] }
  0x2a   : > { %v350_v52 = vpack.c.bf16 %v273_v48, %v272_v47  ;;  %v213_v58 = vld [vmem:[%s2054_s23 + $0x148] sm:$0xff]  ;;  %v276_v59 = vld [vmem:[%s2054_s23 + $0x340] sm:$0xff] }
  0x2b   : > { %v277_v60 = vld [vmem:[%s2054_s23 + $0x348] sm:$0xff]  ;;  %v320_v63 = vpack.c.bf16 %v213_v58, %v212_v57  ;;  %v216_v5 = vld [vmem:[%s2054_s23 + $0x160] sm:$0xff] }
  0x2c   : > { %1868 = vmatmul.mubr.msk.bf16.gmra.mrb[12].mxu0 %vm395_vm0, %v307_v53  ;;  %v210_v53 = vld [vmem:[%s2054_s23 + $0x130] sm:$0xff]  ;;  %v352_v0 = vpack.c.bf16 %v277_v60, %v276_v59  ;;  %v217_v6 = vld [vmem:[%s2054_s23 + $0x168] sm:$0xff]  ;;  %v280_v7 = vld [vmem:[%s2054_s23 + $0x360] sm:$0xff] }
  0x2d   : > { %1932 = vmatmul.mubr.msk.bf16.gmra.mrb[12].mxu1 %vm395_vm0, %v339_v54  ;;  %1871 = vmatprep.mubr.msk.bf16.mxu0 %vm395_vm0, %v308_v55  ;;  %v211_v54 = vld [vmem:[%s2054_s23 + $0x138] sm:$0xff]  ;;  %v274_v55 = vld [vmem:[%s2054_s23 + $0x330] sm:$0xff]  ;;  %v281_v8 = vld [vmem:[%s2054_s23 + $0x368] sm:$0xff]  ;;  %v322_v11 = vpack.c.bf16 %v217_v6, %v216_v5 }
  0x2e   : > { %1935 = vmatprep.mubr.msk.bf16.mxu1 %vm395_vm0, %v340_v56  ;;  %v275_v56 = vld [vmem:[%s2054_s23 + $0x338] sm:$0xff]  ;;  %v319_v61 = vpack.c.bf16 %v211_v54, %v210_v53  ;;  %v354_v12 = vpack.c.bf16 %v281_v8, %v280_v7  ;;  %v220_v17 = vld [vmem:[%s2054_s23 + $0x180] sm:$0xff]  ;;  %v221_v18 = vld [vmem:[%s2054_s23 + $0x188] sm:$0xff] }
  0x2f   : > { %v351_v62 = vpack.c.bf16 %v275_v56, %v274_v55  ;;  %v284_v19 = vld [vmem:[%s2054_s23 + $0x380] sm:$0xff]  ;;  %v285_v20 = vld [vmem:[%s2054_s23 + $0x388] sm:$0xff]  ;;  %v324_v23 = vpack.c.bf16 %v221_v18, %v220_v17 }
  0x30   : > { %v356_v24 = vpack.c.bf16 %v285_v20, %v284_v19  ;;  %v224_v29 = vld [vmem:[%s2054_s23 + $0x1a0] sm:$0xff]  ;;  %v225_v30 = vld [vmem:[%s2054_s23 + $0x1a8] sm:$0xff] }
  0x31   : > { %v288_v31 = vld [vmem:[%s2054_s23 + $0x3a0] sm:$0xff]  ;;  %v289_v32 = vld [vmem:[%s2054_s23 + $0x3a8] sm:$0xff]  ;;  %v326_v35 = vpack.c.bf16 %v225_v30, %v224_v29 }
  0x32   : > { %v358_v36 = vpack.c.bf16 %v289_v32, %v288_v31  ;;  %v228_v41 = vld [vmem:[%s2054_s23 + $0x1c0] sm:$0xff]  ;;  %v229_v42 = vld [vmem:[%s2054_s23 + $0x1c8] sm:$0xff] }
  0x33   : > { %v292_v43 = vld [vmem:[%s2054_s23 + $0x3c0] sm:$0xff]  ;;  %v293_v44 = vld [vmem:[%s2054_s23 + $0x3c8] sm:$0xff]  ;;  %v328_v47 = vpack.c.bf16 %v229_v42, %v228_v41 }
  0x34   : > { %1872 = vmatmul.mubr.msk.bf16.gmra.mrb[16].mxu0 %vm395_vm0, %v309_v1  ;;  %v214_v1 = vld [vmem:[%s2054_s23 + $0x150] sm:$0xff]  ;;  %v360_v48 = vpack.c.bf16 %v293_v44, %v292_v43  ;;  %v232_v53 = vld [vmem:[%s2054_s23 + $0x1e0] sm:$0xff]  ;;  %v233_v54 = vld [vmem:[%s2054_s23 + $0x1e8] sm:$0xff] }
  0x35   : > { %1936 = vmatmul.mubr.msk.bf16.gmra.mrb[16].mxu1 %vm395_vm0, %v341_v2  ;;  %1875 = vmatprep.mubr.msk.bf16.mxu0 %vm395_vm0, %v310_v3  ;;  %v215_v2 = vld [vmem:[%s2054_s23 + $0x158] sm:$0xff]  ;;  %v278_v3 = vld [vmem:[%s2054_s23 + $0x350] sm:$0xff]  ;;  %v296_v55 = vld [vmem:[%s2054_s23 + $0x3e0] sm:$0xff]  ;;  %v330_v59 = vpack.c.bf16 %v233_v54, %v232_v53 }
  0x36   : > { %1939 = vmatprep.mubr.msk.bf16.mxu1 %vm395_vm0, %v342_v4  ;;  %v279_v4 = vld [vmem:[%s2054_s23 + $0x358] sm:$0xff]  ;;  %v321_v9 = vpack.c.bf16 %v215_v2, %v214_v1  ;;  %v297_v56 = vld [vmem:[%s2054_s23 + $0x3e8] sm:$0xff] }
  0x37   : > { %v353_v10 = vpack.c.bf16 %v279_v4, %v278_v3  ;;  %v362_v60 = vpack.c.bf16 %v297_v56, %v296_v55  ;;  %v2251_v3 = vld [vmem:[%s2654_s2] ss:$0 sm:$0xff] }
  0x3c   : > { %1876 = vmatmul.mubr.msk.bf16.gmra.mrb[20].mxu0 %vm395_vm0, %v311_v13  ;;  %v218_v13 = vld [vmem:[%s2054_s23 + $0x170] sm:$0xff] }
  0x3d   : > { %1940 = vmatmul.mubr.msk.bf16.gmra.mrb[20].mxu1 %vm395_vm0, %v343_v14  ;;  %1879 = vmatprep.mubr.msk.bf16.mxu0 %vm395_vm0, %v312_v15  ;;  %v219_v14 = vld [vmem:[%s2054_s23 + $0x178] sm:$0xff]  ;;  %v282_v15 = vld [vmem:[%s2054_s23 + $0x370] sm:$0xff] }
  0x3e   : > { %1943 = vmatprep.mubr.msk.bf16.mxu1 %vm395_vm0, %v344_v16  ;;  %v283_v16 = vld [vmem:[%s2054_s23 + $0x378] sm:$0xff]  ;;  %v323_v21 = vpack.c.bf16 %v219_v14, %v218_v13 }
  0x3f   : > { %v355_v22 = vpack.c.bf16 %v283_v16, %v282_v15 }
  0x44   : > { %1880 = vmatmul.mubr.msk.bf16.gmra.mrb[24].mxu0 %vm395_vm0, %v313_v25  ;;  %v222_v25 = vld [vmem:[%s2054_s23 + $0x190] sm:$0xff] }
  0x45   : > { %1944 = vmatmul.mubr.msk.bf16.gmra.mrb[24].mxu1 %vm395_vm0, %v345_v26  ;;  %1883 = vmatprep.mubr.msk.bf16.mxu0 %vm395_vm0, %v314_v27  ;;  %v223_v26 = vld [vmem:[%s2054_s23 + $0x198] sm:$0xff]  ;;  %v286_v27 = vld [vmem:[%s2054_s23 + $0x390] sm:$0xff] }
  0x46   : > { %1947 = vmatprep.mubr.msk.bf16.mxu1 %vm395_vm0, %v346_v28  ;;  %v287_v28 = vld [vmem:[%s2054_s23 + $0x398] sm:$0xff]  ;;  %v325_v33 = vpack.c.bf16 %v223_v26, %v222_v25 }
  0x47   : > { %v357_v34 = vpack.c.bf16 %v287_v28, %v286_v27 }
  0x4c   : > { %1884 = vmatmul.mubr.msk.bf16.gmra.mrb[28].mxu0 %vm395_vm0, %v315_v37  ;;  %v226_v37 = vld [vmem:[%s2054_s23 + $0x1b0] sm:$0xff] }
  0x4d   : > { %1948 = vmatmul.mubr.msk.bf16.gmra.mrb[28].mxu1 %vm395_vm0, %v347_v38  ;;  %1887 = vmatprep.mubr.msk.bf16.mxu0 %vm395_vm0, %v316_v39  ;;  %v227_v38 = vld [vmem:[%s2054_s23 + $0x1b8] sm:$0xff]  ;;  %v290_v39 = vld [vmem:[%s2054_s23 + $0x3b0] sm:$0xff] }
  0x4e   : > { %1951 = vmatprep.mubr.msk.bf16.mxu1 %vm395_vm0, %v348_v40  ;;  %v291_v40 = vld [vmem:[%s2054_s23 + $0x3b8] sm:$0xff]  ;;  %v327_v45 = vpack.c.bf16 %v227_v38, %v226_v37 }
  0x4f   : > { %v359_v46 = vpack.c.bf16 %v291_v40, %v290_v39 }
  0x54   : > { %1888 = vmatmul.mubr.msk.bf16.gmra.mrb[32].mxu0 %vm395_vm0, %v317_v49  ;;  %v230_v49 = vld [vmem:[%s2054_s23 + $0x1d0] sm:$0xff] }
  0x55   : > { %1952 = vmatmul.mubr.msk.bf16.gmra.mrb[32].mxu1 %vm395_vm0, %v349_v50  ;;  %1891 = vmatprep.mubr.msk.bf16.mxu0 %vm395_vm0, %v318_v51  ;;  %v231_v50 = vld [vmem:[%s2054_s23 + $0x1d8] sm:$0xff]  ;;  %v294_v51 = vld [vmem:[%s2054_s23 + $0x3d0] sm:$0xff] }
  0x56   : > { %1955 = vmatprep.mubr.msk.bf16.mxu1 %vm395_vm0, %v350_v52  ;;  %v295_v52 = vld [vmem:[%s2054_s23 + $0x3d8] sm:$0xff]  ;;  %v329_v57 = vpack.c.bf16 %v231_v50, %v230_v49 }
  0x57   : > { %v361_v58 = vpack.c.bf16 %v295_v52, %v294_v51 }
  0x5c   : > { %1892 = vmatmul.mubr.msk.bf16.gmra.mrb[36].mxu0 %vm395_vm0, %v319_v61  ;;  %v234_v61 = vld [vmem:[%s2054_s23 + $0x1f0] sm:$0xff] }
  0x5d   : > { %1956 = vmatmul.mubr.msk.bf16.gmra.mrb[36].mxu1 %vm395_vm0, %v351_v62  ;;  %1895 = vmatprep.mubr.msk.bf16.mxu0 %vm395_vm0, %v320_v63  ;;  %v235_v62 = vld [vmem:[%s2054_s23 + $0x1f8] sm:$0xff]  ;;  %v298_v63 = vld [vmem:[%s2054_s23 + $0x3f0] sm:$0xff] }
  0x5e   : > { %1959 = vmatprep.mubr.msk.bf16.mxu1 %vm395_vm0, %v352_v0  ;;  %v299_v0 = vld [vmem:[%s2054_s23 + $0x3f8] sm:$0xff]  ;;  %v331_v1 = vpack.c.bf16 %v235_v62, %v234_v61 }
  0x5f   : > { %v363_v2 = vpack.c.bf16 %v299_v0, %v298_v63 }
  0x64   : > { %1896 = vmatmul.mubr.msk.bf16.gmra.mrb[40].mxu0 %vm395_vm0, %v321_v9 }
  0x65   : > { %1960 = vmatmul.mubr.msk.bf16.gmra.mrb[40].mxu1 %vm395_vm0, %v353_v10  ;;  %1899 = vmatprep.mubr.msk.bf16.mxu0 %vm395_vm0, %v322_v11 }
  0x66   : > { %1963 = vmatprep.mubr.msk.bf16.mxu1 %vm395_vm0, %v354_v12 }
  0x6c   : > { %1900 = vmatmul.mubr.msk.bf16.gmra.mrb[44].mxu0 %vm395_vm0, %v323_v21 }
  0x6d   : > { %1964 = vmatmul.mubr.msk.bf16.gmra.mrb[44].mxu1 %vm395_vm0, %v355_v22  ;;  %1903 = vmatprep.mubr.msk.bf16.mxu0 %vm395_vm0, %v324_v23 }
  0x6e   : > { %1967 = vmatprep.mubr.msk.bf16.mxu1 %vm395_vm0, %v356_v24 }
  0x74   : > { %1904 = vmatmul.mubr.msk.bf16.gmra.mrb[48].mxu0 %vm395_vm0, %v325_v33 }
  0x75   : > { %1968 = vmatmul.mubr.msk.bf16.gmra.mrb[48].mxu1 %vm395_vm0, %v357_v34  ;;  %1907 = vmatprep.mubr.msk.bf16.mxu0 %vm395_vm0, %v326_v35 }
  0x76   : > { %1971 = vmatprep.mubr.msk.bf16.mxu1 %vm395_vm0, %v358_v36 }
  0x7c   : > { %1908 = vmatmul.mubr.msk.bf16.gmra.mrb[52].mxu0 %vm395_vm0, %v327_v45 }
  0x7d   : > { %1972 = vmatmul.mubr.msk.bf16.gmra.mrb[52].mxu1 %vm395_vm0, %v359_v46  ;;  %1911 = vmatprep.mubr.msk.bf16.mxu0 %vm395_vm0, %v328_v47 }
  0x7e   : > { %1975 = vmatprep.mubr.msk.bf16.mxu1 %vm395_vm0, %v360_v48 }
  0x84   : > { %1912 = vmatmul.mubr.msk.bf16.gmra.mrb[56].mxu0 %vm395_vm0, %v329_v57 }
  0x85   : > { %1976 = vmatmul.mubr.msk.bf16.gmra.mrb[56].mxu1 %vm395_vm0, %v361_v58  ;;  %1915 = vmatprep.mubr.msk.bf16.mxu0 %vm395_vm0, %v330_v59 }
  0x86   : > { %1979 = vmatprep.mubr.msk.bf16.mxu1 %vm395_vm0, %v362_v60 }
  0x8c   : > { %1916 = vmatmul.mubr.msk.bf16.gmra.mrb[60].mxu0 %vm395_vm0, %v331_v1 }
  0x8d   : > { %1980 = vmatmul.mubr.msk.bf16.gmra.mrb[60].mxu1 %vm395_vm0, %v363_v2 }
  0xe7   : > { %v1857_v4 = vpop.f32.mrb[0].mxu0 }
  0xe8   : > { %v1921_v5 = vpop.f32.mrb[0].mxu1  ;;  %v631_v6 = vadd.f32 %v1857_v4, %v2251_v3  ;;  %v622_v8 = vpop.f32.mrb[1].mxu0 }
  0xe9   : > { %v887_v7 = vadd.f32 %v1921_v5, %v2251_v3  ;;  %v878_v9 = vpop.f32.mrb[1].mxu1  ;;  %v623_v10 = vadd.f32 %v2251_v3, %v622_v8  ;;  %v1858_v12 = vpop.f32.mrb[2].mxu0 }
  0xea   : > { %v879_v11 = vadd.f32 %v2251_v3, %v878_v9  ;;  %v1922_v13 = vpop.f32.mrb[2].mxu1  ;;  %vm1135_vm2 = vcmp.gt.f32.partialorder %v631_v6, 0.0  ;;  %v1263_v14 = vmul.f32 0.2, %v631_v6  ;;  %v634_v20 = vadd.f32 %v1858_v12, %v2251_v3  ;;  %v625_v22 = vpop.f32.mrb[3].mxu0 }
  0xeb   : > { %vm1199_vm3 = vcmp.gt.f32.partialorder %v887_v7, 0.0  ;;  %v1327_v15 = vmul.f32 0.2, %v887_v7  ;;  %vm1133_vm4 = vcmp.gt.f32.partialorder %v623_v10, 0.0  ;;  %v1261_v16 = vmul.f32 0.2, %v623_v10 }
  0xec   : > { %vm1197_vm5 = vcmp.gt.f32.partialorder %v879_v11, 0.0  ;;  %v1325_v17 = vmul.f32 0.2, %v879_v11  ;;  %v1391_v18 = vsel %vm1135_vm2, %v631_v6, %v1263_v14  ;;  %v890_v21 = vadd.f32 %v1922_v13, %v2251_v3  ;;  %v881_v23 = vpop.f32.mrb[3].mxu1 }
  0xed   : > { %v1455_v19 = vsel %vm1199_vm3, %v887_v7, %v1327_v15  ;;  %1520 = vst.msk [vmem:[%s2262_s28 + $0x10] sm:$0xff] %vm1517_vm1, %v1391_v18  ;;  %v1389_v24 = vsel %vm1133_vm4, %v623_v10, %v1261_v16  ;;  %v626_v26 = vadd.f32 %v2251_v3, %v625_v22  ;;  %v882_v27 = vadd.f32 %v2251_v3, %v881_v23 }
  0xee   : > { %1584 = vst.msk [vmem:[%s2262_s28 + $0x210] sm:$0xff] %vm1517_vm1, %v1455_v19  ;;  %v1453_v25 = vsel %vm1197_vm5, %v879_v11, %v1325_v17  ;;  %1518 = vst.msk [vmem:[%s2262_s28] sm:$0xff] %vm1517_vm1, %v1389_v24  ;;  %vm1136_vm6 = vcmp.gt.f32.partialorder %v634_v20, 0.0  ;;  %v1264_v28 = vmul.f32 0.2, %v634_v20  ;;  %vm1200_vm7 = vcmp.gt.f32.partialorder %v890_v21, 0.0 }
  0xef   : > { %1582 = vst.msk [vmem:[%s2262_s28 + $0x200] sm:$0xff] %vm1517_vm1, %v1453_v25  ;;  %v1328_v29 = vmul.f32 0.2, %v890_v21  ;;  %vm1134_vm8 = vcmp.gt.f32.partialorder %v626_v26, 0.0  ;;  %v1262_v30 = vmul.f32 0.2, %v626_v26 }
  0xf0   : > { %vm1198_vm9 = vcmp.gt.f32.partialorder %v882_v27, 0.0  ;;  %v1326_v31 = vmul.f32 0.2, %v882_v27  ;;  %v1392_v32 = vsel %vm1136_vm6, %v634_v20, %v1264_v28  ;;  %v1861_v34 = vpop.f32.mrb[4].mxu0  ;;  %v1925_v35 = vpop.f32.mrb[4].mxu1 }
  0xf1   : > { %v1456_v33 = vsel %vm1200_vm7, %v890_v21, %v1328_v29  ;;  %1521 = vst.msk [vmem:[%s2262_s28 + $0x18] sm:$0xff] %vm1517_vm1, %v1392_v32  ;;  %v1390_v36 = vsel %vm1134_vm8, %v626_v26, %v1262_v30  ;;  %v647_v38 = vadd.f32 %v1861_v34, %v2251_v3  ;;  %v903_v39 = vadd.f32 %v1925_v35, %v2251_v3  ;;  %v638_v40 = vpop.f32.mrb[5].mxu0  ;;  %v894_v41 = vpop.f32.mrb[5].mxu1 }
  0xf2   : > { %1585 = vst.msk [vmem:[%s2262_s28 + $0x218] sm:$0xff] %vm1517_vm1, %v1456_v33  ;;  %v1454_v37 = vsel %vm1198_vm9, %v882_v27, %v1326_v31  ;;  %1519 = vst.msk [vmem:[%s2262_s28 + $0x8] sm:$0xff] %vm1517_vm1, %v1390_v36  ;;  %v639_v42 = vadd.f32 %v2251_v3, %v638_v40  ;;  %v895_v43 = vadd.f32 %v2251_v3, %v894_v41  ;;  %v1862_v44 = vpop.f32.mrb[6].mxu0  ;;  %v1926_v45 = vpop.f32.mrb[6].mxu1 }
  0xf3   : > { %1583 = vst.msk [vmem:[%s2262_s28 + $0x208] sm:$0xff] %vm1517_vm1, %v1454_v37  ;;  %vm1139_vm10 = vcmp.gt.f32.partialorder %v647_v38, 0.0  ;;  %v1267_v46 = vmul.f32 0.2, %v647_v38  ;;  %vm1203_vm11 = vcmp.gt.f32.partialorder %v903_v39, 0.0  ;;  %v650_v52 = vadd.f32 %v1862_v44, %v2251_v3  ;;  %v641_v54 = vpop.f32.mrb[7].mxu0 }
  0xf4   : > { %v1331_v47 = vmul.f32 0.2, %v903_v39  ;;  %vm1137_vm12 = vcmp.gt.f32.partialorder %v639_v42, 0.0  ;;  %v1265_v48 = vmul.f32 0.2, %v639_v42  ;;  %vm1201_vm13 = vcmp.gt.f32.partialorder %v895_v43, 0.0 }
  0xf5   : > { %v1329_v49 = vmul.f32 0.2, %v895_v43  ;;  %v1395_v50 = vsel %vm1139_vm10, %v647_v38, %v1267_v46  ;;  %v906_v53 = vadd.f32 %v1926_v45, %v2251_v3  ;;  %v897_v55 = vpop.f32.mrb[7].mxu1  ;;  %v642_v58 = vadd.f32 %v2251_v3, %v641_v54 }
  0xf6   : > { %v1459_v51 = vsel %vm1203_vm11, %v903_v39, %v1331_v47  ;;  %1524 = vst.msk [vmem:[%s2262_s28 + $0x30] sm:$0xff] %vm1517_vm1, %v1395_v50  ;;  %v1393_v56 = vsel %vm1137_vm12, %v639_v42, %v1265_v48  ;;  %v898_v59 = vadd.f32 %v2251_v3, %v897_v55  ;;  %vm1140_vm14 = vcmp.gt.f32.partialorder %v650_v52, 0.0 }
  0xf7   : > { %1588 = vst.msk [vmem:[%s2262_s28 + $0x230] sm:$0xff] %vm1517_vm1, %v1459_v51  ;;  %v1457_v57 = vsel %vm1201_vm13, %v895_v43, %v1329_v49  ;;  %1522 = vst.msk [vmem:[%s2262_s28 + $0x20] sm:$0xff] %vm1517_vm1, %v1393_v56  ;;  %v1268_v60 = vmul.f32 0.2, %v650_v52  ;;  %vm1204_vm15 = vcmp.gt.f32.partialorder %v906_v53, 0.0  ;;  %vm1138_vm0 = vcmp.gt.f32.partialorder %v642_v58, 0.0 }
  0xf8   : > { %1586 = vst.msk [vmem:[%s2262_s28 + $0x220] sm:$0xff] %vm1517_vm1, %v1457_v57  ;;  %v1332_v61 = vmul.f32 0.2, %v906_v53  ;;  %v1266_v62 = vmul.f32 0.2, %v642_v58  ;;  %vm1202_vm2 = vcmp.gt.f32.partialorder %v898_v59, 0.0 }
  0xf9   : > { %v1330_v63 = vmul.f32 0.2, %v898_v59  ;;  %v1396_v0 = vsel %vm1140_vm14, %v650_v52, %v1268_v60  ;;  %v1865_v2 = vpop.f32.mrb[8].mxu0  ;;  %v1929_v4 = vpop.f32.mrb[8].mxu1 }
  0xfa   : > { %v1460_v1 = vsel %vm1204_vm15, %v906_v53, %v1332_v61  ;;  %1525 = vst.msk [vmem:[%s2262_s28 + $0x38] sm:$0xff] %vm1517_vm1, %v1396_v0  ;;  %v1394_v5 = vsel %vm1138_vm0, %v642_v58, %v1266_v62  ;;  %v663_v7 = vadd.f32 %v1865_v2, %v2251_v3  ;;  %v919_v8 = vadd.f32 %v1929_v4, %v2251_v3  ;;  %v654_v9 = vpop.f32.mrb[9].mxu0  ;;  %v910_v10 = vpop.f32.mrb[9].mxu1 }
  0xfb   : > { %1589 = vst.msk [vmem:[%s2262_s28 + $0x238] sm:$0xff] %vm1517_vm1, %v1460_v1  ;;  %v1458_v6 = vsel %vm1202_vm2, %v898_v59, %v1330_v63  ;;  %1523 = vst.msk [vmem:[%s2262_s28 + $0x28] sm:$0xff] %vm1517_vm1, %v1394_v5  ;;  %v655_v11 = vadd.f32 %v2251_v3, %v654_v9  ;;  %v911_v12 = vadd.f32 %v2251_v3, %v910_v10  ;;  %v1866_v13 = vpop.f32.mrb[10].mxu0  ;;  %v1930_v14 = vpop.f32.mrb[10].mxu1 }
  0xfc   : > { %1587 = vst.msk [vmem:[%s2262_s28 + $0x228] sm:$0xff] %vm1517_vm1, %v1458_v6  ;;  %vm1143_vm3 = vcmp.gt.f32.partialorder %v663_v7, 0.0  ;;  %v1271_v15 = vmul.f32 0.2, %v663_v7  ;;  %vm1207_vm4 = vcmp.gt.f32.partialorder %v919_v8, 0.0  ;;  %v666_v21 = vadd.f32 %v1866_v13, %v2251_v3  ;;  %v657_v23 = vpop.f32.mrb[11].mxu0 }
  0xfd   : > { %v1335_v16 = vmul.f32 0.2, %v919_v8  ;;  %vm1141_vm5 = vcmp.gt.f32.partialorder %v655_v11, 0.0  ;;  %v1269_v17 = vmul.f32 0.2, %v655_v11  ;;  %vm1205_vm6 = vcmp.gt.f32.partialorder %v911_v12, 0.0 }
  0xfe   : > { %v1333_v18 = vmul.f32 0.2, %v911_v12  ;;  %v1399_v19 = vsel %vm1143_vm3, %v663_v7, %v1271_v15  ;;  %v922_v22 = vadd.f32 %v1930_v14, %v2251_v3  ;;  %v913_v24 = vpop.f32.mrb[11].mxu1  ;;  %v658_v27 = vadd.f32 %v2251_v3, %v657_v23 }
  0xff   : > { %v1463_v20 = vsel %vm1207_vm4, %v919_v8, %v1335_v16  ;;  %1528 = vst.msk [vmem:[%s2262_s28 + $0x50] sm:$0xff] %vm1517_vm1, %v1399_v19  ;;  %v1397_v25 = vsel %vm1141_vm5, %v655_v11, %v1269_v17  ;;  %v914_v28 = vadd.f32 %v2251_v3, %v913_v24  ;;  %v1869_v29 = vpop.f32.mrb[12].mxu0  ;;  %vm1144_vm7 = vcmp.gt.f32.partialorder %v666_v21, 0.0 }
 0x100   : > { %1592 = vst.msk [vmem:[%s2262_s28 + $0x250] sm:$0xff] %vm1517_vm1, %v1463_v20  ;;  %v1461_v26 = vsel %vm1205_vm6, %v911_v12, %v1333_v18  ;;  %v1933_v30 = vpop.f32.mrb[12].mxu1  ;;  %1526 = vst.msk [vmem:[%s2262_s28 + $0x40] sm:$0xff] %vm1517_vm1, %v1397_v25  ;;  %v1272_v31 = vmul.f32 0.2, %v666_v21  ;;  %vm1208_vm8 = vcmp.gt.f32.partialorder %v922_v22, 0.0  ;;  %v679_v37 = vadd.f32 %v1869_v29, %v2251_v3 }
 0x101   : > { %1590 = vst.msk [vmem:[%s2262_s28 + $0x240] sm:$0xff] %vm1517_vm1, %v1461_v26  ;;  %v1336_v32 = vmul.f32 0.2, %v922_v22  ;;  %vm1142_vm9 = vcmp.gt.f32.partialorder %v658_v27, 0.0  ;;  %v1270_v33 = vmul.f32 0.2, %v658_v27  ;;  %v935_v38 = vadd.f32 %v1933_v30, %v2251_v3 }
 0x102   : > { %vm1206_vm10 = vcmp.gt.f32.partialorder %v914_v28, 0.0  ;;  %v1334_v34 = vmul.f32 0.2, %v914_v28  ;;  %v1400_v35 = vsel %vm1144_vm7, %v666_v21, %v1272_v31  ;;  %v670_v39 = vpop.f32.mrb[13].mxu0  ;;  %v926_v40 = vpop.f32.mrb[13].mxu1  ;;  %vm1147_vm11 = vcmp.gt.f32.partialorder %v679_v37, 0.0 }
 0x103   : > { %v1464_v36 = vsel %vm1208_vm8, %v922_v22, %v1336_v32  ;;  %1529 = vst.msk [vmem:[%s2262_s28 + $0x58] sm:$0xff] %vm1517_vm1, %v1400_v35  ;;  %v1398_v41 = vsel %vm1142_vm9, %v658_v27, %v1270_v33  ;;  %v671_v43 = vadd.f32 %v2251_v3, %v670_v39  ;;  %v927_v44 = vadd.f32 %v2251_v3, %v926_v40  ;;  %v1870_v45 = vpop.f32.mrb[14].mxu0  ;;  %v1934_v46 = vpop.f32.mrb[14].mxu1 }
 0x104   : > { %1593 = vst.msk [vmem:[%s2262_s28 + $0x258] sm:$0xff] %vm1517_vm1, %v1464_v36  ;;  %v1462_v42 = vsel %vm1206_vm10, %v914_v28, %v1334_v34  ;;  %1527 = vst.msk [vmem:[%s2262_s28 + $0x48] sm:$0xff] %vm1517_vm1, %v1398_v41  ;;  %v1275_v47 = vmul.f32 0.2, %v679_v37  ;;  %vm1211_vm12 = vcmp.gt.f32.partialorder %v935_v38, 0.0  ;;  %v682_v53 = vadd.f32 %v1870_v45, %v2251_v3  ;;  %v673_v55 = vpop.f32.mrb[15].mxu0 }
 0x105   : > { %1591 = vst.msk [vmem:[%s2262_s28 + $0x248] sm:$0xff] %vm1517_vm1, %v1462_v42  ;;  %v1339_v48 = vmul.f32 0.2, %v935_v38  ;;  %vm1145_vm13 = vcmp.gt.f32.partialorder %v671_v43, 0.0  ;;  %v1273_v49 = vmul.f32 0.2, %v671_v43  ;;  %v938_v54 = vadd.f32 %v1934_v46, %v2251_v3 }
 0x106   : > { %vm1209_vm14 = vcmp.gt.f32.partialorder %v927_v44, 0.0  ;;  %v1337_v50 = vmul.f32 0.2, %v927_v44  ;;  %v1403_v51 = vsel %vm1147_vm11, %v679_v37, %v1275_v47  ;;  %v929_v56 = vpop.f32.mrb[15].mxu1  ;;  %v674_v59 = vadd.f32 %v2251_v3, %v673_v55 }
 0x107   : > { %v1467_v52 = vsel %vm1211_vm12, %v935_v38, %v1339_v48  ;;  %1532 = vst.msk [vmem:[%s2262_s28 + $0x70] sm:$0xff] %vm1517_vm1, %v1403_v51  ;;  %v1401_v57 = vsel %vm1145_vm13, %v671_v43, %v1273_v49  ;;  %v930_v60 = vadd.f32 %v2251_v3, %v929_v56  ;;  %v1873_v61 = vpop.f32.mrb[16].mxu0  ;;  %vm1148_vm15 = vcmp.gt.f32.partialorder %v682_v53, 0.0 }
 0x108   : > { %1596 = vst.msk [vmem:[%s2262_s28 + $0x270] sm:$0xff] %vm1517_vm1, %v1467_v52  ;;  %v1465_v58 = vsel %vm1209_vm14, %v927_v44, %v1337_v50  ;;  %v1937_v62 = vpop.f32.mrb[16].mxu1  ;;  %1530 = vst.msk [vmem:[%s2262_s28 + $0x60] sm:$0xff] %vm1517_vm1, %v1401_v57  ;;  %v1276_v63 = vmul.f32 0.2, %v682_v53  ;;  %vm1212_vm0 = vcmp.gt.f32.partialorder %v938_v54, 0.0  ;;  %v695_v6 = vadd.f32 %v1873_v61, %v2251_v3 }
 0x109   : > { %1594 = vst.msk [vmem:[%s2262_s28 + $0x260] sm:$0xff] %vm1517_vm1, %v1465_v58  ;;  %v1340_v0 = vmul.f32 0.2, %v938_v54  ;;  %vm1146_vm2 = vcmp.gt.f32.partialorder %v674_v59, 0.0  ;;  %v1274_v1 = vmul.f32 0.2, %v674_v59  ;;  %v951_v7 = vadd.f32 %v1937_v62, %v2251_v3 }
 0x10a   : > { %vm1210_vm3 = vcmp.gt.f32.partialorder %v930_v60, 0.0  ;;  %v1338_v2 = vmul.f32 0.2, %v930_v60  ;;  %v1404_v4 = vsel %vm1148_vm15, %v682_v53, %v1276_v63  ;;  %v686_v8 = vpop.f32.mrb[17].mxu0  ;;  %v942_v9 = vpop.f32.mrb[17].mxu1  ;;  %vm1151_vm4 = vcmp.gt.f32.partialorder %v695_v6, 0.0 }
 0x10b   : > { %v1468_v5 = vsel %vm1212_vm0, %v938_v54, %v1340_v0  ;;  %1533 = vst.msk [vmem:[%s2262_s28 + $0x78] sm:$0xff] %vm1517_vm1, %v1404_v4  ;;  %v1402_v10 = vsel %vm1146_vm2, %v674_v59, %v1274_v1  ;;  %v687_v12 = vadd.f32 %v2251_v3, %v686_v8  ;;  %v943_v13 = vadd.f32 %v2251_v3, %v942_v9  ;;  %v1874_v14 = vpop.f32.mrb[18].mxu0  ;;  %v1938_v15 = vpop.f32.mrb[18].mxu1 }
 0x10c   : > { %1597 = vst.msk [vmem:[%s2262_s28 + $0x278] sm:$0xff] %vm1517_vm1, %v1468_v5  ;;  %v1466_v11 = vsel %vm1210_vm3, %v930_v60, %v1338_v2  ;;  %1531 = vst.msk [vmem:[%s2262_s28 + $0x68] sm:$0xff] %vm1517_vm1, %v1402_v10  ;;  %v1279_v16 = vmul.f32 0.2, %v695_v6  ;;  %vm1215_vm5 = vcmp.gt.f32.partialorder %v951_v7, 0.0  ;;  %v698_v22 = vadd.f32 %v1874_v14, %v2251_v3  ;;  %v689_v24 = vpop.f32.mrb[19].mxu0 }
 0x10d   : > { %1595 = vst.msk [vmem:[%s2262_s28 + $0x268] sm:$0xff] %vm1517_vm1, %v1466_v11  ;;  %v1343_v17 = vmul.f32 0.2, %v951_v7  ;;  %vm1149_vm6 = vcmp.gt.f32.partialorder %v687_v12, 0.0  ;;  %v1277_v18 = vmul.f32 0.2, %v687_v12  ;;  %v954_v23 = vadd.f32 %v1938_v15, %v2251_v3 }
 0x10e   : > { %vm1213_vm7 = vcmp.gt.f32.partialorder %v943_v13, 0.0  ;;  %v1341_v19 = vmul.f32 0.2, %v943_v13  ;;  %v1407_v20 = vsel %vm1151_vm4, %v695_v6, %v1279_v16  ;;  %v945_v25 = vpop.f32.mrb[19].mxu1  ;;  %v690_v28 = vadd.f32 %v2251_v3, %v689_v24 }
 0x10f   : > { %v1471_v21 = vsel %vm1215_vm5, %v951_v7, %v1343_v17  ;;  %1536 = vst.msk [vmem:[%s2262_s28 + $0x90] sm:$0xff] %vm1517_vm1, %v1407_v20  ;;  %v1405_v26 = vsel %vm1149_vm6, %v687_v12, %v1277_v18  ;;  %v946_v29 = vadd.f32 %v2251_v3, %v945_v25  ;;  %v1877_v30 = vpop.f32.mrb[20].mxu0  ;;  %vm1152_vm8 = vcmp.gt.f32.partialorder %v698_v22, 0.0 }
 0x110   : > { %1600 = vst.msk [vmem:[%s2262_s28 + $0x290] sm:$0xff] %vm1517_vm1, %v1471_v21  ;;  %v1469_v27 = vsel %vm1213_vm7, %v943_v13, %v1341_v19  ;;  %v1941_v31 = vpop.f32.mrb[20].mxu1  ;;  %1534 = vst.msk [vmem:[%s2262_s28 + $0x80] sm:$0xff] %vm1517_vm1, %v1405_v26  ;;  %v1280_v32 = vmul.f32 0.2, %v698_v22  ;;  %vm1216_vm9 = vcmp.gt.f32.partialorder %v954_v23, 0.0  ;;  %v711_v38 = vadd.f32 %v1877_v30, %v2251_v3 }
 0x111   : > { %1598 = vst.msk [vmem:[%s2262_s28 + $0x280] sm:$0xff] %vm1517_vm1, %v1469_v27  ;;  %v1344_v33 = vmul.f32 0.2, %v954_v23  ;;  %vm1150_vm10 = vcmp.gt.f32.partialorder %v690_v28, 0.0  ;;  %v1278_v34 = vmul.f32 0.2, %v690_v28  ;;  %v967_v39 = vadd.f32 %v1941_v31, %v2251_v3 }
 0x112   : > { %vm1214_vm11 = vcmp.gt.f32.partialorder %v946_v29, 0.0  ;;  %v1342_v35 = vmul.f32 0.2, %v946_v29  ;;  %v1408_v36 = vsel %vm1152_vm8, %v698_v22, %v1280_v32  ;;  %v702_v40 = vpop.f32.mrb[21].mxu0  ;;  %v958_v41 = vpop.f32.mrb[21].mxu1  ;;  %vm1155_vm12 = vcmp.gt.f32.partialorder %v711_v38, 0.0 }
 0x113   : > { %v1472_v37 = vsel %vm1216_vm9, %v954_v23, %v1344_v33  ;;  %1537 = vst.msk [vmem:[%s2262_s28 + $0x98] sm:$0xff] %vm1517_vm1, %v1408_v36  ;;  %v1406_v42 = vsel %vm1150_vm10, %v690_v28, %v1278_v34  ;;  %v703_v44 = vadd.f32 %v2251_v3, %v702_v40  ;;  %v959_v45 = vadd.f32 %v2251_v3, %v958_v41  ;;  %v1878_v46 = vpop.f32.mrb[22].mxu0  ;;  %v1942_v47 = vpop.f32.mrb[22].mxu1 }
 0x114   : > { %1601 = vst.msk [vmem:[%s2262_s28 + $0x298] sm:$0xff] %vm1517_vm1, %v1472_v37  ;;  %v1470_v43 = vsel %vm1214_vm11, %v946_v29, %v1342_v35  ;;  %1535 = vst.msk [vmem:[%s2262_s28 + $0x88] sm:$0xff] %vm1517_vm1, %v1406_v42  ;;  %v1283_v48 = vmul.f32 0.2, %v711_v38  ;;  %vm1219_vm13 = vcmp.gt.f32.partialorder %v967_v39, 0.0  ;;  %v714_v54 = vadd.f32 %v1878_v46, %v2251_v3  ;;  %v705_v56 = vpop.f32.mrb[23].mxu0 }
 0x115   : > { %1599 = vst.msk [vmem:[%s2262_s28 + $0x288] sm:$0xff] %vm1517_vm1, %v1470_v43  ;;  %v1347_v49 = vmul.f32 0.2, %v967_v39  ;;  %vm1153_vm14 = vcmp.gt.f32.partialorder %v703_v44, 0.0  ;;  %v1281_v50 = vmul.f32 0.2, %v703_v44  ;;  %v970_v55 = vadd.f32 %v1942_v47, %v2251_v3 }
 0x116   : > { %vm1217_vm15 = vcmp.gt.f32.partialorder %v959_v45, 0.0  ;;  %v1345_v51 = vmul.f32 0.2, %v959_v45  ;;  %v1411_v52 = vsel %vm1155_vm12, %v711_v38, %v1283_v48  ;;  %v961_v57 = vpop.f32.mrb[23].mxu1  ;;  %v706_v60 = vadd.f32 %v2251_v3, %v705_v56 }
 0x117   : > { %v1475_v53 = vsel %vm1219_vm13, %v967_v39, %v1347_v49  ;;  %1540 = vst.msk [vmem:[%s2262_s28 + $0xb0] sm:$0xff] %vm1517_vm1, %v1411_v52  ;;  %v1409_v58 = vsel %vm1153_vm14, %v703_v44, %v1281_v50  ;;  %v962_v61 = vadd.f32 %v2251_v3, %v961_v57  ;;  %v1881_v62 = vpop.f32.mrb[24].mxu0  ;;  %vm1156_vm0 = vcmp.gt.f32.partialorder %v714_v54, 0.0 }
 0x118   : > { %1604 = vst.msk [vmem:[%s2262_s28 + $0x2b0] sm:$0xff] %vm1517_vm1, %v1475_v53  ;;  %v1473_v59 = vsel %vm1217_vm15, %v959_v45, %v1345_v51  ;;  %v1945_v63 = vpop.f32.mrb[24].mxu1  ;;  %1538 = vst.msk [vmem:[%s2262_s28 + $0xa0] sm:$0xff] %vm1517_vm1, %v1409_v58  ;;  %v1284_v0 = vmul.f32 0.2, %v714_v54  ;;  %vm1220_vm2 = vcmp.gt.f32.partialorder %v970_v55, 0.0  ;;  %v727_v7 = vadd.f32 %v1881_v62, %v2251_v3 }
 0x119   : > { %1602 = vst.msk [vmem:[%s2262_s28 + $0x2a0] sm:$0xff] %vm1517_vm1, %v1473_v59  ;;  %v1348_v1 = vmul.f32 0.2, %v970_v55  ;;  %vm1154_vm3 = vcmp.gt.f32.partialorder %v706_v60, 0.0  ;;  %v1282_v2 = vmul.f32 0.2, %v706_v60  ;;  %v983_v8 = vadd.f32 %v1945_v63, %v2251_v3 }
 0x11a   : > { %vm1218_vm4 = vcmp.gt.f32.partialorder %v962_v61, 0.0  ;;  %v1346_v4 = vmul.f32 0.2, %v962_v61  ;;  %v1412_v5 = vsel %vm1156_vm0, %v714_v54, %v1284_v0  ;;  %v718_v9 = vpop.f32.mrb[25].mxu0  ;;  %v974_v10 = vpop.f32.mrb[25].mxu1  ;;  %vm1159_vm5 = vcmp.gt.f32.partialorder %v727_v7, 0.0 }
 0x11b   : > { %v1476_v6 = vsel %vm1220_vm2, %v970_v55, %v1348_v1  ;;  %1541 = vst.msk [vmem:[%s2262_s28 + $0xb8] sm:$0xff] %vm1517_vm1, %v1412_v5  ;;  %v1410_v11 = vsel %vm1154_vm3, %v706_v60, %v1282_v2  ;;  %v719_v13 = vadd.f32 %v2251_v3, %v718_v9  ;;  %v975_v14 = vadd.f32 %v2251_v3, %v974_v10  ;;  %v1882_v15 = vpop.f32.mrb[26].mxu0  ;;  %v1946_v16 = vpop.f32.mrb[26].mxu1 }
 0x11c   : > { %1605 = vst.msk [vmem:[%s2262_s28 + $0x2b8] sm:$0xff] %vm1517_vm1, %v1476_v6  ;;  %v1474_v12 = vsel %vm1218_vm4, %v962_v61, %v1346_v4  ;;  %1539 = vst.msk [vmem:[%s2262_s28 + $0xa8] sm:$0xff] %vm1517_vm1, %v1410_v11  ;;  %v1287_v17 = vmul.f32 0.2, %v727_v7  ;;  %vm1223_vm6 = vcmp.gt.f32.partialorder %v983_v8, 0.0  ;;  %v730_v23 = vadd.f32 %v1882_v15, %v2251_v3  ;;  %v721_v25 = vpop.f32.mrb[27].mxu0 }
 0x11d   : > { %1603 = vst.msk [vmem:[%s2262_s28 + $0x2a8] sm:$0xff] %vm1517_vm1, %v1474_v12  ;;  %v1351_v18 = vmul.f32 0.2, %v983_v8  ;;  %vm1157_vm7 = vcmp.gt.f32.partialorder %v719_v13, 0.0  ;;  %v1285_v19 = vmul.f32 0.2, %v719_v13  ;;  %v986_v24 = vadd.f32 %v1946_v16, %v2251_v3 }
 0x11e   : > { %vm1221_vm8 = vcmp.gt.f32.partialorder %v975_v14, 0.0  ;;  %v1349_v20 = vmul.f32 0.2, %v975_v14  ;;  %v1415_v21 = vsel %vm1159_vm5, %v727_v7, %v1287_v17  ;;  %v977_v26 = vpop.f32.mrb[27].mxu1  ;;  %v722_v29 = vadd.f32 %v2251_v3, %v721_v25 }
 0x11f   : > { %v1479_v22 = vsel %vm1223_vm6, %v983_v8, %v1351_v18  ;;  %1544 = vst.msk [vmem:[%s2262_s28 + $0xd0] sm:$0xff] %vm1517_vm1, %v1415_v21  ;;  %v1413_v27 = vsel %vm1157_vm7, %v719_v13, %v1285_v19  ;;  %v978_v30 = vadd.f32 %v2251_v3, %v977_v26  ;;  %v1885_v31 = vpop.f32.mrb[28].mxu0  ;;  %vm1160_vm9 = vcmp.gt.f32.partialorder %v730_v23, 0.0 }
 0x120   : > { %1608 = vst.msk [vmem:[%s2262_s28 + $0x2d0] sm:$0xff] %vm1517_vm1, %v1479_v22  ;;  %v1477_v28 = vsel %vm1221_vm8, %v975_v14, %v1349_v20  ;;  %v1949_v32 = vpop.f32.mrb[28].mxu1  ;;  %1542 = vst.msk [vmem:[%s2262_s28 + $0xc0] sm:$0xff] %vm1517_vm1, %v1413_v27  ;;  %v1288_v33 = vmul.f32 0.2, %v730_v23  ;;  %vm1224_vm10 = vcmp.gt.f32.partialorder %v986_v24, 0.0  ;;  %v743_v39 = vadd.f32 %v1885_v31, %v2251_v3 }
 0x121   : > { %1606 = vst.msk [vmem:[%s2262_s28 + $0x2c0] sm:$0xff] %vm1517_vm1, %v1477_v28  ;;  %v1352_v34 = vmul.f32 0.2, %v986_v24  ;;  %vm1158_vm11 = vcmp.gt.f32.partialorder %v722_v29, 0.0  ;;  %v1286_v35 = vmul.f32 0.2, %v722_v29  ;;  %v999_v40 = vadd.f32 %v1949_v32, %v2251_v3 }
 0x122   : > { %vm1222_vm12 = vcmp.gt.f32.partialorder %v978_v30, 0.0  ;;  %v1350_v36 = vmul.f32 0.2, %v978_v30  ;;  %v1416_v37 = vsel %vm1160_vm9, %v730_v23, %v1288_v33  ;;  %v734_v41 = vpop.f32.mrb[29].mxu0  ;;  %v990_v42 = vpop.f32.mrb[29].mxu1  ;;  %vm1163_vm13 = vcmp.gt.f32.partialorder %v743_v39, 0.0 }
 0x123   : > { %v1480_v38 = vsel %vm1224_vm10, %v986_v24, %v1352_v34  ;;  %1545 = vst.msk [vmem:[%s2262_s28 + $0xd8] sm:$0xff] %vm1517_vm1, %v1416_v37  ;;  %v1414_v43 = vsel %vm1158_vm11, %v722_v29, %v1286_v35  ;;  %v735_v45 = vadd.f32 %v2251_v3, %v734_v41  ;;  %v991_v46 = vadd.f32 %v2251_v3, %v990_v42  ;;  %v1886_v47 = vpop.f32.mrb[30].mxu0  ;;  %v1950_v48 = vpop.f32.mrb[30].mxu1 }
 0x124   : > { %1609 = vst.msk [vmem:[%s2262_s28 + $0x2d8] sm:$0xff] %vm1517_vm1, %v1480_v38  ;;  %v1478_v44 = vsel %vm1222_vm12, %v978_v30, %v1350_v36  ;;  %1543 = vst.msk [vmem:[%s2262_s28 + $0xc8] sm:$0xff] %vm1517_vm1, %v1414_v43  ;;  %v1291_v49 = vmul.f32 0.2, %v743_v39  ;;  %vm1227_vm14 = vcmp.gt.f32.partialorder %v999_v40, 0.0  ;;  %v746_v55 = vadd.f32 %v1886_v47, %v2251_v3  ;;  %v737_v57 = vpop.f32.mrb[31].mxu0 }
 0x125   : > { %1607 = vst.msk [vmem:[%s2262_s28 + $0x2c8] sm:$0xff] %vm1517_vm1, %v1478_v44  ;;  %v1355_v50 = vmul.f32 0.2, %v999_v40  ;;  %vm1161_vm15 = vcmp.gt.f32.partialorder %v735_v45, 0.0  ;;  %v1289_v51 = vmul.f32 0.2, %v735_v45  ;;  %v1002_v56 = vadd.f32 %v1950_v48, %v2251_v3 }
 0x126   : > { %vm1225_vm0 = vcmp.gt.f32.partialorder %v991_v46, 0.0  ;;  %v1353_v52 = vmul.f32 0.2, %v991_v46  ;;  %v1419_v53 = vsel %vm1163_vm13, %v743_v39, %v1291_v49  ;;  %v993_v58 = vpop.f32.mrb[31].mxu1  ;;  %v738_v61 = vadd.f32 %v2251_v3, %v737_v57 }
 0x127   : > { %v1483_v54 = vsel %vm1227_vm14, %v999_v40, %v1355_v50  ;;  %1548 = vst.msk [vmem:[%s2262_s28 + $0xf0] sm:$0xff] %vm1517_vm1, %v1419_v53  ;;  %v1417_v59 = vsel %vm1161_vm15, %v735_v45, %v1289_v51  ;;  %v994_v62 = vadd.f32 %v2251_v3, %v993_v58  ;;  %v1889_v63 = vpop.f32.mrb[32].mxu0  ;;  %vm1164_vm2 = vcmp.gt.f32.partialorder %v746_v55, 0.0 }
 0x128   : > { %1612 = vst.msk [vmem:[%s2262_s28 + $0x2f0] sm:$0xff] %vm1517_vm1, %v1483_v54  ;;  %v1481_v60 = vsel %vm1225_vm0, %v991_v46, %v1353_v52  ;;  %v1953_v0 = vpop.f32.mrb[32].mxu1  ;;  %1546 = vst.msk [vmem:[%s2262_s28 + $0xe0] sm:$0xff] %vm1517_vm1, %v1417_v59  ;;  %v1292_v1 = vmul.f32 0.2, %v746_v55  ;;  %vm1228_vm3 = vcmp.gt.f32.partialorder %v1002_v56, 0.0  ;;  %v759_v8 = vadd.f32 %v1889_v63, %v2251_v3 }
 0x129   : > { %1610 = vst.msk [vmem:[%s2262_s28 + $0x2e0] sm:$0xff] %vm1517_vm1, %v1481_v60  ;;  %v1356_v2 = vmul.f32 0.2, %v1002_v56  ;;  %vm1162_vm4 = vcmp.gt.f32.partialorder %v738_v61, 0.0  ;;  %v1290_v4 = vmul.f32 0.2, %v738_v61  ;;  %v1015_v9 = vadd.f32 %v1953_v0, %v2251_v3 }
 0x12a   : > { %vm1226_vm5 = vcmp.gt.f32.partialorder %v994_v62, 0.0  ;;  %v1354_v5 = vmul.f32 0.2, %v994_v62  ;;  %v1420_v6 = vsel %vm1164_vm2, %v746_v55, %v1292_v1  ;;  %v750_v10 = vpop.f32.mrb[33].mxu0  ;;  %v1006_v11 = vpop.f32.mrb[33].mxu1  ;;  %vm1167_vm6 = vcmp.gt.f32.partialorder %v759_v8, 0.0 }
 0x12b   : > { %v1484_v7 = vsel %vm1228_vm3, %v1002_v56, %v1356_v2  ;;  %1549 = vst.msk [vmem:[%s2262_s28 + $0xf8] sm:$0xff] %vm1517_vm1, %v1420_v6  ;;  %v1418_v12 = vsel %vm1162_vm4, %v738_v61, %v1290_v4  ;;  %v751_v14 = vadd.f32 %v2251_v3, %v750_v10  ;;  %v1007_v15 = vadd.f32 %v2251_v3, %v1006_v11  ;;  %v1890_v16 = vpop.f32.mrb[34].mxu0  ;;  %v1954_v17 = vpop.f32.mrb[34].mxu1 }
 0x12c   : > { %1613 = vst.msk [vmem:[%s2262_s28 + $0x2f8] sm:$0xff] %vm1517_vm1, %v1484_v7  ;;  %v1482_v13 = vsel %vm1226_vm5, %v994_v62, %v1354_v5  ;;  %1547 = vst.msk [vmem:[%s2262_s28 + $0xe8] sm:$0xff] %vm1517_vm1, %v1418_v12  ;;  %v1295_v18 = vmul.f32 0.2, %v759_v8  ;;  %vm1231_vm7 = vcmp.gt.f32.partialorder %v1015_v9, 0.0  ;;  %v762_v24 = vadd.f32 %v1890_v16, %v2251_v3  ;;  %v753_v26 = vpop.f32.mrb[35].mxu0 }
 0x12d   : > { %1611 = vst.msk [vmem:[%s2262_s28 + $0x2e8] sm:$0xff] %vm1517_vm1, %v1482_v13  ;;  %v1359_v19 = vmul.f32 0.2, %v1015_v9  ;;  %vm1165_vm8 = vcmp.gt.f32.partialorder %v751_v14, 0.0  ;;  %v1293_v20 = vmul.f32 0.2, %v751_v14  ;;  %v1018_v25 = vadd.f32 %v1954_v17, %v2251_v3 }
 0x12e   : > { %vm1229_vm9 = vcmp.gt.f32.partialorder %v1007_v15, 0.0  ;;  %v1357_v21 = vmul.f32 0.2, %v1007_v15  ;;  %v1423_v22 = vsel %vm1167_vm6, %v759_v8, %v1295_v18  ;;  %v1009_v27 = vpop.f32.mrb[35].mxu1  ;;  %v754_v30 = vadd.f32 %v2251_v3, %v753_v26 }
 0x12f   : > { %v1487_v23 = vsel %vm1231_vm7, %v1015_v9, %v1359_v19  ;;  %1552 = vst.msk [vmem:[%s2262_s28 + $0x110] sm:$0xff] %vm1517_vm1, %v1423_v22  ;;  %v1421_v28 = vsel %vm1165_vm8, %v751_v14, %v1293_v20  ;;  %v1010_v31 = vadd.f32 %v2251_v3, %v1009_v27  ;;  %v1893_v32 = vpop.f32.mrb[36].mxu0  ;;  %vm1168_vm10 = vcmp.gt.f32.partialorder %v762_v24, 0.0 }
 0x130   : > { %1616 = vst.msk [vmem:[%s2262_s28 + $0x310] sm:$0xff] %vm1517_vm1, %v1487_v23  ;;  %v1485_v29 = vsel %vm1229_vm9, %v1007_v15, %v1357_v21  ;;  %v1957_v33 = vpop.f32.mrb[36].mxu1  ;;  %1550 = vst.msk [vmem:[%s2262_s28 + $0x100] sm:$0xff] %vm1517_vm1, %v1421_v28  ;;  %v1296_v34 = vmul.f32 0.2, %v762_v24  ;;  %vm1232_vm11 = vcmp.gt.f32.partialorder %v1018_v25, 0.0  ;;  %v775_v40 = vadd.f32 %v1893_v32, %v2251_v3 }
 0x131   : > { %1614 = vst.msk [vmem:[%s2262_s28 + $0x300] sm:$0xff] %vm1517_vm1, %v1485_v29  ;;  %v1360_v35 = vmul.f32 0.2, %v1018_v25  ;;  %vm1166_vm12 = vcmp.gt.f32.partialorder %v754_v30, 0.0  ;;  %v1294_v36 = vmul.f32 0.2, %v754_v30  ;;  %v1031_v41 = vadd.f32 %v1957_v33, %v2251_v3 }
 0x132   : > { %vm1230_vm13 = vcmp.gt.f32.partialorder %v1010_v31, 0.0  ;;  %v1358_v37 = vmul.f32 0.2, %v1010_v31  ;;  %v1424_v38 = vsel %vm1168_vm10, %v762_v24, %v1296_v34  ;;  %v766_v42 = vpop.f32.mrb[37].mxu0  ;;  %v1022_v43 = vpop.f32.mrb[37].mxu1  ;;  %vm1171_vm14 = vcmp.gt.f32.partialorder %v775_v40, 0.0 }
 0x133   : > { %v1488_v39 = vsel %vm1232_vm11, %v1018_v25, %v1360_v35  ;;  %1553 = vst.msk [vmem:[%s2262_s28 + $0x118] sm:$0xff] %vm1517_vm1, %v1424_v38  ;;  %v1422_v44 = vsel %vm1166_vm12, %v754_v30, %v1294_v36  ;;  %v767_v46 = vadd.f32 %v2251_v3, %v766_v42  ;;  %v1023_v47 = vadd.f32 %v2251_v3, %v1022_v43  ;;  %v1894_v48 = vpop.f32.mrb[38].mxu0  ;;  %v1958_v49 = vpop.f32.mrb[38].mxu1  ;;  %v2514_v32 = vld [vmem:[%s2654_s2] ss:$0 sm:$0xff] }
 0x134   : > { %1617 = vst.msk [vmem:[%s2262_s28 + $0x318] sm:$0xff] %vm1517_vm1, %v1488_v39  ;;  %v1486_v45 = vsel %vm1230_vm13, %v1010_v31, %v1358_v37  ;;  %1551 = vst.msk [vmem:[%s2262_s28 + $0x108] sm:$0xff] %vm1517_vm1, %v1422_v44  ;;  %v1299_v50 = vmul.f32 0.2, %v775_v40  ;;  %vm1235_vm15 = vcmp.gt.f32.partialorder %v1031_v41, 0.0  ;;  %v778_v56 = vadd.f32 %v1894_v48, %v2251_v3  ;;  %v769_v58 = vpop.f32.mrb[39].mxu0 }
 0x135   : > { %1615 = vst.msk [vmem:[%s2262_s28 + $0x308] sm:$0xff] %vm1517_vm1, %v1486_v45  ;;  %v1363_v51 = vmul.f32 0.2, %v1031_v41  ;;  %vm1169_vm0 = vcmp.gt.f32.partialorder %v767_v46, 0.0  ;;  %v1297_v52 = vmul.f32 0.2, %v767_v46  ;;  %v1034_v57 = vadd.f32 %v1958_v49, %v2251_v3 }
 0x136   : > { %vm1233_vm2 = vcmp.gt.f32.partialorder %v1023_v47, 0.0  ;;  %v1361_v53 = vmul.f32 0.2, %v1023_v47  ;;  %v1427_v54 = vsel %vm1171_vm14, %v775_v40, %v1299_v50  ;;  %v1025_v59 = vpop.f32.mrb[39].mxu1  ;;  %v770_v62 = vadd.f32 %v2251_v3, %v769_v58 }
 0x137   : > { %v1491_v55 = vsel %vm1235_vm15, %v1031_v41, %v1363_v51  ;;  %1556 = vst.msk [vmem:[%s2262_s28 + $0x130] sm:$0xff] %vm1517_vm1, %v1427_v54  ;;  %v1425_v60 = vsel %vm1169_vm0, %v767_v46, %v1297_v52  ;;  %v1026_v63 = vadd.f32 %v2251_v3, %v1025_v59  ;;  %v1897_v0 = vpop.f32.mrb[40].mxu0  ;;  %vm1172_vm3 = vcmp.gt.f32.partialorder %v778_v56, 0.0 }
 0x138   : > { %1620 = vst.msk [vmem:[%s2262_s28 + $0x330] sm:$0xff] %vm1517_vm1, %v1491_v55  ;;  %v1489_v61 = vsel %vm1233_vm2, %v1023_v47, %v1361_v53  ;;  %v1961_v1 = vpop.f32.mrb[40].mxu1  ;;  %1554 = vst.msk [vmem:[%s2262_s28 + $0x120] sm:$0xff] %vm1517_vm1, %v1425_v60  ;;  %v1300_v2 = vmul.f32 0.2, %v778_v56  ;;  %vm1236_vm4 = vcmp.gt.f32.partialorder %v1034_v57, 0.0  ;;  %v791_v9 = vadd.f32 %v1897_v0, %v2251_v3 }
 0x139   : > { %1618 = vst.msk [vmem:[%s2262_s28 + $0x320] sm:$0xff] %vm1517_vm1, %v1489_v61  ;;  %v1364_v4 = vmul.f32 0.2, %v1034_v57  ;;  %vm1170_vm5 = vcmp.gt.f32.partialorder %v770_v62, 0.0  ;;  %v1298_v5 = vmul.f32 0.2, %v770_v62  ;;  %v1047_v10 = vadd.f32 %v1961_v1, %v2251_v3 }
 0x13a   : > { %vm1234_vm6 = vcmp.gt.f32.partialorder %v1026_v63, 0.0  ;;  %v1362_v6 = vmul.f32 0.2, %v1026_v63  ;;  %v1428_v7 = vsel %vm1172_vm3, %v778_v56, %v1300_v2  ;;  %v782_v11 = vpop.f32.mrb[41].mxu0  ;;  %v1038_v12 = vpop.f32.mrb[41].mxu1  ;;  %vm1175_vm7 = vcmp.gt.f32.partialorder %v791_v9, 0.0 }
 0x13b   : > { %v1492_v8 = vsel %vm1236_vm4, %v1034_v57, %v1364_v4  ;;  %1557 = vst.msk [vmem:[%s2262_s28 + $0x138] sm:$0xff] %vm1517_vm1, %v1428_v7  ;;  %v1426_v13 = vsel %vm1170_vm5, %v770_v62, %v1298_v5  ;;  %v783_v15 = vadd.f32 %v2251_v3, %v782_v11  ;;  %v1039_v16 = vadd.f32 %v2251_v3, %v1038_v12  ;;  %v1898_v17 = vpop.f32.mrb[42].mxu0  ;;  %v1962_v18 = vpop.f32.mrb[42].mxu1 }
 0x13c   : > { %1621 = vst.msk [vmem:[%s2262_s28 + $0x338] sm:$0xff] %vm1517_vm1, %v1492_v8  ;;  %v1490_v14 = vsel %vm1234_vm6, %v1026_v63, %v1362_v6  ;;  %1555 = vst.msk [vmem:[%s2262_s28 + $0x128] sm:$0xff] %vm1517_vm1, %v1426_v13  ;;  %v1303_v19 = vmul.f32 0.2, %v791_v9  ;;  %vm1239_vm8 = vcmp.gt.f32.partialorder %v1047_v10, 0.0  ;;  %v794_v25 = vadd.f32 %v1898_v17, %v2251_v3  ;;  %v785_v27 = vpop.f32.mrb[43].mxu0 }
 0x13d   : > { %1619 = vst.msk [vmem:[%s2262_s28 + $0x328] sm:$0xff] %vm1517_vm1, %v1490_v14  ;;  %v1367_v20 = vmul.f32 0.2, %v1047_v10  ;;  %vm1173_vm9 = vcmp.gt.f32.partialorder %v783_v15, 0.0  ;;  %v1301_v21 = vmul.f32 0.2, %v783_v15  ;;  %v1050_v26 = vadd.f32 %v1962_v18, %v2251_v3 }
 0x13e   : > { %vm1237_vm10 = vcmp.gt.f32.partialorder %v1039_v16, 0.0  ;;  %v1365_v22 = vmul.f32 0.2, %v1039_v16  ;;  %v1431_v23 = vsel %vm1175_vm7, %v791_v9, %v1303_v19  ;;  %v1041_v28 = vpop.f32.mrb[43].mxu1  ;;  %v786_v31 = vadd.f32 %v2251_v3, %v785_v27 }
 0x13f   : > { %v1495_v24 = vsel %vm1239_vm8, %v1047_v10, %v1367_v20  ;;  %1560 = vst.msk [vmem:[%s2262_s28 + $0x150] sm:$0xff] %vm1517_vm1, %v1431_v23  ;;  %v1429_v29 = vsel %vm1173_vm9, %v783_v15, %v1301_v21  ;;  %v1042_v33 = vadd.f32 %v2514_v32, %v1041_v28  ;;  %v1901_v34 = vpop.f32.mrb[44].mxu0  ;;  %vm1176_vm11 = vcmp.gt.f32.partialorder %v794_v25, 0.0 }
 0x140   : > { %1624 = vst.msk [vmem:[%s2262_s28 + $0x350] sm:$0xff] %vm1517_vm1, %v1495_v24  ;;  %v1493_v30 = vsel %vm1237_vm10, %v1039_v16, %v1365_v22  ;;  %v1965_v35 = vpop.f32.mrb[44].mxu1  ;;  %1558 = vst.msk [vmem:[%s2262_s28 + $0x140] sm:$0xff] %vm1517_vm1, %v1429_v29  ;;  %v1304_v36 = vmul.f32 0.2, %v794_v25  ;;  %vm1240_vm12 = vcmp.gt.f32.partialorder %v1050_v26, 0.0  ;;  %v807_v41 = vadd.f32 %v2514_v32, %v1901_v34 }
 0x141   : > { %1622 = vst.msk [vmem:[%s2262_s28 + $0x340] sm:$0xff] %vm1517_vm1, %v1493_v30  ;;  %v1368_v37 = vmul.f32 0.2, %v1050_v26  ;;  %vm1174_vm13 = vcmp.gt.f32.partialorder %v786_v31, 0.0  ;;  %v1302_v3 = vmul.f32 0.2, %v786_v31  ;;  %v1063_v42 = vadd.f32 %v2514_v32, %v1965_v35 }
 0x142   : > { %vm1238_vm14 = vcmp.gt.f32.partialorder %v1042_v33, 0.0  ;;  %v1366_v38 = vmul.f32 0.2, %v1042_v33  ;;  %v1432_v39 = vsel %vm1176_vm11, %v794_v25, %v1304_v36  ;;  %v798_v43 = vpop.f32.mrb[45].mxu0  ;;  %v1054_v44 = vpop.f32.mrb[45].mxu1  ;;  %vm1179_vm15 = vcmp.gt.f32.partialorder %v807_v41, 0.0 }
 0x143   : > { %v1496_v40 = vsel %vm1240_vm12, %v1050_v26, %v1368_v37  ;;  %1561 = vst.msk [vmem:[%s2262_s28 + $0x158] sm:$0xff] %vm1517_vm1, %v1432_v39  ;;  %v1430_v45 = vsel %vm1174_vm13, %v786_v31, %v1302_v3  ;;  %v799_v47 = vadd.f32 %v2514_v32, %v798_v43  ;;  %v1055_v48 = vadd.f32 %v2514_v32, %v1054_v44  ;;  %v1902_v49 = vpop.f32.mrb[46].mxu0  ;;  %v1966_v50 = vpop.f32.mrb[46].mxu1 }
 0x144   : > { %1625 = vst.msk [vmem:[%s2262_s28 + $0x358] sm:$0xff] %vm1517_vm1, %v1496_v40  ;;  %v1494_v46 = vsel %vm1238_vm14, %v1042_v33, %v1366_v38  ;;  %1559 = vst.msk [vmem:[%s2262_s28 + $0x148] sm:$0xff] %vm1517_vm1, %v1430_v45  ;;  %v1307_v51 = vmul.f32 0.2, %v807_v41  ;;  %vm1243_vm0 = vcmp.gt.f32.partialorder %v1063_v42, 0.0  ;;  %v810_v57 = vadd.f32 %v2514_v32, %v1902_v49  ;;  %v801_v59 = vpop.f32.mrb[47].mxu0 }
 0x145   : > { %1623 = vst.msk [vmem:[%s2262_s28 + $0x348] sm:$0xff] %vm1517_vm1, %v1494_v46  ;;  %v1371_v52 = vmul.f32 0.2, %v1063_v42  ;;  %vm1177_vm2 = vcmp.gt.f32.partialorder %v799_v47, 0.0  ;;  %v1305_v53 = vmul.f32 0.2, %v799_v47  ;;  %v1066_v58 = vadd.f32 %v2514_v32, %v1966_v50 }
 0x146   : > { %vm1241_vm3 = vcmp.gt.f32.partialorder %v1055_v48, 0.0  ;;  %v1369_v54 = vmul.f32 0.2, %v1055_v48  ;;  %v1435_v55 = vsel %vm1179_vm15, %v807_v41, %v1307_v51  ;;  %v1057_v60 = vpop.f32.mrb[47].mxu1  ;;  %v802_v63 = vadd.f32 %v2514_v32, %v801_v59 }
 0x147   : > { %v1499_v56 = vsel %vm1243_vm0, %v1063_v42, %v1371_v52  ;;  %1564 = vst.msk [vmem:[%s2262_s28 + $0x170] sm:$0xff] %vm1517_vm1, %v1435_v55  ;;  %v1433_v61 = vsel %vm1177_vm2, %v799_v47, %v1305_v53  ;;  %v1058_v0 = vadd.f32 %v2514_v32, %v1057_v60  ;;  %v1905_v1 = vpop.f32.mrb[48].mxu0  ;;  %vm1180_vm4 = vcmp.gt.f32.partialorder %v810_v57, 0.0 }
 0x148   : > { %1628 = vst.msk [vmem:[%s2262_s28 + $0x370] sm:$0xff] %vm1517_vm1, %v1499_v56  ;;  %v1497_v62 = vsel %vm1241_vm3, %v1055_v48, %v1369_v54  ;;  %v1969_v2 = vpop.f32.mrb[48].mxu1  ;;  %1562 = vst.msk [vmem:[%s2262_s28 + $0x160] sm:$0xff] %vm1517_vm1, %v1433_v61  ;;  %v1308_v4 = vmul.f32 0.2, %v810_v57  ;;  %vm1244_vm5 = vcmp.gt.f32.partialorder %v1066_v58, 0.0  ;;  %v823_v10 = vadd.f32 %v2514_v32, %v1905_v1 }
 0x149   : > { %1626 = vst.msk [vmem:[%s2262_s28 + $0x360] sm:$0xff] %vm1517_vm1, %v1497_v62  ;;  %v1372_v5 = vmul.f32 0.2, %v1066_v58  ;;  %vm1178_vm6 = vcmp.gt.f32.partialorder %v802_v63, 0.0  ;;  %v1306_v6 = vmul.f32 0.2, %v802_v63  ;;  %v1079_v11 = vadd.f32 %v2514_v32, %v1969_v2 }
 0x14a   : > { %vm1242_vm7 = vcmp.gt.f32.partialorder %v1058_v0, 0.0  ;;  %v1370_v7 = vmul.f32 0.2, %v1058_v0  ;;  %v1436_v8 = vsel %vm1180_vm4, %v810_v57, %v1308_v4  ;;  %v814_v12 = vpop.f32.mrb[49].mxu0  ;;  %v1070_v13 = vpop.f32.mrb[49].mxu1  ;;  %vm1183_vm8 = vcmp.gt.f32.partialorder %v823_v10, 0.0 }
 0x14b   : > { %v1500_v9 = vsel %vm1244_vm5, %v1066_v58, %v1372_v5  ;;  %1565 = vst.msk [vmem:[%s2262_s28 + $0x178] sm:$0xff] %vm1517_vm1, %v1436_v8  ;;  %v1434_v14 = vsel %vm1178_vm6, %v802_v63, %v1306_v6  ;;  %v815_v16 = vadd.f32 %v2514_v32, %v814_v12  ;;  %v1071_v17 = vadd.f32 %v2514_v32, %v1070_v13  ;;  %v1906_v18 = vpop.f32.mrb[50].mxu0  ;;  %v1970_v19 = vpop.f32.mrb[50].mxu1 }
 0x14c   : > { %1629 = vst.msk [vmem:[%s2262_s28 + $0x378] sm:$0xff] %vm1517_vm1, %v1500_v9  ;;  %v1498_v15 = vsel %vm1242_vm7, %v1058_v0, %v1370_v7  ;;  %1563 = vst.msk [vmem:[%s2262_s28 + $0x168] sm:$0xff] %vm1517_vm1, %v1434_v14  ;;  %v1311_v20 = vmul.f32 0.2, %v823_v10  ;;  %vm1247_vm9 = vcmp.gt.f32.partialorder %v1079_v11, 0.0  ;;  %v826_v26 = vadd.f32 %v2514_v32, %v1906_v18  ;;  %v817_v28 = vpop.f32.mrb[51].mxu0 }
 0x14d   : > { %1627 = vst.msk [vmem:[%s2262_s28 + $0x368] sm:$0xff] %vm1517_vm1, %v1498_v15  ;;  %v1375_v21 = vmul.f32 0.2, %v1079_v11  ;;  %vm1181_vm10 = vcmp.gt.f32.partialorder %v815_v16, 0.0  ;;  %v1309_v22 = vmul.f32 0.2, %v815_v16  ;;  %v1082_v27 = vadd.f32 %v2514_v32, %v1970_v19 }
 0x14e   : > { %vm1245_vm11 = vcmp.gt.f32.partialorder %v1071_v17, 0.0  ;;  %v1373_v23 = vmul.f32 0.2, %v1071_v17  ;;  %v1439_v24 = vsel %vm1183_vm8, %v823_v10, %v1311_v20  ;;  %v1073_v29 = vpop.f32.mrb[51].mxu1  ;;  %v818_v33 = vadd.f32 %v2514_v32, %v817_v28 }
 0x14f   : > { %v1503_v25 = vsel %vm1247_vm9, %v1079_v11, %v1375_v21  ;;  %1568 = vst.msk [vmem:[%s2262_s28 + $0x190] sm:$0xff] %vm1517_vm1, %v1439_v24  ;;  %v1437_v30 = vsel %vm1181_vm10, %v815_v16, %v1309_v22  ;;  %v1074_v34 = vadd.f32 %v2514_v32, %v1073_v29  ;;  %v1909_v35 = vpop.f32.mrb[52].mxu0  ;;  %vm1184_vm12 = vcmp.gt.f32.partialorder %v826_v26, 0.0 }
 0x150   : > { %1632 = vst.msk [vmem:[%s2262_s28 + $0x390] sm:$0xff] %vm1517_vm1, %v1503_v25  ;;  %v1501_v31 = vsel %vm1245_vm11, %v1071_v17, %v1373_v23  ;;  %v1973_v36 = vpop.f32.mrb[52].mxu1  ;;  %1566 = vst.msk [vmem:[%s2262_s28 + $0x180] sm:$0xff] %vm1517_vm1, %v1437_v30  ;;  %v1312_v37 = vmul.f32 0.2, %v826_v26  ;;  %vm1248_vm13 = vcmp.gt.f32.partialorder %v1082_v27, 0.0  ;;  %v839_v42 = vadd.f32 %v2514_v32, %v1909_v35 }
 0x151   : > { %1630 = vst.msk [vmem:[%s2262_s28 + $0x380] sm:$0xff] %vm1517_vm1, %v1501_v31  ;;  %v1376_v3 = vmul.f32 0.2, %v1082_v27  ;;  %vm1182_vm14 = vcmp.gt.f32.partialorder %v818_v33, 0.0  ;;  %v1310_v38 = vmul.f32 0.2, %v818_v33  ;;  %v1095_v43 = vadd.f32 %v2514_v32, %v1973_v36 }
 0x152   : > { %vm1246_vm15 = vcmp.gt.f32.partialorder %v1074_v34, 0.0  ;;  %v1374_v39 = vmul.f32 0.2, %v1074_v34  ;;  %v1440_v40 = vsel %vm1184_vm12, %v826_v26, %v1312_v37  ;;  %v830_v44 = vpop.f32.mrb[53].mxu0  ;;  %v1086_v45 = vpop.f32.mrb[53].mxu1  ;;  %vm1187_vm0 = vcmp.gt.f32.partialorder %v839_v42, 0.0 }
 0x153   : > { %v1504_v41 = vsel %vm1248_vm13, %v1082_v27, %v1376_v3  ;;  %1569 = vst.msk [vmem:[%s2262_s28 + $0x198] sm:$0xff] %vm1517_vm1, %v1440_v40  ;;  %v1438_v46 = vsel %vm1182_vm14, %v818_v33, %v1310_v38  ;;  %v831_v48 = vadd.f32 %v2514_v32, %v830_v44  ;;  %v1087_v49 = vadd.f32 %v2514_v32, %v1086_v45  ;;  %v1910_v50 = vpop.f32.mrb[54].mxu0  ;;  %v1974_v51 = vpop.f32.mrb[54].mxu1 }
 0x154   : > { %1633 = vst.msk [vmem:[%s2262_s28 + $0x398] sm:$0xff] %vm1517_vm1, %v1504_v41  ;;  %v1502_v47 = vsel %vm1246_vm15, %v1074_v34, %v1374_v39  ;;  %1567 = vst.msk [vmem:[%s2262_s28 + $0x188] sm:$0xff] %vm1517_vm1, %v1438_v46  ;;  %v1315_v52 = vmul.f32 0.2, %v839_v42  ;;  %vm1251_vm2 = vcmp.gt.f32.partialorder %v1095_v43, 0.0  ;;  %v842_v58 = vadd.f32 %v2514_v32, %v1910_v50  ;;  %v833_v60 = vpop.f32.mrb[55].mxu0 }
 0x155   : > { %1631 = vst.msk [vmem:[%s2262_s28 + $0x388] sm:$0xff] %vm1517_vm1, %v1502_v47  ;;  %v1379_v53 = vmul.f32 0.2, %v1095_v43  ;;  %vm1185_vm3 = vcmp.gt.f32.partialorder %v831_v48, 0.0  ;;  %v1313_v54 = vmul.f32 0.2, %v831_v48  ;;  %v1098_v59 = vadd.f32 %v2514_v32, %v1974_v51 }
 0x156   : > { %vm1249_vm4 = vcmp.gt.f32.partialorder %v1087_v49, 0.0  ;;  %v1377_v55 = vmul.f32 0.2, %v1087_v49  ;;  %v1443_v56 = vsel %vm1187_vm0, %v839_v42, %v1315_v52  ;;  %v1089_v61 = vpop.f32.mrb[55].mxu1  ;;  %v834_v0 = vadd.f32 %v2514_v32, %v833_v60 }
 0x157   : > { %v1507_v57 = vsel %vm1251_vm2, %v1095_v43, %v1379_v53  ;;  %1572 = vst.msk [vmem:[%s2262_s28 + $0x1b0] sm:$0xff] %vm1517_vm1, %v1443_v56  ;;  %v1441_v62 = vsel %vm1185_vm3, %v831_v48, %v1313_v54  ;;  %v1090_v1 = vadd.f32 %v2514_v32, %v1089_v61  ;;  %v1913_v2 = vpop.f32.mrb[56].mxu0  ;;  %vm1188_vm5 = vcmp.gt.f32.partialorder %v842_v58, 0.0 }
 0x158   : > { %1636 = vst.msk [vmem:[%s2262_s28 + $0x3b0] sm:$0xff] %vm1517_vm1, %v1507_v57  ;;  %v1505_v63 = vsel %vm1249_vm4, %v1087_v49, %v1377_v55  ;;  %v1977_v4 = vpop.f32.mrb[56].mxu1  ;;  %1570 = vst.msk [vmem:[%s2262_s28 + $0x1a0] sm:$0xff] %vm1517_vm1, %v1441_v62  ;;  %v1316_v5 = vmul.f32 0.2, %v842_v58  ;;  %vm1252_vm6 = vcmp.gt.f32.partialorder %v1098_v59, 0.0  ;;  %v855_v11 = vadd.f32 %v2514_v32, %v1913_v2 }
 0x159   : > { %1634 = vst.msk [vmem:[%s2262_s28 + $0x3a0] sm:$0xff] %vm1517_vm1, %v1505_v63  ;;  %v1380_v6 = vmul.f32 0.2, %v1098_v59  ;;  %vm1186_vm7 = vcmp.gt.f32.partialorder %v834_v0, 0.0  ;;  %v1314_v7 = vmul.f32 0.2, %v834_v0  ;;  %v1111_v12 = vadd.f32 %v2514_v32, %v1977_v4 }
 0x15a   : > { %vm1250_vm8 = vcmp.gt.f32.partialorder %v1090_v1, 0.0  ;;  %v1378_v8 = vmul.f32 0.2, %v1090_v1  ;;  %v1444_v9 = vsel %vm1188_vm5, %v842_v58, %v1316_v5  ;;  %v846_v13 = vpop.f32.mrb[57].mxu0  ;;  %v1102_v14 = vpop.f32.mrb[57].mxu1  ;;  %vm1191_vm9 = vcmp.gt.f32.partialorder %v855_v11, 0.0 }
 0x15b   : > { %v1508_v10 = vsel %vm1252_vm6, %v1098_v59, %v1380_v6  ;;  %1573 = vst.msk [vmem:[%s2262_s28 + $0x1b8] sm:$0xff] %vm1517_vm1, %v1444_v9  ;;  %v1442_v15 = vsel %vm1186_vm7, %v834_v0, %v1314_v7  ;;  %v847_v17 = vadd.f32 %v2514_v32, %v846_v13  ;;  %v1103_v18 = vadd.f32 %v2514_v32, %v1102_v14  ;;  %v1914_v19 = vpop.f32.mrb[58].mxu0  ;;  %v1978_v20 = vpop.f32.mrb[58].mxu1 }
 0x15c   : > { %1637 = vst.msk [vmem:[%s2262_s28 + $0x3b8] sm:$0xff] %vm1517_vm1, %v1508_v10  ;;  %v1506_v16 = vsel %vm1250_vm8, %v1090_v1, %v1378_v8  ;;  %1571 = vst.msk [vmem:[%s2262_s28 + $0x1a8] sm:$0xff] %vm1517_vm1, %v1442_v15  ;;  %v1319_v21 = vmul.f32 0.2, %v855_v11  ;;  %vm1255_vm10 = vcmp.gt.f32.partialorder %v1111_v12, 0.0  ;;  %v858_v27 = vadd.f32 %v2514_v32, %v1914_v19  ;;  %v849_v29 = vpop.f32.mrb[59].mxu0 }
 0x15d   : > { %1635 = vst.msk [vmem:[%s2262_s28 + $0x3a8] sm:$0xff] %vm1517_vm1, %v1506_v16  ;;  %v1383_v22 = vmul.f32 0.2, %v1111_v12  ;;  %vm1189_vm11 = vcmp.gt.f32.partialorder %v847_v17, 0.0  ;;  %v1317_v23 = vmul.f32 0.2, %v847_v17  ;;  %v1114_v28 = vadd.f32 %v2514_v32, %v1978_v20 }
 0x15e   : > { %vm1253_vm12 = vcmp.gt.f32.partialorder %v1103_v18, 0.0  ;;  %v1381_v24 = vmul.f32 0.2, %v1103_v18  ;;  %v1447_v25 = vsel %vm1191_vm9, %v855_v11, %v1319_v21  ;;  %v1105_v30 = vpop.f32.mrb[59].mxu1  ;;  %v850_v34 = vadd.f32 %v2514_v32, %v849_v29 }
 0x15f   : > { %v1511_v26 = vsel %vm1255_vm10, %v1111_v12, %v1383_v22  ;;  %1576 = vst.msk [vmem:[%s2262_s28 + $0x1d0] sm:$0xff] %vm1517_vm1, %v1447_v25  ;;  %v1445_v31 = vsel %vm1189_vm11, %v847_v17, %v1317_v23  ;;  %v1106_v35 = vadd.f32 %v2514_v32, %v1105_v30  ;;  %v1917_v36 = vpop.f32.mrb[60].mxu0  ;;  %vm1192_vm13 = vcmp.gt.f32.partialorder %v858_v27, 0.0 }
 0x160   : > { %1640 = vst.msk [vmem:[%s2262_s28 + $0x3d0] sm:$0xff] %vm1517_vm1, %v1511_v26  ;;  %v1509_v33 = vsel %vm1253_vm12, %v1103_v18, %v1381_v24  ;;  %v1981_v37 = vpop.f32.mrb[60].mxu1  ;;  %1574 = vst.msk [vmem:[%s2262_s28 + $0x1c0] sm:$0xff] %vm1517_vm1, %v1445_v31  ;;  %v1320_v3 = vmul.f32 0.2, %v858_v27  ;;  %vm1256_vm14 = vcmp.gt.f32.partialorder %v1114_v28, 0.0  ;;  %v871_v43 = vadd.f32 %v2514_v32, %v1917_v36 }
 0x161   : > { %1638 = vst.msk [vmem:[%s2262_s28 + $0x3c0] sm:$0xff] %vm1517_vm1, %v1509_v33  ;;  %v1384_v38 = vmul.f32 0.2, %v1114_v28  ;;  %vm1190_vm15 = vcmp.gt.f32.partialorder %v850_v34, 0.0  ;;  %v1318_v39 = vmul.f32 0.2, %v850_v34  ;;  %v1127_v44 = vadd.f32 %v2514_v32, %v1981_v37 }
 0x162   : > { %vm1254_vm0 = vcmp.gt.f32.partialorder %v1106_v35, 0.0  ;;  %v1382_v40 = vmul.f32 0.2, %v1106_v35  ;;  %v1448_v41 = vsel %vm1192_vm13, %v858_v27, %v1320_v3  ;;  %v862_v45 = vpop.f32.mrb[61].mxu0  ;;  %v1118_v46 = vpop.f32.mrb[61].mxu1  ;;  %vm1195_vm2 = vcmp.gt.f32.partialorder %v871_v43, 0.0 }
 0x163   : > { %v1512_v42 = vsel %vm1256_vm14, %v1114_v28, %v1384_v38  ;;  %1577 = vst.msk [vmem:[%s2262_s28 + $0x1d8] sm:$0xff] %vm1517_vm1, %v1448_v41  ;;  %v1446_v47 = vsel %vm1190_vm15, %v850_v34, %v1318_v39  ;;  %v863_v49 = vadd.f32 %v2514_v32, %v862_v45  ;;  %v1119_v50 = vadd.f32 %v2514_v32, %v1118_v46  ;;  %v1918_v51 = vpop.f32.mrb[62].mxu0  ;;  %v1982_v52 = vpop.f32.mrb[62].mxu1 }
 0x164   : > { %1641 = vst.msk [vmem:[%s2262_s28 + $0x3d8] sm:$0xff] %vm1517_vm1, %v1512_v42  ;;  %v1510_v48 = vsel %vm1254_vm0, %v1106_v35, %v1382_v40  ;;  %1575 = vst.msk [vmem:[%s2262_s28 + $0x1c8] sm:$0xff] %vm1517_vm1, %v1446_v47  ;;  %v1323_v53 = vmul.f32 0.2, %v871_v43  ;;  %vm1259_vm3 = vcmp.gt.f32.partialorder %v1127_v44, 0.0  ;;  %v874_v59 = vadd.f32 %v2514_v32, %v1918_v51  ;;  %v865_v61 = vpop.f32.mrb[63].mxu0 }
 0x165   : > { %1639 = vst.msk [vmem:[%s2262_s28 + $0x3c8] sm:$0xff] %vm1517_vm1, %v1510_v48  ;;  %v1387_v54 = vmul.f32 0.2, %v1127_v44  ;;  %vm1193_vm4 = vcmp.gt.f32.partialorder %v863_v49, 0.0  ;;  %v1321_v55 = vmul.f32 0.2, %v863_v49  ;;  %v1130_v60 = vadd.f32 %v2514_v32, %v1982_v52 }
 0x166   : > { %vm1257_vm5 = vcmp.gt.f32.partialorder %v1119_v50, 0.0  ;;  %v1385_v56 = vmul.f32 0.2, %v1119_v50  ;;  %v1451_v57 = vsel %vm1195_vm2, %v871_v43, %v1323_v53  ;;  %v1121_v62 = vpop.f32.mrb[63].mxu1  ;;  %v866_v1 = vadd.f32 %v2514_v32, %v865_v61 }
 0x167   : > { %v1515_v58 = vsel %vm1259_vm3, %v1127_v44, %v1387_v54  ;;  %1580 = vst.msk [vmem:[%s2262_s28 + $0x1f0] sm:$0xff] %vm1517_vm1, %v1451_v57  ;;  %v1449_v63 = vsel %vm1193_vm4, %v863_v49, %v1321_v55  ;;  %v1122_v2 = vadd.f32 %v2514_v32, %v1121_v62  ;;  %vm1196_vm6 = vcmp.gt.f32.partialorder %v874_v59, 0.0 }
 0x168   : > { %1644 = vst.msk [vmem:[%s2262_s28 + $0x3f0] sm:$0xff] %vm1517_vm1, %v1515_v58  ;;  %v1513_v0 = vsel %vm1257_vm5, %v1119_v50, %v1385_v56  ;;  %1578 = vst.msk [vmem:[%s2262_s28 + $0x1e0] sm:$0xff] %vm1517_vm1, %v1449_v63  ;;  %v1324_v4 = vmul.f32 0.2, %v874_v59  ;;  %vm1260_vm7 = vcmp.gt.f32.partialorder %v1130_v60, 0.0  ;;  %vm1194_vm8 = vcmp.gt.f32.partialorder %v866_v1, 0.0 }
 0x169   : > { %1642 = vst.msk [vmem:[%s2262_s28 + $0x3e0] sm:$0xff] %vm1517_vm1, %v1513_v0  ;;  %v1388_v5 = vmul.f32 0.2, %v1130_v60  ;;  %v1322_v6 = vmul.f32 0.2, %v866_v1  ;;  %vm1258_vm9 = vcmp.gt.f32.partialorder %v1122_v2, 0.0 }
 0x16a   : > { %v1386_v7 = vmul.f32 0.2, %v1122_v2  ;;  %v1452_v8 = vsel %vm1196_vm6, %v874_v59, %v1324_v4 }
 0x16b   : > { %v1516_v9 = vsel %vm1260_vm7, %v1130_v60, %v1388_v5  ;;  %1581 = vst.msk [vmem:[%s2262_s28 + $0x1f8] sm:$0xff] %vm1517_vm1, %v1452_v8  ;;  %v1450_v32 = vsel %vm1194_vm8, %v866_v1, %v1322_v6 }
 0x16c   : > { %1645 = vst.msk [vmem:[%s2262_s28 + $0x3f8] sm:$0xff] %vm1517_vm1, %v1516_v9  ;;  %v1514_v10 = vsel %vm1258_vm9, %v1122_v2, %v1386_v7  ;;  %1579 = vst.msk [vmem:[%s2262_s28 + $0x1e8] sm:$0xff] %vm1517_vm1, %v1450_v32 }
 0x16d   : > { %1643 = vst.msk [vmem:[%s2262_s28 + $0x3e8] sm:$0xff] %vm1517_vm1, %v1514_v10 }
 0x16e PF: > { %s13_s12 = sadd.s32 1, %s2007_s12  }
 0x16f   : > { %p10_p4 = scmp.ge.s32.totalorder %s13_s12, 4  }
 0x171   :  { %12 = sbr.rel (!%p10_p4) target bundleno = 1 (0x1), region = 62 }

// kernel: discriminator_forward.4
= control target key start
LH: loop header
LB: loop body
LE: loop exit
PB: predicated region body
PF: predicated region fallthrough
CT: control target
= control target key end

     0   :  { %s7795_s12 = smov 0   ;;  %s8765_s0 = inlined_call_operand.vmem [shape: f32[2,4,17,17,64], index: 0, kind: input, shape index: {}]   ;;  %s8766_s1 = inlined_call_operand.vmem [shape: bf16[1024,128], index: 1, kind: input, shape index: {}]   ;;  %s8767_s2 = inlined_call_operand.vmem [shape: f32[1,128], index: 2, kind: input, shape index: {}]   ;;  %s8768_s3 = inlined_call_operand.vmem [shape: f32[2,256,128], index: 3, kind: output, shape index: {}]  }
   0x1 LB: > { %s5474_s13 = sadd.s32 4294967295, %s7773_s12   ;;  %p5478_p0 = scmp.ge.s32.totalorder %s7773_s12, 1  ;;  %s7773_s12 = sphi %s7795_s12, %s13_s12  }
   0x2   : > { %p137_p1 = scmp.lt.s32.totalorder %s7773_s12, 3 }
   0x4   : > { %p138_p2 = pnand %p5478_p0, %p137_p1 }
   0x5   : > { %v7703_v0 = vld [vmem:[%s8766_s1 + $0x20] sm:$0xff] (!%p138_p2)   ;;  %p161_p3 = scmp.lt.s32.totalorder (!%p138_p2), %s5474_s13, 1  ;;  %v7705_v2 = vld [vmem:[%s8766_s1 + $0x28] sm:$0xff] (!%p138_p2)   ;;  %v7707_v4 = vld [vmem:[%s8766_s1 + $0x30] sm:$0xff] (!%p138_p2)   ;;  %vm309_vm0 = vcmask (!%p138_p2), 523264  }
   0x6   : > { %141 = sbr.rel (%p138_p2) target bundleno = 750 (0x2ee), region = 32  ;;  %v7704_v1 = vld [vmem:[%s8766_s1 + $0x100] sm:$0xff] (!%p138_p2)   ;;  %6574 = vmatprep.subr.bf16.mxu1 (!%p138_p2), %v7703_v0  ;;  %v7706_v3 = vld [vmem:[%s8766_s1 + $0x108] sm:$0xff] (!%p138_p2)   ;;  %v7708_v5 = vld [vmem:[%s8766_s1 + $0x110] sm:$0xff] (!%p138_p2)  }
   0x7   : > { %6894 = vmatprep.subr.bf16.mxu0 (!%p138_p2), %v7704_v1  ;;  %6575 = vmatpush3.bf16.msra.mxu1 (!%p138_p2), %v7703_v0  ;;  %v7709_v6 = vld [vmem:[%s8766_s1 + $0x38] sm:$0xff] (!%p138_p2)   ;;  %v7711_v16 = vld [vmem:[%s8766_s1] sm:$0xff] (!%p138_p2)   ;;  %v7713_v31 = vld [vmem:[%s8766_s1 + $0x8] sm:$0xff] (!%p138_p2)  }
   0x8   : > { %6895 = vmatpush3.bf16.msra.mxu0 (!%p138_p2), %v7704_v1  ;;  %6576 = vmatprep.subr.bf16.mxu1 (!%p138_p2), %v7705_v2  ;;  %v7710_v10 = vld [vmem:[%s8766_s1 + $0x118] sm:$0xff] (!%p138_p2)   ;;  %v7712_v19 = vld [vmem:[%s8766_s1 + $0x120] sm:$0xff] (!%p138_p2)   ;;  %v7714_v32 = vld [vmem:[%s8766_s1 + $0x128] sm:$0xff] (!%p138_p2)  }
   0x9   : > { %6896 = vmatprep.subr.bf16.mxu0 (!%p138_p2), %v7706_v3  ;;  %v7715_v42 = vld [vmem:[%s8766_s1 + $0x10] sm:$0xff] (!%p138_p2)   ;;  %v7717_v56 = vld [vmem:[%s8766_s1 + $0x18] sm:$0xff] (!%p138_p2)  }
   0xa   : > { %v7716_v46 = vld [vmem:[%s8766_s1 + $0x130] sm:$0xff] (!%p138_p2)   ;;  %v7718_v57 = vld [vmem:[%s8766_s1 + $0x138] sm:$0xff] (!%p138_p2)  }
   0xb   : > { %6577 = vmatpush3.bf16.msra.mxu1 (!%p138_p2), %v7705_v2 }
   0xc   : > { %6897 = vmatpush3.bf16.msra.mxu0 (!%p138_p2), %v7706_v3  ;;  %6578 = vmatprep.subr.bf16.mxu1 (!%p138_p2), %v7707_v4  ;;  %v7953_v3 = vld [vmem:[%s8766_s1 + $0x40] sm:$0xff] (!%p138_p2)  }
   0xd   : > { %s8770_s13 = smov (!%p161_p3, %s5474_s13), 1  ;;  %6898 = vmatprep.subr.bf16.mxu0 %v7708_v5 }
   0xe   : > { %s7694_s24 = smul.u32 1632, %s8770_s13  ;;  %s6253_s27 = sshll.u32 %s8770_s13, 8 }
   0xf   : > { %6579 = vmatpush3.bf16.msra.mxu1 %v7707_v4  ;;  %s8698_s30 = scalar_lea.vmem %s8768_s3, %s6253_s27 }
  0x10   : > { %s7827_s29 = scalar_lea.vmem %s8765_s0, %s7694_s24  ;;  %6899 = vmatpush3.bf16.msra.mxu0 %v7708_v5  ;;  %6580 = vmatprep.subr.bf16.mxu1 %v7709_v6 }
  0x11   : > { %v5482_v7 = vld [vmem:[%s7827_s29 + $0x198] sm:$0xff]  ;;  %v5483_v8 = vld [vmem:[%s7827_s29 + $0x1a0] sm:$0xff]  ;;  %v5484_v14 = vld [vmem:[%s7827_s29 + $0x1b0] sm:$0xff]  ;;  %6900 = vmatprep.subr.bf16.mxu0 %v7710_v10 }
  0x12   : > { %v5834_v9 = vld [vmem:[%s7827_s29 + $0x18] sm:$0xff]  ;;  %v261_v11 = vpack.c.bf16 %v5483_v8, %v5482_v7  ;;  %v5835_v12 = vld [vmem:[%s7827_s29 + $0x20] sm:$0xff]  ;;  %v5836_v17 = vld [vmem:[%s7827_s29 + $0x30] sm:$0xff] }
  0x13   : > { %v7839_v13 = vpack.c.bf16 %v5835_v12, %v5834_v9  ;;  %v5485_v15 = vld [vmem:[%s7827_s29 + $0x1b8] sm:$0xff]  ;;  %v5486_v20 = vld [vmem:[%s7827_s29 + $0x1c8] sm:$0xff]  ;;  %v5487_v21 = vld [vmem:[%s7827_s29 + $0x1d0] sm:$0xff]  ;;  %6581 = vmatpush3.bf16.msra.mxu1 %v7709_v6 }
  0x14   : > { %6582 = vmatprep.mubr.msk.bf16.mxu1 %vm309_vm0, %v261_v11  ;;  %v5837_v18 = vld [vmem:[%s7827_s29 + $0x38] sm:$0xff]  ;;  %v7856_v22 = vpack.c.bf16 %v5485_v15, %v5484_v14  ;;  %v5838_v23 = vld [vmem:[%s7827_s29 + $0x48] sm:$0xff]  ;;  %v5839_v24 = vld [vmem:[%s7827_s29 + $0x50] sm:$0xff]  ;;  %6901 = vmatpush3.bf16.msra.mxu0 %v7710_v10  ;;  %v7862_v26 = vpack.c.bf16 %v5487_v21, %v5486_v20 }
  0x15   : > { %6902 = vmatprep.mubr.msk.bf16.mxu0 %vm309_vm0, %v7839_v13  ;;  %v7860_v25 = vpack.c.bf16 %v5837_v18, %v5836_v17  ;;  %6614 = vmatprep.subr.bf16.mxu1 %v7711_v16  ;;  %v7864_v27 = vpack.c.bf16 %v5839_v24, %v5838_v23  ;;  %v5488_v28 = vld [vmem:[%s7827_s29 + $0x1e0] sm:$0xff]  ;;  %v5489_v29 = vld [vmem:[%s7827_s29 + $0x1e8] sm:$0xff]  ;;  %v5490_v34 = vld [vmem:[%s7827_s29 + $0x1f8] sm:$0xff] }
  0x16   : > { %6934 = vmatprep.subr.bf16.mxu0 %v7712_v19  ;;  %6583 = vmatmul.mubr.msk.bf16.vlgmr.msra.gmra.mrb[0].mxu1 %vm309_vm0, %v7856_v22  ;;  %v5840_v30 = vld [vmem:[%s7827_s29 + $0x60] sm:$0xff]  ;;  %v5841_v33 = vld [vmem:[%s7827_s29 + $0x68] sm:$0xff]  ;;  %v5842_v36 = vld [vmem:[%s7827_s29 + $0x78] sm:$0xff]  ;;  %v7888_v38 = vpack.c.bf16 %v5489_v29, %v5488_v28 }
  0x17   : > { %6903 = vmatmul.mubr.msk.bf16.vlgmr.msra.gmra.mrb[0].mxu0 %vm309_vm0, %v7860_v25  ;;  %6615 = vmatpush3.bf16.msra.mxu1 %v7711_v16  ;;  %v5491_v35 = vld [vmem:[%s7827_s29 + $0x200] sm:$0xff]  ;;  %v7890_v39 = vpack.c.bf16 %v5841_v33, %v5840_v30  ;;  %v5492_v43 = vld [vmem:[%s7827_s29 + $0x210] sm:$0xff]  ;;  %v5493_v44 = vld [vmem:[%s7827_s29 + $0x218] sm:$0xff] }
  0x18   : > { %6935 = vmatpush3.bf16.msra.mxu0 %v7712_v19  ;;  %6586 = vmatprep.mubr.msk.bf16.mxu1 %vm309_vm0, %v7862_v26  ;;  %v5843_v37 = vld [vmem:[%s7827_s29 + $0x80] sm:$0xff]  ;;  %v7892_v40 = vpack.c.bf16 %v5491_v35, %v5490_v34  ;;  %v5844_v45 = vld [vmem:[%s7827_s29 + $0x90] sm:$0xff]  ;;  %v5845_v47 = vld [vmem:[%s7827_s29 + $0x98] sm:$0xff]  ;;  %v7918_v52 = vpack.c.bf16 %v5493_v44, %v5492_v43 }
  0x19   : > { %6906 = vmatprep.mubr.msk.bf16.mxu0 %vm309_vm0, %v7864_v27  ;;  %6616 = vmatprep.subr.bf16.mxu1 %v7713_v31  ;;  %v7894_v41 = vpack.c.bf16 %v5843_v37, %v5842_v36  ;;  %v5494_v48 = vld [vmem:[%s7827_s29 + $0x228] sm:$0xff]  ;;  %v5495_v49 = vld [vmem:[%s7827_s29 + $0x230] sm:$0xff]  ;;  %v7920_v53 = vpack.c.bf16 %v5845_v47, %v5844_v45  ;;  %v5496_v58 = vld [vmem:[%s7827_s29 + $0x240] sm:$0xff] }
  0x1a   : > { %6936 = vmatprep.subr.bf16.mxu0 %v7714_v32  ;;  %v5846_v50 = vld [vmem:[%s7827_s29 + $0xa8] sm:$0xff]  ;;  %v5847_v51 = vld [vmem:[%s7827_s29 + $0xb0] sm:$0xff]  ;;  %v7922_v54 = vpack.c.bf16 %v5495_v49, %v5494_v48  ;;  %v5848_v60 = vld [vmem:[%s7827_s29 + $0xc0] sm:$0xff] }
  0x1b   : > { %6617 = vmatpush3.bf16.msra.mxu1 %v7713_v31  ;;  %v7924_v55 = vpack.c.bf16 %v5847_v51, %v5846_v50  ;;  %v5497_v59 = vld [vmem:[%s7827_s29 + $0x248] sm:$0xff]  ;;  %v5498_v62 = vld [vmem:[%s7827_s29 + $0x258] sm:$0xff]  ;;  %v5499_v63 = vld [vmem:[%s7827_s29 + $0x260] sm:$0xff] }
  0x1c   : > { %6937 = vmatpush3.bf16.msra.mxu0 %v7714_v32  ;;  %6618 = vmatprep.subr.bf16.mxu1 %v7715_v42  ;;  %v5849_v61 = vld [vmem:[%s7827_s29 + $0xc8] sm:$0xff]  ;;  %v5850_v0 = vld [vmem:[%s7827_s29 + $0xd8] sm:$0xff]  ;;  %v5851_v1 = vld [vmem:[%s7827_s29 + $0xe0] sm:$0xff]  ;;  %v7948_v2 = vpack.c.bf16 %v5497_v59, %v5496_v58  ;;  %v7957_v5 = vpack.c.bf16 %v5499_v63, %v5498_v62 }
  0x1d   : > { %6938 = vmatprep.subr.bf16.mxu0 %v7716_v46  ;;  %v7955_v4 = vpack.c.bf16 %v5849_v61, %v5848_v60  ;;  %v7962_v6 = vld [vmem:[%s8766_s1 + $0x140] sm:$0xff]   ;;  %v7964_v7 = vpack.c.bf16 %v5851_v1, %v5850_v0  ;;  %v5500_v8 = vld [vmem:[%s7827_s29 + $0x270] sm:$0xff]  ;;  %v5501_v9 = vld [vmem:[%s7827_s29 + $0x278] sm:$0xff] }
  0x1e   : > { %6587 = vmatmul.mubr.msk.bf16.gmra.mrb[4].mxu1 %vm309_vm0, %v7888_v38  ;;  %v5852_v10 = vld [vmem:[%s7827_s29 + $0xf0] sm:$0xff]  ;;  %v5853_v11 = vld [vmem:[%s7827_s29 + $0xf8] sm:$0xff]  ;;  %v5502_v12 = vld [vmem:[%s7827_s29 + $0x288] sm:$0xff]  ;;  %v7984_v17 = vpack.c.bf16 %v5501_v9, %v5500_v8 }
  0x1f   : > { %6907 = vmatmul.mubr.msk.bf16.gmra.mrb[4].mxu0 %vm309_vm0, %v7890_v39  ;;  %6590 = vmatprep.mubr.msk.bf16.mxu1 %vm309_vm0, %v7892_v40  ;;  %v5503_v14 = vld [vmem:[%s7827_s29 + $0x290] sm:$0xff]  ;;  %v5854_v15 = vld [vmem:[%s7827_s29 + $0x108] sm:$0xff]  ;;  %v7986_v18 = vpack.c.bf16 %v5853_v11, %v5852_v10  ;;  %v5504_v21 = vld [vmem:[%s7827_s29 + $0x2a0] sm:$0xff] }
  0x20   : > { %6910 = vmatprep.mubr.msk.bf16.mxu0 %vm309_vm0, %v7894_v41  ;;  %6619 = vmatpush3.bf16.msra.mxu1 %v7715_v42  ;;  %v5855_v16 = vld [vmem:[%s7827_s29 + $0x110] sm:$0xff]  ;;  %v7988_v19 = vpack.c.bf16 %v5503_v14, %v5502_v12  ;;  %v5505_v23 = vld [vmem:[%s7827_s29 + $0x2a8] sm:$0xff]  ;;  %v5856_v24 = vld [vmem:[%s7827_s29 + $0x120] sm:$0xff] }
  0x21   : > { %6939 = vmatpush3.bf16.msra.mxu0 %v7716_v46  ;;  %6620 = vmatprep.subr.bf16.mxu1 %v7717_v56  ;;  %v7990_v20 = vpack.c.bf16 %v5855_v16, %v5854_v15  ;;  %v5857_v28 = vld [vmem:[%s7827_s29 + $0x128] sm:$0xff]  ;;  %v5506_v29 = vld [vmem:[%s7827_s29 + $0x2b8] sm:$0xff]  ;;  %v5507_v30 = vld [vmem:[%s7827_s29 + $0x2c0] sm:$0xff]  ;;  %v8008_v33 = vpack.c.bf16 %v5505_v23, %v5504_v21 }
  0x22   : > { %6940 = vmatprep.subr.bf16.mxu0 %v7718_v57  ;;  %v5858_v31 = vld [vmem:[%s7827_s29 + $0x138] sm:$0xff]  ;;  %v5859_v32 = vld [vmem:[%s7827_s29 + $0x140] sm:$0xff]  ;;  %v8010_v34 = vpack.c.bf16 %v5857_v28, %v5856_v24  ;;  %v8012_v35 = vpack.c.bf16 %v5507_v30, %v5506_v29  ;;  %v5508_v37 = vld [vmem:[%s7827_s29 + $0x2d0] sm:$0xff] }
  0x23   : > { %v8014_v36 = vpack.c.bf16 %v5859_v32, %v5858_v31  ;;  %v5509_v42 = vld [vmem:[%s7827_s29 + $0x2d8] sm:$0xff]  ;;  %v5860_v43 = vld [vmem:[%s7827_s29 + $0x150] sm:$0xff]  ;;  %v5510_v45 = vld [vmem:[%s7827_s29 + $0x2e8] sm:$0xff] }
  0x24   : > { %6621 = vmatpush3.bf16.msra.mxu1 %v7717_v56  ;;  %v5861_v44 = vld [vmem:[%s7827_s29 + $0x158] sm:$0xff]  ;;  %v5511_v46 = vld [vmem:[%s7827_s29 + $0x2f0] sm:$0xff]  ;;  %v5862_v47 = vld [vmem:[%s7827_s29 + $0x168] sm:$0xff]  ;;  %v8032_v49 = vpack.c.bf16 %v5509_v42, %v5508_v37 }
  0x25   : > { %6941 = vmatpush3.bf16.msra.mxu0 %v7718_v57  ;;  %6654 = vmatprep.subr.bf16.mxu1 %v7953_v3  ;;  %v5863_v48 = vld [vmem:[%s7827_s29 + $0x170] sm:$0xff]  ;;  %v8034_v50 = vpack.c.bf16 %v5861_v44, %v5860_v43  ;;  %v8036_v51 = vpack.c.bf16 %v5511_v46, %v5510_v45  ;;  %v5512_v57 = vld [vmem:[%s7827_s29 + $0x300] sm:$0xff]  ;;  %v5513_v58 = vld [vmem:[%s7827_s29 + $0x308] sm:$0xff] }
  0x26   : > { %6591 = vmatmul.mubr.msk.bf16.gmra.mrb[8].mxu1 %vm309_vm0, %v7918_v52  ;;  %6974 = vmatprep.subr.bf16.mxu0 %v7962_v6  ;;  %v8038_v56 = vpack.c.bf16 %v5863_v48, %v5862_v47  ;;  %v5864_v59 = vld [vmem:[%s7827_s29 + $0x180] sm:$0xff]  ;;  %v5865_v60 = vld [vmem:[%s7827_s29 + $0x188] sm:$0xff]  ;;  %v276_v63 = vpack.c.bf16 %v5513_v58, %v5512_v57  ;;  %v7733_v24 = vld [vmem:[%s8766_s1 + $0x78] sm:$0xff]  }
  0x27   : > { %6911 = vmatmul.mubr.msk.bf16.gmra.mrb[8].mxu0 %vm309_vm0, %v7920_v53  ;;  %6594 = vmatprep.mubr.msk.bf16.mxu1 %vm309_vm0, %v7922_v54  ;;  %v172_v61 = vld [vmem:[%s7827_s29] sm:$0xff]  ;;  %v173_v62 = vld [vmem:[%s7827_s29 + $0x8] sm:$0xff]  ;;  %v2728_v0 = vpack.c.bf16 %v5865_v60, %v5864_v59  ;;  %v7734_v28 = vld [vmem:[%s8766_s1 + $0x178] sm:$0xff]  }
  0x28   : > { %6914 = vmatprep.mubr.msk.bf16.mxu0 %vm309_vm0, %v7924_v55  ;;  %v204_v1 = vpack.c.bf16 %v173_v62, %v172_v61  ;;  %v7721_v8 = vld [vmem:[%s8766_s1 + $0x48] sm:$0xff]   ;;  %v5948_v29 = vld [vmem:[%s7827_s29 + $0x91] sm:$0xff]  ;;  %v5949_v30 = vld [vmem:[%s7827_s29 + $0x99] sm:$0xff] }
  0x29   : > { %v7722_v9 = vld [vmem:[%s8766_s1 + $0x148] sm:$0xff]   ;;  %v5951_v32 = vld [vmem:[%s7827_s29 + $0xb1] sm:$0xff]  ;;  %v5954_v43 = vld [vmem:[%s7827_s29 + $0xd9] sm:$0xff] }
  0x2a   : > { %v7729_v12 = vld [vmem:[%s8766_s1 + $0x68] sm:$0xff]   ;;  %v5956_v47 = vld [vmem:[%s7827_s29 + $0xf1] sm:$0xff]  ;;  %v5957_v48 = vld [vmem:[%s7827_s29 + $0xf9] sm:$0xff] }
  0x2b   : > { %v7730_v14 = vld [vmem:[%s8766_s1 + $0x168] sm:$0xff]   ;;  %v5962_v59 = vld [vmem:[%s7827_s29 + $0x139] sm:$0xff] }
  0x2c   : > { %v5944_v15 = vld [vmem:[%s7827_s29 + $0x61] sm:$0xff]  ;;  %v5945_v16 = vld [vmem:[%s7827_s29 + $0x69] sm:$0xff] }
  0x2d   : > { %v3359_v21 = vpack.c.bf16 %v5945_v16, %v5944_v15  ;;  %v5950_v31 = vld [vmem:[%s7827_s29 + $0xa9] sm:$0xff]  ;;  %v5952_v37 = vld [vmem:[%s7827_s29 + $0xc1] sm:$0xff] }
  0x2e   : > { %6595 = vmatmul.mubr.msk.bf16.gmra.mrb[12].mxu1 %vm309_vm0, %v7948_v2  ;;  %v5953_v42 = vld [vmem:[%s7827_s29 + $0xc9] sm:$0xff]  ;;  %v5955_v44 = vld [vmem:[%s7827_s29 + $0xe1] sm:$0xff] }
  0x2f   : > { %6915 = vmatmul.mubr.msk.bf16.gmra.mrb[12].mxu0 %vm309_vm0, %v7955_v4  ;;  %6598 = vmatprep.mubr.msk.bf16.mxu1 %vm309_vm0, %v7957_v5  ;;  %v3363_v45 = vpack.c.bf16 %v5953_v42, %v5952_v37  ;;  %v3364_v46 = vpack.c.bf16 %v5955_v44, %v5954_v43  ;;  %v5960_v57 = vld [vmem:[%s7827_s29 + $0x121] sm:$0xff]  ;;  %v5961_v58 = vld [vmem:[%s7827_s29 + $0x129] sm:$0xff]  ;;  %v6009_v43 = vld [vmem:[%s7827_s29 + $0x291] sm:$0xff] }
  0x30   : > { %6918 = vmatprep.mubr.msk.bf16.mxu0 %vm309_vm0, %v7964_v7  ;;  %v5963_v60 = vld [vmem:[%s7827_s29 + $0x141] sm:$0xff]  ;;  %v3367_v61 = vpack.c.bf16 %v5961_v58, %v5960_v57  ;;  %v7740_v15 = vld [vmem:[%s8766_s1 + $0x190] sm:$0xff]  }
  0x31   : > { %v3368_v62 = vpack.c.bf16 %v5963_v60, %v5962_v59  ;;  %v6008_v42 = vld [vmem:[%s7827_s29 + $0x289] sm:$0xff]  ;;  %v6010_v44 = vld [vmem:[%s7827_s29 + $0x2a1] sm:$0xff]  ;;  %v6017_v59 = vld [vmem:[%s7827_s29 + $0x2f1] sm:$0xff] }
  0x32   : > { %v6016_v58 = vld [vmem:[%s7827_s29 + $0x2e9] sm:$0xff]  ;;  %v6018_v60 = vld [vmem:[%s7827_s29 + $0x301] sm:$0xff] }
  0x36   : > { %6599 = vmatmul.mubr.msk.bf16.gmra.mrb[16].mxu1 %vm309_vm0, %v7984_v17 }
  0x37   : > { %6919 = vmatmul.mubr.msk.bf16.gmra.mrb[16].mxu0 %vm309_vm0, %v7986_v18  ;;  %6602 = vmatprep.mubr.msk.bf16.mxu1 %vm309_vm0, %v7988_v19 }
  0x38   : > { %6922 = vmatprep.mubr.msk.bf16.mxu0 %vm309_vm0, %v7990_v20 }
  0x3e   : > { %6603 = vmatmul.mubr.msk.bf16.gmra.mrb[20].mxu1 %vm309_vm0, %v8008_v33 }
  0x3f   : > { %6923 = vmatmul.mubr.msk.bf16.gmra.mrb[20].mxu0 %vm309_vm0, %v8010_v34  ;;  %6606 = vmatprep.mubr.msk.bf16.mxu1 %vm309_vm0, %v8012_v35 }
  0x40   : > { %6926 = vmatprep.mubr.msk.bf16.mxu0 %vm309_vm0, %v8014_v36 }
  0x46   : > { %6607 = vmatmul.mubr.msk.bf16.gmra.mrb[24].mxu1 %vm309_vm0, %v8032_v49 }
  0x47   : > { %6927 = vmatmul.mubr.msk.bf16.gmra.mrb[24].mxu0 %vm309_vm0, %v8034_v50  ;;  %6610 = vmatprep.mubr.msk.bf16.mxu1 %vm309_vm0, %v8036_v51 }
  0x48   : > { %6930 = vmatprep.mubr.msk.bf16.mxu0 %vm309_vm0, %v8038_v56 }
  0x4e   : > { %6611 = vmatmul.mubr.msk.bf16.gmra.mrb[28].mxu1 %vm309_vm0, %v276_v63 }
  0x4f   : > { %6931 = vmatmul.mubr.msk.bf16.gmra.mrb[28].mxu0 %vm309_vm0, %v2728_v0  ;;  %6622 = vmatprep.mubr.msk.bf16.mxu1 %vm309_vm0, %v204_v1  ;;  %v5965_v0 = vld [vmem:[%s7827_s29 + $0x159] sm:$0xff]  ;;  %v5966_v1 = vld [vmem:[%s7827_s29 + $0x169] sm:$0xff] }
  0x50   : > { %6942 = vmatprep.mubr.msk.bf16.mxu0 %vm309_vm0, %v7856_v22  ;;  %v7723_v22 = vld [vmem:[%s8766_s1 + $0x50] sm:$0xff]  }
  0x56   : > { %6623 = vmatmul.mubr.msk.bf16.vlgmr.msra.gmra.mrb[0].mxu1 %vm309_vm0, %v7839_v13  ;;  %v7724_v13 = vld [vmem:[%s8766_s1 + $0x150] sm:$0xff]  }
  0x57   : > { %6943 = vmatmul.mubr.msk.bf16.vlgmr.msra.gmra.mrb[0].mxu0 %vm309_vm0, %v7862_v26  ;;  %6655 = vmatpush3.bf16.msra.mxu1 %v7953_v3  ;;  %v7726_v26 = vld [vmem:[%s8766_s1 + $0x158] sm:$0xff]  }
  0x58   : > { %6975 = vmatpush3.bf16.msra.mxu0 %v7962_v6  ;;  %6626 = vmatprep.mubr.msk.bf16.mxu1 %vm309_vm0, %v7860_v25  ;;  %v7725_v25 = vld [vmem:[%s8766_s1 + $0x58] sm:$0xff]   ;;  %v5942_v6 = vld [vmem:[%s7827_s29 + $0x49] sm:$0xff] }
  0x59   : > { %6946 = vmatprep.mubr.msk.bf16.mxu0 %vm309_vm0, %v7888_v38  ;;  %6656 = vmatprep.subr.bf16.mxu1 %v7721_v8  ;;  %v7727_v38 = vld [vmem:[%s8766_s1 + $0x60] sm:$0xff]  }
  0x5a   : > { %6976 = vmatprep.subr.bf16.mxu0 %v7722_v9 }
  0x5b   : > { %6657 = vmatpush3.bf16.msra.mxu1 %v7721_v8  ;;  %v5967_v8 = vld [vmem:[%s7827_s29 + $0x171] sm:$0xff] }
  0x5c   : > { %6977 = vmatpush3.bf16.msra.mxu0 %v7722_v9  ;;  %6658 = vmatprep.subr.bf16.mxu1 %v7723_v22 }
  0x5d   : > { %6978 = vmatprep.subr.bf16.mxu0 %v7724_v13 }
  0x5e   : > { %6627 = vmatmul.mubr.msk.bf16.gmra.mrb[4].mxu1 %vm309_vm0, %v7864_v27  ;;  %v7728_v27 = vld [vmem:[%s8766_s1 + $0x160] sm:$0xff]  }
  0x5f   : > { %6947 = vmatmul.mubr.msk.bf16.gmra.mrb[4].mxu0 %vm309_vm0, %v7892_v40  ;;  %6630 = vmatprep.mubr.msk.bf16.mxu1 %vm309_vm0, %v7890_v39  ;;  %v5916_v39 = vld [vmem:[%s7827_s29 + $0x318] sm:$0xff]  ;;  %v5917_v40 = vld [vmem:[%s7827_s29 + $0x320] sm:$0xff] }
  0x60   : > { %6950 = vmatprep.mubr.msk.bf16.mxu0 %vm309_vm0, %v7918_v52  ;;  %6659 = vmatpush3.bf16.msra.mxu1 %v7723_v22  ;;  %v753_v52 = vld [vmem:[%s7827_s29 + $0x9] sm:$0xff]  ;;  %v3370_v22 = vpack.c.bf16 %v5967_v8, %v5966_v1  ;;  %v6021_v1 = vld [vmem:[%s7827_s29 + $0x321] sm:$0xff] }
  0x61   : > { %6979 = vmatpush3.bf16.msra.mxu0 %v7724_v13  ;;  %6660 = vmatprep.subr.bf16.mxu1 %v7725_v25  ;;  %v5968_v13 = vld [vmem:[%s7827_s29 + $0x181] sm:$0xff]  ;;  %v5626_v8 = vld [vmem:[%s7827_s29 + $0x330] sm:$0xff] }
  0x62   : > { %6980 = vmatprep.subr.bf16.mxu0 %v7726_v26 }
  0x64   : > { %6661 = vmatpush3.bf16.msra.mxu1 %v7725_v25  ;;  %v5969_v25 = vld [vmem:[%s7827_s29 + $0x189] sm:$0xff] }
  0x65   : > { %6981 = vmatpush3.bf16.msra.mxu0 %v7726_v26  ;;  %6694 = vmatprep.subr.bf16.mxu1 %v7727_v38  ;;  %v5574_v26 = vld [vmem:[%s7827_s29 + $0x199] sm:$0xff] }
  0x66   : > { %6631 = vmatmul.mubr.msk.bf16.gmra.mrb[8].mxu1 %vm309_vm0, %v7894_v41  ;;  %7014 = vmatprep.subr.bf16.mxu0 %v7728_v27  ;;  %v752_v41 = vld [vmem:[%s7827_s29 + $0x1] sm:$0xff] }
  0x67   : > { %6951 = vmatmul.mubr.msk.bf16.gmra.mrb[8].mxu0 %vm309_vm0, %v7922_v54  ;;  %6634 = vmatprep.mubr.msk.bf16.mxu1 %vm309_vm0, %v7920_v53  ;;  %v5938_v53 = vld [vmem:[%s7827_s29 + $0x19] sm:$0xff]  ;;  %v5939_v54 = vld [vmem:[%s7827_s29 + $0x21] sm:$0xff] }
  0x68   : > { %6954 = vmatprep.mubr.msk.bf16.mxu0 %vm309_vm0, %v7948_v2  ;;  %v784_v2 = vpack.c.bf16 %v753_v52, %v752_v41  ;;  %v3356_v3 = vpack.c.bf16 %v5939_v54, %v5938_v53  ;;  %v5992_v53 = vld [vmem:[%s7827_s29 + $0x1c9] sm:$0xff]  ;;  %v5993_v54 = vld [vmem:[%s7827_s29 + $0x1d1] sm:$0xff] }
  0x6e   : > { %6635 = vmatmul.mubr.msk.bf16.gmra.mrb[12].mxu1 %vm309_vm0, %v7924_v55  ;;  %v3050_v55 = vpack.c.bf16 %v5917_v40, %v5916_v39  ;;  %v5991_v39 = vld [vmem:[%s7827_s29 + $0x1b9] sm:$0xff]  ;;  %v3371_v40 = vpack.c.bf16 %v5969_v25, %v5968_v13  ;;  %v6043_v13 = vld [vmem:[%s7827_s29 + $0x350] sm:$0xff] }
  0x6f   : > { %6955 = vmatmul.mubr.msk.bf16.gmra.mrb[12].mxu0 %vm309_vm0, %v7957_v5  ;;  %6638 = vmatprep.mubr.msk.bf16.mxu1 %vm309_vm0, %v7955_v4  ;;  %v5940_v4 = vld [vmem:[%s7827_s29 + $0x31] sm:$0xff]  ;;  %v5941_v5 = vld [vmem:[%s7827_s29 + $0x39] sm:$0xff] }
  0x70   : > { %6958 = vmatprep.mubr.msk.bf16.mxu0 %vm309_vm0, %v7984_v17  ;;  %v3357_v10 = vpack.c.bf16 %v5941_v5, %v5940_v4  ;;  %v7731_v17 = vld [vmem:[%s8766_s1 + $0x70] sm:$0xff]   ;;  %v7737_v5 = vld [vmem:[%s8766_s1 + $0x88] sm:$0xff]  }
  0x76   : > { %6639 = vmatmul.mubr.msk.bf16.gmra.mrb[16].mxu1 %vm309_vm0, %v7964_v7  ;;  %v5943_v7 = vld [vmem:[%s7827_s29 + $0x51] sm:$0xff] }
  0x77   : > { %6959 = vmatmul.mubr.msk.bf16.gmra.mrb[16].mxu0 %vm309_vm0, %v7988_v19  ;;  %6642 = vmatprep.mubr.msk.bf16.mxu1 %vm309_vm0, %v7986_v18  ;;  %v3358_v11 = vpack.c.bf16 %v5943_v7, %v5942_v6  ;;  %v5946_v18 = vld [vmem:[%s7827_s29 + $0x79] sm:$0xff]  ;;  %v5947_v19 = vld [vmem:[%s7827_s29 + $0x81] sm:$0xff] }
  0x78   : > { %6962 = vmatprep.mubr.msk.bf16.mxu0 %vm309_vm0, %v8008_v33  ;;  %v3360_v23 = vpack.c.bf16 %v5947_v19, %v5946_v18  ;;  %v8192_v33 = vld [vmem:[%s8766_s1 + $0x80] sm:$0xff]   ;;  %v7738_v6 = vld [vmem:[%s8766_s1 + $0x188] sm:$0xff]   ;;  %v7741_v18 = vld [vmem:[%s8766_s1 + $0x98] sm:$0xff]  }
  0x79   : > { %v5996_v7 = vld [vmem:[%s7827_s29 + $0x1f9] sm:$0xff] }
  0x7a   : > { %v7742_v19 = vld [vmem:[%s8766_s1 + $0x198] sm:$0xff]  }
  0x7e   : > { %6643 = vmatmul.mubr.msk.bf16.gmra.mrb[20].mxu1 %vm309_vm0, %v7990_v20  ;;  %v7732_v20 = vld [vmem:[%s8766_s1 + $0x170] sm:$0xff]  }
  0x7f   : > { %6963 = vmatmul.mubr.msk.bf16.gmra.mrb[20].mxu0 %vm309_vm0, %v8012_v35  ;;  %6646 = vmatprep.mubr.msk.bf16.mxu1 %vm309_vm0, %v8010_v34  ;;  %v8197_v34 = vld [vmem:[%s8766_s1 + $0x180] sm:$0xff]   ;;  %v3361_v35 = vpack.c.bf16 %v5949_v30, %v5948_v29 }
  0x80   : > { %6966 = vmatprep.mubr.msk.bf16.mxu0 %vm309_vm0, %v8032_v49  ;;  %v5958_v49 = vld [vmem:[%s7827_s29 + $0x109] sm:$0xff]  ;;  %v8295_v29 = vld [vmem:[%s8766_s1 + $0x1a0] sm:$0xff]  }
  0x86   : > { %6647 = vmatmul.mubr.msk.bf16.gmra.mrb[24].mxu1 %vm309_vm0, %v8014_v36  ;;  %v3362_v36 = vpack.c.bf16 %v5951_v32, %v5950_v31  ;;  %v6004_v32 = vld [vmem:[%s7827_s29 + $0x259] sm:$0xff] }
  0x87   : > { %6967 = vmatmul.mubr.msk.bf16.gmra.mrb[24].mxu0 %vm309_vm0, %v8036_v51  ;;  %6650 = vmatprep.mubr.msk.bf16.mxu1 %vm309_vm0, %v8034_v50  ;;  %v5959_v50 = vld [vmem:[%s7827_s29 + $0x111] sm:$0xff]  ;;  %v3365_v51 = vpack.c.bf16 %v5957_v48, %v5956_v47  ;;  %v6012_v48 = vld [vmem:[%s7827_s29 + $0x2b9] sm:$0xff] }
  0x88   : > { %6970 = vmatprep.mubr.msk.bf16.mxu0 %vm309_vm0, %v276_v63  ;;  %v5964_v63 = vld [vmem:[%s7827_s29 + $0x151] sm:$0xff] }
  0x89   : > { %v3369_v9 = vpack.c.bf16 %v5965_v0, %v5964_v63  ;;  %v6020_v0 = vld [vmem:[%s7827_s29 + $0x319] sm:$0xff] }
  0x8a   : > { %v3692_v25 = vpack.c.bf16 %v6021_v1, %v6020_v0  ;;  %v6095_v0 = vld [vmem:[%s7827_s29 + $0x4e8] sm:$0xff] }
  0x8e   : > { %6651 = vmatmul.mubr.msk.bf16.gmra.mrb[28].mxu1 %vm309_vm0, %v8038_v56  ;;  %v3366_v56 = vpack.c.bf16 %v5959_v50, %v5958_v49  ;;  %v6013_v49 = vld [vmem:[%s7827_s29 + $0x2c1] sm:$0xff]  ;;  %v6014_v50 = vld [vmem:[%s7827_s29 + $0x2d1] sm:$0xff] }
  0x8f   : > { %6971 = vmatmul.mubr.msk.bf16.gmra.mrb[28].mxu0 %vm309_vm0, %v3050_v55  ;;  %6662 = vmatprep.mubr.msk.bf16.mxu1 %vm309_vm0, %v784_v2  ;;  %v5994_v55 = vld [vmem:[%s7827_s29 + $0x1e1] sm:$0xff]  ;;  %v5995_v2 = vld [vmem:[%s7827_s29 + $0x1e9] sm:$0xff] }
  0x90   : > { %6982 = vmatprep.mubr.msk.bf16.mxu0 %vm309_vm0, %v3356_v3  ;;  %v3679_v4 = vpack.c.bf16 %v5995_v2, %v5994_v55  ;;  %v7746_v55 = vld [vmem:[%s8766_s1 + $0x1a8] sm:$0xff]   ;;  %v6048_v2 = vld [vmem:[%s7827_s29 + $0x390] sm:$0xff] }
  0x96   : > { %6663 = vmatmul.mubr.msk.bf16.vlgmr.msra.gmra.mrb[0].mxu1 %vm309_vm0, %v3356_v3  ;;  %v3678_v3 = vpack.c.bf16 %v5993_v54, %v5992_v53  ;;  %v7745_v54 = vld [vmem:[%s8766_s1 + $0xa8] sm:$0xff]  }
  0x97   : > { %6983 = vmatmul.mubr.msk.bf16.vlgmr.msra.gmra.mrb[0].mxu0 %vm309_vm0, %v3357_v10  ;;  %6695 = vmatpush3.bf16.msra.mxu1 %v7727_v38  ;;  %v5575_v38 = vld [vmem:[%s7827_s29 + $0x1a1] sm:$0xff] }
  0x98   : > { %7015 = vmatpush3.bf16.msra.mxu0 %v7728_v27  ;;  %6666 = vmatprep.mubr.msk.bf16.mxu1 %vm309_vm0, %v3357_v10  ;;  %v5990_v27 = vld [vmem:[%s7827_s29 + $0x1b1] sm:$0xff]  ;;  %v1105_v41 = vpack.c.bf16 %v5575_v38, %v5574_v26  ;;  %v5997_v10 = vld [vmem:[%s7827_s29 + $0x201] sm:$0xff] }
  0x99   : > { %6986 = vmatprep.mubr.msk.bf16.mxu0 %vm309_vm0, %v3358_v11  ;;  %6696 = vmatprep.subr.bf16.mxu1 %v7729_v12  ;;  %v3677_v52 = vpack.c.bf16 %v5991_v39, %v5990_v27  ;;  %v3680_v16 = vpack.c.bf16 %v5997_v10, %v5996_v7  ;;  %v6044_v27 = vld [vmem:[%s7827_s29 + $0x360] sm:$0xff]  ;;  %v6045_v39 = vld [vmem:[%s7827_s29 + $0x368] sm:$0xff]  ;;  %v7748_v7 = vld [vmem:[%s8766_s1 + $0x1b0] sm:$0xff]  }
  0x9a   : > { %7016 = vmatprep.subr.bf16.mxu0 %v7730_v14 }
  0x9b   : > { %6697 = vmatpush3.bf16.msra.mxu1 %v7729_v12  ;;  %v5998_v12 = vld [vmem:[%s7827_s29 + $0x211] sm:$0xff] }
  0x9c   : > { %7017 = vmatpush3.bf16.msra.mxu0 %v7730_v14  ;;  %6698 = vmatprep.subr.bf16.mxu1 %v7731_v17  ;;  %v5999_v14 = vld [vmem:[%s7827_s29 + $0x219] sm:$0xff] }
  0x9d   : > { %7018 = vmatprep.subr.bf16.mxu0 %v7732_v20 }
  0x9e   : > { %6667 = vmatmul.mubr.msk.bf16.gmra.mrb[4].mxu1 %vm309_vm0, %v3358_v11  ;;  %v7739_v11 = vld [vmem:[%s8766_s1 + $0x90] sm:$0xff]  }
  0x9f   : > { %6987 = vmatmul.mubr.msk.bf16.gmra.mrb[4].mxu0 %vm309_vm0, %v3359_v21  ;;  %6670 = vmatprep.mubr.msk.bf16.mxu1 %vm309_vm0, %v3359_v21  ;;  %v6001_v21 = vld [vmem:[%s7827_s29 + $0x231] sm:$0xff] }
  0xa0   : > { %6990 = vmatprep.mubr.msk.bf16.mxu0 %vm309_vm0, %v3360_v23  ;;  %6699 = vmatpush3.bf16.msra.mxu1 %v7731_v17  ;;  %v3681_v17 = vpack.c.bf16 %v5999_v14, %v5998_v12  ;;  %v7749_v12 = vld [vmem:[%s8766_s1 + $0xb8] sm:$0xff]  }
  0xa1   : > { %7019 = vmatpush3.bf16.msra.mxu0 %v7732_v20  ;;  %6700 = vmatprep.subr.bf16.mxu1 %v7733_v24  ;;  %v6000_v20 = vld [vmem:[%s7827_s29 + $0x229] sm:$0xff]  ;;  %v7750_v14 = vld [vmem:[%s8766_s1 + $0x1b8] sm:$0xff]  }
  0xa2   : > { %7020 = vmatprep.subr.bf16.mxu0 %v7734_v28  ;;  %v3682_v30 = vpack.c.bf16 %v6001_v21, %v6000_v20  ;;  %v8393_v20 = vld [vmem:[%s8766_s1 + $0x1c0] sm:$0xff]  }
  0xa4   : > { %6701 = vmatpush3.bf16.msra.mxu1 %v7733_v24  ;;  %v6003_v24 = vld [vmem:[%s7827_s29 + $0x249] sm:$0xff] }
  0xa5   : > { %7021 = vmatpush3.bf16.msra.mxu0 %v7734_v28  ;;  %6734 = vmatprep.subr.bf16.mxu1 %v8192_v33  ;;  %v8290_v28 = vld [vmem:[%s8766_s1 + $0xa0] sm:$0xff]  }
  0xa6   : > { %6671 = vmatmul.mubr.msk.bf16.gmra.mrb[8].mxu1 %vm309_vm0, %v3360_v23  ;;  %7054 = vmatprep.subr.bf16.mxu0 %v8197_v34  ;;  %v6002_v23 = vld [vmem:[%s7827_s29 + $0x241] sm:$0xff] }
  0xa7   : > { %6991 = vmatmul.mubr.msk.bf16.gmra.mrb[8].mxu0 %vm309_vm0, %v3361_v35  ;;  %6674 = vmatprep.mubr.msk.bf16.mxu1 %vm309_vm0, %v3361_v35  ;;  %v3683_v31 = vpack.c.bf16 %v6003_v24, %v6002_v23  ;;  %v6007_v35 = vld [vmem:[%s7827_s29 + $0x279] sm:$0xff]  ;;  %v6056_v24 = vld [vmem:[%s7827_s29 + $0x3f0] sm:$0xff] }
  0xa8   : > { %6994 = vmatprep.mubr.msk.bf16.mxu0 %vm309_vm0, %v3362_v36 }
  0xae   : > { %6675 = vmatmul.mubr.msk.bf16.gmra.mrb[12].mxu1 %vm309_vm0, %v3362_v36 }
  0xaf   : > { %6995 = vmatmul.mubr.msk.bf16.gmra.mrb[12].mxu0 %vm309_vm0, %v3363_v45  ;;  %6678 = vmatprep.mubr.msk.bf16.mxu1 %vm309_vm0, %v3363_v45  ;;  %v6011_v45 = vld [vmem:[%s7827_s29 + $0x2a9] sm:$0xff] }
  0xb0   : > { %6998 = vmatprep.mubr.msk.bf16.mxu0 %vm309_vm0, %v3364_v46  ;;  %v3687_v47 = vpack.c.bf16 %v6011_v45, %v6010_v44  ;;  %v6065_v44 = vld [vmem:[%s7827_s29 + $0x458] sm:$0xff]  ;;  %v6066_v45 = vld [vmem:[%s7827_s29 + $0x468] sm:$0xff] }
  0xb6   : > { %6679 = vmatmul.mubr.msk.bf16.gmra.mrb[16].mxu1 %vm309_vm0, %v3364_v46  ;;  %v3686_v46 = vpack.c.bf16 %v6009_v43, %v6008_v42  ;;  %v6064_v43 = vld [vmem:[%s7827_s29 + $0x450] sm:$0xff] }
  0xb7   : > { %6999 = vmatmul.mubr.msk.bf16.gmra.mrb[16].mxu0 %vm309_vm0, %v3365_v51  ;;  %6682 = vmatprep.mubr.msk.bf16.mxu1 %vm309_vm0, %v3365_v51  ;;  %v6015_v51 = vld [vmem:[%s7827_s29 + $0x2d9] sm:$0xff] }
  0xb8   : > { %7002 = vmatprep.mubr.msk.bf16.mxu0 %vm309_vm0, %v3366_v56  ;;  %v3689_v57 = vpack.c.bf16 %v6015_v51, %v6014_v50  ;;  %v6069_v50 = vld [vmem:[%s7827_s29 + $0x488] sm:$0xff]  ;;  %v6070_v51 = vld [vmem:[%s7827_s29 + $0x498] sm:$0xff] }
  0xbe   : > { %6683 = vmatmul.mubr.msk.bf16.gmra.mrb[20].mxu1 %vm309_vm0, %v3366_v56  ;;  %v3688_v56 = vpack.c.bf16 %v6013_v49, %v6012_v48  ;;  %v6068_v49 = vld [vmem:[%s7827_s29 + $0x480] sm:$0xff] }
  0xbf   : > { %7003 = vmatmul.mubr.msk.bf16.gmra.mrb[20].mxu0 %vm309_vm0, %v3367_v61  ;;  %6686 = vmatprep.mubr.msk.bf16.mxu1 %vm309_vm0, %v3367_v61  ;;  %v6019_v61 = vld [vmem:[%s7827_s29 + $0x309] sm:$0xff] }
  0xc0   : > { %7006 = vmatprep.mubr.msk.bf16.mxu0 %vm309_vm0, %v3368_v62  ;;  %v3691_v63 = vpack.c.bf16 %v6019_v61, %v6018_v60  ;;  %v6073_v60 = vld [vmem:[%s7827_s29 + $0x4b8] sm:$0xff]  ;;  %v5678_v61 = vld [vmem:[%s7827_s29 + $0x4c8] sm:$0xff] }
  0xc6   : > { %6687 = vmatmul.mubr.msk.bf16.gmra.mrb[24].mxu1 %vm309_vm0, %v3368_v62  ;;  %v3690_v62 = vpack.c.bf16 %v6017_v59, %v6016_v58  ;;  %v6072_v59 = vld [vmem:[%s7827_s29 + $0x4b0] sm:$0xff] }
  0xc7   : > { %7007 = vmatmul.mubr.msk.bf16.gmra.mrb[24].mxu0 %vm309_vm0, %v3369_v9  ;;  %6690 = vmatprep.mubr.msk.bf16.mxu1 %vm309_vm0, %v3369_v9  ;;  %v5627_v9 = vld [vmem:[%s7827_s29 + $0x338] sm:$0xff]  ;;  %v4014_v1 = vpack.c.bf16 %v6073_v60, %v6072_v59 }
  0xc8   : > { %7010 = vmatprep.mubr.msk.bf16.mxu0 %vm309_vm0, %v3370_v22  ;;  %v1427_v26 = vpack.c.bf16 %v5627_v9, %v5626_v8  ;;  %v6147_v59 = vld [vmem:[%s7827_s29 + $0x351] sm:$0xff] }
  0xce   : > { %6691 = vmatmul.mubr.msk.bf16.gmra.mrb[28].mxu1 %vm309_vm0, %v3370_v22  ;;  %v6042_v22 = vld [vmem:[%s7827_s29 + $0x348] sm:$0xff] }
  0xcf   : > { %7011 = vmatmul.mubr.msk.bf16.gmra.mrb[28].mxu0 %vm309_vm0, %v3371_v40  ;;  %6702 = vmatprep.mubr.msk.bf16.mxu1 %vm309_vm0, %v1105_v41  ;;  %v3999_v38 = vpack.c.bf16 %v6043_v13, %v6042_v22  ;;  %v6046_v40 = vld [vmem:[%s7827_s29 + $0x378] sm:$0xff]  ;;  %v6047_v41 = vld [vmem:[%s7827_s29 + $0x380] sm:$0xff] }
  0xd0   : > { %7022 = vmatprep.mubr.msk.bf16.mxu0 %vm309_vm0, %v3677_v52  ;;  %v4001_v53 = vpack.c.bf16 %v6047_v41, %v6046_v40  ;;  %v6096_v22 = vld [vmem:[%s7827_s29 + $0x4f8] sm:$0xff]  ;;  %v6097_v13 = vld [vmem:[%s7827_s29 + $0x500] sm:$0xff]  ;;  %v7754_v40 = vld [vmem:[%s8766_s1 + $0x1c8] sm:$0xff]  }
  0xd1   : > { %v6100_v41 = vld [vmem:[%s7827_s29 + $0x528] sm:$0xff] }
  0xd6   : > { %6703 = vmatmul.mubr.msk.bf16.vlgmr.msra.gmra.mrb[0].mxu1 %vm309_vm0, %v3677_v52  ;;  %v4000_v52 = vpack.c.bf16 %v6045_v39, %v6044_v27  ;;  %v7753_v39 = vld [vmem:[%s8766_s1 + $0xc8] sm:$0xff]  }
  0xd7   : > { %7023 = vmatmul.mubr.msk.bf16.vlgmr.msra.gmra.mrb[0].mxu0 %vm309_vm0, %v3678_v3  ;;  %6735 = vmatpush3.bf16.msra.mxu1 %v8192_v33  ;;  %v6005_v33 = vld [vmem:[%s7827_s29 + $0x261] sm:$0xff] }
  0xd8   : > { %7055 = vmatpush3.bf16.msra.mxu0 %v8197_v34  ;;  %6706 = vmatprep.mubr.msk.bf16.mxu1 %vm309_vm0, %v3678_v3  ;;  %v6006_v34 = vld [vmem:[%s7827_s29 + $0x271] sm:$0xff]  ;;  %v3684_v36 = vpack.c.bf16 %v6005_v33, %v6004_v32  ;;  %v6060_v33 = vld [vmem:[%s7827_s29 + $0x420] sm:$0xff] }
  0xd9   : > { %7026 = vmatprep.mubr.msk.bf16.mxu0 %vm309_vm0, %v3679_v4  ;;  %6736 = vmatprep.subr.bf16.mxu1 %v7737_v5  ;;  %v3685_v37 = vpack.c.bf16 %v6007_v35, %v6006_v34  ;;  %v6049_v3 = vld [vmem:[%s7827_s29 + $0x398] sm:$0xff]  ;;  %v6061_v34 = vld [vmem:[%s7827_s29 + $0x428] sm:$0xff] }
  0xda   : > { %7056 = vmatprep.subr.bf16.mxu0 %v7738_v6  ;;  %v4002_v10 = vpack.c.bf16 %v6049_v3, %v6048_v2  ;;  %v6062_v35 = vld [vmem:[%s7827_s29 + $0x438] sm:$0xff]  ;;  %v7756_v2 = vld [vmem:[%s8766_s1 + $0x1d0] sm:$0xff]  }
  0xdb   : > { %6737 = vmatpush3.bf16.msra.mxu1 %v7737_v5  ;;  %v6050_v5 = vld [vmem:[%s7827_s29 + $0x3a8] sm:$0xff] }
  0xdc   : > { %7057 = vmatpush3.bf16.msra.mxu0 %v7738_v6  ;;  %6738 = vmatprep.subr.bf16.mxu1 %v7739_v11  ;;  %v6051_v6 = vld [vmem:[%s7827_s29 + $0x3b0] sm:$0xff] }
  0xdd   : > { %7058 = vmatprep.subr.bf16.mxu0 %v7740_v15 }
  0xde   : > { %6707 = vmatmul.mubr.msk.bf16.gmra.mrb[4].mxu1 %vm309_vm0, %v3679_v4  ;;  %v7747_v4 = vld [vmem:[%s8766_s1 + $0xb0] sm:$0xff]  }
  0xdf   : > { %7027 = vmatmul.mubr.msk.bf16.gmra.mrb[4].mxu0 %vm309_vm0, %v3680_v16  ;;  %6710 = vmatprep.mubr.msk.bf16.mxu1 %vm309_vm0, %v3680_v16  ;;  %v6053_v16 = vld [vmem:[%s7827_s29 + $0x3c8] sm:$0xff] }
  0xe0   : > { %7030 = vmatprep.mubr.msk.bf16.mxu0 %vm309_vm0, %v3681_v17  ;;  %6739 = vmatpush3.bf16.msra.mxu1 %v7739_v11  ;;  %v4003_v11 = vpack.c.bf16 %v6051_v6, %v6050_v5  ;;  %v7757_v5 = vld [vmem:[%s8766_s1 + $0xd8] sm:$0xff]  }
  0xe1   : > { %7059 = vmatpush3.bf16.msra.mxu0 %v7740_v15  ;;  %6740 = vmatprep.subr.bf16.mxu1 %v7741_v18  ;;  %v6052_v15 = vld [vmem:[%s7827_s29 + $0x3c0] sm:$0xff]  ;;  %v7758_v6 = vld [vmem:[%s8766_s1 + $0x1d8] sm:$0xff]  }
  0xe2   : > { %7060 = vmatprep.subr.bf16.mxu0 %v7742_v19  ;;  %v4004_v21 = vpack.c.bf16 %v6053_v16, %v6052_v15  ;;  %v8491_v15 = vld [vmem:[%s8766_s1 + $0x1e0] sm:$0xff]  }
  0xe4   : > { %6741 = vmatpush3.bf16.msra.mxu1 %v7741_v18  ;;  %v6055_v18 = vld [vmem:[%s7827_s29 + $0x3e0] sm:$0xff] }
  0xe5   : > { %7061 = vmatpush3.bf16.msra.mxu0 %v7742_v19  ;;  %6774 = vmatprep.subr.bf16.mxu1 %v8290_v28  ;;  %v8388_v19 = vld [vmem:[%s8766_s1 + $0xc0] sm:$0xff]  }
  0xe6   : > { %6711 = vmatmul.mubr.msk.bf16.gmra.mrb[8].mxu1 %vm309_vm0, %v3681_v17  ;;  %7094 = vmatprep.subr.bf16.mxu0 %v8295_v29  ;;  %v6054_v17 = vld [vmem:[%s7827_s29 + $0x3d8] sm:$0xff] }
  0xe7   : > { %7031 = vmatmul.mubr.msk.bf16.gmra.mrb[8].mxu0 %vm309_vm0, %v3682_v30  ;;  %6714 = vmatprep.mubr.msk.bf16.mxu1 %vm309_vm0, %v3682_v30  ;;  %v4005_v23 = vpack.c.bf16 %v6055_v18, %v6054_v17  ;;  %v6059_v30 = vld [vmem:[%s7827_s29 + $0x410] sm:$0xff]  ;;  %v6108_v18 = vld [vmem:[%s7827_s29 + $0x588] sm:$0xff] }
  0xe8   : > { %7034 = vmatprep.mubr.msk.bf16.mxu0 %vm309_vm0, %v3683_v31 }
  0xee   : > { %6715 = vmatmul.mubr.msk.bf16.gmra.mrb[12].mxu1 %vm309_vm0, %v3683_v31 }
  0xef   : > { %7035 = vmatmul.mubr.msk.bf16.gmra.mrb[12].mxu0 %vm309_vm0, %v3684_v36  ;;  %6718 = vmatprep.mubr.msk.bf16.mxu1 %vm309_vm0, %v3684_v36  ;;  %v6063_v36 = vld [vmem:[%s7827_s29 + $0x440] sm:$0xff] }
  0xf0   : > { %7038 = vmatprep.mubr.msk.bf16.mxu0 %vm309_vm0, %v3685_v37  ;;  %v4009_v42 = vpack.c.bf16 %v6063_v36, %v6062_v35  ;;  %v6117_v35 = vld [vmem:[%s7827_s29 + $0x5f0] sm:$0xff]  ;;  %v6118_v36 = vld [vmem:[%s7827_s29 + $0x600] sm:$0xff] }
  0xf6   : > { %6719 = vmatmul.mubr.msk.bf16.gmra.mrb[16].mxu1 %vm309_vm0, %v3685_v37  ;;  %v4008_v37 = vpack.c.bf16 %v6061_v34, %v6060_v33  ;;  %v6116_v34 = vld [vmem:[%s7827_s29 + $0x5e8] sm:$0xff] }
  0xf7   : > { %7039 = vmatmul.mubr.msk.bf16.gmra.mrb[16].mxu0 %vm309_vm0, %v3686_v46  ;;  %6722 = vmatprep.mubr.msk.bf16.mxu1 %vm309_vm0, %v3686_v46  ;;  %v6067_v46 = vld [vmem:[%s7827_s29 + $0x470] sm:$0xff] }
  0xf8   : > { %7042 = vmatprep.mubr.msk.bf16.mxu0 %vm309_vm0, %v3687_v47  ;;  %v4011_v48 = vpack.c.bf16 %v6067_v46, %v6066_v45  ;;  %v6121_v45 = vld [vmem:[%s7827_s29 + $0x620] sm:$0xff]  ;;  %v6122_v46 = vld [vmem:[%s7827_s29 + $0x630] sm:$0xff] }
  0xfe   : > { %6723 = vmatmul.mubr.msk.bf16.gmra.mrb[20].mxu1 %vm309_vm0, %v3687_v47  ;;  %v4010_v47 = vpack.c.bf16 %v6065_v44, %v6064_v43  ;;  %v6120_v44 = vld [vmem:[%s7827_s29 + $0x618] sm:$0xff] }
  0xff   : > { %7043 = vmatmul.mubr.msk.bf16.gmra.mrb[20].mxu0 %vm309_vm0, %v3688_v56  ;;  %6726 = vmatprep.mubr.msk.bf16.mxu1 %vm309_vm0, %v3688_v56  ;;  %v6071_v56 = vld [vmem:[%s7827_s29 + $0x4a0] sm:$0xff] }
 0x100   : > { %7046 = vmatprep.mubr.msk.bf16.mxu0 %vm309_vm0, %v3689_v57  ;;  %v4013_v58 = vpack.c.bf16 %v6071_v56, %v6070_v51  ;;  %v6125_v51 = vld [vmem:[%s7827_s29 + $0x650] sm:$0xff] }
 0x101   : > { %v5730_v56 = vld [vmem:[%s7827_s29 + $0x331] sm:$0xff] }
 0x106   : > { %6727 = vmatmul.mubr.msk.bf16.gmra.mrb[24].mxu1 %vm309_vm0, %v3689_v57  ;;  %v4012_v57 = vpack.c.bf16 %v6069_v50, %v6068_v49  ;;  %v6124_v50 = vld [vmem:[%s7827_s29 + $0x648] sm:$0xff] }
 0x107   : > { %7047 = vmatmul.mubr.msk.bf16.gmra.mrb[24].mxu0 %vm309_vm0, %v3690_v62  ;;  %6730 = vmatprep.mubr.msk.bf16.mxu1 %vm309_vm0, %v3690_v62  ;;  %v5679_v62 = vld [vmem:[%s7827_s29 + $0x4d0] sm:$0xff]  ;;  %v4336_v60 = vpack.c.bf16 %v6125_v51, %v6124_v50 }
 0x108   : > { %7050 = vmatprep.mubr.msk.bf16.mxu0 %vm309_vm0, %v3691_v63  ;;  %v1749_v8 = vpack.c.bf16 %v5679_v62, %v5678_v61 }
 0x10e   : > { %6731 = vmatmul.mubr.msk.bf16.gmra.mrb[28].mxu1 %vm309_vm0, %v3691_v63  ;;  %v6094_v63 = vld [vmem:[%s7827_s29 + $0x4e0] sm:$0xff] }
 0x10f   : > { %7051 = vmatmul.mubr.msk.bf16.gmra.mrb[28].mxu0 %vm309_vm0, %v3692_v25  ;;  %6742 = vmatprep.mubr.msk.bf16.mxu1 %vm309_vm0, %v1427_v26  ;;  %v4321_v9 = vpack.c.bf16 %v6095_v0, %v6094_v63  ;;  %v6098_v25 = vld [vmem:[%s7827_s29 + $0x510] sm:$0xff]  ;;  %v6099_v26 = vld [vmem:[%s7827_s29 + $0x518] sm:$0xff]  ;;  %v6148_v63 = vld [vmem:[%s7827_s29 + $0x361] sm:$0xff] }
 0x110   : > { %7062 = vmatprep.mubr.msk.bf16.mxu0 %vm309_vm0, %v3999_v38  ;;  %v4323_v27 = vpack.c.bf16 %v6099_v26, %v6098_v25  ;;  %v6149_v0 = vld [vmem:[%s7827_s29 + $0x369] sm:$0xff]  ;;  %v6152_v26 = vld [vmem:[%s7827_s29 + $0x391] sm:$0xff] }
 0x111   : > { %v7762_v25 = vld [vmem:[%s8766_s1 + $0x1e8] sm:$0xff]  }
 0x116   : > { %6743 = vmatmul.mubr.msk.bf16.vlgmr.msra.gmra.mrb[0].mxu1 %vm309_vm0, %v3999_v38  ;;  %v4322_v38 = vpack.c.bf16 %v6097_v13, %v6096_v22  ;;  %v7761_v13 = vld [vmem:[%s8766_s1 + $0xe8] sm:$0xff]  }
 0x117   : > { %7063 = vmatmul.mubr.msk.bf16.vlgmr.msra.gmra.mrb[0].mxu0 %vm309_vm0, %v4000_v52  ;;  %6775 = vmatpush3.bf16.msra.mxu1 %v8290_v28  ;;  %v6057_v28 = vld [vmem:[%s7827_s29 + $0x3f8] sm:$0xff] }
 0x118   : > { %7095 = vmatpush3.bf16.msra.mxu0 %v8295_v29  ;;  %6746 = vmatprep.mubr.msk.bf16.mxu1 %vm309_vm0, %v4000_v52  ;;  %v6058_v29 = vld [vmem:[%s7827_s29 + $0x408] sm:$0xff]  ;;  %v4006_v31 = vpack.c.bf16 %v6057_v28, %v6056_v24  ;;  %v6101_v52 = vld [vmem:[%s7827_s29 + $0x530] sm:$0xff]  ;;  %v6112_v28 = vld [vmem:[%s7827_s29 + $0x5b8] sm:$0xff] }
 0x119   : > { %7066 = vmatprep.mubr.msk.bf16.mxu0 %vm309_vm0, %v4001_v53  ;;  %6776 = vmatprep.subr.bf16.mxu1 %v7745_v54  ;;  %v4007_v32 = vpack.c.bf16 %v6059_v30, %v6058_v29  ;;  %v4324_v3 = vpack.c.bf16 %v6101_v52, %v6100_v41  ;;  %v6113_v29 = vld [vmem:[%s7827_s29 + $0x5c0] sm:$0xff]  ;;  %v6114_v30 = vld [vmem:[%s7827_s29 + $0x5d0] sm:$0xff] }
 0x11a   : > { %7096 = vmatprep.subr.bf16.mxu0 %v7746_v55  ;;  %v7764_v41 = vld [vmem:[%s8766_s1 + $0x1f0] sm:$0xff]  }
 0x11b   : > { %6777 = vmatpush3.bf16.msra.mxu1 %v7745_v54  ;;  %v6102_v54 = vld [vmem:[%s7827_s29 + $0x540] sm:$0xff] }
 0x11c   : > { %7097 = vmatpush3.bf16.msra.mxu0 %v7746_v55  ;;  %6778 = vmatprep.subr.bf16.mxu1 %v7747_v4  ;;  %v6103_v55 = vld [vmem:[%s7827_s29 + $0x548] sm:$0xff] }
 0x11d   : > { %7098 = vmatprep.subr.bf16.mxu0 %v7748_v7 }
 0x11e   : > { %6747 = vmatmul.mubr.msk.bf16.gmra.mrb[4].mxu1 %vm309_vm0, %v4001_v53  ;;  %v7755_v53 = vld [vmem:[%s8766_s1 + $0xd0] sm:$0xff]  }
 0x11f   : > { %7067 = vmatmul.mubr.msk.bf16.gmra.mrb[4].mxu0 %vm309_vm0, %v4002_v10  ;;  %6750 = vmatprep.mubr.msk.bf16.mxu1 %vm309_vm0, %v4002_v10  ;;  %v6105_v10 = vld [vmem:[%s7827_s29 + $0x560] sm:$0xff] }
 0x120   : > { %7070 = vmatprep.mubr.msk.bf16.mxu0 %vm309_vm0, %v4003_v11  ;;  %6779 = vmatpush3.bf16.msra.mxu1 %v7747_v4  ;;  %v4325_v4 = vpack.c.bf16 %v6103_v55, %v6102_v54  ;;  %v7765_v54 = vld [vmem:[%s8766_s1 + $0xf8] sm:$0xff]  }
 0x121   : > { %7099 = vmatpush3.bf16.msra.mxu0 %v7748_v7  ;;  %6780 = vmatprep.subr.bf16.mxu1 %v7749_v12  ;;  %v6104_v7 = vld [vmem:[%s7827_s29 + $0x558] sm:$0xff] }
 0x122   : > { %7100 = vmatprep.subr.bf16.mxu0 %v7750_v14  ;;  %v4326_v16 = vpack.c.bf16 %v6105_v10, %v6104_v7  ;;  %v7766_v55 = vld [vmem:[%s8766_s1 + $0x1f8] sm:$0xff]  }
 0x123   : > { %v6160_v10 = vld [vmem:[%s7827_s29 + $0x3f1] sm:$0xff] }
 0x124   : > { %6781 = vmatpush3.bf16.msra.mxu1 %v7749_v12  ;;  %v6107_v12 = vld [vmem:[%s7827_s29 + $0x578] sm:$0xff] }
 0x125   : > { %7101 = vmatpush3.bf16.msra.mxu0 %v7750_v14  ;;  %6814 = vmatprep.subr.bf16.mxu1 %v8388_v19  ;;  %v8486_v14 = vld [vmem:[%s8766_s1 + $0xe0] sm:$0xff]  }
 0x126   : > { %6751 = vmatmul.mubr.msk.bf16.gmra.mrb[8].mxu1 %vm309_vm0, %v4003_v11  ;;  %7134 = vmatprep.subr.bf16.mxu0 %v8393_v20  ;;  %v6106_v11 = vld [vmem:[%s7827_s29 + $0x570] sm:$0xff] }
 0x127   : > { %7071 = vmatmul.mubr.msk.bf16.gmra.mrb[8].mxu0 %vm309_vm0, %v4004_v21  ;;  %6754 = vmatprep.mubr.msk.bf16.mxu1 %vm309_vm0, %v4004_v21  ;;  %v4327_v17 = vpack.c.bf16 %v6107_v12, %v6106_v11  ;;  %v6111_v21 = vld [vmem:[%s7827_s29 + $0x5a8] sm:$0xff]  ;;  %v6161_v11 = vld [vmem:[%s7827_s29 + $0x3f9] sm:$0xff] }
 0x128   : > { %7074 = vmatprep.mubr.msk.bf16.mxu0 %vm309_vm0, %v4005_v23  ;;  %v6162_v12 = vld [vmem:[%s7827_s29 + $0x409] sm:$0xff] }
 0x12e   : > { %6755 = vmatmul.mubr.msk.bf16.gmra.mrb[12].mxu1 %vm309_vm0, %v4005_v23 }
 0x12f   : > { %7075 = vmatmul.mubr.msk.bf16.gmra.mrb[12].mxu0 %vm309_vm0, %v4006_v31  ;;  %6758 = vmatprep.mubr.msk.bf16.mxu1 %vm309_vm0, %v4006_v31  ;;  %v6115_v31 = vld [vmem:[%s7827_s29 + $0x5d8] sm:$0xff] }
 0x130   : > { %7078 = vmatprep.mubr.msk.bf16.mxu0 %vm309_vm0, %v4007_v32  ;;  %v4331_v33 = vpack.c.bf16 %v6115_v31, %v6114_v30  ;;  %v6171_v30 = vld [vmem:[%s7827_s29 + $0x471] sm:$0xff] }
 0x136   : > { %6759 = vmatmul.mubr.msk.bf16.gmra.mrb[16].mxu1 %vm309_vm0, %v4007_v32  ;;  %v4330_v32 = vpack.c.bf16 %v6113_v29, %v6112_v28  ;;  %v6169_v28 = vld [vmem:[%s7827_s29 + $0x459] sm:$0xff]  ;;  %v6170_v29 = vld [vmem:[%s7827_s29 + $0x469] sm:$0xff] }
 0x137   : > { %7079 = vmatmul.mubr.msk.bf16.gmra.mrb[16].mxu0 %vm309_vm0, %v4008_v37  ;;  %6762 = vmatprep.mubr.msk.bf16.mxu1 %vm309_vm0, %v4008_v37  ;;  %v6119_v37 = vld [vmem:[%s7827_s29 + $0x608] sm:$0xff] }
 0x138   : > { %7082 = vmatprep.mubr.msk.bf16.mxu0 %vm309_vm0, %v4009_v42  ;;  %v4333_v43 = vpack.c.bf16 %v6119_v37, %v6118_v36  ;;  %v6175_v36 = vld [vmem:[%s7827_s29 + $0x4a1] sm:$0xff] }
 0x13e   : > { %6763 = vmatmul.mubr.msk.bf16.gmra.mrb[20].mxu1 %vm309_vm0, %v4009_v42  ;;  %v4332_v42 = vpack.c.bf16 %v6117_v35, %v6116_v34  ;;  %v6173_v34 = vld [vmem:[%s7827_s29 + $0x489] sm:$0xff]  ;;  %v6174_v35 = vld [vmem:[%s7827_s29 + $0x499] sm:$0xff] }
 0x13f   : > { %7083 = vmatmul.mubr.msk.bf16.gmra.mrb[20].mxu0 %vm309_vm0, %v4010_v47  ;;  %6766 = vmatprep.mubr.msk.bf16.mxu1 %vm309_vm0, %v4010_v47  ;;  %v6123_v47 = vld [vmem:[%s7827_s29 + $0x638] sm:$0xff] }
 0x140   : > { %7086 = vmatprep.mubr.msk.bf16.mxu0 %vm309_vm0, %v4011_v48  ;;  %v4335_v49 = vpack.c.bf16 %v6123_v47, %v6122_v46  ;;  %v5783_v46 = vld [vmem:[%s7827_s29 + $0x4d1] sm:$0xff]  ;;  %v6198_v47 = vld [vmem:[%s7827_s29 + $0x4e1] sm:$0xff] }
 0x146   : > { %6767 = vmatmul.mubr.msk.bf16.gmra.mrb[24].mxu1 %vm309_vm0, %v4011_v48  ;;  %v4334_v48 = vpack.c.bf16 %v6121_v45, %v6120_v44  ;;  %v6177_v44 = vld [vmem:[%s7827_s29 + $0x4b9] sm:$0xff]  ;;  %v5782_v45 = vld [vmem:[%s7827_s29 + $0x4c9] sm:$0xff] }
 0x147   : > { %7087 = vmatmul.mubr.msk.bf16.gmra.mrb[24].mxu0 %vm309_vm0, %v4012_v57  ;;  %6770 = vmatprep.mubr.msk.bf16.mxu1 %vm309_vm0, %v4012_v57  ;;  %v5731_v57 = vld [vmem:[%s7827_s29 + $0x339] sm:$0xff]  ;;  %v2391_v50 = vpack.c.bf16 %v5783_v46, %v5782_v45 }
 0x148   : > { %7090 = vmatprep.mubr.msk.bf16.mxu0 %vm309_vm0, %v4013_v58  ;;  %v2070_v61 = vpack.c.bf16 %v5731_v57, %v5730_v56  ;;  %v6200_v56 = vld [vmem:[%s7827_s29 + $0x4f9] sm:$0xff]  ;;  %v6201_v57 = vld [vmem:[%s7827_s29 + $0x501] sm:$0xff] }
 0x14e   : > { %6771 = vmatmul.mubr.msk.bf16.gmra.mrb[28].mxu1 %vm309_vm0, %v4013_v58  ;;  %v6146_v58 = vld [vmem:[%s7827_s29 + $0x349] sm:$0xff] }
 0x14f   : > { %7091 = vmatmul.mubr.msk.bf16.gmra.mrb[28].mxu0 %vm309_vm0, %v4014_v1  ;;  %6782 = vmatprep.mubr.msk.bf16.mxu1 %vm309_vm0, %v1749_v8  ;;  %v4642_v62 = vpack.c.bf16 %v6147_v59, %v6146_v58  ;;  %v6150_v1 = vld [vmem:[%s7827_s29 + $0x379] sm:$0xff]  ;;  %v6151_v8 = vld [vmem:[%s7827_s29 + $0x381] sm:$0xff]  ;;  %v6202_v58 = vld [vmem:[%s7827_s29 + $0x511] sm:$0xff] }
 0x150   : > { %7102 = vmatprep.mubr.msk.bf16.mxu0 %vm309_vm0, %v4321_v9  ;;  %v4644_v22 = vpack.c.bf16 %v6151_v8, %v6150_v1  ;;  %v6203_v59 = vld [vmem:[%s7827_s29 + $0x519] sm:$0xff]  ;;  %v6207_v1 = vld [vmem:[%s7827_s29 + $0x549] sm:$0xff] }
 0x156   : > { %6783 = vmatmul.mubr.msk.bf16.vlgmr.msra.gmra.mrb[0].mxu1 %vm309_vm0, %v4321_v9  ;;  %v4643_v9 = vpack.c.bf16 %v6149_v0, %v6148_v63  ;;  %v6205_v63 = vld [vmem:[%s7827_s29 + $0x531] sm:$0xff]  ;;  %v6206_v0 = vld [vmem:[%s7827_s29 + $0x541] sm:$0xff] }
 0x157   : > { %7103 = vmatmul.mubr.msk.bf16.vlgmr.msra.gmra.mrb[0].mxu0 %vm309_vm0, %v4322_v38  ;;  %6815 = vmatpush3.bf16.msra.mxu1 %v8388_v19  ;;  %v6109_v19 = vld [vmem:[%s7827_s29 + $0x590] sm:$0xff] }
 0x158   : > { %7135 = vmatpush3.bf16.msra.mxu0 %v8393_v20  ;;  %6786 = vmatprep.mubr.msk.bf16.mxu1 %vm309_vm0, %v4322_v38  ;;  %v6110_v20 = vld [vmem:[%s7827_s29 + $0x5a0] sm:$0xff]  ;;  %v4328_v23 = vpack.c.bf16 %v6109_v19, %v6108_v18  ;;  %v6165_v18 = vld [vmem:[%s7827_s29 + $0x429] sm:$0xff] }
 0x159   : > { %7106 = vmatprep.mubr.msk.bf16.mxu0 %vm309_vm0, %v4323_v27  ;;  %6816 = vmatprep.subr.bf16.mxu1 %v7753_v39  ;;  %v4329_v24 = vpack.c.bf16 %v6111_v21, %v6110_v20  ;;  %v6153_v38 = vld [vmem:[%s7827_s29 + $0x399] sm:$0xff]  ;;  %v6167_v20 = vld [vmem:[%s7827_s29 + $0x441] sm:$0xff] }
 0x15a   : > { %7136 = vmatprep.subr.bf16.mxu0 %v7754_v40  ;;  %v4645_v52 = vpack.c.bf16 %v6153_v38, %v6152_v26  ;;  %v6166_v19 = vld [vmem:[%s7827_s29 + $0x439] sm:$0xff] }
 0x15b   : > { %6817 = vmatpush3.bf16.msra.mxu1 %v7753_v39  ;;  %v6154_v39 = vld [vmem:[%s7827_s29 + $0x3a9] sm:$0xff]  ;;  %v6211_v26 = vld [vmem:[%s7827_s29 + $0x579] sm:$0xff] }
 0x15c   : > { %7137 = vmatpush3.bf16.msra.mxu0 %v7754_v40  ;;  %6818 = vmatprep.subr.bf16.mxu1 %v7755_v53  ;;  %v6155_v40 = vld [vmem:[%s7827_s29 + $0x3b1] sm:$0xff] }
 0x15d   : > { %7138 = vmatprep.subr.bf16.mxu0 %v7756_v2 }
 0x15e   : > { %6787 = vmatmul.mubr.msk.bf16.gmra.mrb[4].mxu1 %vm309_vm0, %v4323_v27  ;;  %v7763_v27 = vld [vmem:[%s8766_s1 + $0xf0] sm:$0xff]  }
 0x15f   : > { %7107 = vmatmul.mubr.msk.bf16.gmra.mrb[4].mxu0 %vm309_vm0, %v4324_v3  ;;  %6790 = vmatprep.mubr.msk.bf16.mxu1 %vm309_vm0, %v4324_v3  ;;  %v6157_v3 = vld [vmem:[%s7827_s29 + $0x3c9] sm:$0xff] }
 0x160   : > { %7110 = vmatprep.mubr.msk.bf16.mxu0 %vm309_vm0, %v4325_v4  ;;  %6819 = vmatpush3.bf16.msra.mxu1 %v7755_v53  ;;  %v4646_v53 = vpack.c.bf16 %v6155_v40, %v6154_v39  ;;  %v6212_v39 = vld [vmem:[%s7827_s29 + $0x589] sm:$0xff]  ;;  %v6213_v40 = vld [vmem:[%s7827_s29 + $0x591] sm:$0xff] }
 0x161   : > { %7139 = vmatpush3.bf16.msra.mxu0 %v7756_v2  ;;  %6820 = vmatprep.subr.bf16.mxu1 %v7757_v5  ;;  %v6156_v2 = vld [vmem:[%s7827_s29 + $0x3c1] sm:$0xff] }
 0x162   : > { %7140 = vmatprep.subr.bf16.mxu0 %v7758_v6 }
 0x164   : > { %6821 = vmatpush3.bf16.msra.mxu1 %v7757_v5  ;;  %v6159_v5 = vld [vmem:[%s7827_s29 + $0x3e1] sm:$0xff] }
 0x165   : > { %7141 = vmatpush3.bf16.msra.mxu0 %v7758_v6  ;;  %6854 = vmatprep.subr.bf16.mxu1 %v8486_v14  ;;  %v4647_v6 = vpack.c.bf16 %v6157_v3, %v6156_v2  ;;  %v6217_v2 = vld [vmem:[%s7827_s29 + $0x5c1] sm:$0xff]  ;;  %v6218_v3 = vld [vmem:[%s7827_s29 + $0x5d1] sm:$0xff] }
 0x166   : > { %6791 = vmatmul.mubr.msk.bf16.gmra.mrb[8].mxu1 %vm309_vm0, %v4325_v4  ;;  %7174 = vmatprep.subr.bf16.mxu0 %v8491_v15  ;;  %v6158_v4 = vld [vmem:[%s7827_s29 + $0x3d9] sm:$0xff] }
 0x167   : > { %7111 = vmatmul.mubr.msk.bf16.gmra.mrb[8].mxu0 %vm309_vm0, %v4326_v16  ;;  %6794 = vmatprep.mubr.msk.bf16.mxu1 %vm309_vm0, %v4326_v16  ;;  %v4648_v7 = vpack.c.bf16 %v6159_v5, %v6158_v4  ;;  %v6219_v4 = vld [vmem:[%s7827_s29 + $0x5d9] sm:$0xff] }
 0x168   : > { %7114 = vmatprep.mubr.msk.bf16.mxu0 %vm309_vm0, %v4327_v17 }
 0x16e   : > { %6795 = vmatmul.mubr.msk.bf16.gmra.mrb[12].mxu1 %vm309_vm0, %v4327_v17  ;;  %v6164_v17 = vld [vmem:[%s7827_s29 + $0x421] sm:$0xff] }
 0x16f   : > { %7115 = vmatmul.mubr.msk.bf16.gmra.mrb[12].mxu0 %vm309_vm0, %v4328_v23  ;;  %6798 = vmatprep.mubr.msk.bf16.mxu1 %vm309_vm0, %v4328_v23  ;;  %v4651_v21 = vpack.c.bf16 %v6165_v18, %v6164_v17  ;;  %v4652_v23 = vpack.c.bf16 %v6167_v20, %v6166_v19  ;;  %v6225_v17 = vld [vmem:[%s7827_s29 + $0x621] sm:$0xff]  ;;  %v6226_v18 = vld [vmem:[%s7827_s29 + $0x631] sm:$0xff]  ;;  %v6227_v19 = vld [vmem:[%s7827_s29 + $0x639] sm:$0xff] }
 0x170   : > { %7118 = vmatprep.mubr.msk.bf16.mxu0 %vm309_vm0, %v4329_v24 }
 0x176   : > { %6799 = vmatmul.mubr.msk.bf16.gmra.mrb[16].mxu1 %vm309_vm0, %v4329_v24  ;;  %v6168_v24 = vld [vmem:[%s7827_s29 + $0x451] sm:$0xff] }
 0x177   : > { %7119 = vmatmul.mubr.msk.bf16.gmra.mrb[16].mxu0 %vm309_vm0, %v4330_v32  ;;  %6802 = vmatprep.mubr.msk.bf16.mxu1 %vm309_vm0, %v4330_v32  ;;  %v4653_v31 = vpack.c.bf16 %v6169_v28, %v6168_v24  ;;  %v4654_v32 = vpack.c.bf16 %v6171_v30, %v6170_v29  ;;  %v6229_v24 = vld [vmem:[%s7827_s29 + $0x651] sm:$0xff] }
 0x178   : > { %7122 = vmatprep.mubr.msk.bf16.mxu0 %vm309_vm0, %v4331_v33 }
 0x17e   : > { %6803 = vmatmul.mubr.msk.bf16.gmra.mrb[20].mxu1 %vm309_vm0, %v4331_v33  ;;  %v6172_v33 = vld [vmem:[%s7827_s29 + $0x481] sm:$0xff] }
 0x17f   : > { %7123 = vmatmul.mubr.msk.bf16.gmra.mrb[20].mxu0 %vm309_vm0, %v4332_v42  ;;  %6806 = vmatprep.mubr.msk.bf16.mxu1 %vm309_vm0, %v4332_v42  ;;  %v4655_v37 = vpack.c.bf16 %v6173_v34, %v6172_v33  ;;  %v4656_v42 = vpack.c.bf16 %v6175_v36, %v6174_v35 }
 0x180   : > { %7126 = vmatprep.mubr.msk.bf16.mxu0 %vm309_vm0, %v4333_v43 }
 0x186   : > { %6807 = vmatmul.mubr.msk.bf16.gmra.mrb[24].mxu1 %vm309_vm0, %v4333_v43  ;;  %v6176_v43 = vld [vmem:[%s7827_s29 + $0x4b1] sm:$0xff] }
 0x187   : > { %7127 = vmatmul.mubr.msk.bf16.gmra.mrb[24].mxu0 %vm309_vm0, %v4334_v48  ;;  %6810 = vmatprep.mubr.msk.bf16.mxu1 %vm309_vm0, %v4334_v48  ;;  %v6199_v48 = vld [vmem:[%s7827_s29 + $0x4e9] sm:$0xff] }
 0x188   : > { %7130 = vmatprep.mubr.msk.bf16.mxu0 %vm309_vm0, %v4335_v49  ;;  %v4963_v51 = vpack.c.bf16 %v6199_v48, %v6198_v47 }
 0x18e   : > { %6811 = vmatmul.mubr.msk.bf16.gmra.mrb[28].mxu1 %vm309_vm0, %v4335_v49  ;;  %v4657_v49 = vpack.c.bf16 %v6177_v44, %v6176_v43 }
 0x18f   : > { %7131 = vmatmul.mubr.msk.bf16.gmra.mrb[28].mxu0 %vm309_vm0, %v4336_v60  ;;  %6822 = vmatprep.mubr.msk.bf16.mxu1 %vm309_vm0, %v2070_v61  ;;  %v4964_v60 = vpack.c.bf16 %v6201_v57, %v6200_v56  ;;  %v4965_v61 = vpack.c.bf16 %v6203_v59, %v6202_v58 }
 0x190   : > { %7142 = vmatprep.mubr.msk.bf16.mxu0 %vm309_vm0, %v4642_v62 }
 0x196   : > { %6823 = vmatmul.mubr.msk.bf16.vlgmr.msra.gmra.mrb[0].mxu1 %vm309_vm0, %v4642_v62  ;;  %v6204_v62 = vld [vmem:[%s7827_s29 + $0x529] sm:$0xff] }
 0x197   : > { %7143 = vmatmul.mubr.msk.bf16.vlgmr.msra.gmra.mrb[0].mxu0 %vm309_vm0, %v4643_v9  ;;  %6855 = vmatpush3.bf16.msra.mxu1 %v8486_v14  ;;  %v6163_v14 = vld [vmem:[%s7827_s29 + $0x411] sm:$0xff]  ;;  %v4966_v8 = vpack.c.bf16 %v6205_v63, %v6204_v62 }
 0x198   : > { %7175 = vmatpush3.bf16.msra.mxu0 %v8491_v15  ;;  %6826 = vmatprep.mubr.msk.bf16.mxu1 %vm309_vm0, %v4643_v9  ;;  %v4649_v15 = vpack.c.bf16 %v6161_v11, %v6160_v10  ;;  %v4650_v16 = vpack.c.bf16 %v6163_v14, %v6162_v12  ;;  %v4967_v9 = vpack.c.bf16 %v6207_v1, %v6206_v0  ;;  %v6221_v10 = vld [vmem:[%s7827_s29 + $0x5f1] sm:$0xff]  ;;  %v6222_v11 = vld [vmem:[%s7827_s29 + $0x601] sm:$0xff]  ;;  %v6223_v12 = vld [vmem:[%s7827_s29 + $0x609] sm:$0xff] }
 0x199   : > { %7146 = vmatprep.mubr.msk.bf16.mxu0 %vm309_vm0, %v4644_v22  ;;  %6856 = vmatprep.subr.bf16.mxu1 %v7761_v13 }
 0x19a   : > { %7176 = vmatprep.subr.bf16.mxu0 %v7762_v25 }
 0x19b   : > { %6857 = vmatpush3.bf16.msra.mxu1 %v7761_v13  ;;  %v6209_v13 = vld [vmem:[%s7827_s29 + $0x561] sm:$0xff] }
 0x19c   : > { %7177 = vmatpush3.bf16.msra.mxu0 %v7762_v25  ;;  %6858 = vmatprep.subr.bf16.mxu1 %v7763_v27  ;;  %v6210_v25 = vld [vmem:[%s7827_s29 + $0x571] sm:$0xff] }
 0x19d   : > { %7178 = vmatprep.subr.bf16.mxu0 %v7764_v41 }
 0x19e   : > { %6827 = vmatmul.mubr.msk.bf16.gmra.mrb[4].mxu1 %vm309_vm0, %v4644_v22  ;;  %v6208_v22 = vld [vmem:[%s7827_s29 + $0x559] sm:$0xff] }
 0x19f   : > { %7147 = vmatmul.mubr.msk.bf16.gmra.mrb[4].mxu0 %vm309_vm0, %v4645_v52  ;;  %6830 = vmatprep.mubr.msk.bf16.mxu1 %vm309_vm0, %v4645_v52  ;;  %v4968_v38 = vpack.c.bf16 %v6209_v13, %v6208_v22  ;;  %v6215_v52 = vld [vmem:[%s7827_s29 + $0x5a9] sm:$0xff] }
 0x1a0   : > { %7150 = vmatprep.mubr.msk.bf16.mxu0 %vm309_vm0, %v4646_v53  ;;  %6859 = vmatpush3.bf16.msra.mxu1 %v7763_v27  ;;  %v4969_v27 = vpack.c.bf16 %v6211_v26, %v6210_v25 }
 0x1a1   : > { %7179 = vmatpush3.bf16.msra.mxu0 %v7764_v41  ;;  %6860 = vmatprep.subr.bf16.mxu1 %v7765_v54  ;;  %v6214_v41 = vld [vmem:[%s7827_s29 + $0x5a1] sm:$0xff] }
 0x1a2   : > { %7180 = vmatprep.subr.bf16.mxu0 %v7766_v55 }
 0x1a4   : > { %6861 = vmatpush3.bf16.msra.mxu1 %v7765_v54  ;;  %v4971_v54 = vpack.c.bf16 %v6215_v52, %v6214_v41 }
 0x1a5   : > { %7181 = vmatpush3.bf16.msra.mxu0 %v7766_v55  ;;  %v6216_v55 = vld [vmem:[%s7827_s29 + $0x5b9] sm:$0xff] }
 0x1a6   : > { %6831 = vmatmul.mubr.msk.bf16.gmra.mrb[8].mxu1 %vm309_vm0, %v4646_v53  ;;  %v4970_v53 = vpack.c.bf16 %v6213_v40, %v6212_v39  ;;  %v4972_v5 = vpack.c.bf16 %v6217_v2, %v6216_v55 }
 0x1a7   : > { %7151 = vmatmul.mubr.msk.bf16.gmra.mrb[8].mxu0 %vm309_vm0, %v4647_v6  ;;  %6834 = vmatprep.mubr.msk.bf16.mxu1 %vm309_vm0, %v4647_v6  ;;  %v4973_v6 = vpack.c.bf16 %v6219_v4, %v6218_v3 }
 0x1a8   : > { %7154 = vmatprep.mubr.msk.bf16.mxu0 %vm309_vm0, %v4648_v7 }
 0x1ae   : > { %6835 = vmatmul.mubr.msk.bf16.gmra.mrb[12].mxu1 %vm309_vm0, %v4648_v7  ;;  %v6220_v7 = vld [vmem:[%s7827_s29 + $0x5e9] sm:$0xff] }
 0x1af   : > { %7155 = vmatmul.mubr.msk.bf16.gmra.mrb[12].mxu0 %vm309_vm0, %v4649_v15  ;;  %6838 = vmatprep.mubr.msk.bf16.mxu1 %vm309_vm0, %v4649_v15  ;;  %v4974_v14 = vpack.c.bf16 %v6221_v10, %v6220_v7  ;;  %v4975_v15 = vpack.c.bf16 %v6223_v12, %v6222_v11 }
 0x1b0   : > { %7158 = vmatprep.mubr.msk.bf16.mxu0 %vm309_vm0, %v4650_v16 }
 0x1b6   : > { %6839 = vmatmul.mubr.msk.bf16.gmra.mrb[16].mxu1 %vm309_vm0, %v4650_v16  ;;  %v6224_v16 = vld [vmem:[%s7827_s29 + $0x619] sm:$0xff] }
 0x1b7   : > { %7159 = vmatmul.mubr.msk.bf16.gmra.mrb[16].mxu0 %vm309_vm0, %v4651_v21  ;;  %6842 = vmatprep.mubr.msk.bf16.mxu1 %vm309_vm0, %v4651_v21  ;;  %v4976_v20 = vpack.c.bf16 %v6225_v17, %v6224_v16  ;;  %v4977_v21 = vpack.c.bf16 %v6227_v19, %v6226_v18 }
 0x1b8   : > { %7162 = vmatprep.mubr.msk.bf16.mxu0 %vm309_vm0, %v4652_v23 }
 0x1be   : > { %6843 = vmatmul.mubr.msk.bf16.gmra.mrb[20].mxu1 %vm309_vm0, %v4652_v23  ;;  %v6228_v23 = vld [vmem:[%s7827_s29 + $0x649] sm:$0xff] }
 0x1bf   : > { %7163 = vmatmul.mubr.msk.bf16.gmra.mrb[20].mxu0 %vm309_vm0, %v4653_v31  ;;  %6846 = vmatprep.mubr.msk.bf16.mxu1 %vm309_vm0, %v4653_v31  ;;  %v4978_v28 = vpack.c.bf16 %v6229_v24, %v6228_v23  ;;  %v8690_v31 = vld [vmem:[%s8767_s2] ss:$0 sm:$0xff] }
 0x1c0   : > { %7166 = vmatprep.mubr.msk.bf16.mxu0 %vm309_vm0, %v4654_v32 }
 0x1c6   : > { %6847 = vmatmul.mubr.msk.bf16.gmra.mrb[24].mxu1 %vm309_vm0, %v4654_v32 }
 0x1c7   : > { %7167 = vmatmul.mubr.msk.bf16.gmra.mrb[24].mxu0 %vm309_vm0, %v4655_v37  ;;  %6850 = vmatprep.mubr.msk.bf16.mxu1 %vm309_vm0, %v4655_v37 }
 0x1c8   : > { %7170 = vmatprep.mubr.msk.bf16.mxu0 %vm309_vm0, %v4656_v42 }
 0x1ce   : > { %6851 = vmatmul.mubr.msk.bf16.gmra.mrb[28].mxu1 %vm309_vm0, %v4656_v42 }
 0x1cf   : > { %7171 = vmatmul.mubr.msk.bf16.gmra.mrb[28].mxu0 %vm309_vm0, %v4657_v49  ;;  %6862 = vmatprep.mubr.msk.bf16.mxu1 %vm309_vm0, %v2391_v50 }
 0x1d0   : > { %7182 = vmatprep.mubr.msk.bf16.mxu0 %vm309_vm0, %v4963_v51 }
 0x1d6   : > { %6863 = vmatmul.mubr.msk.bf16.vlgmr.msra.gmra.mrb[0].mxu1 %vm309_vm0, %v4963_v51 }
 0x1d7   : > { %7183 = vmatmul.mubr.msk.bf16.vlgmr.msra.gmra.mrb[0].mxu0 %vm309_vm0, %v4964_v60  ;;  %6866 = vmatprep.mubr.msk.bf16.mxu1 %vm309_vm0, %v4964_v60 }
 0x1d8   : > { %7186 = vmatprep.mubr.msk.bf16.mxu0 %vm309_vm0, %v4965_v61 }
 0x1de   : > { %6867 = vmatmul.mubr.msk.bf16.gmra.mrb[4].mxu1 %vm309_vm0, %v4965_v61 }
 0x1df   : > { %7187 = vmatmul.mubr.msk.bf16.gmra.mrb[4].mxu0 %vm309_vm0, %v4966_v8  ;;  %6870 = vmatprep.mubr.msk.bf16.mxu1 %vm309_vm0, %v4966_v8 }
 0x1e0   : > { %7190 = vmatprep.mubr.msk.bf16.mxu0 %vm309_vm0, %v4967_v9 }
 0x1e6   : > { %6871 = vmatmul.mubr.msk.bf16.gmra.mrb[8].mxu1 %vm309_vm0, %v4967_v9 }
 0x1e7   : > { %7191 = vmatmul.mubr.msk.bf16.gmra.mrb[8].mxu0 %vm309_vm0, %v4968_v38  ;;  %6874 = vmatprep.mubr.msk.bf16.mxu1 %vm309_vm0, %v4968_v38 }
 0x1e8   : > { %7194 = vmatprep.mubr.msk.bf16.mxu0 %vm309_vm0, %v4969_v27 }
 0x1ee   : > { %6875 = vmatmul.mubr.msk.bf16.gmra.mrb[12].mxu1 %vm309_vm0, %v4969_v27 }
 0x1ef   : > { %7195 = vmatmul.mubr.msk.bf16.gmra.mrb[12].mxu0 %vm309_vm0, %v4970_v53  ;;  %6878 = vmatprep.mubr.msk.bf16.mxu1 %vm309_vm0, %v4970_v53 }
 0x1f0   : > { %7198 = vmatprep.mubr.msk.bf16.mxu0 %vm309_vm0, %v4971_v54 }
 0x1f6   : > { %6879 = vmatmul.mubr.msk.bf16.gmra.mrb[16].mxu1 %vm309_vm0, %v4971_v54 }
 0x1f7   : > { %7199 = vmatmul.mubr.msk.bf16.gmra.mrb[16].mxu0 %vm309_vm0, %v4972_v5  ;;  %6882 = vmatprep.mubr.msk.bf16.mxu1 %vm309_vm0, %v4972_v5 }
 0x1f8   : > { %7202 = vmatprep.mubr.msk.bf16.mxu0 %vm309_vm0, %v4973_v6 }
 0x1fe   : > { %6883 = vmatmul.mubr.msk.bf16.gmra.mrb[20].mxu1 %vm309_vm0, %v4973_v6 }
 0x1ff   : > { %7203 = vmatmul.mubr.msk.bf16.gmra.mrb[20].mxu0 %vm309_vm0, %v4974_v14  ;;  %6886 = vmatprep.mubr.msk.bf16.mxu1 %vm309_vm0, %v4974_v14 }
 0x200   : > { %7206 = vmatprep.mubr.msk.bf16.mxu0 %vm309_vm0, %v4975_v15 }
 0x206   : > { %6887 = vmatmul.mubr.msk.bf16.gmra.mrb[24].mxu1 %vm309_vm0, %v4975_v15 }
 0x207   : > { %7207 = vmatmul.mubr.msk.bf16.gmra.mrb[24].mxu0 %vm309_vm0, %v4976_v20  ;;  %6890 = vmatprep.mubr.msk.bf16.mxu1 %vm309_vm0, %v4976_v20 }
 0x208   : > { %7210 = vmatprep.mubr.msk.bf16.mxu0 %vm309_vm0, %v4977_v21 }
 0x20e   : > { %6891 = vmatmul.mubr.msk.bf16.gmra.mrb[28].mxu1 %vm309_vm0, %v4977_v21 }
 0x20f   : > { %7211 = vmatmul.mubr.msk.bf16.gmra.mrb[28].mxu0 %vm309_vm0, %v4978_v28 }
 0x2a9   : > { %v6864_v29 = vpop.f32.mrb[0].mxu1 }
 0x2aa   : > { %v7184_v30 = vpop.f32.mrb[0].mxu0  ;;  %v2521_v32 = vpop.f32.mrb[1].mxu1 }
 0x2ab   : > { %v7214_v33 = vadd.f32 %v7184_v30, %v6864_v29  ;;  %v5093_v34 = vpop.f32.mrb[1].mxu0  ;;  %v6865_v35 = vpop.f32.mrb[2].mxu1 }
 0x2ac   : > { %v7215_v36 = vadd.f32 %v5093_v34, %v2521_v32  ;;  %v7185_v37 = vpop.f32.mrb[2].mxu0  ;;  %v2524_v42 = vpop.f32.mrb[3].mxu1 }
 0x2ad   : > { %v5261_v43 = vadd.f32 %v7214_v33, %v8690_v31  ;;  %v7216_v44 = vadd.f32 %v7185_v37, %v6865_v35  ;;  %v5096_v45 = vpop.f32.mrb[3].mxu0 }
 0x2ae   : > { %v5259_v46 = vadd.f32 %v7215_v36, %v8690_v31  ;;  %v7217_v47 = vadd.f32 %v5096_v45, %v2524_v42 }
 0x2af   : > { %vm5293_vm1 = vcmp.gt.f32.partialorder %v5261_v43, 0.0  ;;  %v5325_v48 = vmul.f32 0.2, %v5261_v43  ;;  %v5262_v49 = vadd.f32 %v7216_v44, %v8690_v31 }
 0x2b0   : > { %vm5291_vm2 = vcmp.gt.f32.partialorder %v5259_v46, 0.0  ;;  %v5323_v50 = vmul.f32 0.2, %v5259_v46  ;;  %v5260_v51 = vadd.f32 %v7217_v47, %v8690_v31 }
 0x2b1   : > { %v5357_v56 = vsel %vm5293_vm1, %v5261_v43, %v5325_v48  ;;  %vm5294_vm3 = vcmp.gt.f32.partialorder %v5262_v49, 0.0  ;;  %v5326_v57 = vmul.f32 0.2, %v5262_v49  ;;  %v6868_v58 = vpop.f32.mrb[4].mxu1 }
 0x2b2   : > { %5389 = vst [vmem:[%s8698_s30 + $0x10] sm:$0xff] %v5357_v56  ;;  %v5355_v59 = vsel %vm5291_vm2, %v5259_v46, %v5323_v50  ;;  %vm5292_vm4 = vcmp.gt.f32.partialorder %v5260_v51, 0.0  ;;  %v5324_v60 = vmul.f32 0.2, %v5260_v51  ;;  %v7188_v61 = vpop.f32.mrb[4].mxu0  ;;  %v2537_v62 = vpop.f32.mrb[5].mxu1 }
 0x2b3   : > { %5387 = vst [vmem:[%s8698_s30] sm:$0xff] %v5355_v59  ;;  %v5358_v63 = vsel %vm5294_vm3, %v5262_v49, %v5326_v57  ;;  %v7218_v0 = vadd.f32 %v7188_v61, %v6868_v58  ;;  %v5109_v1 = vpop.f32.mrb[5].mxu0  ;;  %v6869_v8 = vpop.f32.mrb[6].mxu1 }
 0x2b4   : > { %5390 = vst [vmem:[%s8698_s30 + $0x18] sm:$0xff] %v5358_v63  ;;  %v5356_v9 = vsel %vm5292_vm4, %v5260_v51, %v5324_v60  ;;  %v7219_v22 = vadd.f32 %v5109_v1, %v2537_v62  ;;  %v7189_v13 = vpop.f32.mrb[6].mxu0  ;;  %v2540_v25 = vpop.f32.mrb[7].mxu1 }
 0x2b5   : > { %5388 = vst [vmem:[%s8698_s30 + $0x8] sm:$0xff] %v5356_v9  ;;  %v5265_v26 = vadd.f32 %v7218_v0, %v8690_v31  ;;  %v7220_v38 = vadd.f32 %v7189_v13, %v6869_v8  ;;  %v5112_v27 = vpop.f32.mrb[7].mxu0 }
 0x2b6   : > { %v5263_v39 = vadd.f32 %v7219_v22, %v8690_v31  ;;  %v7221_v40 = vadd.f32 %v5112_v27, %v2540_v25 }
 0x2b7   : > { %vm5297_vm5 = vcmp.gt.f32.partialorder %v5265_v26, 0.0  ;;  %v5329_v41 = vmul.f32 0.2, %v5265_v26  ;;  %v5266_v52 = vadd.f32 %v7220_v38, %v8690_v31 }
 0x2b8   : > { %vm5295_vm6 = vcmp.gt.f32.partialorder %v5263_v39, 0.0  ;;  %v5327_v53 = vmul.f32 0.2, %v5263_v39  ;;  %v5264_v54 = vadd.f32 %v7221_v40, %v8690_v31 }
 0x2b9   : > { %v5361_v55 = vsel %vm5297_vm5, %v5265_v26, %v5329_v41  ;;  %vm5298_vm7 = vcmp.gt.f32.partialorder %v5266_v52, 0.0  ;;  %v5330_v2 = vmul.f32 0.2, %v5266_v52  ;;  %v6872_v3 = vpop.f32.mrb[8].mxu1 }
 0x2ba   : > { %5393 = vst [vmem:[%s8698_s30 + $0x30] sm:$0xff] %v5361_v55  ;;  %v5359_v4 = vsel %vm5295_vm6, %v5263_v39, %v5327_v53  ;;  %vm5296_vm8 = vcmp.gt.f32.partialorder %v5264_v54, 0.0  ;;  %v5328_v5 = vmul.f32 0.2, %v5264_v54  ;;  %v7192_v6 = vpop.f32.mrb[8].mxu0  ;;  %v2553_v7 = vpop.f32.mrb[9].mxu1 }
 0x2bb   : > { %5391 = vst [vmem:[%s8698_s30 + $0x20] sm:$0xff] %v5359_v4  ;;  %v5362_v10 = vsel %vm5298_vm7, %v5266_v52, %v5330_v2  ;;  %v7222_v11 = vadd.f32 %v7192_v6, %v6872_v3  ;;  %v5125_v12 = vpop.f32.mrb[9].mxu0  ;;  %v6873_v14 = vpop.f32.mrb[10].mxu1 }
 0x2bc   : > { %5394 = vst [vmem:[%s8698_s30 + $0x38] sm:$0xff] %v5362_v10  ;;  %v5360_v15 = vsel %vm5296_vm8, %v5264_v54, %v5328_v5  ;;  %v7223_v16 = vadd.f32 %v5125_v12, %v2553_v7  ;;  %v7193_v17 = vpop.f32.mrb[10].mxu0  ;;  %v2556_v18 = vpop.f32.mrb[11].mxu1 }
 0x2bd   : > { %5392 = vst [vmem:[%s8698_s30 + $0x28] sm:$0xff] %v5360_v15  ;;  %v5269_v19 = vadd.f32 %v7222_v11, %v8690_v31  ;;  %v7224_v20 = vadd.f32 %v7193_v17, %v6873_v14  ;;  %v5128_v21 = vpop.f32.mrb[11].mxu0 }
 0x2be   : > { %v5267_v23 = vadd.f32 %v7223_v16, %v8690_v31  ;;  %v7225_v24 = vadd.f32 %v5128_v21, %v2556_v18 }
 0x2bf   : > { %vm5301_vm9 = vcmp.gt.f32.partialorder %v5269_v19, 0.0  ;;  %v5333_v28 = vmul.f32 0.2, %v5269_v19  ;;  %v5270_v29 = vadd.f32 %v7224_v20, %v8690_v31 }
 0x2c0   : > { %vm5299_vm10 = vcmp.gt.f32.partialorder %v5267_v23, 0.0  ;;  %v5331_v30 = vmul.f32 0.2, %v5267_v23  ;;  %v5268_v32 = vadd.f32 %v7225_v24, %v8690_v31 }
 0x2c1   : > { %v5365_v33 = vsel %vm5301_vm9, %v5269_v19, %v5333_v28  ;;  %vm5302_vm11 = vcmp.gt.f32.partialorder %v5270_v29, 0.0  ;;  %v5334_v34 = vmul.f32 0.2, %v5270_v29  ;;  %v6876_v35 = vpop.f32.mrb[12].mxu1 }
 0x2c2   : > { %5397 = vst [vmem:[%s8698_s30 + $0x50] sm:$0xff] %v5365_v33  ;;  %v5363_v36 = vsel %vm5299_vm10, %v5267_v23, %v5331_v30  ;;  %vm5300_vm12 = vcmp.gt.f32.partialorder %v5268_v32, 0.0  ;;  %v5332_v37 = vmul.f32 0.2, %v5268_v32  ;;  %v7196_v42 = vpop.f32.mrb[12].mxu0  ;;  %v2569_v43 = vpop.f32.mrb[13].mxu1 }
 0x2c3   : > { %5395 = vst [vmem:[%s8698_s30 + $0x40] sm:$0xff] %v5363_v36  ;;  %v5366_v44 = vsel %vm5302_vm11, %v5270_v29, %v5334_v34  ;;  %v7226_v45 = vadd.f32 %v7196_v42, %v6876_v35  ;;  %v5141_v46 = vpop.f32.mrb[13].mxu0  ;;  %v6877_v47 = vpop.f32.mrb[14].mxu1 }
 0x2c4   : > { %5398 = vst [vmem:[%s8698_s30 + $0x58] sm:$0xff] %v5366_v44  ;;  %v5364_v48 = vsel %vm5300_vm12, %v5268_v32, %v5332_v37  ;;  %v7227_v49 = vadd.f32 %v5141_v46, %v2569_v43  ;;  %v7197_v50 = vpop.f32.mrb[14].mxu0  ;;  %v2572_v51 = vpop.f32.mrb[15].mxu1 }
 0x2c5   : > { %5396 = vst [vmem:[%s8698_s30 + $0x48] sm:$0xff] %v5364_v48  ;;  %v5273_v56 = vadd.f32 %v7226_v45, %v8690_v31  ;;  %v7228_v57 = vadd.f32 %v7197_v50, %v6877_v47  ;;  %v5144_v58 = vpop.f32.mrb[15].mxu0 }
 0x2c6   : > { %v5271_v59 = vadd.f32 %v7227_v49, %v8690_v31  ;;  %v7229_v60 = vadd.f32 %v5144_v58, %v2572_v51 }
 0x2c7   : > { %vm5305_vm13 = vcmp.gt.f32.partialorder %v5273_v56, 0.0  ;;  %v5337_v61 = vmul.f32 0.2, %v5273_v56  ;;  %v5274_v62 = vadd.f32 %v7228_v57, %v8690_v31 }
 0x2c8   : > { %vm5303_vm14 = vcmp.gt.f32.partialorder %v5271_v59, 0.0  ;;  %v5335_v63 = vmul.f32 0.2, %v5271_v59  ;;  %v5272_v0 = vadd.f32 %v7229_v60, %v8690_v31 }
 0x2c9   : > { %v5369_v1 = vsel %vm5305_vm13, %v5273_v56, %v5337_v61  ;;  %vm5306_vm15 = vcmp.gt.f32.partialorder %v5274_v62, 0.0  ;;  %v5338_v8 = vmul.f32 0.2, %v5274_v62  ;;  %v6880_v9 = vpop.f32.mrb[16].mxu1 }
 0x2ca   : > { %5401 = vst [vmem:[%s8698_s30 + $0x70] sm:$0xff] %v5369_v1  ;;  %v5367_v22 = vsel %vm5303_vm14, %v5271_v59, %v5335_v63  ;;  %vm5304_vm0 = vcmp.gt.f32.partialorder %v5272_v0, 0.0  ;;  %v5336_v13 = vmul.f32 0.2, %v5272_v0  ;;  %v7200_v25 = vpop.f32.mrb[16].mxu0  ;;  %v2585_v26 = vpop.f32.mrb[17].mxu1 }
 0x2cb   : > { %5399 = vst [vmem:[%s8698_s30 + $0x60] sm:$0xff] %v5367_v22  ;;  %v5370_v38 = vsel %vm5306_vm15, %v5274_v62, %v5338_v8  ;;  %v7230_v27 = vadd.f32 %v7200_v25, %v6880_v9  ;;  %v5157_v39 = vpop.f32.mrb[17].mxu0  ;;  %v6881_v40 = vpop.f32.mrb[18].mxu1 }
 0x2cc   : > { %5402 = vst [vmem:[%s8698_s30 + $0x78] sm:$0xff] %v5370_v38  ;;  %v5368_v41 = vsel %vm5304_vm0, %v5272_v0, %v5336_v13  ;;  %v7231_v52 = vadd.f32 %v5157_v39, %v2585_v26  ;;  %v7201_v53 = vpop.f32.mrb[18].mxu0  ;;  %v2588_v54 = vpop.f32.mrb[19].mxu1 }
 0x2cd   : > { %5400 = vst [vmem:[%s8698_s30 + $0x68] sm:$0xff] %v5368_v41  ;;  %v5277_v55 = vadd.f32 %v7230_v27, %v8690_v31  ;;  %v7232_v2 = vadd.f32 %v7201_v53, %v6881_v40  ;;  %v5160_v3 = vpop.f32.mrb[19].mxu0 }
 0x2ce   : > { %v5275_v4 = vadd.f32 %v7231_v52, %v8690_v31  ;;  %v7233_v5 = vadd.f32 %v5160_v3, %v2588_v54 }
 0x2cf   : > { %vm5309_vm1 = vcmp.gt.f32.partialorder %v5277_v55, 0.0  ;;  %v5341_v6 = vmul.f32 0.2, %v5277_v55  ;;  %v5278_v7 = vadd.f32 %v7232_v2, %v8690_v31 }
 0x2d0   : > { %vm5307_vm2 = vcmp.gt.f32.partialorder %v5275_v4, 0.0  ;;  %v5339_v10 = vmul.f32 0.2, %v5275_v4  ;;  %v5276_v11 = vadd.f32 %v7233_v5, %v8690_v31 }
 0x2d1   : > { %v5373_v12 = vsel %vm5309_vm1, %v5277_v55, %v5341_v6  ;;  %vm5310_vm3 = vcmp.gt.f32.partialorder %v5278_v7, 0.0  ;;  %v5342_v14 = vmul.f32 0.2, %v5278_v7  ;;  %v6884_v15 = vpop.f32.mrb[20].mxu1 }
 0x2d2   : > { %5405 = vst [vmem:[%s8698_s30 + $0x90] sm:$0xff] %v5373_v12  ;;  %v5371_v16 = vsel %vm5307_vm2, %v5275_v4, %v5339_v10  ;;  %vm5308_vm4 = vcmp.gt.f32.partialorder %v5276_v11, 0.0  ;;  %v5340_v17 = vmul.f32 0.2, %v5276_v11  ;;  %v7204_v18 = vpop.f32.mrb[20].mxu0  ;;  %v2601_v19 = vpop.f32.mrb[21].mxu1 }
 0x2d3   : > { %5403 = vst [vmem:[%s8698_s30 + $0x80] sm:$0xff] %v5371_v16  ;;  %v5374_v20 = vsel %vm5310_vm3, %v5278_v7, %v5342_v14  ;;  %v7234_v21 = vadd.f32 %v7204_v18, %v6884_v15  ;;  %v5173_v23 = vpop.f32.mrb[21].mxu0  ;;  %v6885_v24 = vpop.f32.mrb[22].mxu1 }
 0x2d4   : > { %5406 = vst [vmem:[%s8698_s30 + $0x98] sm:$0xff] %v5374_v20  ;;  %v5372_v28 = vsel %vm5308_vm4, %v5276_v11, %v5340_v17  ;;  %v7235_v29 = vadd.f32 %v5173_v23, %v2601_v19  ;;  %v7205_v30 = vpop.f32.mrb[22].mxu0  ;;  %v2604_v32 = vpop.f32.mrb[23].mxu1 }
 0x2d5   : > { %5404 = vst [vmem:[%s8698_s30 + $0x88] sm:$0xff] %v5372_v28  ;;  %v5281_v33 = vadd.f32 %v7234_v21, %v8690_v31  ;;  %v7236_v34 = vadd.f32 %v7205_v30, %v6885_v24  ;;  %v5176_v35 = vpop.f32.mrb[23].mxu0 }
 0x2d6   : > { %v5279_v36 = vadd.f32 %v7235_v29, %v8690_v31  ;;  %v7237_v37 = vadd.f32 %v5176_v35, %v2604_v32 }
 0x2d7   : > { %vm5313_vm5 = vcmp.gt.f32.partialorder %v5281_v33, 0.0  ;;  %v5345_v42 = vmul.f32 0.2, %v5281_v33  ;;  %v5282_v43 = vadd.f32 %v7236_v34, %v8690_v31 }
 0x2d8   : > { %vm5311_vm6 = vcmp.gt.f32.partialorder %v5279_v36, 0.0  ;;  %v5343_v44 = vmul.f32 0.2, %v5279_v36  ;;  %v5280_v45 = vadd.f32 %v7237_v37, %v8690_v31 }
 0x2d9   : > { %v5377_v46 = vsel %vm5313_vm5, %v5281_v33, %v5345_v42  ;;  %vm5314_vm7 = vcmp.gt.f32.partialorder %v5282_v43, 0.0  ;;  %v5346_v47 = vmul.f32 0.2, %v5282_v43  ;;  %v6888_v48 = vpop.f32.mrb[24].mxu1 }
 0x2da   : > { %5409 = vst [vmem:[%s8698_s30 + $0xb0] sm:$0xff] %v5377_v46  ;;  %v5375_v49 = vsel %vm5311_vm6, %v5279_v36, %v5343_v44  ;;  %vm5312_vm8 = vcmp.gt.f32.partialorder %v5280_v45, 0.0  ;;  %v5344_v50 = vmul.f32 0.2, %v5280_v45  ;;  %v7208_v51 = vpop.f32.mrb[24].mxu0  ;;  %v2617_v56 = vpop.f32.mrb[25].mxu1 }
 0x2db   : > { %5407 = vst [vmem:[%s8698_s30 + $0xa0] sm:$0xff] %v5375_v49  ;;  %v5378_v57 = vsel %vm5314_vm7, %v5282_v43, %v5346_v47  ;;  %v7238_v58 = vadd.f32 %v7208_v51, %v6888_v48  ;;  %v5189_v59 = vpop.f32.mrb[25].mxu0  ;;  %v6889_v60 = vpop.f32.mrb[26].mxu1 }
 0x2dc   : > { %5410 = vst [vmem:[%s8698_s30 + $0xb8] sm:$0xff] %v5378_v57  ;;  %v5376_v61 = vsel %vm5312_vm8, %v5280_v45, %v5344_v50  ;;  %v7239_v62 = vadd.f32 %v5189_v59, %v2617_v56  ;;  %v7209_v63 = vpop.f32.mrb[26].mxu0  ;;  %v2620_v0 = vpop.f32.mrb[27].mxu1 }
 0x2dd   : > { %5408 = vst [vmem:[%s8698_s30 + $0xa8] sm:$0xff] %v5376_v61  ;;  %v5285_v1 = vadd.f32 %v7238_v58, %v8690_v31  ;;  %v7240_v8 = vadd.f32 %v7209_v63, %v6889_v60  ;;  %v5192_v9 = vpop.f32.mrb[27].mxu0 }
 0x2de   : > { %v5283_v22 = vadd.f32 %v7239_v62, %v8690_v31  ;;  %v7241_v13 = vadd.f32 %v5192_v9, %v2620_v0 }
 0x2df   : > { %vm5317_vm9 = vcmp.gt.f32.partialorder %v5285_v1, 0.0  ;;  %v5349_v25 = vmul.f32 0.2, %v5285_v1  ;;  %v5286_v26 = vadd.f32 %v7240_v8, %v8690_v31 }
 0x2e0   : > { %vm5315_vm10 = vcmp.gt.f32.partialorder %v5283_v22, 0.0  ;;  %v5347_v38 = vmul.f32 0.2, %v5283_v22  ;;  %v5284_v27 = vadd.f32 %v7241_v13, %v8690_v31 }
 0x2e1   : > { %v5381_v39 = vsel %vm5317_vm9, %v5285_v1, %v5349_v25  ;;  %vm5318_vm11 = vcmp.gt.f32.partialorder %v5286_v26, 0.0  ;;  %v5350_v40 = vmul.f32 0.2, %v5286_v26  ;;  %v6892_v41 = vpop.f32.mrb[28].mxu1 }
 0x2e2   : > { %5413 = vst [vmem:[%s8698_s30 + $0xd0] sm:$0xff] %v5381_v39  ;;  %v5379_v52 = vsel %vm5315_vm10, %v5283_v22, %v5347_v38  ;;  %vm5316_vm12 = vcmp.gt.f32.partialorder %v5284_v27, 0.0  ;;  %v5348_v53 = vmul.f32 0.2, %v5284_v27  ;;  %v7212_v54 = vpop.f32.mrb[28].mxu0  ;;  %v2633_v55 = vpop.f32.mrb[29].mxu1 }
 0x2e3   : > { %5411 = vst [vmem:[%s8698_s30 + $0xc0] sm:$0xff] %v5379_v52  ;;  %v5382_v2 = vsel %vm5318_vm11, %v5286_v26, %v5350_v40  ;;  %v7242_v3 = vadd.f32 %v7212_v54, %v6892_v41  ;;  %v5205_v4 = vpop.f32.mrb[29].mxu0  ;;  %v6893_v5 = vpop.f32.mrb[30].mxu1 }
 0x2e4   : > { %5414 = vst [vmem:[%s8698_s30 + $0xd8] sm:$0xff] %v5382_v2  ;;  %v5380_v6 = vsel %vm5316_vm12, %v5284_v27, %v5348_v53  ;;  %v7243_v7 = vadd.f32 %v5205_v4, %v2633_v55  ;;  %v7213_v10 = vpop.f32.mrb[30].mxu0  ;;  %v2636_v11 = vpop.f32.mrb[31].mxu1 }
 0x2e5   : > { %5412 = vst [vmem:[%s8698_s30 + $0xc8] sm:$0xff] %v5380_v6  ;;  %v5289_v12 = vadd.f32 %v7242_v3, %v8690_v31  ;;  %v7244_v14 = vadd.f32 %v7213_v10, %v6893_v5  ;;  %v5208_v15 = vpop.f32.mrb[31].mxu0 }
 0x2e6   : > { %v5287_v16 = vadd.f32 %v7243_v7, %v8690_v31  ;;  %v7245_v17 = vadd.f32 %v5208_v15, %v2636_v11 }
 0x2e7   : > { %vm5321_vm13 = vcmp.gt.f32.partialorder %v5289_v12, 0.0  ;;  %v5353_v18 = vmul.f32 0.2, %v5289_v12  ;;  %v5290_v19 = vadd.f32 %v7244_v14, %v8690_v31 }
 0x2e8   : > { %vm5319_vm14 = vcmp.gt.f32.partialorder %v5287_v16, 0.0  ;;  %v5351_v20 = vmul.f32 0.2, %v5287_v16  ;;  %v5288_v21 = vadd.f32 %v7245_v17, %v8690_v31 }
 0x2e9   : > { %v5385_v23 = vsel %vm5321_vm13, %v5289_v12, %v5353_v18  ;;  %vm5322_vm15 = vcmp.gt.f32.partialorder %v5290_v19, 0.0  ;;  %v5354_v24 = vmul.f32 0.2, %v5290_v19 }
 0x2ea   : > { %5417 = vst [vmem:[%s8698_s30 + $0xf0] sm:$0xff] %v5385_v23  ;;  %v5383_v28 = vsel %vm5319_vm14, %v5287_v16, %v5351_v20  ;;  %vm5320_vm0 = vcmp.gt.f32.partialorder %v5288_v21, 0.0  ;;  %v5352_v29 = vmul.f32 0.2, %v5288_v21 }
 0x2eb   : > { %5415 = vst [vmem:[%s8698_s30 + $0xe0] sm:$0xff] %v5383_v28  ;;  %v5386_v30 = vsel %vm5322_vm15, %v5290_v19, %v5354_v24 }
 0x2ec   : > { %5418 = vst [vmem:[%s8698_s30 + $0xf8] sm:$0xff] %v5386_v30  ;;  %v5384_v32 = vsel %vm5320_vm0, %v5288_v21, %v5352_v29 }
 0x2ed   : > { %5416 = vst [vmem:[%s8698_s30 + $0xe8] sm:$0xff] %v5384_v32 }
 0x2ee PF: > { %s13_s12 = sadd.s32 1, %s7773_s12  }
 0x2ef   : > { %p10_p4 = scmp.ge.s32.totalorder %s13_s12, 4  }
 0x2f1   :  { %12 = sbr.rel (!%p10_p4) target bundleno = 1 (0x1), region = 69 }

// kernel: discriminator_forward.5
= control target key start
LH: loop header
LB: loop body
LE: loop exit
PB: predicated region body
PF: predicated region fallthrough
CT: control target
= control target key end

     0   :  { %s4628_s20 = smov 0   ;;  %s5695_s0 = inlined_call_operand.vmem [shape: f32[2,4,9,9,128], index: 0, kind: input, shape index: {}]   ;;  %s5696_s1 = inlined_call_operand.vmem [shape: bf16[2048,256], index: 1, kind: input, shape index: {}]   ;;  %s5697_s2 = inlined_call_operand.vmem [shape: f32[1,256], index: 2, kind: input, shape index: {}]   ;;  %s5698_s3 = inlined_call_operand.vmem [shape: f32[64,256], index: 3, kind: input, shape index: {}]   ;;  %s5699_s4 = inlined_call_operand.<no memory space> [shape: f32[1,1], index: 4, kind: input, shape index: {}]   ;;  %s5700_s5 = inlined_call_operand.vmem [shape: f32[2,8,128], index: 5, kind: output, shape index: {}]  }
   0x1   :  { %v10_v0 = vstv %s5699_s4 }
   0x2   :  { %11 = vst [vmem:[#allocation2] sm:$0x1] %v10_v0 }
   0x3 LB: > { %s3569_s21 = sadd.s32 4294967295, %s4592_s20   ;;  %p3573_p0 = scmp.ge.s32.totalorder %s4592_s20, 1  ;;  %s4592_s20 = sphi %s4628_s20, %s17_s20  }
   0x4   : > { %p189_p1 = scmp.lt.s32.totalorder %s4592_s20, 3 }
   0x6   : > { %p190_p2 = pnand %p3573_p0, %p189_p1 }
   0x7   : > { %v4198_v1 = vld [vmem:[%s5696_s1 + $0x84] ss:$8 sps:$4 sm:$0xff] (!%p190_p2)   ;;  %v4594_v3 = vmov (!%p190_p2), 0   ;;  %v4202_v4 = vld [vmem:[%s5696_s1 + $0x80] ss:$8 sps:$4 sm:$0xff] (!%p190_p2)   ;;  %p216_p3 = scmp.lt.s32.totalorder (!%p190_p2), %s3569_s21, 1 }
   0x8   : > { %193 = sbr.rel (%p190_p2) target bundleno = 831 (0x33f), region = 40  ;;  %v4200_v2 = vld [vmem:[%s5696_s1 + $0x404] ss:$8 sps:$4 sm:$0xff] (!%p190_p2)   ;;  %395 = vmatprep.mubr.bf16.mxu1 (!%p190_p2), %v4594_v3  ;;  %1914 = vmatprep.mubr.bf16.mxu0 (!%p190_p2), %v4594_v3  ;;  %v4203_v5 = vld [vmem:[%s5696_s1 + $0x400] ss:$8 sps:$4 sm:$0xff] (!%p190_p2)  }
   0x9   : > { %363 = vmatprep.subr.bf16.mxu1 (!%p190_p2), %v4198_v1  ;;  %4197 = vset.pattern.permute.xlu0 (!%p190_p2), %v4594_v3  ;;  %v4204_v6 = vld [vmem:[%s5696_s1 + $0x94] ss:$8 sps:$4 sm:$0xff] (!%p190_p2)   ;;  %v4208_v8 = vld [vmem:[%s5696_s1 + $0x90] ss:$8 sps:$4 sm:$0xff] (!%p190_p2)   ;;  %v4210_v10 = vld [vmem:[%s5696_s1 + $0xa4] ss:$8 sps:$4 sm:$0xff] (!%p190_p2)  }
   0xa   : > { %1882 = vmatprep.subr.bf16.mxu0 (!%p190_p2), %v4200_v2  ;;  %364 = vmatpush1.bf16.msra.mxu1 (!%p190_p2), %v4202_v4  ;;  %v4206_v7 = vld [vmem:[%s5696_s1 + $0x414] ss:$8 sps:$4 sm:$0xff] (!%p190_p2)   ;;  %v4209_v9 = vld [vmem:[%s5696_s1 + $0x410] ss:$8 sps:$4 sm:$0xff] (!%p190_p2)   ;;  %v4212_v11 = vld [vmem:[%s5696_s1 + $0x424] ss:$8 sps:$4 sm:$0xff] (!%p190_p2)  }
   0xb   : > { %1883 = vmatpush1.bf16.msra.mxu0 (!%p190_p2), %v4203_v5  ;;  %365 = vmatprep.subr.bf16.mxu1 (!%p190_p2), %v4204_v6  ;;  %v4214_v12 = vld [vmem:[%s5696_s1 + $0xa0] ss:$8 sps:$4 sm:$0xff] (!%p190_p2)   ;;  %v4216_v14 = vld [vmem:[%s5696_s1 + $0xb4] ss:$8 sps:$4 sm:$0xff] (!%p190_p2)   ;;  %v4220_v16 = vld [vmem:[%s5696_s1 + $0xb0] ss:$8 sps:$4 sm:$0xff] (!%p190_p2)  }
   0xc   : > { %1884 = vmatprep.subr.bf16.mxu0 (!%p190_p2), %v4206_v7  ;;  %v4215_v13 = vld [vmem:[%s5696_s1 + $0x420] ss:$8 sps:$4 sm:$0xff] (!%p190_p2)   ;;  %v4218_v15 = vld [vmem:[%s5696_s1 + $0x434] ss:$8 sps:$4 sm:$0xff] (!%p190_p2)   ;;  %v4221_v17 = vld [vmem:[%s5696_s1 + $0x430] ss:$8 sps:$4 sm:$0xff] (!%p190_p2)  }
   0xd   : > { %v4222_v18 = vld [vmem:[%s5696_s1 + $0xc4] ss:$8 sps:$4 sm:$0xff] (!%p190_p2)   ;;  %v4226_v20 = vld [vmem:[%s5696_s1 + $0xc0] ss:$8 sps:$4 sm:$0xff] (!%p190_p2)   ;;  %v4228_v22 = vld [vmem:[%s5696_s1 + $0xd4] ss:$8 sps:$4 sm:$0xff] (!%p190_p2)  }
   0xe   : > { %366 = vmatpush1.bf16.msra.mxu1 (!%p190_p2), %v4208_v8  ;;  %v4224_v19 = vld [vmem:[%s5696_s1 + $0x444] ss:$8 sps:$4 sm:$0xff] (!%p190_p2)   ;;  %v4227_v21 = vld [vmem:[%s5696_s1 + $0x440] ss:$8 sps:$4 sm:$0xff] (!%p190_p2)   ;;  %v4230_v23 = vld [vmem:[%s5696_s1 + $0x454] ss:$8 sps:$4 sm:$0xff] (!%p190_p2)  }
   0xf   : > { %1885 = vmatpush1.bf16.msra.mxu0 %v4209_v9  ;;  %367 = vmatprep.subr.bf16.mxu1 %v4210_v10  ;;  %s5702_s21 = smov (!%p216_p3, %s3569_s21), 1  ;;  %v4232_v24 = vld [vmem:[%s5696_s1 + $0xd0] ss:$8 sps:$4 sm:$0xff]   ;;  %v4234_v26 = vld [vmem:[%s5696_s1 + $0xe4] ss:$8 sps:$4 sm:$0xff]  }
  0x10   : > { %1886 = vmatprep.subr.bf16.mxu0 %v4212_v11  ;;  %v4233_v25 = vld [vmem:[%s5696_s1 + $0x450] ss:$8 sps:$4 sm:$0xff]   ;;  %s4187_s22 = smul.u32 576, %s5702_s21  ;;  %v4236_v27 = vld [vmem:[%s5696_s1 + $0x464] ss:$8 sps:$4 sm:$0xff]   ;;  %s3575_s13 = sshll.u32 %s5702_s21, 3 }
  0x11   : > { %v4238_v28 = vld [vmem:[%s5696_s1 + $0xe0] ss:$8 sps:$4 sm:$0xff]   ;;  %v4240_v30 = vld [vmem:[%s5696_s1 + $0xf4] ss:$8 sps:$4 sm:$0xff]   ;;  %v4244_v32 = vld [vmem:[%s5696_s1 + $0xf0] ss:$8 sps:$4 sm:$0xff]   ;;  %s224_s16 = scalar_lea.vmem %s5700_s5, %s3575_s13 }
  0x12   : > { %368 = vmatpush1.bf16.msra.mxu1 %v4214_v12  ;;  %v4239_v29 = vld [vmem:[%s5696_s1 + $0x460] ss:$8 sps:$4 sm:$0xff]   ;;  %s4736_s9 = scalar_lea.vmem %s5695_s0, %s4187_s22  ;;  %v4242_v31 = vld [vmem:[%s5696_s1 + $0x474] ss:$8 sps:$4 sm:$0xff]   ;;  %v4245_v33 = vld [vmem:[%s5696_s1 + $0x470] ss:$8 sps:$4 sm:$0xff]  }
  0x13   : > { %1887 = vmatpush1.bf16.msra.mxu0 %v4215_v13  ;;  %369 = vmatprep.subr.bf16.mxu1 %v4216_v14  ;;  %v3576_v34 = vld [vmem:[%s4736_s9 + $0x90] sm:$0xff]  ;;  %v4749_v35 = vld [vmem:[%s4736_s9 + $0xa0] sm:$0xff] }
  0x14   : > { %1888 = vmatprep.subr.bf16.mxu0 %v4218_v15  ;;  %v4752_v36 = vld [vmem:[%s4736_s9 + $0x10] sm:$0xff]  ;;  %v4755_v37 = vld [vmem:[%s4736_s9 + $0x20] sm:$0xff]  ;;  %v263_v40 = vpack.c.bf16 %v4749_v35, %v3576_v34 }
  0x15   : > { %v4248_v38 = vld [vmem:[%s5696_s1 + $0x4] ss:$8 sps:$4 sm:$0xff]   ;;  %v4246_v41 = vld [vmem:[%s5696_s1] ss:$8 sps:$4 sm:$0xff]   ;;  %v1782_v42 = vpack.c.bf16 %v4755_v37, %v4752_v36  ;;  %v4254_v44 = vld [vmem:[%s5696_s1 + $0x14] ss:$8 sps:$4 sm:$0xff]  }
  0x16   : > { %370 = vmatpush1.bf16.msra.mxu1 %v4220_v16  ;;  %v4251_v39 = vld [vmem:[%s5696_s1 + $0x484] ss:$8 sps:$4 sm:$0xff]   ;;  %v4249_v43 = vld [vmem:[%s5696_s1 + $0x480] ss:$8 sps:$4 sm:$0xff]   ;;  %v4257_v45 = vld [vmem:[%s5696_s1 + $0x494] ss:$8 sps:$4 sm:$0xff]  }
  0x17   : > { %1889 = vmatpush1.bf16.msra.mxu0 %v4221_v17  ;;  %371 = vmatprep.subr.bf16.mxu1 %v4222_v18  ;;  %v4252_v46 = vld [vmem:[%s5696_s1 + $0x10] ss:$8 sps:$4 sm:$0xff]   ;;  %v4788_v49 = vld [vmem:[%s4736_s9 + $0xc0] sm:$0xff]  ;;  %v4266_v58 = vld [vmem:[%s5696_s1 + $0x34] ss:$8 sps:$4 sm:$0xff]  }
  0x18   : > { %1890 = vmatprep.subr.bf16.mxu0 %v4224_v19  ;;  %v4255_v47 = vld [vmem:[%s5696_s1 + $0x490] ss:$8 sps:$4 sm:$0xff]   ;;  %v4260_v50 = vld [vmem:[%s5696_s1 + $0x24] ss:$8 sps:$4 sm:$0xff]   ;;  %v4258_v55 = vld [vmem:[%s5696_s1 + $0x20] ss:$8 sps:$4 sm:$0xff]  }
  0x19   : > { %v4785_v48 = vld [vmem:[%s4736_s9 + $0xb0] sm:$0xff]  ;;  %v4797_v52 = vld [vmem:[%s4736_s9 + $0x40] sm:$0xff] }
  0x1a   : > { %372 = vmatpush1.bf16.msra.mxu1 %v4226_v20  ;;  %v4794_v51 = vld [vmem:[%s4736_s9 + $0x30] sm:$0xff]  ;;  %v4263_v53 = vld [vmem:[%s5696_s1 + $0x4a4] ss:$8 sps:$4 sm:$0xff]   ;;  %v264_v54 = vpack.c.bf16 %v4788_v49, %v4785_v48  ;;  %v4261_v57 = vld [vmem:[%s5696_s1 + $0x4a0] ss:$8 sps:$4 sm:$0xff]  }
  0x1b   : > { %1891 = vmatpush1.bf16.msra.mxu0 %v4227_v21  ;;  %373 = vmatprep.subr.bf16.mxu1 %v4228_v22  ;;  %v1783_v56 = vpack.c.bf16 %v4797_v52, %v4794_v51  ;;  %v4269_v59 = vld [vmem:[%s5696_s1 + $0x4b4] ss:$8 sps:$4 sm:$0xff]   ;;  %v4264_v60 = vld [vmem:[%s5696_s1 + $0x30] ss:$8 sps:$4 sm:$0xff]   ;;  %v4830_v63 = vld [vmem:[%s4736_s9 + $0xe0] sm:$0xff] }
  0x1c   : > { %1892 = vmatprep.subr.bf16.mxu0 %v4230_v23  ;;  %v4267_v61 = vld [vmem:[%s5696_s1 + $0x4b0] ss:$8 sps:$4 sm:$0xff]   ;;  %v4272_v0 = vld [vmem:[%s5696_s1 + $0x44] ss:$8 sps:$4 sm:$0xff]   ;;  %v4270_v6 = vld [vmem:[%s5696_s1 + $0x40] ss:$8 sps:$4 sm:$0xff]  }
  0x1d   : > { %v4827_v62 = vld [vmem:[%s4736_s9 + $0xd0] sm:$0xff]  ;;  %v4839_v2 = vld [vmem:[%s4736_s9 + $0x60] sm:$0xff] }
  0x1e   : > { %374 = vmatpush1.bf16.msra.mxu1 %v4232_v24  ;;  %v4836_v1 = vld [vmem:[%s4736_s9 + $0x50] sm:$0xff]  ;;  %v4275_v4 = vld [vmem:[%s5696_s1 + $0x4c4] ss:$8 sps:$4 sm:$0xff]   ;;  %v265_v5 = vpack.c.bf16 %v4830_v63, %v4827_v62  ;;  %v4273_v8 = vld [vmem:[%s5696_s1 + $0x4c0] ss:$8 sps:$4 sm:$0xff]  }
  0x1f   : > { %1893 = vmatpush1.bf16.msra.mxu0 %v4233_v25  ;;  %375 = vmatprep.subr.bf16.mxu1 %v4234_v26  ;;  %v1784_v7 = vpack.c.bf16 %v4839_v2, %v4836_v1  ;;  %v4278_v9 = vld [vmem:[%s5696_s1 + $0x54] ss:$8 sps:$4 sm:$0xff]   ;;  %v4276_v11 = vld [vmem:[%s5696_s1 + $0x50] ss:$8 sps:$4 sm:$0xff]   ;;  %v4872_v14 = vld [vmem:[%s4736_s9 + $0x100] sm:$0xff] }
  0x20   : > { %1894 = vmatprep.subr.bf16.mxu0 %v4236_v27  ;;  %v4281_v10 = vld [vmem:[%s5696_s1 + $0x4d4] ss:$8 sps:$4 sm:$0xff]   ;;  %v4279_v12 = vld [vmem:[%s5696_s1 + $0x4d0] ss:$8 sps:$4 sm:$0xff]   ;;  %v3759_v16 = vld [vmem:[%s4736_s9 + $0x80] sm:$0xff] }
  0x21   : > { %v4869_v13 = vld [vmem:[%s4736_s9 + $0xf0] sm:$0xff]  ;;  %v4284_v17 = vld [vmem:[%s5696_s1 + $0x64] ss:$8 sps:$4 sm:$0xff]   ;;  %v4282_v20 = vld [vmem:[%s5696_s1 + $0x60] ss:$8 sps:$4 sm:$0xff]  }
  0x22   : > { %376 = vmatpush1.bf16.msra.mxu1 %v4238_v28  ;;  %v4875_v15 = vld [vmem:[%s4736_s9 + $0x70] sm:$0xff]  ;;  %v4287_v18 = vld [vmem:[%s5696_s1 + $0x4e4] ss:$8 sps:$4 sm:$0xff]   ;;  %v266_v19 = vpack.c.bf16 %v4872_v14, %v4869_v13  ;;  %v4285_v22 = vld [vmem:[%s5696_s1 + $0x4e0] ss:$8 sps:$4 sm:$0xff]  }
  0x23   : > { %1895 = vmatpush1.bf16.msra.mxu0 %v4239_v29  ;;  %377 = vmatprep.subr.bf16.mxu1 %v4240_v30  ;;  %v1785_v21 = vpack.c.bf16 %v3759_v16, %v4875_v15  ;;  %v4290_v23 = vld [vmem:[%s5696_s1 + $0x74] ss:$8 sps:$4 sm:$0xff]   ;;  %v4288_v25 = vld [vmem:[%s5696_s1 + $0x70] ss:$8 sps:$4 sm:$0xff]   ;;  %v226_v27 = vld [vmem:[%s4736_s9] sm:$0xff] }
  0x24   : > { %1896 = vmatprep.subr.bf16.mxu0 %v4242_v31  ;;  %v4293_v24 = vld [vmem:[%s5696_s1 + $0x4f4] ss:$8 sps:$4 sm:$0xff]   ;;  %v4291_v26 = vld [vmem:[%s5696_s1 + $0x4f0] ss:$8 sps:$4 sm:$0xff]   ;;  %v4296_v28 = vld [vmem:[%s5696_s1 + $0x104] ss:$8 sps:$4 sm:$0xff]   ;;  %v234_v30 = vpack.c.bf16 %v4752_v36, %v226_v27 }
  0x25   : > { %v4299_v29 = vld [vmem:[%s5696_s1 + $0x504] ss:$8 sps:$4 sm:$0xff]   ;;  %v4294_v31 = vld [vmem:[%s5696_s1 + $0x100] ss:$8 sps:$4 sm:$0xff]   ;;  %v4302_v34 = vld [vmem:[%s5696_s1 + $0x114] ss:$8 sps:$4 sm:$0xff]  }
  0x26   : > { %378 = vmatpush1.bf16.msra.mxu1 %v4244_v32  ;;  %v1980_v32 = vpack.c.bf16 %v4785_v48, %v4749_v35  ;;  %v4305_v36 = vld [vmem:[%s5696_s1 + $0x514] ss:$8 sps:$4 sm:$0xff]   ;;  %v4300_v35 = vld [vmem:[%s5696_s1 + $0x110] ss:$8 sps:$4 sm:$0xff]   ;;  %v4320_v48 = vld [vmem:[%s5696_s1 + $0x144] ss:$8 sps:$4 sm:$0xff]  }
  0x27   : > { %1897 = vmatpush1.bf16.msra.mxu0 %v4245_v33  ;;  %516 = vmatprep.subr.bf16.mxu1 %v4248_v38  ;;  %v4297_v33 = vld [vmem:[%s5696_s1 + $0x500] ss:$8 sps:$4 sm:$0xff]   ;;  %v4303_v38 = vld [vmem:[%s5696_s1 + $0x510] ss:$8 sps:$4 sm:$0xff]   ;;  %v4353_v16 = vld [vmem:[%s5696_s1 + $0x594] ss:$8 sps:$4 sm:$0xff]  }
  0x28   : > { %2080 = vmatprep.subr.bf16.mxu0 %v4251_v39  ;;  %v4308_v39 = vld [vmem:[%s5696_s1 + $0x124] ss:$8 sps:$4 sm:$0xff]   ;;  %v4362_v27 = vld [vmem:[%s5696_s1 + $0x1b4] ss:$8 sps:$4 sm:$0xff]  }
  0x29   : > { %396 = vmatmul.mubr.bf16.vlgmr.msra.gmra.mrb[0].mxu1 %v263_v40  ;;  %v4311_v40 = vld [vmem:[%s5696_s1 + $0x524] ss:$8 sps:$4 sm:$0xff]  }
  0x2a   : > { %1915 = vmatmul.mubr.bf16.vlgmr.msra.gmra.mrb[0].mxu0 %v1782_v42  ;;  %517 = vmatpush1.bf16.msra.mxu1 %v4246_v41  ;;  %v235_v41 = vpack.c.bf16 %v4794_v51, %v4755_v37  ;;  %v4306_v42 = vld [vmem:[%s5696_s1 + $0x120] ss:$8 sps:$4 sm:$0xff]   ;;  %v4317_v37 = vld [vmem:[%s5696_s1 + $0x534] ss:$8 sps:$4 sm:$0xff]  }
  0x2b   : > { %2081 = vmatpush1.bf16.msra.mxu0 %v4249_v43  ;;  %518 = vmatprep.subr.bf16.mxu1 %v4254_v44  ;;  %v1981_v43 = vpack.c.bf16 %v4827_v62, %v4788_v49  ;;  %v4309_v44 = vld [vmem:[%s5696_s1 + $0x520] ss:$8 sps:$4 sm:$0xff]   ;;  %v4323_v49 = vld [vmem:[%s5696_s1 + $0x544] ss:$8 sps:$4 sm:$0xff]  }
  0x2c   : > { %2082 = vmatprep.subr.bf16.mxu0 %v4257_v45  ;;  %405 = vmatprep.mubr.bf16.mxu1 %v4594_v3  ;;  %v4314_v45 = vld [vmem:[%s5696_s1 + $0x134] ss:$8 sps:$4 sm:$0xff]   ;;  %v4318_v51 = vld [vmem:[%s5696_s1 + $0x140] ss:$8 sps:$4 sm:$0xff]  }
  0x2d   : > { %1924 = vmatprep.mubr.bf16.mxu0 %v4594_v3 }
  0x2e   : > { %519 = vmatpush1.bf16.msra.mxu1 %v4252_v46  ;;  %v4312_v46 = vld [vmem:[%s5696_s1 + $0x130] ss:$8 sps:$4 sm:$0xff]  }
  0x2f   : > { %2083 = vmatpush1.bf16.msra.mxu0 %v4255_v47  ;;  %520 = vmatprep.subr.bf16.mxu1 %v4260_v50  ;;  %v4315_v47 = vld [vmem:[%s5696_s1 + $0x530] ss:$8 sps:$4 sm:$0xff]   ;;  %v236_v50 = vpack.c.bf16 %v4836_v1, %v4797_v52  ;;  %v4329_v52 = vld [vmem:[%s5696_s1 + $0x554] ss:$8 sps:$4 sm:$0xff]  }
  0x30   : > { %2084 = vmatprep.subr.bf16.mxu0 %v4263_v53  ;;  %v1982_v53 = vpack.c.bf16 %v4869_v13, %v4830_v63  ;;  %v4330_v63 = vld [vmem:[%s5696_s1 + $0x160] ss:$8 sps:$4 sm:$0xff]   ;;  %v4338_v1 = vld [vmem:[%s5696_s1 + $0x174] ss:$8 sps:$4 sm:$0xff]  }
  0x31   : > { %406 = vmatmul.mubr.bf16.gmra.mrb[4].mxu1 %v264_v54  ;;  %v4321_v54 = vld [vmem:[%s5696_s1 + $0x540] ss:$8 sps:$4 sm:$0xff]  }
  0x32   : > { %1925 = vmatmul.mubr.bf16.gmra.mrb[4].mxu0 %v1783_v56  ;;  %521 = vmatpush1.bf16.msra.mxu1 %v4258_v55  ;;  %v4326_v55 = vld [vmem:[%s5696_s1 + $0x154] ss:$8 sps:$4 sm:$0xff]   ;;  %v4324_v56 = vld [vmem:[%s5696_s1 + $0x150] ss:$8 sps:$4 sm:$0xff]   ;;  %v4342_v13 = vld [vmem:[%s5696_s1 + $0x180] ss:$8 sps:$4 sm:$0xff]  }
  0x33   : > { %2085 = vmatpush1.bf16.msra.mxu0 %v4261_v57  ;;  %522 = vmatprep.subr.bf16.mxu1 %v4266_v58  ;;  %v4327_v57 = vld [vmem:[%s5696_s1 + $0x550] ss:$8 sps:$4 sm:$0xff]  }
  0x34   : > { %2086 = vmatprep.subr.bf16.mxu0 %v4269_v59  ;;  %415 = vmatprep.mubr.bf16.mxu1 %v4594_v3  ;;  %v3783_v58 = vld [vmem:[%s4736_s9 + $0x110] sm:$0xff]  ;;  %v4332_v59 = vld [vmem:[%s5696_s1 + $0x164] ss:$8 sps:$4 sm:$0xff]  }
  0x35   : > { %1934 = vmatprep.mubr.bf16.mxu0 %v4594_v3  ;;  %v1983_v62 = vpack.c.bf16 %v3783_v58, %v4872_v14  ;;  %v4345_v14 = vld [vmem:[%s5696_s1 + $0x580] ss:$8 sps:$4 sm:$0xff]   ;;  %v3825_v58 = vld [vmem:[%s4736_s9 + $0xb1] sm:$0xff] }
  0x36   : > { %523 = vmatpush1.bf16.msra.mxu1 %v4264_v60  ;;  %v4335_v60 = vld [vmem:[%s5696_s1 + $0x564] ss:$8 sps:$4 sm:$0xff]  }
  0x37   : > { %2087 = vmatpush1.bf16.msra.mxu0 %v4267_v61  ;;  %524 = vmatprep.subr.bf16.mxu1 %v4272_v0  ;;  %v237_v61 = vpack.c.bf16 %v4875_v15, %v4839_v2  ;;  %v4333_v0 = vld [vmem:[%s5696_s1 + $0x560] ss:$8 sps:$4 sm:$0xff]   ;;  %v4341_v2 = vld [vmem:[%s5696_s1 + $0x574] ss:$8 sps:$4 sm:$0xff]  }
  0x38   : > { %2088 = vmatprep.subr.bf16.mxu0 %v4275_v4  ;;  %v4336_v4 = vld [vmem:[%s5696_s1 + $0x170] ss:$8 sps:$4 sm:$0xff]   ;;  %v4350_v15 = vld [vmem:[%s5696_s1 + $0x194] ss:$8 sps:$4 sm:$0xff]  }
  0x39   : > { %416 = vmatmul.mubr.bf16.gmra.mrb[8].mxu1 %v265_v5  ;;  %v4339_v5 = vld [vmem:[%s5696_s1 + $0x570] ss:$8 sps:$4 sm:$0xff]  }
  0x3a   : > { %1935 = vmatmul.mubr.bf16.gmra.mrb[8].mxu0 %v1784_v7  ;;  %525 = vmatpush1.bf16.msra.mxu1 %v4270_v6  ;;  %v589_v6 = vld [vmem:[%s4736_s9 + $0x1] sm:$0xff]  ;;  %v590_v7 = vld [vmem:[%s4736_s9 + $0x11] sm:$0xff] }
  0x3b   : > { %2089 = vmatpush1.bf16.msra.mxu0 %v4273_v8  ;;  %526 = vmatprep.subr.bf16.mxu1 %v4278_v9  ;;  %v4344_v8 = vld [vmem:[%s5696_s1 + $0x184] ss:$8 sps:$4 sm:$0xff]  }
  0x3c   : > { %2090 = vmatprep.subr.bf16.mxu0 %v4281_v10  ;;  %425 = vmatprep.mubr.bf16.mxu1 %v4594_v3  ;;  %v3801_v9 = vld [vmem:[%s4736_s9 + $0x21] sm:$0xff] }
  0x3d   : > { %1944 = vmatprep.mubr.bf16.mxu0 %v4594_v3  ;;  %v4347_v10 = vld [vmem:[%s5696_s1 + $0x584] ss:$8 sps:$4 sm:$0xff]  }
  0x3e   : > { %527 = vmatpush1.bf16.msra.mxu1 %v4276_v11  ;;  %v597_v11 = vpack.c.bf16 %v590_v7, %v589_v6  ;;  %v4404_v6 = vld [vmem:[%s5696_s1 + $0x224] ss:$8 sps:$4 sm:$0xff]  }
  0x3f   : > { %2091 = vmatpush1.bf16.msra.mxu0 %v4279_v12  ;;  %528 = vmatprep.subr.bf16.mxu1 %v4284_v17  ;;  %v2177_v12 = vpack.c.bf16 %v3801_v9, %v590_v7  ;;  %v4348_v17 = vld [vmem:[%s5696_s1 + $0x190] ss:$8 sps:$4 sm:$0xff]  }
  0x40   : > { %2092 = vmatprep.subr.bf16.mxu0 %v4287_v18  ;;  %v4351_v18 = vld [vmem:[%s5696_s1 + $0x590] ss:$8 sps:$4 sm:$0xff]  }
  0x41   : > { %426 = vmatmul.mubr.bf16.gmra.mrb[12].mxu1 %v266_v19  ;;  %v592_v19 = vld [vmem:[%s4736_s9 + $0x31] sm:$0xff] }
  0x42   : > { %1945 = vmatmul.mubr.bf16.gmra.mrb[12].mxu0 %v1785_v21  ;;  %529 = vmatpush1.bf16.msra.mxu1 %v4282_v20  ;;  %v4356_v20 = vld [vmem:[%s5696_s1 + $0x1a4] ss:$8 sps:$4 sm:$0xff]   ;;  %v3827_v7 = vld [vmem:[%s4736_s9 + $0xd1] sm:$0xff] }
  0x43   : > { %2093 = vmatpush1.bf16.msra.mxu0 %v4285_v22  ;;  %530 = vmatprep.subr.bf16.mxu1 %v4290_v23  ;;  %v3803_v21 = vld [vmem:[%s4736_s9 + $0x41] sm:$0xff]  ;;  %v598_v23 = vpack.c.bf16 %v592_v19, %v3801_v9 }
  0x44   : > { %2094 = vmatprep.subr.bf16.mxu0 %v4293_v24  ;;  %548 = vmatprep.mubr.bf16.mxu1 %v4594_v3  ;;  %v4359_v22 = vld [vmem:[%s5696_s1 + $0x5a4] ss:$8 sps:$4 sm:$0xff]   ;;  %v4354_v24 = vld [vmem:[%s5696_s1 + $0x1a0] ss:$8 sps:$4 sm:$0xff]  }
  0x45   : > { %2112 = vmatprep.mubr.bf16.mxu0 %v4594_v3 }
  0x46   : > { %531 = vmatpush1.bf16.msra.mxu1 %v4288_v25  ;;  %v2178_v25 = vpack.c.bf16 %v3803_v21, %v592_v19  ;;  %v4416_v19 = vld [vmem:[%s5696_s1 + $0x244] ss:$8 sps:$4 sm:$0xff]  }
  0x47   : > { %2095 = vmatpush1.bf16.msra.mxu0 %v4291_v26  ;;  %697 = vmatprep.subr.bf16.mxu1 %v4296_v28  ;;  %v4357_v26 = vld [vmem:[%s5696_s1 + $0x5a0] ss:$8 sps:$4 sm:$0xff]   ;;  %v4365_v28 = vld [vmem:[%s5696_s1 + $0x5b4] ss:$8 sps:$4 sm:$0xff]  }
  0x48   : > { %2277 = vmatprep.subr.bf16.mxu0 %v4299_v29  ;;  %v4360_v29 = vld [vmem:[%s5696_s1 + $0x1b0] ss:$8 sps:$4 sm:$0xff]  }
  0x49   : > { %549 = vmatmul.mubr.bf16.vlgmr.msra.gmra.mrb[0].mxu1 %v234_v30  ;;  %v4363_v30 = vld [vmem:[%s5696_s1 + $0x5b0] ss:$8 sps:$4 sm:$0xff]  }
  0x4a   : > { %2113 = vmatmul.mubr.bf16.vlgmr.msra.gmra.mrb[0].mxu0 %v1980_v32  ;;  %698 = vmatpush1.bf16.msra.mxu1 %v4294_v31  ;;  %v594_v31 = vld [vmem:[%s4736_s9 + $0x51] sm:$0xff]  ;;  %v3805_v32 = vld [vmem:[%s4736_s9 + $0x61] sm:$0xff] }
  0x4b   : > { %2278 = vmatpush1.bf16.msra.mxu0 %v4297_v33  ;;  %699 = vmatprep.subr.bf16.mxu1 %v4302_v34  ;;  %v4368_v33 = vld [vmem:[%s5696_s1 + $0x1c4] ss:$8 sps:$4 sm:$0xff]  }
  0x4c   : > { %2279 = vmatprep.subr.bf16.mxu0 %v4305_v36  ;;  %558 = vmatprep.mubr.bf16.mxu1 %v4594_v3  ;;  %v4371_v34 = vld [vmem:[%s5696_s1 + $0x5c4] ss:$8 sps:$4 sm:$0xff]   ;;  %v599_v36 = vpack.c.bf16 %v594_v31, %v3803_v21 }
  0x4d   : > { %2122 = vmatprep.mubr.bf16.mxu0 %v4594_v3 }
  0x4e   : > { %700 = vmatpush1.bf16.msra.mxu1 %v4300_v35  ;;  %v2179_v35 = vpack.c.bf16 %v3805_v32, %v594_v31  ;;  %v4428_v31 = vld [vmem:[%s5696_s1 + $0x264] ss:$8 sps:$4 sm:$0xff]  }
  0x4f   : > { %2280 = vmatpush1.bf16.msra.mxu0 %v4303_v38  ;;  %701 = vmatprep.subr.bf16.mxu1 %v4308_v39  ;;  %v4366_v38 = vld [vmem:[%s5696_s1 + $0x1c0] ss:$8 sps:$4 sm:$0xff]  }
  0x50   : > { %2281 = vmatprep.subr.bf16.mxu0 %v4311_v40  ;;  %v4369_v39 = vld [vmem:[%s5696_s1 + $0x5c0] ss:$8 sps:$4 sm:$0xff]   ;;  %v4374_v40 = vld [vmem:[%s5696_s1 + $0x1d4] ss:$8 sps:$4 sm:$0xff]  }
  0x51   : > { %559 = vmatmul.mubr.bf16.gmra.mrb[4].mxu1 %v235_v41  ;;  %v4377_v41 = vld [vmem:[%s5696_s1 + $0x5d4] ss:$8 sps:$4 sm:$0xff]  }
  0x52   : > { %2123 = vmatmul.mubr.bf16.gmra.mrb[4].mxu0 %v1981_v43  ;;  %702 = vmatpush1.bf16.msra.mxu1 %v4306_v42  ;;  %v4372_v42 = vld [vmem:[%s5696_s1 + $0x1d0] ss:$8 sps:$4 sm:$0xff]  }
  0x53   : > { %2282 = vmatpush1.bf16.msra.mxu0 %v4309_v44  ;;  %703 = vmatprep.subr.bf16.mxu1 %v4314_v45  ;;  %v4375_v43 = vld [vmem:[%s5696_s1 + $0x5d0] ss:$8 sps:$4 sm:$0xff]   ;;  %v4380_v45 = vld [vmem:[%s5696_s1 + $0x1e4] ss:$8 sps:$4 sm:$0xff]  }
  0x54   : > { %2283 = vmatprep.subr.bf16.mxu0 %v4317_v37  ;;  %568 = vmatprep.mubr.bf16.mxu1 %v4594_v3  ;;  %v596_v44 = vld [vmem:[%s4736_s9 + $0x71] sm:$0xff]  ;;  %v3807_v37 = vld [vmem:[%s4736_s9 + $0x81] sm:$0xff] }
  0x55   : > { %2132 = vmatprep.mubr.bf16.mxu0 %v4594_v3 }
  0x56   : > { %704 = vmatpush1.bf16.msra.mxu1 %v4312_v46  ;;  %v4383_v46 = vld [vmem:[%s5696_s1 + $0x5e4] ss:$8 sps:$4 sm:$0xff]  }
  0x57   : > { %2284 = vmatpush1.bf16.msra.mxu0 %v4315_v47  ;;  %705 = vmatprep.subr.bf16.mxu1 %v4320_v48  ;;  %v600_v47 = vpack.c.bf16 %v596_v44, %v3805_v32  ;;  %v2180_v48 = vpack.c.bf16 %v3807_v37, %v596_v44  ;;  %v4431_v32 = vld [vmem:[%s5696_s1 + $0x664] ss:$8 sps:$4 sm:$0xff]  }
  0x58   : > { %2285 = vmatprep.subr.bf16.mxu0 %v4323_v49  ;;  %v4378_v49 = vld [vmem:[%s5696_s1 + $0x1e0] ss:$8 sps:$4 sm:$0xff]   ;;  %v4440_v44 = vld [vmem:[%s5696_s1 + $0x284] ss:$8 sps:$4 sm:$0xff]  }
  0x59   : > { %569 = vmatmul.mubr.bf16.gmra.mrb[8].mxu1 %v236_v50  ;;  %v4381_v50 = vld [vmem:[%s5696_s1 + $0x5e0] ss:$8 sps:$4 sm:$0xff]   ;;  %v4443_v37 = vld [vmem:[%s5696_s1 + $0x684] ss:$8 sps:$4 sm:$0xff]  }
  0x5a   : > { %2133 = vmatmul.mubr.bf16.gmra.mrb[8].mxu0 %v1982_v53  ;;  %706 = vmatpush1.bf16.msra.mxu1 %v4318_v51  ;;  %v4386_v51 = vld [vmem:[%s5696_s1 + $0x1f4] ss:$8 sps:$4 sm:$0xff]  }
  0x5b   : > { %2286 = vmatpush1.bf16.msra.mxu0 %v4321_v54  ;;  %707 = vmatprep.subr.bf16.mxu1 %v4326_v55  ;;  %v4389_v53 = vld [vmem:[%s5696_s1 + $0x5f4] ss:$8 sps:$4 sm:$0xff]   ;;  %v4384_v54 = vld [vmem:[%s5696_s1 + $0x1f0] ss:$8 sps:$4 sm:$0xff]  }
  0x5c   : > { %2287 = vmatprep.subr.bf16.mxu0 %v4329_v52  ;;  %578 = vmatprep.mubr.bf16.mxu1 %v4594_v3  ;;  %v4387_v55 = vld [vmem:[%s5696_s1 + $0x5f0] ss:$8 sps:$4 sm:$0xff]  }
  0x5d   : > { %2142 = vmatprep.mubr.bf16.mxu0 %v4594_v3  ;;  %v3632_v52 = vld [vmem:[%s4736_s9 + $0x91] sm:$0xff] }
  0x5e   : > { %708 = vmatpush1.bf16.msra.mxu1 %v4324_v56  ;;  %v3633_v56 = vld [vmem:[%s4736_s9 + $0xa1] sm:$0xff] }
  0x5f   : > { %2288 = vmatpush1.bf16.msra.mxu0 %v4327_v57  ;;  %709 = vmatprep.subr.bf16.mxu1 %v4332_v59  ;;  %v4392_v57 = vld [vmem:[%s5696_s1 + $0x204] ss:$8 sps:$4 sm:$0xff]  }
  0x60   : > { %2289 = vmatprep.subr.bf16.mxu0 %v4335_v60  ;;  %v4395_v59 = vld [vmem:[%s5696_s1 + $0x604] ss:$8 sps:$4 sm:$0xff]   ;;  %v794_v60 = vpack.c.bf16 %v3633_v56, %v3632_v52 }
  0x61   : > { %579 = vmatmul.mubr.bf16.gmra.mrb[12].mxu1 %v237_v61  ;;  %v4390_v61 = vld [vmem:[%s5696_s1 + $0x200] ss:$8 sps:$4 sm:$0xff]  }
  0x62   : > { %2143 = vmatmul.mubr.bf16.gmra.mrb[12].mxu0 %v1983_v62  ;;  %710 = vmatpush1.bf16.msra.mxu1 %v4330_v63  ;;  %v2374_v62 = vpack.c.bf16 %v3825_v58, %v3633_v56  ;;  %v4393_v63 = vld [vmem:[%s5696_s1 + $0x600] ss:$8 sps:$4 sm:$0xff]   ;;  %v4452_v56 = vld [vmem:[%s5696_s1 + $0x2a4] ss:$8 sps:$4 sm:$0xff]  }
  0x63   : > { %2290 = vmatpush1.bf16.msra.mxu0 %v4333_v0  ;;  %711 = vmatprep.subr.bf16.mxu1 %v4338_v1  ;;  %v4398_v0 = vld [vmem:[%s5696_s1 + $0x214] ss:$8 sps:$4 sm:$0xff]   ;;  %v3851_v52 = vld [vmem:[%s4736_s9 + $0x160] sm:$0xff] }
  0x64   : > { %2291 = vmatprep.subr.bf16.mxu0 %v4341_v2  ;;  %729 = vmatprep.mubr.bf16.mxu1 %v4594_v3  ;;  %v4401_v1 = vld [vmem:[%s5696_s1 + $0x614] ss:$8 sps:$4 sm:$0xff]   ;;  %v4396_v2 = vld [vmem:[%s5696_s1 + $0x210] ss:$8 sps:$4 sm:$0xff]  }
  0x65   : > { %2309 = vmatprep.mubr.bf16.mxu0 %v4594_v3 }
  0x66   : > { %712 = vmatpush1.bf16.msra.mxu1 %v4336_v4  ;;  %v4399_v4 = vld [vmem:[%s5696_s1 + $0x610] ss:$8 sps:$4 sm:$0xff]  }
  0x67   : > { %2292 = vmatpush1.bf16.msra.mxu0 %v4339_v5  ;;  %894 = vmatprep.subr.bf16.mxu1 %v4344_v8  ;;  %v3635_v5 = vld [vmem:[%s4736_s9 + $0xc1] sm:$0xff] }
  0x68   : > { %2474 = vmatprep.subr.bf16.mxu0 %v4347_v10  ;;  %v4407_v8 = vld [vmem:[%s5696_s1 + $0x624] ss:$8 sps:$4 sm:$0xff]   ;;  %v795_v9 = vpack.c.bf16 %v3635_v5, %v3825_v58  ;;  %v4402_v10 = vld [vmem:[%s5696_s1 + $0x220] ss:$8 sps:$4 sm:$0xff]  }
  0x69   : > { %730 = vmatmul.mubr.bf16.vlgmr.msra.gmra.mrb[0].mxu1 %v597_v11  ;;  %v2375_v11 = vpack.c.bf16 %v3827_v7, %v3635_v5  ;;  %v4464_v5 = vld [vmem:[%s5696_s1 + $0x2c4] ss:$8 sps:$4 sm:$0xff]  }
  0x6a   : > { %2310 = vmatmul.mubr.bf16.vlgmr.msra.gmra.mrb[0].mxu0 %v2177_v12  ;;  %895 = vmatpush1.bf16.msra.mxu1 %v4342_v13  ;;  %v4405_v12 = vld [vmem:[%s5696_s1 + $0x620] ss:$8 sps:$4 sm:$0xff]   ;;  %v4410_v13 = vld [vmem:[%s5696_s1 + $0x234] ss:$8 sps:$4 sm:$0xff]  }
  0x6b   : > { %2475 = vmatpush1.bf16.msra.mxu0 %v4345_v14  ;;  %896 = vmatprep.subr.bf16.mxu1 %v4350_v15  ;;  %v4413_v14 = vld [vmem:[%s5696_s1 + $0x634] ss:$8 sps:$4 sm:$0xff]   ;;  %v4408_v15 = vld [vmem:[%s5696_s1 + $0x230] ss:$8 sps:$4 sm:$0xff]  }
  0x6c   : > { %2476 = vmatprep.subr.bf16.mxu0 %v4353_v16  ;;  %739 = vmatprep.mubr.bf16.mxu1 %v4594_v3  ;;  %v4411_v16 = vld [vmem:[%s5696_s1 + $0x630] ss:$8 sps:$4 sm:$0xff]  }
  0x6d   : > { %2319 = vmatprep.mubr.bf16.mxu0 %v4594_v3 }
  0x6e   : > { %897 = vmatpush1.bf16.msra.mxu1 %v4348_v17  ;;  %v3637_v17 = vld [vmem:[%s4736_s9 + $0xe1] sm:$0xff] }
  0x6f   : > { %2477 = vmatpush1.bf16.msra.mxu0 %v4351_v18  ;;  %898 = vmatprep.subr.bf16.mxu1 %v4356_v20  ;;  %v3829_v18 = vld [vmem:[%s4736_s9 + $0xf1] sm:$0xff]  ;;  %v4419_v20 = vld [vmem:[%s5696_s1 + $0x644] ss:$8 sps:$4 sm:$0xff]   ;;  %v796_v21 = vpack.c.bf16 %v3637_v17, %v3827_v7 }
  0x70   : > { %2478 = vmatprep.subr.bf16.mxu0 %v4359_v22  ;;  %v4414_v22 = vld [vmem:[%s5696_s1 + $0x240] ss:$8 sps:$4 sm:$0xff]  }
  0x71   : > { %740 = vmatmul.mubr.bf16.gmra.mrb[4].mxu1 %v598_v23  ;;  %v2376_v23 = vpack.c.bf16 %v3829_v18, %v3637_v17  ;;  %v4476_v17 = vld [vmem:[%s5696_s1 + $0x2e4] ss:$8 sps:$4 sm:$0xff]  }
  0x72   : > { %2320 = vmatmul.mubr.bf16.gmra.mrb[4].mxu0 %v2178_v25  ;;  %899 = vmatpush1.bf16.msra.mxu1 %v4354_v24  ;;  %v4417_v24 = vld [vmem:[%s5696_s1 + $0x640] ss:$8 sps:$4 sm:$0xff]   ;;  %v4422_v25 = vld [vmem:[%s5696_s1 + $0x254] ss:$8 sps:$4 sm:$0xff]  }
  0x73   : > { %2479 = vmatpush1.bf16.msra.mxu0 %v4357_v26  ;;  %900 = vmatprep.subr.bf16.mxu1 %v4362_v27  ;;  %v4425_v26 = vld [vmem:[%s5696_s1 + $0x654] ss:$8 sps:$4 sm:$0xff]   ;;  %v4420_v27 = vld [vmem:[%s5696_s1 + $0x250] ss:$8 sps:$4 sm:$0xff]  }
  0x74   : > { %2480 = vmatprep.subr.bf16.mxu0 %v4365_v28  ;;  %749 = vmatprep.mubr.bf16.mxu1 %v4594_v3  ;;  %v4423_v28 = vld [vmem:[%s5696_s1 + $0x650] ss:$8 sps:$4 sm:$0xff]  }
  0x75   : > { %2329 = vmatprep.mubr.bf16.mxu0 %v4594_v3 }
  0x76   : > { %901 = vmatpush1.bf16.msra.mxu1 %v4360_v29  ;;  %v3639_v29 = vld [vmem:[%s4736_s9 + $0x101] sm:$0xff] }
  0x77   : > { %2481 = vmatpush1.bf16.msra.mxu0 %v4363_v30  ;;  %902 = vmatprep.subr.bf16.mxu1 %v4368_v33  ;;  %v3831_v30 = vld [vmem:[%s4736_s9 + $0x111] sm:$0xff]  ;;  %v797_v33 = vpack.c.bf16 %v3639_v29, %v3829_v18  ;;  %v4479_v18 = vld [vmem:[%s5696_s1 + $0x6e4] ss:$8 sps:$4 sm:$0xff]  }
  0x78   : > { %2482 = vmatprep.subr.bf16.mxu0 %v4371_v34  ;;  %v2377_v34 = vpack.c.bf16 %v3831_v30, %v3639_v29  ;;  %v4488_v29 = vld [vmem:[%s5696_s1 + $0x304] ss:$8 sps:$4 sm:$0xff]   ;;  %v3873_v30 = vld [vmem:[%s4736_s9 + $0x1d0] sm:$0xff] }
  0x79   : > { %750 = vmatmul.mubr.bf16.gmra.mrb[8].mxu1 %v599_v36  ;;  %v4426_v36 = vld [vmem:[%s5696_s1 + $0x260] ss:$8 sps:$4 sm:$0xff]  }
  0x7a   : > { %2330 = vmatmul.mubr.bf16.gmra.mrb[8].mxu0 %v2179_v35  ;;  %903 = vmatpush1.bf16.msra.mxu1 %v4366_v38  ;;  %v4429_v35 = vld [vmem:[%s5696_s1 + $0x660] ss:$8 sps:$4 sm:$0xff]   ;;  %v4434_v38 = vld [vmem:[%s5696_s1 + $0x274] ss:$8 sps:$4 sm:$0xff]  }
  0x7b   : > { %2483 = vmatpush1.bf16.msra.mxu0 %v4369_v39  ;;  %904 = vmatprep.subr.bf16.mxu1 %v4374_v40  ;;  %v4437_v39 = vld [vmem:[%s5696_s1 + $0x674] ss:$8 sps:$4 sm:$0xff]   ;;  %v4432_v40 = vld [vmem:[%s5696_s1 + $0x270] ss:$8 sps:$4 sm:$0xff]  }
  0x7c   : > { %2484 = vmatprep.subr.bf16.mxu0 %v4377_v41  ;;  %759 = vmatprep.mubr.bf16.mxu1 %v4594_v3  ;;  %v4435_v41 = vld [vmem:[%s5696_s1 + $0x670] ss:$8 sps:$4 sm:$0xff]  }
  0x7d   : > { %2339 = vmatprep.mubr.bf16.mxu0 %v4594_v3 }
  0x7e   : > { %905 = vmatpush1.bf16.msra.mxu1 %v4372_v42  ;;  %v3656_v42 = vld [vmem:[%s4736_s9 + $0x120] sm:$0xff] }
  0x7f   : > { %2485 = vmatpush1.bf16.msra.mxu0 %v4375_v43  ;;  %906 = vmatprep.subr.bf16.mxu1 %v4380_v45  ;;  %v3657_v43 = vld [vmem:[%s4736_s9 + $0x130] sm:$0xff]  ;;  %v3849_v45 = vld [vmem:[%s4736_s9 + $0x140] sm:$0xff] }
  0x80   : > { %2486 = vmatprep.subr.bf16.mxu0 %v4383_v46  ;;  %v992_v46 = vpack.c.bf16 %v3657_v43, %v3656_v42  ;;  %v3875_v42 = vld [vmem:[%s4736_s9 + $0x1f0] sm:$0xff] }
  0x81   : > { %760 = vmatmul.mubr.bf16.gmra.mrb[12].mxu1 %v600_v47  ;;  %v4438_v47 = vld [vmem:[%s5696_s1 + $0x280] ss:$8 sps:$4 sm:$0xff]  }
  0x82   : > { %2340 = vmatmul.mubr.bf16.gmra.mrb[12].mxu0 %v2180_v48  ;;  %907 = vmatpush1.bf16.msra.mxu1 %v4378_v49  ;;  %v2572_v48 = vpack.c.bf16 %v3849_v45, %v3657_v43  ;;  %v4441_v49 = vld [vmem:[%s5696_s1 + $0x680] ss:$8 sps:$4 sm:$0xff]   ;;  %v4500_v43 = vld [vmem:[%s5696_s1 + $0x324] ss:$8 sps:$4 sm:$0xff]  }
  0x83   : > { %2487 = vmatpush1.bf16.msra.mxu0 %v4381_v50  ;;  %908 = vmatprep.subr.bf16.mxu1 %v4386_v51  ;;  %v4446_v50 = vld [vmem:[%s5696_s1 + $0x294] ss:$8 sps:$4 sm:$0xff]  }
  0x84   : > { %2488 = vmatprep.subr.bf16.mxu0 %v4389_v53  ;;  %926 = vmatprep.mubr.bf16.mxu1 %v4594_v3  ;;  %v4449_v51 = vld [vmem:[%s5696_s1 + $0x694] ss:$8 sps:$4 sm:$0xff]   ;;  %v4444_v53 = vld [vmem:[%s5696_s1 + $0x290] ss:$8 sps:$4 sm:$0xff]  }
  0x85   : > { %2506 = vmatprep.mubr.bf16.mxu0 %v4594_v3 }
  0x86   : > { %909 = vmatpush1.bf16.msra.mxu1 %v4384_v54  ;;  %v4447_v54 = vld [vmem:[%s5696_s1 + $0x690] ss:$8 sps:$4 sm:$0xff]  }
  0x87   : > { %2489 = vmatpush1.bf16.msra.mxu0 %v4387_v55  ;;  %1092 = vmatprep.subr.bf16.mxu1 %v4392_v57  ;;  %v3659_v55 = vld [vmem:[%s4736_s9 + $0x150] sm:$0xff]  ;;  %v4455_v57 = vld [vmem:[%s5696_s1 + $0x6a4] ss:$8 sps:$4 sm:$0xff]  }
  0x88   : > { %2672 = vmatprep.subr.bf16.mxu0 %v4395_v59  ;;  %v993_v58 = vpack.c.bf16 %v3659_v55, %v3849_v45  ;;  %v4450_v59 = vld [vmem:[%s5696_s1 + $0x2a0] ss:$8 sps:$4 sm:$0xff]  }
  0x89   : > { %927 = vmatmul.mubr.bf16.vlgmr.msra.gmra.mrb[0].mxu1 %v794_v60  ;;  %v2573_v60 = vpack.c.bf16 %v3851_v52, %v3659_v55  ;;  %v4512_v55 = vld [vmem:[%s5696_s1 + $0x344] ss:$8 sps:$4 sm:$0xff]  }
  0x8a   : > { %2507 = vmatmul.mubr.bf16.vlgmr.msra.gmra.mrb[0].mxu0 %v2374_v62  ;;  %1093 = vmatpush1.bf16.msra.mxu1 %v4390_v61  ;;  %v4453_v61 = vld [vmem:[%s5696_s1 + $0x6a0] ss:$8 sps:$4 sm:$0xff]   ;;  %v4458_v62 = vld [vmem:[%s5696_s1 + $0x2b4] ss:$8 sps:$4 sm:$0xff]  }
  0x8b   : > { %2673 = vmatpush1.bf16.msra.mxu0 %v4393_v63  ;;  %1094 = vmatprep.subr.bf16.mxu1 %v4398_v0  ;;  %v4461_v63 = vld [vmem:[%s5696_s1 + $0x6b4] ss:$8 sps:$4 sm:$0xff]   ;;  %v4456_v0 = vld [vmem:[%s5696_s1 + $0x2b0] ss:$8 sps:$4 sm:$0xff]  }
  0x8c   : > { %2674 = vmatprep.subr.bf16.mxu0 %v4401_v1  ;;  %936 = vmatprep.mubr.bf16.mxu1 %v4594_v3  ;;  %v4459_v1 = vld [vmem:[%s5696_s1 + $0x6b0] ss:$8 sps:$4 sm:$0xff]  }
  0x8d   : > { %2516 = vmatprep.mubr.bf16.mxu0 %v4594_v3 }
  0x8e   : > { %1095 = vmatpush1.bf16.msra.mxu1 %v4396_v2  ;;  %v3661_v2 = vld [vmem:[%s4736_s9 + $0x170] sm:$0xff] }
  0x8f   : > { %2675 = vmatpush1.bf16.msra.mxu0 %v4399_v4  ;;  %1096 = vmatprep.subr.bf16.mxu1 %v4404_v6  ;;  %v3853_v4 = vld [vmem:[%s4736_s9 + $0x180] sm:$0xff]  ;;  %v994_v7 = vpack.c.bf16 %v3661_v2, %v3851_v52 }
  0x90   : > { %2676 = vmatprep.subr.bf16.mxu0 %v4407_v8  ;;  %v4467_v6 = vld [vmem:[%s5696_s1 + $0x6c4] ss:$8 sps:$4 sm:$0xff]   ;;  %v4462_v8 = vld [vmem:[%s5696_s1 + $0x2c0] ss:$8 sps:$4 sm:$0xff]  }
  0x91   : > { %937 = vmatmul.mubr.bf16.gmra.mrb[4].mxu1 %v795_v9  ;;  %v2574_v9 = vpack.c.bf16 %v3853_v4, %v3661_v2  ;;  %v4515_v52 = vld [vmem:[%s5696_s1 + $0x744] ss:$8 sps:$4 sm:$0xff]  }
  0x92   : > { %2517 = vmatmul.mubr.bf16.gmra.mrb[4].mxu0 %v2375_v11  ;;  %1097 = vmatpush1.bf16.msra.mxu1 %v4402_v10  ;;  %v4465_v10 = vld [vmem:[%s5696_s1 + $0x6c0] ss:$8 sps:$4 sm:$0xff]   ;;  %v4470_v11 = vld [vmem:[%s5696_s1 + $0x2d4] ss:$8 sps:$4 sm:$0xff]   ;;  %v4524_v2 = vld [vmem:[%s5696_s1 + $0x364] ss:$8 sps:$4 sm:$0xff]  }
  0x93   : > { %2677 = vmatpush1.bf16.msra.mxu0 %v4405_v12  ;;  %1098 = vmatprep.subr.bf16.mxu1 %v4410_v13  ;;  %v4473_v12 = vld [vmem:[%s5696_s1 + $0x6d4] ss:$8 sps:$4 sm:$0xff]   ;;  %v4468_v13 = vld [vmem:[%s5696_s1 + $0x2d0] ss:$8 sps:$4 sm:$0xff]  }
  0x94   : > { %2678 = vmatprep.subr.bf16.mxu0 %v4413_v14  ;;  %946 = vmatprep.mubr.bf16.mxu1 %v4594_v3  ;;  %v4471_v14 = vld [vmem:[%s5696_s1 + $0x6d0] ss:$8 sps:$4 sm:$0xff]  }
  0x95   : > { %2526 = vmatprep.mubr.bf16.mxu0 %v4594_v3 }
  0x96   : > { %1099 = vmatpush1.bf16.msra.mxu1 %v4408_v15  ;;  %v3663_v15 = vld [vmem:[%s4736_s9 + $0x190] sm:$0xff] }
  0x97   : > { %2679 = vmatpush1.bf16.msra.mxu0 %v4411_v16  ;;  %1100 = vmatprep.subr.bf16.mxu1 %v4416_v19  ;;  %v3855_v16 = vld [vmem:[%s4736_s9 + $0x1a0] sm:$0xff]  ;;  %v995_v19 = vpack.c.bf16 %v3663_v15, %v3853_v4 }
  0x98   : > { %2680 = vmatprep.subr.bf16.mxu0 %v4419_v20  ;;  %v4474_v20 = vld [vmem:[%s5696_s1 + $0x2e0] ss:$8 sps:$4 sm:$0xff]   ;;  %v4527_v4 = vld [vmem:[%s5696_s1 + $0x764] ss:$8 sps:$4 sm:$0xff]  }
  0x99   : > { %947 = vmatmul.mubr.bf16.gmra.mrb[8].mxu1 %v796_v21  ;;  %v2575_v21 = vpack.c.bf16 %v3855_v16, %v3663_v15  ;;  %v3897_v15 = vld [vmem:[%s4736_s9 + $0x141] sm:$0xff] }
  0x9a   : > { %2527 = vmatmul.mubr.bf16.gmra.mrb[8].mxu0 %v2376_v23  ;;  %1101 = vmatpush1.bf16.msra.mxu1 %v4414_v22  ;;  %v4477_v22 = vld [vmem:[%s5696_s1 + $0x6e0] ss:$8 sps:$4 sm:$0xff]   ;;  %v4482_v23 = vld [vmem:[%s5696_s1 + $0x2f4] ss:$8 sps:$4 sm:$0xff]   ;;  %v4536_v16 = vld [vmem:[%s5696_s1 + $0x384] ss:$8 sps:$4 sm:$0xff]  }
  0x9b   : > { %2681 = vmatpush1.bf16.msra.mxu0 %v4417_v24  ;;  %1102 = vmatprep.subr.bf16.mxu1 %v4422_v25  ;;  %v4485_v24 = vld [vmem:[%s5696_s1 + $0x6f4] ss:$8 sps:$4 sm:$0xff]   ;;  %v4480_v25 = vld [vmem:[%s5696_s1 + $0x2f0] ss:$8 sps:$4 sm:$0xff]  }
  0x9c   : > { %2682 = vmatprep.subr.bf16.mxu0 %v4425_v26  ;;  %956 = vmatprep.mubr.bf16.mxu1 %v4594_v3  ;;  %v4483_v26 = vld [vmem:[%s5696_s1 + $0x6f0] ss:$8 sps:$4 sm:$0xff]  }
  0x9d   : > { %2536 = vmatprep.mubr.bf16.mxu0 %v4594_v3 }
  0x9e   : > { %1103 = vmatpush1.bf16.msra.mxu1 %v4420_v27  ;;  %v3680_v27 = vld [vmem:[%s4736_s9 + $0x1b0] sm:$0xff] }
  0x9f   : > { %2683 = vmatpush1.bf16.msra.mxu0 %v4423_v28  ;;  %1104 = vmatprep.subr.bf16.mxu1 %v4428_v31  ;;  %v3681_v28 = vld [vmem:[%s4736_s9 + $0x1c0] sm:$0xff] }
  0xa0   : > { %2684 = vmatprep.subr.bf16.mxu0 %v4431_v32  ;;  %v4491_v31 = vld [vmem:[%s5696_s1 + $0x704] ss:$8 sps:$4 sm:$0xff]   ;;  %v1190_v32 = vpack.c.bf16 %v3681_v28, %v3680_v27 }
  0xa1   : > { %957 = vmatmul.mubr.bf16.gmra.mrb[12].mxu1 %v797_v33  ;;  %v2770_v33 = vpack.c.bf16 %v3873_v30, %v3681_v28  ;;  %v3899_v27 = vld [vmem:[%s4736_s9 + $0x161] sm:$0xff] }
  0xa2   : > { %2537 = vmatmul.mubr.bf16.gmra.mrb[12].mxu0 %v2377_v34  ;;  %1105 = vmatpush1.bf16.msra.mxu1 %v4426_v36  ;;  %v4486_v34 = vld [vmem:[%s5696_s1 + $0x300] ss:$8 sps:$4 sm:$0xff]   ;;  %v4548_v28 = vld [vmem:[%s5696_s1 + $0x3a4] ss:$8 sps:$4 sm:$0xff]  }
  0xa3   : > { %2685 = vmatpush1.bf16.msra.mxu0 %v4429_v35  ;;  %1106 = vmatprep.subr.bf16.mxu1 %v4434_v38  ;;  %v4489_v36 = vld [vmem:[%s5696_s1 + $0x700] ss:$8 sps:$4 sm:$0xff]   ;;  %v4494_v35 = vld [vmem:[%s5696_s1 + $0x314] ss:$8 sps:$4 sm:$0xff]  }
  0xa4   : > { %2686 = vmatprep.subr.bf16.mxu0 %v4437_v39  ;;  %1124 = vmatprep.mubr.bf16.mxu1 %v4594_v3  ;;  %v4497_v38 = vld [vmem:[%s5696_s1 + $0x714] ss:$8 sps:$4 sm:$0xff]   ;;  %v4492_v39 = vld [vmem:[%s5696_s1 + $0x310] ss:$8 sps:$4 sm:$0xff]  }
  0xa5   : > { %2704 = vmatprep.mubr.bf16.mxu0 %v4594_v3 }
  0xa6   : > { %1107 = vmatpush1.bf16.msra.mxu1 %v4432_v40  ;;  %v4495_v40 = vld [vmem:[%s5696_s1 + $0x710] ss:$8 sps:$4 sm:$0xff]  }
  0xa7   : > { %2687 = vmatpush1.bf16.msra.mxu0 %v4435_v41  ;;  %1290 = vmatprep.subr.bf16.mxu1 %v4440_v44  ;;  %v3683_v41 = vld [vmem:[%s4736_s9 + $0x1e0] sm:$0xff] }
  0xa8   : > { %2870 = vmatprep.subr.bf16.mxu0 %v4443_v37  ;;  %v4503_v44 = vld [vmem:[%s5696_s1 + $0x724] ss:$8 sps:$4 sm:$0xff]   ;;  %v1191_v45 = vpack.c.bf16 %v3683_v41, %v3873_v30  ;;  %v2771_v37 = vpack.c.bf16 %v3875_v42, %v3683_v41 }
  0xa9   : > { %1125 = vmatmul.mubr.bf16.vlgmr.msra.gmra.mrb[0].mxu1 %v992_v46  ;;  %v4498_v46 = vld [vmem:[%s5696_s1 + $0x320] ss:$8 sps:$4 sm:$0xff]   ;;  %v4560_v41 = vld [vmem:[%s5696_s1 + $0x3c4] ss:$8 sps:$4 sm:$0xff]  }
  0xaa   : > { %2705 = vmatmul.mubr.bf16.vlgmr.msra.gmra.mrb[0].mxu0 %v2572_v48  ;;  %1291 = vmatpush1.bf16.msra.mxu1 %v4438_v47  ;;  %v4501_v47 = vld [vmem:[%s5696_s1 + $0x720] ss:$8 sps:$4 sm:$0xff]   ;;  %v4506_v48 = vld [vmem:[%s5696_s1 + $0x334] ss:$8 sps:$4 sm:$0xff]  }
  0xab   : > { %2871 = vmatpush1.bf16.msra.mxu0 %v4441_v49  ;;  %1292 = vmatprep.subr.bf16.mxu1 %v4446_v50  ;;  %v4509_v49 = vld [vmem:[%s5696_s1 + $0x734] ss:$8 sps:$4 sm:$0xff]   ;;  %v4504_v50 = vld [vmem:[%s5696_s1 + $0x330] ss:$8 sps:$4 sm:$0xff]  }
  0xac   : > { %2872 = vmatprep.subr.bf16.mxu0 %v4449_v51  ;;  %1134 = vmatprep.mubr.bf16.mxu1 %v4594_v3  ;;  %v4507_v51 = vld [vmem:[%s5696_s1 + $0x730] ss:$8 sps:$4 sm:$0xff]  }
  0xad   : > { %2714 = vmatprep.mubr.bf16.mxu0 %v4594_v3 }
  0xae   : > { %1293 = vmatpush1.bf16.msra.mxu1 %v4444_v53  ;;  %v3685_v53 = vld [vmem:[%s4736_s9 + $0x200] sm:$0xff] }
  0xaf   : > { %2873 = vmatpush1.bf16.msra.mxu0 %v4447_v54  ;;  %1294 = vmatprep.subr.bf16.mxu1 %v4452_v56  ;;  %v3877_v54 = vld [vmem:[%s4736_s9 + $0x210] sm:$0xff]  ;;  %v1192_v56 = vpack.c.bf16 %v3685_v53, %v3875_v42  ;;  %v4563_v42 = vld [vmem:[%s5696_s1 + $0x7c4] ss:$8 sps:$4 sm:$0xff]  }
  0xb0   : > { %2874 = vmatprep.subr.bf16.mxu0 %v4455_v57  ;;  %v2772_v57 = vpack.c.bf16 %v3877_v54, %v3685_v53  ;;  %v4572_v53 = vld [vmem:[%s5696_s1 + $0x3e4] ss:$8 sps:$4 sm:$0xff]  }
  0xb1   : > { %1135 = vmatmul.mubr.bf16.gmra.mrb[4].mxu1 %v993_v58  ;;  %v4510_v58 = vld [vmem:[%s5696_s1 + $0x340] ss:$8 sps:$4 sm:$0xff]  }
  0xb2   : > { %2715 = vmatmul.mubr.bf16.gmra.mrb[4].mxu0 %v2573_v60  ;;  %1295 = vmatpush1.bf16.msra.mxu1 %v4450_v59  ;;  %v4513_v59 = vld [vmem:[%s5696_s1 + $0x740] ss:$8 sps:$4 sm:$0xff]   ;;  %v4518_v60 = vld [vmem:[%s5696_s1 + $0x354] ss:$8 sps:$4 sm:$0xff]  }
  0xb3   : > { %2875 = vmatpush1.bf16.msra.mxu0 %v4453_v61  ;;  %1296 = vmatprep.subr.bf16.mxu1 %v4458_v62  ;;  %v4521_v61 = vld [vmem:[%s5696_s1 + $0x754] ss:$8 sps:$4 sm:$0xff]   ;;  %v4516_v62 = vld [vmem:[%s5696_s1 + $0x350] ss:$8 sps:$4 sm:$0xff]  }
  0xb4   : > { %2876 = vmatprep.subr.bf16.mxu0 %v4461_v63  ;;  %1144 = vmatprep.mubr.bf16.mxu1 %v4594_v3  ;;  %v4519_v63 = vld [vmem:[%s5696_s1 + $0x750] ss:$8 sps:$4 sm:$0xff]  }
  0xb5   : > { %2724 = vmatprep.mubr.bf16.mxu0 %v4594_v3 }
  0xb6   : > { %1297 = vmatpush1.bf16.msra.mxu1 %v4456_v0  ;;  %v3687_v0 = vld [vmem:[%s4736_s9 + $0x220] sm:$0xff] }
  0xb7   : > { %2877 = vmatpush1.bf16.msra.mxu0 %v4459_v1  ;;  %1298 = vmatprep.subr.bf16.mxu1 %v4464_v5  ;;  %v3879_v1 = vld [vmem:[%s4736_s9 + $0x230] sm:$0xff]  ;;  %v1193_v5 = vpack.c.bf16 %v3687_v0, %v3877_v54  ;;  %v4575_v54 = vld [vmem:[%s5696_s1 + $0x7e4] ss:$8 sps:$4 sm:$0xff]  }
  0xb8   : > { %2878 = vmatprep.subr.bf16.mxu0 %v4467_v6  ;;  %v2773_v6 = vpack.c.bf16 %v3879_v1, %v3687_v0  ;;  %v3921_v0 = vld [vmem:[%s4736_s9 + $0x1d1] sm:$0xff] }
  0xb9   : > { %1145 = vmatmul.mubr.bf16.gmra.mrb[8].mxu1 %v994_v7  ;;  %v4522_v7 = vld [vmem:[%s5696_s1 + $0x360] ss:$8 sps:$4 sm:$0xff]  }
  0xba   : > { %2725 = vmatmul.mubr.bf16.gmra.mrb[8].mxu0 %v2574_v9  ;;  %1299 = vmatpush1.bf16.msra.mxu1 %v4462_v8  ;;  %v4525_v8 = vld [vmem:[%s5696_s1 + $0x760] ss:$8 sps:$4 sm:$0xff]   ;;  %v4530_v9 = vld [vmem:[%s5696_s1 + $0x374] ss:$8 sps:$4 sm:$0xff]  }
  0xbb   : > { %2879 = vmatpush1.bf16.msra.mxu0 %v4465_v10  ;;  %1300 = vmatprep.subr.bf16.mxu1 %v4470_v11  ;;  %v4533_v10 = vld [vmem:[%s5696_s1 + $0x774] ss:$8 sps:$4 sm:$0xff]   ;;  %v4528_v11 = vld [vmem:[%s5696_s1 + $0x370] ss:$8 sps:$4 sm:$0xff]  }
  0xbc   : > { %2880 = vmatprep.subr.bf16.mxu0 %v4473_v12  ;;  %1154 = vmatprep.mubr.bf16.mxu1 %v4594_v3  ;;  %v4531_v12 = vld [vmem:[%s5696_s1 + $0x770] ss:$8 sps:$4 sm:$0xff]  }
  0xbd   : > { %2734 = vmatprep.mubr.bf16.mxu0 %v4594_v3 }
  0xbe   : > { %1301 = vmatpush1.bf16.msra.mxu1 %v4468_v13  ;;  %v3704_v13 = vld [vmem:[%s4736_s9 + $0x121] sm:$0xff] }
  0xbf   : > { %2881 = vmatpush1.bf16.msra.mxu0 %v4471_v14  ;;  %1302 = vmatprep.subr.bf16.mxu1 %v4476_v17  ;;  %v3705_v14 = vld [vmem:[%s4736_s9 + $0x131] sm:$0xff]  ;;  %v4539_v17 = vld [vmem:[%s5696_s1 + $0x784] ss:$8 sps:$4 sm:$0xff]  }
  0xc0   : > { %2882 = vmatprep.subr.bf16.mxu0 %v4479_v18  ;;  %v1387_v18 = vpack.c.bf16 %v3705_v14, %v3704_v13  ;;  %v3927_v13 = vld [vmem:[%s4736_s9 + $0x231] sm:$0xff] }
  0xc1   : > { %1155 = vmatmul.mubr.bf16.gmra.mrb[12].mxu1 %v995_v19  ;;  %v2967_v19 = vpack.c.bf16 %v3897_v15, %v3705_v14 }
  0xc2   : > { %2735 = vmatmul.mubr.bf16.gmra.mrb[12].mxu0 %v2575_v21  ;;  %1303 = vmatpush1.bf16.msra.mxu1 %v4474_v20  ;;  %v4534_v20 = vld [vmem:[%s5696_s1 + $0x380] ss:$8 sps:$4 sm:$0xff]  }
  0xc3   : > { %2883 = vmatpush1.bf16.msra.mxu0 %v4477_v22  ;;  %1304 = vmatprep.subr.bf16.mxu1 %v4482_v23  ;;  %v4537_v21 = vld [vmem:[%s5696_s1 + $0x780] ss:$8 sps:$4 sm:$0xff]   ;;  %v4542_v22 = vld [vmem:[%s5696_s1 + $0x394] ss:$8 sps:$4 sm:$0xff]  }
  0xc4   : > { %2884 = vmatprep.subr.bf16.mxu0 %v4485_v24  ;;  %1322 = vmatprep.mubr.bf16.mxu1 %v4594_v3  ;;  %v4545_v23 = vld [vmem:[%s5696_s1 + $0x794] ss:$8 sps:$4 sm:$0xff]   ;;  %v4540_v24 = vld [vmem:[%s5696_s1 + $0x390] ss:$8 sps:$4 sm:$0xff]  }
  0xc5   : > { %2902 = vmatprep.mubr.bf16.mxu0 %v4594_v3 }
  0xc6   : > { %1305 = vmatpush1.bf16.msra.mxu1 %v4480_v25  ;;  %v4543_v25 = vld [vmem:[%s5696_s1 + $0x790] ss:$8 sps:$4 sm:$0xff]  }
  0xc7   : > { %2885 = vmatpush1.bf16.msra.mxu0 %v4483_v26  ;;  %1487 = vmatprep.subr.bf16.mxu1 %v4488_v29  ;;  %v3707_v26 = vld [vmem:[%s4736_s9 + $0x151] sm:$0xff]  ;;  %v4551_v29 = vld [vmem:[%s5696_s1 + $0x7a4] ss:$8 sps:$4 sm:$0xff]  }
  0xc8   : > { %3067 = vmatprep.subr.bf16.mxu0 %v4491_v31  ;;  %v1388_v30 = vpack.c.bf16 %v3707_v26, %v3897_v15  ;;  %v2968_v31 = vpack.c.bf16 %v3899_v27, %v3707_v26 }
  0xc9   : > { %1323 = vmatmul.mubr.bf16.vlgmr.msra.gmra.mrb[0].mxu1 %v1190_v32  ;;  %v4546_v32 = vld [vmem:[%s5696_s1 + $0x3a0] ss:$8 sps:$4 sm:$0xff]  }
  0xca   : > { %2903 = vmatmul.mubr.bf16.vlgmr.msra.gmra.mrb[0].mxu0 %v2770_v33  ;;  %1488 = vmatpush1.bf16.msra.mxu1 %v4486_v34  ;;  %v4549_v33 = vld [vmem:[%s5696_s1 + $0x7a0] ss:$8 sps:$4 sm:$0xff]   ;;  %v4554_v34 = vld [vmem:[%s5696_s1 + $0x3b4] ss:$8 sps:$4 sm:$0xff]  }
  0xcb   : > { %3068 = vmatpush1.bf16.msra.mxu0 %v4489_v36  ;;  %1489 = vmatprep.subr.bf16.mxu1 %v4494_v35  ;;  %v4557_v36 = vld [vmem:[%s5696_s1 + $0x7b4] ss:$8 sps:$4 sm:$0xff]   ;;  %v4552_v35 = vld [vmem:[%s5696_s1 + $0x3b0] ss:$8 sps:$4 sm:$0xff]  }
  0xcc   : > { %3069 = vmatprep.subr.bf16.mxu0 %v4497_v38  ;;  %1332 = vmatprep.mubr.bf16.mxu1 %v4594_v3  ;;  %v4555_v38 = vld [vmem:[%s5696_s1 + $0x7b0] ss:$8 sps:$4 sm:$0xff]  }
  0xcd   : > { %2912 = vmatprep.mubr.bf16.mxu0 %v4594_v3 }
  0xce   : > { %1490 = vmatpush1.bf16.msra.mxu1 %v4492_v39  ;;  %v3709_v39 = vld [vmem:[%s4736_s9 + $0x171] sm:$0xff] }
  0xcf   : > { %3070 = vmatpush1.bf16.msra.mxu0 %v4495_v40  ;;  %1491 = vmatprep.subr.bf16.mxu1 %v4500_v43  ;;  %v3901_v40 = vld [vmem:[%s4736_s9 + $0x181] sm:$0xff]  ;;  %v1389_v43 = vpack.c.bf16 %v3709_v39, %v3899_v27 }
  0xd0   : > { %3071 = vmatprep.subr.bf16.mxu0 %v4503_v44  ;;  %v2969_v44 = vpack.c.bf16 %v3901_v40, %v3709_v39  ;;  %v3429_v39 = vld [vmem:[%s5698_s3] sm:$0xff] }
  0xd1   : > { %1333 = vmatmul.mubr.bf16.gmra.mrb[4].mxu1 %v1191_v45  ;;  %v4558_v45 = vld [vmem:[%s5696_s1 + $0x3c0] ss:$8 sps:$4 sm:$0xff]  }
  0xd2   : > { %2913 = vmatmul.mubr.bf16.gmra.mrb[4].mxu0 %v2771_v37  ;;  %1492 = vmatpush1.bf16.msra.mxu1 %v4498_v46  ;;  %v4561_v37 = vld [vmem:[%s5696_s1 + $0x7c0] ss:$8 sps:$4 sm:$0xff]   ;;  %v4566_v46 = vld [vmem:[%s5696_s1 + $0x3d4] ss:$8 sps:$4 sm:$0xff]  }
  0xd3   : > { %3072 = vmatpush1.bf16.msra.mxu0 %v4501_v47  ;;  %1493 = vmatprep.subr.bf16.mxu1 %v4506_v48  ;;  %v4569_v47 = vld [vmem:[%s5696_s1 + $0x7d4] ss:$8 sps:$4 sm:$0xff]   ;;  %v4564_v48 = vld [vmem:[%s5696_s1 + $0x3d0] ss:$8 sps:$4 sm:$0xff]  }
  0xd4   : > { %3073 = vmatprep.subr.bf16.mxu0 %v4509_v49  ;;  %1342 = vmatprep.mubr.bf16.mxu1 %v4594_v3  ;;  %v4567_v49 = vld [vmem:[%s5696_s1 + $0x7d0] ss:$8 sps:$4 sm:$0xff]  }
  0xd5   : > { %2922 = vmatprep.mubr.bf16.mxu0 %v4594_v3 }
  0xd6   : > { %1494 = vmatpush1.bf16.msra.mxu1 %v4504_v50  ;;  %v3711_v50 = vld [vmem:[%s4736_s9 + $0x191] sm:$0xff] }
  0xd7   : > { %3074 = vmatpush1.bf16.msra.mxu0 %v4507_v51  ;;  %1495 = vmatprep.subr.bf16.mxu1 %v4512_v55  ;;  %v3903_v51 = vld [vmem:[%s4736_s9 + $0x1a1] sm:$0xff]  ;;  %v1390_v55 = vpack.c.bf16 %v3711_v50, %v3901_v40 }
  0xd8   : > { %3075 = vmatprep.subr.bf16.mxu0 %v4515_v52  ;;  %v2970_v52 = vpack.c.bf16 %v3903_v51, %v3711_v50  ;;  %v3432_v50 = vld [vmem:[%s5698_s3 + $0x18] sm:$0xff] }
  0xd9   : > { %1343 = vmatmul.mubr.bf16.gmra.mrb[8].mxu1 %v1192_v56  ;;  %v4570_v56 = vld [vmem:[%s5696_s1 + $0x3e0] ss:$8 sps:$4 sm:$0xff]  }
  0xda   : > { %2923 = vmatmul.mubr.bf16.gmra.mrb[8].mxu0 %v2772_v57  ;;  %1496 = vmatpush1.bf16.msra.mxu1 %v4510_v58  ;;  %v4573_v57 = vld [vmem:[%s5696_s1 + $0x7e0] ss:$8 sps:$4 sm:$0xff]   ;;  %v4578_v58 = vld [vmem:[%s5696_s1 + $0x3f4] ss:$8 sps:$4 sm:$0xff]  }
  0xdb   : > { %3076 = vmatpush1.bf16.msra.mxu0 %v4513_v59  ;;  %1497 = vmatprep.subr.bf16.mxu1 %v4518_v60  ;;  %v4581_v59 = vld [vmem:[%s5696_s1 + $0x7f4] ss:$8 sps:$4 sm:$0xff]   ;;  %v4576_v60 = vld [vmem:[%s5696_s1 + $0x3f0] ss:$8 sps:$4 sm:$0xff]  }
  0xdc   : > { %3077 = vmatprep.subr.bf16.mxu0 %v4521_v61  ;;  %1352 = vmatprep.mubr.bf16.mxu1 %v4594_v3  ;;  %v4579_v61 = vld [vmem:[%s5696_s1 + $0x7f0] ss:$8 sps:$4 sm:$0xff]  }
  0xdd   : > { %2932 = vmatprep.mubr.bf16.mxu0 %v4594_v3 }
  0xde   : > { %1498 = vmatpush1.bf16.msra.mxu1 %v4516_v62  ;;  %v3728_v62 = vld [vmem:[%s4736_s9 + $0x1b1] sm:$0xff] }
  0xdf   : > { %3078 = vmatpush1.bf16.msra.mxu0 %v4519_v63  ;;  %1499 = vmatprep.subr.bf16.mxu1 %v4524_v2  ;;  %v3729_v63 = vld [vmem:[%s4736_s9 + $0x1c1] sm:$0xff] }
  0xe0   : > { %3079 = vmatprep.subr.bf16.mxu0 %v4527_v4  ;;  %v1584_v1 = vpack.c.bf16 %v3729_v63, %v3728_v62  ;;  %v3164_v2 = vpack.c.bf16 %v3921_v0, %v3729_v63  ;;  %v3731_v4 = vld [vmem:[%s4736_s9 + $0x1e1] sm:$0xff] }
  0xe1   : > { %1353 = vmatmul.mubr.bf16.gmra.mrb[12].mxu1 %v1193_v5  ;;  %v3923_v5 = vld [vmem:[%s4736_s9 + $0x1f1] sm:$0xff] }
  0xe2   : > { %2933 = vmatmul.mubr.bf16.gmra.mrb[12].mxu0 %v2773_v6  ;;  %1500 = vmatpush1.bf16.msra.mxu1 %v4522_v7  ;;  %v1585_v6 = vpack.c.bf16 %v3731_v4, %v3921_v0  ;;  %v3165_v7 = vpack.c.bf16 %v3923_v5, %v3731_v4 }
  0xe3   : > { %3080 = vmatpush1.bf16.msra.mxu0 %v4525_v8  ;;  %1501 = vmatprep.subr.bf16.mxu1 %v4530_v9  ;;  %v3733_v8 = vld [vmem:[%s4736_s9 + $0x201] sm:$0xff]  ;;  %v3925_v9 = vld [vmem:[%s4736_s9 + $0x211] sm:$0xff] }
  0xe4   : > { %3081 = vmatprep.subr.bf16.mxu0 %v4533_v10  ;;  %1519 = vmatprep.mubr.bf16.mxu1 %v4594_v3  ;;  %v1586_v10 = vpack.c.bf16 %v3733_v8, %v3923_v5 }
  0xe5   : > { %3099 = vmatprep.mubr.bf16.mxu0 %v4594_v3 }
  0xe6   : > { %1502 = vmatpush1.bf16.msra.mxu1 %v4528_v11  ;;  %v3166_v11 = vpack.c.bf16 %v3925_v9, %v3733_v8 }
  0xe7   : > { %3082 = vmatpush1.bf16.msra.mxu0 %v4531_v12  ;;  %1684 = vmatprep.subr.bf16.mxu1 %v4536_v16  ;;  %v3735_v12 = vld [vmem:[%s4736_s9 + $0x221] sm:$0xff]  ;;  %v3355_v16 = vlaneseq }
  0xe8   : > { %3264 = vmatprep.subr.bf16.mxu0 %v4539_v17  ;;  %v1587_v14 = vpack.c.bf16 %v3735_v12, %v3925_v9  ;;  %v3167_v15 = vpack.c.bf16 %v3927_v13, %v3735_v12  ;;  %v3433_v9 = vld [vmem:[%s5698_s3 + $0x20] sm:$0xff]  ;;  %v3434_v12 = vld [vmem:[%s5698_s3 + $0x28] sm:$0xff] }
  0xe9   : > { %1520 = vmatmul.mubr.bf16.vlgmr.msra.gmra.mrb[0].mxu1 %v1387_v18  ;;  %v5609_v17 = vshrl.u32 %v3355_v16, 7 }
  0xea   : > { %3100 = vmatmul.mubr.bf16.vlgmr.msra.gmra.mrb[0].mxu0 %v2967_v19  ;;  %1685 = vmatpush1.bf16.msra.mxu1 %v4534_v20  ;;  %v3353_v19 = vld [vmem:[%s5697_s2] sm:$0x3] }
  0xeb   : > { %3265 = vmatpush1.bf16.msra.mxu0 %v4537_v21  ;;  %1686 = vmatprep.subr.bf16.mxu1 %v4542_v22  ;;  %v3357_v18 = vsub.s32 0, %v5609_v17  ;;  %v3361_v20 = vsub.s32 1, %v5609_v17 }
  0xec   : > { %3266 = vmatprep.subr.bf16.mxu0 %v4545_v23  ;;  %1529 = vmatprep.mubr.bf16.mxu1 %v4594_v3 }
  0xed   : > { %3109 = vmatprep.mubr.bf16.mxu0 %v4594_v3  ;;  %v5620_v23 = vrot.slane %v3353_v19, %v3361_v20 }
  0xee   : > { %1687 = vmatpush1.bf16.msra.mxu1 %v4540_v24 }
  0xef   : > { %3267 = vmatpush1.bf16.msra.mxu0 %v4543_v25  ;;  %1688 = vmatprep.subr.bf16.mxu1 %v4548_v28 }
  0xf0   : > { %3268 = vmatprep.subr.bf16.mxu0 %v4551_v29 }
  0xf1   : > { %1530 = vmatmul.mubr.bf16.gmra.mrb[4].mxu1 %v1388_v30 }
  0xf2   : > { %3110 = vmatmul.mubr.bf16.gmra.mrb[4].mxu0 %v2968_v31  ;;  %1689 = vmatpush1.bf16.msra.mxu1 %v4546_v32 }
  0xf3   : > { %3269 = vmatpush1.bf16.msra.mxu0 %v4549_v33  ;;  %1690 = vmatprep.subr.bf16.mxu1 %v4554_v34 }
  0xf4   : > { %3270 = vmatprep.subr.bf16.mxu0 %v4557_v36  ;;  %1539 = vmatprep.mubr.bf16.mxu1 %v4594_v3 }
  0xf5   : > { %3119 = vmatprep.mubr.bf16.mxu0 %v4594_v3 }
  0xf6   : > { %1691 = vmatpush1.bf16.msra.mxu1 %v4552_v35 }
  0xf7   : > { %3271 = vmatpush1.bf16.msra.mxu0 %v4555_v38  ;;  %1692 = vmatprep.subr.bf16.mxu1 %v4560_v41 }
  0xf8   : > { %3272 = vmatprep.subr.bf16.mxu0 %v4563_v42  ;;  %v3430_v42 = vld [vmem:[%s5698_s3 + $0x8] sm:$0xff] }
  0xf9   : > { %1540 = vmatmul.mubr.bf16.gmra.mrb[8].mxu1 %v1389_v43 }
  0xfa   : > { %3120 = vmatmul.mubr.bf16.gmra.mrb[8].mxu0 %v2969_v44  ;;  %1693 = vmatpush1.bf16.msra.mxu1 %v4558_v45  ;;  %v3431_v45 = vld [vmem:[%s5698_s3 + $0x10] sm:$0xff] }
  0xfb   : > { %3273 = vmatpush1.bf16.msra.mxu0 %v4561_v37  ;;  %1694 = vmatprep.subr.bf16.mxu1 %v4566_v46 }
  0xfc   : > { %3274 = vmatprep.subr.bf16.mxu0 %v4569_v47  ;;  %1549 = vmatprep.mubr.bf16.mxu1 %v4594_v3 }
  0xfd   : > { %3129 = vmatprep.mubr.bf16.mxu0 %v4594_v3 }
  0xfe   : > { %1695 = vmatpush1.bf16.msra.mxu1 %v4564_v48 }
  0xff   : > { %3275 = vmatpush1.bf16.msra.mxu0 %v4567_v49  ;;  %1696 = vmatprep.subr.bf16.mxu1 %v4572_v53 }
 0x100   : > { %3276 = vmatprep.subr.bf16.mxu0 %v4575_v54 }
 0x101   : > { %1550 = vmatmul.mubr.bf16.gmra.mrb[12].mxu1 %v1390_v55 }
 0x102   : > { %3130 = vmatmul.mubr.bf16.gmra.mrb[12].mxu0 %v2970_v52  ;;  %1697 = vmatpush1.bf16.msra.mxu1 %v4570_v56 }
 0x103   : > { %3277 = vmatpush1.bf16.msra.mxu0 %v4573_v57  ;;  %1698 = vmatprep.subr.bf16.mxu1 %v4578_v58 }
 0x104   : > { %3278 = vmatprep.subr.bf16.mxu0 %v4581_v59  ;;  %1716 = vmatprep.mubr.bf16.mxu1 %v4594_v3 }
 0x105   : > { %3296 = vmatprep.mubr.bf16.mxu0 %v4594_v3 }
 0x106   : > { %1699 = vmatpush1.bf16.msra.mxu1 %v4576_v60 }
 0x107   : > { %3279 = vmatpush1.bf16.msra.mxu0 %v4579_v61 }
 0x109   : > { %1717 = vmatmul.mubr.bf16.vlgmr.msra.gmra.mrb[0].mxu1 %v1584_v1 }
 0x10a   : > { %3297 = vmatmul.mubr.bf16.vlgmr.msra.gmra.mrb[0].mxu0 %v3164_v2  ;;  %1726 = vmatprep.mubr.bf16.mxu1 %v4594_v3 }
 0x10b   : > { %3306 = vmatprep.mubr.bf16.mxu0 %v4594_v3 }
 0x111   : > { %1727 = vmatmul.mubr.bf16.gmra.mrb[4].mxu1 %v1585_v6 }
 0x112   : > { %3307 = vmatmul.mubr.bf16.gmra.mrb[4].mxu0 %v3165_v7  ;;  %1736 = vmatprep.mubr.bf16.mxu1 %v4594_v3 }
 0x113   : > { %3316 = vmatprep.mubr.bf16.mxu0 %v4594_v3 }
 0x119   : > { %1737 = vmatmul.mubr.bf16.gmra.mrb[8].mxu1 %v1586_v10 }
 0x11a   : > { %3317 = vmatmul.mubr.bf16.gmra.mrb[8].mxu0 %v3166_v11  ;;  %1746 = vmatprep.mubr.bf16.mxu1 %v4594_v3 }
 0x11b   : > { %3326 = vmatprep.mubr.bf16.mxu0 %v4594_v3  ;;  %v5618_v3 = vrot.slane %v3353_v19, %v3357_v18 }
 0x121   : > { %1747 = vmatmul.mubr.bf16.gmra.mrb[12].mxu1 %v1587_v14 }
 0x122   : > { %3327 = vmatmul.mubr.bf16.gmra.mrb[12].mxu0 %v3167_v15  ;;  %v3435_v15 = vld [vmem:[%s5698_s3 + $0x30] sm:$0xff] }
 0x1dc   : > { %v1718_v21 = vpop.f32.mrb[0].mxu1 }
 0x1dd   : > { %v3298_v22 = vpop.f32.mrb[0].mxu0  ;;  %v1720_v25 = vpop.f32.mrb[1].mxu1 }
 0x1de   : > { %v3947_v24 = vadd.f32 %v3298_v22, %v1718_v21  ;;  %v3300_v26 = vpop.f32.mrb[1].mxu0  ;;  %v1722_v28 = vpop.f32.mrb[2].mxu1 }
 0x1df   : > { %v3948_v27 = vadd.f32 %v3300_v26, %v1720_v25  ;;  %v3302_v29 = vpop.f32.mrb[2].mxu0  ;;  %v1724_v32 = vpop.f32.mrb[3].mxu1 }
 0x1e0   : > { %v3365_v30 = vadd.f32 %v3947_v24, %v5618_v3  ;;  %v3949_v31 = vadd.f32 %v3302_v29, %v1722_v28  ;;  %v3304_v33 = vpop.f32.mrb[3].mxu0  ;;  %v3436_v24 = vld [vmem:[%s5698_s3 + $0x38] sm:$0xff] }
 0x1e1   : > { %v3366_v34 = vadd.f32 %v3948_v27, %v5620_v23  ;;  %v3950_v36 = vadd.f32 %v3304_v33, %v1724_v32 }
 0x1e2   : > { %v3397_v35 = vmul.f32 0.2, %v3365_v30  ;;  %v3367_v38 = vadd.f32 %v3949_v31, %v5618_v3  ;;  %vm3381_vm0 = vcmp.gt.f32.partialorder %v3365_v30, 0.0 }
 0x1e3   : > { %v3398_v40 = vmul.f32 0.2, %v3366_v34  ;;  %v3368_v41 = vadd.f32 %v3950_v36, %v5620_v23  ;;  %vm3382_vm1 = vcmp.gt.f32.partialorder %v3366_v34, 0.0 }
 0x1e4   : > { %v3399_v43 = vmul.f32 0.2, %v3367_v38  ;;  %v3413_v44 = vsel %vm3381_vm0, %v3365_v30, %v3397_v35  ;;  %vm3383_vm2 = vcmp.gt.f32.partialorder %v3367_v38, 0.0  ;;  %v1728_v46 = vpop.f32.mrb[4].mxu1 }
 0x1e5   : > { %v3400_v37 = vmul.f32 0.2, %v3368_v41  ;;  %v3308_v47 = vpop.f32.mrb[4].mxu0  ;;  %v3414_v48 = vsel %vm3382_vm1, %v3366_v34, %v3398_v40  ;;  %v3445_v49 = vmul.f32 %v3429_v39, %v3413_v44  ;;  %vm3384_vm3 = vcmp.gt.f32.partialorder %v3368_v41, 0.0  ;;  %v1730_v53 = vpop.f32.mrb[5].mxu1 }
 0x1e6   : > { %v3951_v51 = vadd.f32 %v3308_v47, %v1728_v46  ;;  %v3310_v54 = vpop.f32.mrb[5].mxu0  ;;  %v3446_v55 = vmul.f32 %v3430_v42, %v3414_v48  ;;  %v3415_v52 = vsel %vm3383_vm2, %v3367_v38, %v3399_v43  ;;  %v1732_v57 = vpop.f32.mrb[6].mxu1  ;;  %v3437_v46 = vld [vmem:[%s5698_s3 + $0x40] sm:$0xff] }
 0x1e7   : > { %v3952_v56 = vadd.f32 %v3310_v54, %v1730_v53  ;;  %v3312_v58 = vpop.f32.mrb[6].mxu0  ;;  %v3416_v59 = vsel %vm3384_vm3, %v3368_v41, %v3400_v37  ;;  %v3447_v60 = vmul.f32 %v3431_v45, %v3415_v52  ;;  %v1734_v63 = vpop.f32.mrb[7].mxu1  ;;  %v3439_v53 = vld [vmem:[%s5698_s3 + $0x50] sm:$0xff] }
 0x1e8   : > { %v3369_v61 = vadd.f32 %v3951_v51, %v5618_v3  ;;  %v3953_v62 = vadd.f32 %v3312_v58, %v1732_v57  ;;  %v3314_v0 = vpop.f32.mrb[7].mxu0  ;;  %v3461_v1 = vadd.f32 %v3446_v55, %v3445_v49  ;;  %v3448_v2 = vmul.f32 %v3432_v50, %v3416_v59  ;;  %v3438_v49 = vld [vmem:[%s5698_s3 + $0x48] sm:$0xff]  ;;  %v3440_v58 = vld [vmem:[%s5698_s3 + $0x58] sm:$0xff] }
 0x1e9   : > { %v3370_v4 = vadd.f32 %v3952_v56, %v5620_v23  ;;  %v3954_v5 = vadd.f32 %v3314_v0, %v1734_v63 }
 0x1ea   : > { %v3401_v6 = vmul.f32 0.2, %v3369_v61  ;;  %v3371_v7 = vadd.f32 %v3953_v62, %v5618_v3  ;;  %3462 = vadd.xlane.f32.xlu0 %v3461_v1  ;;  %v3464_v8 = vadd.f32 %v3448_v2, %v3447_v60  ;;  %vm3385_vm4 = vcmp.gt.f32.partialorder %v3369_v61, 0.0 }
 0x1eb   : > { %v3402_v10 = vmul.f32 0.2, %v3370_v4  ;;  %v3372_v11 = vadd.f32 %v3954_v5, %v5620_v23  ;;  %vm3386_vm5 = vcmp.gt.f32.partialorder %v3370_v4, 0.0 }
 0x1ec   : > { %v3403_v13 = vmul.f32 0.2, %v3371_v7  ;;  %v3417_v14 = vsel %vm3385_vm4, %v3369_v61, %v3401_v6  ;;  %vm3387_vm6 = vcmp.gt.f32.partialorder %v3371_v7, 0.0  ;;  %v1738_v19 = vpop.f32.mrb[8].mxu1 }
 0x1ed   : > { %v3404_v16 = vmul.f32 0.2, %v3372_v11  ;;  %v3318_v20 = vpop.f32.mrb[8].mxu0  ;;  %v3418_v21 = vsel %vm3386_vm5, %v3370_v4, %v3402_v10  ;;  %v3449_v22 = vmul.f32 %v3433_v9, %v3417_v14  ;;  %vm3388_vm7 = vcmp.gt.f32.partialorder %v3372_v11, 0.0  ;;  %v1740_v27 = vpop.f32.mrb[9].mxu1 }
 0x1ee   : > { %v3955_v25 = vadd.f32 %v3318_v20, %v1738_v19  ;;  %v3320_v26 = vpop.f32.mrb[9].mxu0  ;;  %3465 = vadd.xlane.f32.xlu0 %v3464_v8  ;;  %v3450_v28 = vmul.f32 %v3434_v12, %v3418_v21  ;;  %v3419_v29 = vsel %vm3387_vm6, %v3371_v7, %v3403_v13  ;;  %v1742_v31 = vpop.f32.mrb[10].mxu1  ;;  %v3441_v19 = vld [vmem:[%s5698_s3 + $0x60] sm:$0xff] }
 0x1ef   : > { %v3956_v30 = vadd.f32 %v3320_v26, %v1740_v27  ;;  %v3322_v32 = vpop.f32.mrb[10].mxu0  ;;  %v3420_v33 = vsel %vm3388_vm7, %v3372_v11, %v3404_v16  ;;  %v3451_v34 = vmul.f32 %v3435_v15, %v3419_v29  ;;  %v1744_v38 = vpop.f32.mrb[11].mxu1 }
 0x1f0   : > { %v3373_v36 = vadd.f32 %v3955_v25, %v5618_v3  ;;  %v3957_v35 = vadd.f32 %v3322_v32, %v1742_v31  ;;  %v3324_v39 = vpop.f32.mrb[11].mxu0  ;;  %v3467_v40 = vadd.f32 %v3450_v28, %v3449_v22  ;;  %v3452_v41 = vmul.f32 %v3436_v24, %v3420_v33  ;;  %v3442_v22 = vld [vmem:[%s5698_s3 + $0x68] sm:$0xff] }
 0x1f1   : > { %v3374_v42 = vadd.f32 %v3956_v30, %v5620_v23  ;;  %v3958_v43 = vadd.f32 %v3324_v39, %v1744_v38 }
 0x1f2   : > { %v3405_v44 = vmul.f32 0.2, %v3373_v36  ;;  %v3375_v45 = vadd.f32 %v3957_v35, %v5618_v3  ;;  %3468 = vadd.xlane.f32.xlu1 %v3467_v40  ;;  %v3470_v37 = vadd.f32 %v3452_v41, %v3451_v34  ;;  %vm3389_vm8 = vcmp.gt.f32.partialorder %v3373_v36, 0.0 }
 0x1f3   : > { %v3406_v47 = vmul.f32 0.2, %v3374_v42  ;;  %v3376_v48 = vadd.f32 %v3958_v43, %v5620_v23  ;;  %vm3390_vm9 = vcmp.gt.f32.partialorder %v3374_v42, 0.0 }
 0x1f4   : > { %v3407_v50 = vmul.f32 0.2, %v3375_v45  ;;  %v3421_v51 = vsel %vm3389_vm8, %v3373_v36, %v3405_v44  ;;  %vm3391_vm10 = vcmp.gt.f32.partialorder %v3375_v45, 0.0  ;;  %v1748_v55 = vpop.f32.mrb[12].mxu1 }
 0x1f5   : > { %v3408_v54 = vmul.f32 0.2, %v3376_v48  ;;  %v3328_v52 = vpop.f32.mrb[12].mxu0  ;;  %v3422_v56 = vsel %vm3390_vm9, %v3374_v42, %v3406_v47  ;;  %v3453_v57 = vmul.f32 %v3437_v46, %v3421_v51  ;;  %vm3392_vm11 = vcmp.gt.f32.partialorder %v3376_v48, 0.0  ;;  %v1750_v61 = vpop.f32.mrb[13].mxu1 }
 0x1f6   : > { %v3959_v59 = vadd.f32 %v3328_v52, %v1748_v55  ;;  %v3330_v60 = vpop.f32.mrb[13].mxu0  ;;  %3471 = vadd.xlane.f32.xlu1 %v3470_v37  ;;  %v3454_v62 = vmul.f32 %v3438_v49, %v3422_v56  ;;  %v3423_v63 = vsel %vm3391_vm10, %v3375_v45, %v3407_v50  ;;  %v1752_v1 = vpop.f32.mrb[14].mxu1  ;;  %v3498_v56 = vld [vmem:[#allocation2] sm:$0x1] }
 0x1f7   : > { %v3960_v0 = vadd.f32 %v3330_v60, %v1750_v61  ;;  %v3332_v2 = vpop.f32.mrb[14].mxu0  ;;  %v3424_v4 = vsel %vm3392_vm11, %v3376_v48, %v3408_v54  ;;  %v3455_v5 = vmul.f32 %v3439_v53, %v3423_v63  ;;  %v1754_v8 = vpop.f32.mrb[15].mxu1 }
 0x1f8   : > { %v3377_v6 = vadd.f32 %v3959_v59, %v5618_v3  ;;  %v3961_v7 = vadd.f32 %v3332_v2, %v1752_v1  ;;  %v3334_v9 = vpop.f32.mrb[15].mxu0  ;;  %v3473_v10 = vadd.f32 %v3454_v62, %v3453_v57  ;;  %v3456_v11 = vmul.f32 %v3440_v58, %v3424_v4 }
 0x1f9   : > { %v3378_v12 = vadd.f32 %v3960_v0, %v5620_v23  ;;  %v3962_v13 = vadd.f32 %v3334_v9, %v1754_v8 }
 0x1fa   : > { %v3409_v14 = vmul.f32 0.2, %v3377_v6  ;;  %v3379_v15 = vadd.f32 %v3961_v7, %v5618_v3  ;;  %3474 = vadd.xlane.f32.xlu0 %v3473_v10  ;;  %v3476_v16 = vadd.f32 %v3456_v11, %v3455_v5  ;;  %vm3393_vm12 = vcmp.gt.f32.partialorder %v3377_v6, 0.0  ;;  %v3443_v3 = vld [vmem:[%s5698_s3 + $0x70] sm:$0xff] }
 0x1fb   : > { %v3410_v20 = vmul.f32 0.2, %v3378_v12  ;;  %v3380_v21 = vadd.f32 %v3962_v13, %v5620_v23  ;;  %vm3394_vm13 = vcmp.gt.f32.partialorder %v3378_v12, 0.0  ;;  %v3444_v23 = vld [vmem:[%s5698_s3 + $0x78] sm:$0xff] }
 0x1fc   : > { %v3411_v24 = vmul.f32 0.2, %v3379_v15  ;;  %3477 = vadd.xlane.f32.xlu1 %v3476_v16  ;;  %v3425_v25 = vsel %vm3393_vm12, %v3377_v6, %v3409_v14  ;;  %vm3395_vm14 = vcmp.gt.f32.partialorder %v3379_v15, 0.0 }
 0x1fd   : > { %v3412_v26 = vmul.f32 0.2, %v3380_v21  ;;  %v3426_v27 = vsel %vm3394_vm13, %v3378_v12, %v3410_v20  ;;  %v3457_v28 = vmul.f32 %v3441_v19, %v3425_v25  ;;  %vm3396_vm15 = vcmp.gt.f32.partialorder %v3380_v21, 0.0 }
 0x1fe   : > { %v3458_v29 = vmul.f32 %v3442_v22, %v3426_v27  ;;  %v3427_v30 = vsel %vm3395_vm14, %v3379_v15, %v3411_v24 }
 0x1ff   : > { %v3428_v31 = vsel %vm3396_vm15, %v3380_v21, %v3412_v26  ;;  %v3459_v32 = vmul.f32 %v3443_v3, %v3427_v30 }
 0x200   : > { %v3479_v33 = vadd.f32 %v3458_v29, %v3457_v28  ;;  %v3460_v34 = vmul.f32 %v3444_v23, %v3428_v31 }
 0x202   : > { %3480 = vadd.xlane.f32.xlu0 %v3479_v33  ;;  %v3482_v36 = vadd.f32 %v3460_v34, %v3459_v32 }
 0x204   : > { %3483 = vadd.xlane.f32.xlu1 %v3482_v36 }
 0x277   : > { %v3463_v35 = vpop.xlane.xlu0 %3462 }
 0x27b   : > { %v3466_v39 = vpop.xlane.xlu0 %3465 }
 0x27c   : > { %v3485_v40 = vadd.f32 %v3466_v39, %v3463_v35 }
 0x27f   : > { %v3469_v38 = vpop.xlane.xlu1 %3468 }
 0x280   : > { %v3486_v42 = vadd.f32 %v3485_v40, %v3469_v38 }
 0x283   : > { %v3472_v41 = vpop.xlane.xlu1 %3471 }
 0x284   : > { %v3487_v44 = vadd.f32 %v3486_v42, %v3472_v41 }
 0x287   : > { %v3475_v43 = vpop.xlane.xlu0 %3474 }
 0x288   : > { %v3488_v45 = vadd.f32 %v3487_v44, %v3475_v43 }
 0x289   : > { %v3478_v37 = vpop.xlane.xlu1 %3477 }
 0x28a   : > { %v3489_v46 = vadd.f32 %v3488_v45, %v3478_v37 }
 0x28f   : > { %v3481_v47 = vpop.xlane.xlu0 %3480 }
 0x290   : > { %v3490_v48 = vadd.f32 %v3489_v46, %v3481_v47 }
 0x291   : > { %v3484_v49 = vpop.xlane.xlu1 %3483 }
 0x292   : > { %v3491_v50 = vadd.f32 %v3490_v48, %v3484_v49 }
 0x294   : > { %v3492_v51 = vrot.slane %v3491_v50, 4 }
 0x296   : > { %v3493_v53 = vadd.f32 %v3492_v51, %v3491_v50 }
 0x298   : > { %v3494_v54 = vrot.slane %v3493_v53, 2 }
 0x29a   : > { %v3495_v55 = vadd.f32 %v3494_v54, %v3493_v53 }
 0x29c   : > { %v3496_v52 = vrot.slane %v3495_v55, 1 }
 0x29e   : > { %v3497_v57 = vadd.f32 %v3496_v52, %v3495_v55 }
 0x2a0   : > { %v3499_v58 = vadd.f32 %v3498_v56, %v3497_v57 }
 0x2a2   : > { %v3944_v59 = vmul.f32 -1.442695, %v3499_v58 }
 0x2a4   : > { %4582 = vpow2.f32 %v3944_v59 }
 0x2ae   : > { %v4583_v60 = vpop.eup %4582 }
 0x2af   : > { %v3503_v61 = vadd.f32 1.0, %v4583_v60 }
 0x2b1   : > { %4584 = vrcp.f32 %v3503_v61 }
 0x2bb   : > { %v4585_v62 = vpop.eup %4584 }
 0x2bc   : > { %v3510_v63 = vrot.slane %v4585_v62, %v3357_v18 }
 0x2be   : > { %3512 = vperm.xlu0 %4197, %v3510_v63  }
 0x33d   : > { %v3513_v0 = vpop.permute.xlu0 %3512 }
 0x33e   : > { %3515 = vst [vmem:[%s224_s16] sm:$0xff] %v3513_v0 }
 0x33f PF: > { %s17_s20 = sadd.s32 1, %s4592_s20  }
 0x340   : > { %p14_p4 = scmp.ge.s32.totalorder %s17_s20, 4  }
 0x342   :  { %16 = sbr.rel (!%p14_p4) target bundleno = 3 (0x3), region = 77 }

</bundles_post_ra>
